<compile_context>
chip_gen: v6e
topology: v6e:2x2x1
jax: 0.10.0
libtpu: 0.0.40
codegen_flags: <defaults>
</compile_context>

<pallas_src>
import functools

import jax
import jax.numpy as jnp
from jax import lax
from jax.experimental import pallas as pl
from jax.experimental.pallas import tpu as pltpu


def _avg_pool(t, s):
    """Non-overlapping s x s average pooling on an NHWC block (VPU only)."""
    if s == 1:
        return t
    tb, h, w, c = t.shape
    ho, wo = h // s, w // s
    t = t.reshape(tb, ho, s, wo, s, c)        # split H (leading) and W (sublane)
    t = jnp.sum(t, axis=4)                    # reduce inner-W (second-minor dim)
    t = sum(t[:, :, i] for i in range(s))     # reduce inner-H (leading dim)
    return t * (1.0 / float(s * s))           # (tb, ho, wo, c)


def _bottleneck_kernel(x_ref,
                       w1_ref, s1_ref, b1_ref,
                       w2_ref, s2_ref, b2_ref,
                       w3_ref, s3_ref, b3_ref,
                       wd_ref, sd_ref, bd_ref,
                       o_ref, pad_ref,
                       *, TB, H, W, Ho, Wo, planes, stride, pad_off,
                       use_pool, use_downsample):
    P = planes
    M = TB * H * W
    Mo = TB * Ho * Wo

    x = x_ref[...]                                       # (TB, H, W, Cin) bf16
    Cin = x.shape[-1]
    x2 = x.reshape(M, Cin)

    # ---- conv1 (1x1) + folded bn1 + relu : bf16 in, f32 accumulate ----
    t = jnp.dot(x2, w1_ref[...], preferred_element_type=jnp.float32)   # (M, P)
    t = jnp.maximum(t * s1_ref[...] + b1_ref[...], 0.0)

    # ---- conv2 (3x3, padding=1) + bn2 + relu : ONE im2col matmul, K = 9P ----
    # Payload goes into the bf16 scratch at a sublane-aligned column offset;
    # only the halo strips are zeroed (the interior is fully overwritten).
    t_b = t.astype(jnp.bfloat16).reshape(TB, H, W, P)
    wpad = pad_ref.shape[2]
    zrow = jnp.zeros((TB, 1, wpad, P), jnp.bfloat16)
    zcol = jnp.zeros((TB, H, 1, P), jnp.bfloat16)
    pad_ref[:, 0:1, :, :] = zrow                                   # top halo
    pad_ref[:, H + 1:H + 2, :, :] = zrow                           # bottom halo
    pad_ref[:, 1:H + 1, pad_off - 1:pad_off, :] = zcol             # left halo
    pad_ref[:, 1:H + 1, pad_off + W:pad_off + W + 1, :] = zcol     # right halo
    pad_ref[:, 1:H + 1, pad_off:pad_off + W, :] = t_b              # aligned payload

    cols = []
    for ky in range(3):
        for kx in range(3):
            c0 = pad_off - 1 + kx
            cols.append(pad_ref[:, ky:ky + H, c0:c0 + W, :])       # (TB,H,W,P) bf16
    patches = jnp.concatenate(cols, axis=-1)                       # (TB,H,W,9P)
    t = jnp.dot(patches.reshape(M, 9 * P), w2_ref[...],
                preferred_element_type=jnp.float32)                # (M, P)
    t = jnp.maximum(t * s2_ref[...] + b2_ref[...], 0.0)

    # ---- avgpool(stride) on the VPU (no pooling-matrix matmul) ----
    t4 = t.reshape(TB, H, W, P)
    if use_pool:
        t4 = _avg_pool(t4, stride)                                 # (TB,Ho,Wo,P)

    # ---- conv3 (1x1) + folded bn3 ----
    out = jnp.dot(t4.reshape(Mo, P).astype(jnp.bfloat16), w3_ref[...],
                  preferred_element_type=jnp.float32)              # (Mo, 4P)
    out = out * s3_ref[...] + b3_ref[...]

    # ---- identity / downsample branch ----
    if use_downsample:
        xi = x.astype(jnp.float32)
        if use_pool:
            xi = _avg_pool(xi, stride)                             # (TB,Ho,Wo,Cin)
        idn = jnp.dot(xi.reshape(Mo, Cin).astype(jnp.bfloat16), wd_ref[...],
                      preferred_element_type=jnp.float32)          # (Mo, 4P)
        idn = idn * sd_ref[...] + bd_ref[...]
    else:
        idn = x2.astype(jnp.float32)                 # stride == 1, Cin == 4P

    y = jnp.maximum(out + idn, 0.0)
    o_ref[...] = y.reshape(TB, Ho, Wo, 4 * P).astype(o_ref.dtype)


# ----------------------------- wrapper ------------------------------------

def _fold_bn(bn, eps=1e-5):
    g, b, m, v = bn
    scale = g * lax.rsqrt(v + eps)
    bias = b - m * scale
    return (scale.reshape(1, -1).astype(jnp.float32),
            bias.reshape(1, -1).astype(jnp.float32))


def prepare_params(conv1_w, bn1, conv2_w, bn2, conv3_w, bn3,
                   convd_w=None, bnd=None):
    """Torch-layout (OIHW) params -> kernel operands (pre-transposed / packed bf16)."""
    planes = conv1_w.shape[0]
    w1 = jnp.transpose(conv1_w[:, :, 0, 0]).astype(jnp.bfloat16)        # (Cin, P)
    # (O, I, 3, 3) -> (ky, kx, I, O) -> (9*I, O): matches the im2col patch order.
    w2 = jnp.transpose(conv2_w, (2, 3, 1, 0)).reshape(9 * planes, planes)
    w2 = w2.astype(jnp.bfloat16)                                        # (9P, P)
    w3 = jnp.transpose(conv3_w[:, :, 0, 0]).astype(jnp.bfloat16)        # (P, 4P)
    s1, b1 = _fold_bn(bn1)
    s2, b2 = _fold_bn(bn2)
    s3, b3 = _fold_bn(bn3)
    if convd_w is not None:
        wd = jnp.transpose(convd_w[:, :, 0, 0]).astype(jnp.bfloat16)    # (Cin, 4P)
        sd, bd = _fold_bn(bnd)
    else:
        wd = jnp.zeros((1, 1), jnp.bfloat16)                            # unused dummies
        sd = jnp.zeros((1, 1), jnp.float32)
        bd = jnp.zeros((1, 1), jnp.float32)
    return (w1, s1, b1, w2, s2, b2, w3, s3, b3, wd, sd, bd)


def _pick_tb(N, H, W):
    rows = H * W
    tb = max(1, -(-128 // rows))            # TB*H*W >= 128 fills the MXU M dim
    tb = min(tb, N)
    if N >= 2 and pl.cdiv(N, tb) < 2:       # keep >= 2 grid steps for 2-TC chips
        tb = max(1, N // 2)
    return tb


def bottleneck_forward(x, kparams, *, stride, planes, has_downsample,
                       out_dtype=jnp.float32):
    N, H, W, Cin = x.shape
    Ho, Wo = H // stride, W // stride
    Cout = 4 * planes
    use_pool = stride > 1
    if not has_downsample:
        assert stride == 1 and Cin == Cout, (
            "identity path without downsample requires stride==1 and Cin==4*planes")

    TB = _pick_tb(N, H, W)
    pad_off = 16                            # bf16 sublane-aligned payload offset
    wpad = pad_off + W + 16                 # halo + right alignment padding

    kernel = functools.partial(
        _bottleneck_kernel, TB=TB, H=H, W=W, Ho=Ho, Wo=Wo, planes=planes,
        stride=stride, pad_off=pad_off, use_pool=use_pool,
        use_downsample=has_downsample)

    def full_spec(a):
        zeros = (0,) * a.ndim
        return pl.BlockSpec(a.shape, lambda n, _z=zeros: _z)

    # TODO(synk): for stages where W is not a multiple of the sublane granule
    #             (e.g. 7 / 14), the (TB,H,W,C)->(TB*H*W,C) flatten costs a
    #             relayout; batch-block so the merged dim is tile-friendly.
    in_specs = ([pl.BlockSpec((TB, H, W, Cin), lambda n: (n, 0, 0, 0))]
                + [full_spec(a) for a in kparams])
    out_specs = pl.BlockSpec((TB, Ho, Wo, Cout), lambda n: (n, 0, 0, 0))

    return pl.pallas_call(
        kernel,
        out_shape=jax.ShapeDtypeStruct((N, Ho, Wo, Cout), out_dtype),
        grid=(pl.cdiv(N, TB),),
        in_specs=in_specs,
        out_specs=out_specs,
        scratch_shapes=[pltpu.VMEM((TB, H + 2, wpad, planes), jnp.bfloat16)],
        compiler_params=pltpu.CompilerParams(
            dimension_semantics=("parallel",),
            vmem_limit_bytes=48 * 1024 * 1024),
    )(x.astype(jnp.bfloat16), *kparams)


# ---------------- plain-JAX (f32) reference for sanity checking -------------

def _reference(x, conv1_w, bn1, conv2_w, bn2, conv3_w, bn3, convd_w, bnd,
               stride, eps=1e-5):
    def conv(v, w, padding):
        return lax.conv_general_dilated(
            v.astype(jnp.float32), w.astype(jnp.float32),
            window_strides=(1, 1), padding=padding,
            dimension_numbers=('NHWC', 'OIHW', 'NHWC'))

    def bn(v, p):
        g, b, m, s2 = p
        return g * (v - m) * lax.rsqrt(s2 + eps) + b

    def avgpool(v, s):
        if s == 1:
            return v
        n, h, w, c = v.shape
        return v.reshape(n, h // s, s, w // s, s, c).mean(axis=(2, 4))

    out = jax.nn.relu(bn(conv(x, conv1_w, 'VALID'), bn1))
    out = jax.nn.relu(bn(conv(out, conv2_w, ((1, 1), (1, 1))), bn2))
    out = avgpool(out, stride)
    out = bn(conv(out, conv3_w, 'VALID'), bn3)
    if convd_w is not None:
        identity = bn(conv(avgpool(x, stride), convd_w, 'VALID'), bnd)
    else:
        identity = x
    return jax.nn.relu(out + identity)


if __name__ == "__main__":
    N, H, W = 2, 16, 16
    inplanes, planes, stride = 32, 16, 2
    cout = 4 * planes

    key = jax.random.PRNGKey(0)
    ks = jax.random.split(key, 9)

    x = jax.random.normal(ks[0], (N, H, W, inplanes), jnp.float32)

    conv1_w = 0.1 * jax.random.normal(ks[1], (planes, inplanes, 1, 1), jnp.float32)
    conv2_w = 0.1 * jax.random.normal(ks[2], (planes, planes, 3, 3), jnp.float32)
    conv3_w = 0.1 * jax.random.normal(ks[3], (cout, planes, 1, 1), jnp.float32)
    convd_w = 0.1 * jax.random.normal(ks[4], (cout, inplanes, 1, 1), jnp.float32)

    def make_bn(k, c):
        k1, k2, k3, k4 = jax.random.split(k, 4)
        return (1.0 + 0.1 * jax.random.normal(k1, (c,), jnp.float32),   # gamma
                0.1 * jax.random.normal(k2, (c,), jnp.float32),         # beta
                0.1 * jax.random.normal(k3, (c,), jnp.float32),         # running mean
                1.0 + 0.5 * jax.random.uniform(k4, (c,), jnp.float32))  # running var

    bn1 = make_bn(ks[5], planes)
    bn2 = make_bn(ks[6], planes)
    bn3 = make_bn(ks[7], cout)
    bnd = make_bn(ks[8], cout)

    kparams = prepare_params(conv1_w, bn1, conv2_w, bn2, conv3_w, bn3,
                             convd_w, bnd)

    out = bottleneck_forward(x, kparams, stride=stride, planes=planes,
                             has_downsample=True)
    out = jax.block_until_ready(out)

    ref = _reference(x, conv1_w, bn1, conv2_w, bn2, conv3_w, bn3, convd_w, bnd, stride)

    assert out.shape == (N, H // stride, W // stride, cout)
    max_err = float(jnp.max(jnp.abs(out - ref)))
    # bf16 matmul operands / bf16 input with f32 accumulation -> loosened tolerance.
    assert jnp.allclose(out, ref, atol=5e-2, rtol=5e-2), \
        f"mismatch vs reference (max err {max_err})"

    print("KERNEL_OK")
</pallas_src>

<mosaic_0001>
module attributes {stable_mosaic.version = 11 : i64} {
  func.func @_bottleneck_kernel(%arg0: i32, %arg1: memref<1x16x16x32xbf16, #tpu.memory_space<vmem>>, %arg2: memref<32x16xbf16, #tpu.memory_space<vmem>>, %arg3: memref<1x16xf32, #tpu.memory_space<vmem>>, %arg4: memref<1x16xf32, #tpu.memory_space<vmem>>, %arg5: memref<144x16xbf16, #tpu.memory_space<vmem>>, %arg6: memref<1x16xf32, #tpu.memory_space<vmem>>, %arg7: memref<1x16xf32, #tpu.memory_space<vmem>>, %arg8: memref<16x64xbf16, #tpu.memory_space<vmem>>, %arg9: memref<1x64xf32, #tpu.memory_space<vmem>>, %arg10: memref<1x64xf32, #tpu.memory_space<vmem>>, %arg11: memref<32x64xbf16, #tpu.memory_space<vmem>>, %arg12: memref<1x64xf32, #tpu.memory_space<vmem>>, %arg13: memref<1x64xf32, #tpu.memory_space<vmem>>, %arg14: memref<1x8x8x64xf32, #tpu.memory_space<vmem>>, %arg15: memref<1x18x48x16xbf16, #tpu.memory_space<vmem>>) attributes {dimension_semantics = [#tpu.dimension_semantics<parallel>], iteration_bounds = array<i64: 2>, scalar_prefetch = 0 : i64, scratch_operands = 1 : i64, tpu.core_type = #tpu.core_type<tc>, window_params = [{transform_indices = @transform_0, window_bounds = array<i64: 1, 16, 16, 32>}, {pipeline_mode = #tpu.pipeline_mode<synchronous>, transform_indices = @transform_1, window_bounds = array<i64: 32, 16>}, {pipeline_mode = #tpu.pipeline_mode<synchronous>, transform_indices = @transform_2, window_bounds = array<i64: 1, 16>}, {pipeline_mode = #tpu.pipeline_mode<synchronous>, transform_indices = @transform_3, window_bounds = array<i64: 1, 16>}, {pipeline_mode = #tpu.pipeline_mode<synchronous>, transform_indices = @transform_4, window_bounds = array<i64: 144, 16>}, {pipeline_mode = #tpu.pipeline_mode<synchronous>, transform_indices = @transform_5, window_bounds = array<i64: 1, 16>}, {pipeline_mode = #tpu.pipeline_mode<synchronous>, transform_indices = @transform_6, window_bounds = array<i64: 1, 16>}, {pipeline_mode = #tpu.pipeline_mode<synchronous>, transform_indices = @transform_7, window_bounds = array<i64: 16, 64>}, {pipeline_mode = #tpu.pipeline_mode<synchronous>, transform_indices = @transform_8, window_bounds = array<i64: 1, 64>}, {pipeline_mode = #tpu.pipeline_mode<synchronous>, transform_indices = @transform_9, window_bounds = array<i64: 1, 64>}, {pipeline_mode = #tpu.pipeline_mode<synchronous>, transform_indices = @transform_10, window_bounds = array<i64: 32, 64>}, {pipeline_mode = #tpu.pipeline_mode<synchronous>, transform_indices = @transform_11, window_bounds = array<i64: 1, 64>}, {pipeline_mode = #tpu.pipeline_mode<synchronous>, transform_indices = @transform_12, window_bounds = array<i64: 1, 64>}, {transform_indices = @transform_13, window_bounds = array<i64: 1, 8, 8, 64>}]} {
    %c0 = arith.constant 0 : index
    %c0_0 = arith.constant 0 : index
    %c0_1 = arith.constant 0 : index
    %c0_2 = arith.constant 0 : index
    %0 = vector.load %arg1[%c0, %c0_0, %c0_1, %c0_2] : memref<1x16x16x32xbf16, #tpu.memory_space<vmem>>, vector<1x16x16x32xbf16>
    %1 = vector.shape_cast %0 : vector<1x16x16x32xbf16> to vector<256x32xbf16>
    %c0_3 = arith.constant 0 : index
    %c0_4 = arith.constant 0 : index
    %2 = vector.load %arg2[%c0_3, %c0_4] : memref<32x16xbf16, #tpu.memory_space<vmem>>, vector<32x16xbf16>
    %cst = arith.constant dense<0.000000e+00> : vector<256x16xf32>
    %3 = tpu.matmul %1, %2, %cst {dimension_numbers = #tpu.dot_dimension_numbers<[1], [0], [0], [1], [0, 0, 1, 1], [], []>} : vector<256x32xbf16>, vector<32x16xbf16>, vector<256x16xf32> -> vector<256x16xf32>
    %c0_5 = arith.constant 0 : index
    %c0_6 = arith.constant 0 : index
    %4 = vector.load %arg3[%c0_5, %c0_6] : memref<1x16xf32, #tpu.memory_space<vmem>>, vector<1x16xf32>
    %5 = vector.broadcast %4 : vector<1x16xf32> to vector<256x16xf32>
    %6 = arith.mulf %3, %5 : vector<256x16xf32>
    %c0_7 = arith.constant 0 : index
    %c0_8 = arith.constant 0 : index
    %7 = vector.load %arg4[%c0_7, %c0_8] : memref<1x16xf32, #tpu.memory_space<vmem>>, vector<1x16xf32>
    %8 = vector.broadcast %7 : vector<1x16xf32> to vector<256x16xf32>
    %9 = arith.addf %6, %8 : vector<256x16xf32>
    %cst_9 = arith.constant 0.000000e+00 : f32
    %10 = vector.broadcast %cst_9 : f32 to vector<256x16xf32>
    %11 = arith.maximumf %9, %10 : vector<256x16xf32>
    %12 = arith.truncf %11 : vector<256x16xf32> to vector<256x16xbf16>
    %13 = vector.shape_cast %12 : vector<256x16xbf16> to vector<1x16x16x16xbf16>
    %cst_10 = arith.constant 0.000000e+00 : bf16
    %14 = vector.broadcast %cst_10 : bf16 to vector<1x1x48x16xbf16>
    %cst_11 = arith.constant 0.000000e+00 : bf16
    %15 = vector.broadcast %cst_11 : bf16 to vector<1x16x1x16xbf16>
    %c0_12 = arith.constant 0 : index
    %c0_13 = arith.constant 0 : index
    %c0_14 = arith.constant 0 : index
    %c0_15 = arith.constant 0 : index
    %16 = vector.load %arg15[%c0_12, %c0_13, %c0_14, %c0_15] : memref<1x18x48x16xbf16, #tpu.memory_space<vmem>>, vector<1x1x48x16xbf16>
    tpu.vector_store %arg15[%c0_12, %c0_13, %c0_14, %c0_15], %14 {strides = array<i32>} : memref<1x18x48x16xbf16, #tpu.memory_space<vmem>>, vector<1x1x48x16xbf16>,
    %c0_16 = arith.constant 0 : index
    %c17 = arith.constant 17 : index
    %c0_17 = arith.constant 0 : index
    %c0_18 = arith.constant 0 : index
    %17 = vector.load %arg15[%c0_16, %c17, %c0_17, %c0_18] : memref<1x18x48x16xbf16, #tpu.memory_space<vmem>>, vector<1x1x48x16xbf16>
    tpu.vector_store %arg15[%c0_16, %c17, %c0_17, %c0_18], %14 {strides = array<i32>} : memref<1x18x48x16xbf16, #tpu.memory_space<vmem>>, vector<1x1x48x16xbf16>,
    %c0_19 = arith.constant 0 : index
    %c1 = arith.constant 1 : index
    %c15 = arith.constant 15 : index
    %c0_20 = arith.constant 0 : index
    %18 = vector.load %arg15[%c0_19, %c1, %c15, %c0_20] : memref<1x18x48x16xbf16, #tpu.memory_space<vmem>>, vector<1x16x1x16xbf16>
    tpu.vector_store %arg15[%c0_19, %c1, %c15, %c0_20], %15 {strides = array<i32>} : memref<1x18x48x16xbf16, #tpu.memory_space<vmem>>, vector<1x16x1x16xbf16>,
    %c0_21 = arith.constant 0 : index
    %c1_22 = arith.constant 1 : index
    %c32 = arith.constant 32 : index
    %c0_23 = arith.constant 0 : index
    %19 = vector.load %arg15[%c0_21, %c1_22, %c32, %c0_23] : memref<1x18x48x16xbf16, #tpu.memory_space<vmem>>, vector<1x16x1x16xbf16>
    tpu.vector_store %arg15[%c0_21, %c1_22, %c32, %c0_23], %15 {strides = array<i32>} : memref<1x18x48x16xbf16, #tpu.memory_space<vmem>>, vector<1x16x1x16xbf16>,
    %c0_24 = arith.constant 0 : index
    %c1_25 = arith.constant 1 : index
    %c16 = arith.constant 16 : index
    %c0_26 = arith.constant 0 : index
    %20 = vector.load %arg15[%c0_24, %c1_25, %c16, %c0_26] : memref<1x18x48x16xbf16, #tpu.memory_space<vmem>>, vector<1x16x16x16xbf16>
    tpu.vector_store %arg15[%c0_24, %c1_25, %c16, %c0_26], %13 {strides = array<i32>} : memref<1x18x48x16xbf16, #tpu.memory_space<vmem>>, vector<1x16x16x16xbf16>,
    %c0_27 = arith.constant 0 : index
    %c0_28 = arith.constant 0 : index
    %c15_29 = arith.constant 15 : index
    %c0_30 = arith.constant 0 : index
    %21 = vector.load %arg15[%c0_27, %c0_28, %c15_29, %c0_30] : memref<1x18x48x16xbf16, #tpu.memory_space<vmem>>, vector<1x16x16x16xbf16>
    %c0_31 = arith.constant 0 : index
    %c0_32 = arith.constant 0 : index
    %c16_33 = arith.constant 16 : index
    %c0_34 = arith.constant 0 : index
    %22 = vector.load %arg15[%c0_31, %c0_32, %c16_33, %c0_34] : memref<1x18x48x16xbf16, #tpu.memory_space<vmem>>, vector<1x16x16x16xbf16>
    %c0_35 = arith.constant 0 : index
    %c0_36 = arith.constant 0 : index
    %c17_37 = arith.constant 17 : index
    %c0_38 = arith.constant 0 : index
    %23 = vector.load %arg15[%c0_35, %c0_36, %c17_37, %c0_38] : memref<1x18x48x16xbf16, #tpu.memory_space<vmem>>, vector<1x16x16x16xbf16>
    %c0_39 = arith.constant 0 : index
    %c1_40 = arith.constant 1 : index
    %c15_41 = arith.constant 15 : index
    %c0_42 = arith.constant 0 : index
    %24 = vector.load %arg15[%c0_39, %c1_40, %c15_41, %c0_42] : memref<1x18x48x16xbf16, #tpu.memory_space<vmem>>, vector<1x16x16x16xbf16>
    %c0_43 = arith.constant 0 : index
    %c1_44 = arith.constant 1 : index
    %c16_45 = arith.constant 16 : index
    %c0_46 = arith.constant 0 : index
    %25 = vector.load %arg15[%c0_43, %c1_44, %c16_45, %c0_46] : memref<1x18x48x16xbf16, #tpu.memory_space<vmem>>, vector<1x16x16x16xbf16>
    %c0_47 = arith.constant 0 : index
    %c1_48 = arith.constant 1 : index
    %c17_49 = arith.constant 17 : index
    %c0_50 = arith.constant 0 : index
    %26 = vector.load %arg15[%c0_47, %c1_48, %c17_49, %c0_50] : memref<1x18x48x16xbf16, #tpu.memory_space<vmem>>, vector<1x16x16x16xbf16>
    %c0_51 = arith.constant 0 : index
    %c2 = arith.constant 2 : index
    %c15_52 = arith.constant 15 : index
    %c0_53 = arith.constant 0 : index
    %27 = vector.load %arg15[%c0_51, %c2, %c15_52, %c0_53] : memref<1x18x48x16xbf16, #tpu.memory_space<vmem>>, vector<1x16x16x16xbf16>
    %c0_54 = arith.constant 0 : index
    %c2_55 = arith.constant 2 : index
    %c16_56 = arith.constant 16 : index
    %c0_57 = arith.constant 0 : index
    %28 = vector.load %arg15[%c0_54, %c2_55, %c16_56, %c0_57] : memref<1x18x48x16xbf16, #tpu.memory_space<vmem>>, vector<1x16x16x16xbf16>
    %c0_58 = arith.constant 0 : index
    %c2_59 = arith.constant 2 : index
    %c17_60 = arith.constant 17 : index
    %c0_61 = arith.constant 0 : index
    %29 = vector.load %arg15[%c0_58, %c2_59, %c17_60, %c0_61] : memref<1x18x48x16xbf16, #tpu.memory_space<vmem>>, vector<1x16x16x16xbf16>
    %30 = tpu.concatenate %21, %22, %23, %24, %25, %26, %27, %28, %29 in 3 : vector<1x16x16x16xbf16>, vector<1x16x16x16xbf16>, vector<1x16x16x16xbf16>, vector<1x16x16x16xbf16>, vector<1x16x16x16xbf16>, vector<1x16x16x16xbf16>, vector<1x16x16x16xbf16>, vector<1x16x16x16xbf16>, vector<1x16x16x16xbf16> -> vector<1x16x16x144xbf16>
    %31 = vector.shape_cast %30 : vector<1x16x16x144xbf16> to vector<256x144xbf16>
    %c0_62 = arith.constant 0 : index
    %c0_63 = arith.constant 0 : index
    %32 = vector.load %arg5[%c0_62, %c0_63] : memref<144x16xbf16, #tpu.memory_space<vmem>>, vector<144x16xbf16>
    %cst_64 = arith.constant dense<0.000000e+00> : vector<256x16xf32>
    %33 = tpu.matmul %31, %32, %cst_64 {dimension_numbers = #tpu.dot_dimension_numbers<[1], [0], [0], [1], [0, 0, 1, 1], [], []>} : vector<256x144xbf16>, vector<144x16xbf16>, vector<256x16xf32> -> vector<256x16xf32>
    %c0_65 = arith.constant 0 : index
    %c0_66 = arith.constant 0 : index
    %34 = vector.load %arg6[%c0_65, %c0_66] : memref<1x16xf32, #tpu.memory_space<vmem>>, vector<1x16xf32>
    %35 = vector.broadcast %34 : vector<1x16xf32> to vector<256x16xf32>
    %36 = arith.mulf %33, %35 : vector<256x16xf32>
    %c0_67 = arith.constant 0 : index
    %c0_68 = arith.constant 0 : index
    %37 = vector.load %arg7[%c0_67, %c0_68] : memref<1x16xf32, #tpu.memory_space<vmem>>, vector<1x16xf32>
    %38 = vector.broadcast %37 : vector<1x16xf32> to vector<256x16xf32>
    %39 = arith.addf %36, %38 : vector<256x16xf32>
    %cst_69 = arith.constant 0.000000e+00 : f32
    %40 = vector.broadcast %cst_69 : f32 to vector<256x16xf32>
    %41 = arith.maximumf %39, %40 : vector<256x16xf32>
    %42 = vector.shape_cast %41 : vector<256x16xf32> to vector<1x16x16x16xf32>
    %43 = vector.shape_cast %42 : vector<1x16x16x16xf32> to vector<1x8x2x8x2x16xf32>
    %cst_70 = arith.constant dense<0.000000e+00> : vector<1x8x2x8x16xf32>
    %44 = vector.multi_reduction <add>, %43, %cst_70 [4] : vector<1x8x2x8x2x16xf32> to vector<1x8x2x8x16xf32>
    %45 = vector.extract_strided_slice %44 {offsets = [0, 0, 0, 0, 0], sizes = [1, 8, 1, 8, 16], strides = [1, 1, 1, 1, 1]} : vector<1x8x2x8x16xf32> to vector<1x8x1x8x16xf32>
    %46 = vector.shape_cast %45 : vector<1x8x1x8x16xf32> to vector<1x8x8x16xf32>
    %cst_71 = arith.constant 0.000000e+00 : f32
    %47 = vector.broadcast %cst_71 : f32 to vector<1x8x8x16xf32>
    %48 = arith.addf %47, %46 : vector<1x8x8x16xf32>
    %49 = vector.extract_strided_slice %44 {offsets = [0, 0, 1, 0, 0], sizes = [1, 8, 1, 8, 16], strides = [1, 1, 1, 1, 1]} : vector<1x8x2x8x16xf32> to vector<1x8x1x8x16xf32>
    %50 = vector.shape_cast %49 : vector<1x8x1x8x16xf32> to vector<1x8x8x16xf32>
    %51 = arith.addf %48, %50 : vector<1x8x8x16xf32>
    %cst_72 = arith.constant 2.500000e-01 : f32
    %52 = vector.broadcast %cst_72 : f32 to vector<1x8x8x16xf32>
    %53 = arith.mulf %51, %52 : vector<1x8x8x16xf32>
    %54 = vector.shape_cast %53 : vector<1x8x8x16xf32> to vector<64x16xf32>
    %55 = arith.truncf %54 : vector<64x16xf32> to vector<64x16xbf16>
    %c0_73 = arith.constant 0 : index
    %c0_74 = arith.constant 0 : index
    %56 = vector.load %arg8[%c0_73, %c0_74] : memref<16x64xbf16, #tpu.memory_space<vmem>>, vector<16x64xbf16>
    %cst_75 = arith.constant dense<0.000000e+00> : vector<64x64xf32>
    %57 = tpu.matmul %55, %56, %cst_75 {dimension_numbers = #tpu.dot_dimension_numbers<[1], [0], [0], [1], [0, 0, 1, 1], [], []>} : vector<64x16xbf16>, vector<16x64xbf16>, vector<64x64xf32> -> vector<64x64xf32>
    %c0_76 = arith.constant 0 : index
    %c0_77 = arith.constant 0 : index
    %58 = vector.load %arg9[%c0_76, %c0_77] : memref<1x64xf32, #tpu.memory_space<vmem>>, vector<1x64xf32>
    %59 = vector.broadcast %58 : vector<1x64xf32> to vector<64x64xf32>
    %60 = arith.mulf %57, %59 : vector<64x64xf32>
    %c0_78 = arith.constant 0 : index
    %c0_79 = arith.constant 0 : index
    %61 = vector.load %arg10[%c0_78, %c0_79] : memref<1x64xf32, #tpu.memory_space<vmem>>, vector<1x64xf32>
    %62 = vector.broadcast %61 : vector<1x64xf32> to vector<64x64xf32>
    %63 = arith.addf %60, %62 : vector<64x64xf32>
    %64 = arith.extf %0 : vector<1x16x16x32xbf16> to vector<1x16x16x32xf32>
    %65 = vector.shape_cast %64 : vector<1x16x16x32xf32> to vector<1x8x2x8x2x32xf32>
    %cst_80 = arith.constant dense<0.000000e+00> : vector<1x8x2x8x32xf32>
    %66 = vector.multi_reduction <add>, %65, %cst_80 [4] : vector<1x8x2x8x2x32xf32> to vector<1x8x2x8x32xf32>
    %67 = vector.extract_strided_slice %66 {offsets = [0, 0, 0, 0, 0], sizes = [1, 8, 1, 8, 32], strides = [1, 1, 1, 1, 1]} : vector<1x8x2x8x32xf32> to vector<1x8x1x8x32xf32>
    %68 = vector.shape_cast %67 : vector<1x8x1x8x32xf32> to vector<1x8x8x32xf32>
    %cst_81 = arith.constant 0.000000e+00 : f32
    %69 = vector.broadcast %cst_81 : f32 to vector<1x8x8x32xf32>
    %70 = arith.addf %69, %68 : vector<1x8x8x32xf32>
    %71 = vector.extract_strided_slice %66 {offsets = [0, 0, 1, 0, 0], sizes = [1, 8, 1, 8, 32], strides = [1, 1, 1, 1, 1]} : vector<1x8x2x8x32xf32> to vector<1x8x1x8x32xf32>
    %72 = vector.shape_cast %71 : vector<1x8x1x8x32xf32> to vector<1x8x8x32xf32>
    %73 = arith.addf %70, %72 : vector<1x8x8x32xf32>
    %cst_82 = arith.constant 2.500000e-01 : f32
    %74 = vector.broadcast %cst_82 : f32 to vector<1x8x8x32xf32>
    %75 = arith.mulf %73, %74 : vector<1x8x8x32xf32>
    %76 = vector.shape_cast %75 : vector<1x8x8x32xf32> to vector<64x32xf32>
    %77 = arith.truncf %76 : vector<64x32xf32> to vector<64x32xbf16>
    %c0_83 = arith.constant 0 : index
    %c0_84 = arith.constant 0 : index
    %78 = vector.load %arg11[%c0_83, %c0_84] : memref<32x64xbf16, #tpu.memory_space<vmem>>, vector<32x64xbf16>
    %cst_85 = arith.constant dense<0.000000e+00> : vector<64x64xf32>
    %79 = tpu.matmul %77, %78, %cst_85 {dimension_numbers = #tpu.dot_dimension_numbers<[1], [0], [0], [1], [0, 0, 1, 1], [], []>} : vector<64x32xbf16>, vector<32x64xbf16>, vector<64x64xf32> -> vector<64x64xf32>
    %c0_86 = arith.constant 0 : index
    %c0_87 = arith.constant 0 : index
    %80 = vector.load %arg12[%c0_86, %c0_87] : memref<1x64xf32, #tpu.memory_space<vmem>>, vector<1x64xf32>
    %81 = vector.broadcast %80 : vector<1x64xf32> to vector<64x64xf32>
    %82 = arith.mulf %79, %81 : vector<64x64xf32>
    %c0_88 = arith.constant 0 : index
    %c0_89 = arith.constant 0 : index
    %83 = vector.load %arg13[%c0_88, %c0_89] : memref<1x64xf32, #tpu.memory_space<vmem>>, vector<1x64xf32>
    %84 = vector.broadcast %83 : vector<1x64xf32> to vector<64x64xf32>
    %85 = arith.addf %82, %84 : vector<64x64xf32>
    %86 = arith.addf %63, %85 : vector<64x64xf32>
    %cst_90 = arith.constant 0.000000e+00 : f32
    %87 = vector.broadcast %cst_90 : f32 to vector<64x64xf32>
    %88 = arith.maximumf %86, %87 : vector<64x64xf32>
    %89 = vector.shape_cast %88 : vector<64x64xf32> to vector<1x8x8x64xf32>
    %c0_91 = arith.constant 0 : index
    %c0_92 = arith.constant 0 : index
    %c0_93 = arith.constant 0 : index
    %c0_94 = arith.constant 0 : index
    %90 = vector.load %arg14[%c0_91, %c0_92, %c0_93, %c0_94] : memref<1x8x8x64xf32, #tpu.memory_space<vmem>>, vector<1x8x8x64xf32>
    tpu.vector_store %arg14[%c0_91, %c0_92, %c0_93, %c0_94], %89 {strides = array<i32>} : memref<1x8x8x64xf32, #tpu.memory_space<vmem>>, vector<1x8x8x64xf32>,
    return
  }
  func.func @transform_0(%arg0: i32) -> (i32, i32, i32, i32) {
    %c0_i32 = arith.constant 0 : i32
    %c0_i32_0 = arith.constant 0 : i32
    %c0_i32_1 = arith.constant 0 : i32
    %c0_i32_2 = arith.constant 0 : i32
    return %arg0, %c0_i32, %c0_i32_0, %c0_i32_1 : i32, i32, i32, i32
  }
  func.func @transform_1(%arg0: i32) -> (i32, i32) {
    %c0_i32 = arith.constant 0 : i32
    %c0_i32_0 = arith.constant 0 : i32
    %c0_i32_1 = arith.constant 0 : i32
    return %c0_i32, %c0_i32_0 : i32, i32
  }
  func.func @transform_2(%arg0: i32) -> (i32, i32) {
    %c0_i32 = arith.constant 0 : i32
    %c0_i32_0 = arith.constant 0 : i32
    %c0_i32_1 = arith.constant 0 : i32
    return %c0_i32, %c0_i32_0 : i32, i32
  }
  func.func @transform_3(%arg0: i32) -> (i32, i32) {
    %c0_i32 = arith.constant 0 : i32
    %c0_i32_0 = arith.constant 0 : i32
    %c0_i32_1 = arith.constant 0 : i32
    return %c0_i32, %c0_i32_0 : i32, i32
  }
  func.func @transform_4(%arg0: i32) -> (i32, i32) {
    %c0_i32 = arith.constant 0 : i32
    %c0_i32_0 = arith.constant 0 : i32
    %c0_i32_1 = arith.constant 0 : i32
    return %c0_i32, %c0_i32_0 : i32, i32
  }
  func.func @transform_5(%arg0: i32) -> (i32, i32) {
    %c0_i32 = arith.constant 0 : i32
    %c0_i32_0 = arith.constant 0 : i32
    %c0_i32_1 = arith.constant 0 : i32
    return %c0_i32, %c0_i32_0 : i32, i32
  }
  func.func @transform_6(%arg0: i32) -> (i32, i32) {
    %c0_i32 = arith.constant 0 : i32
    %c0_i32_0 = arith.constant 0 : i32
    %c0_i32_1 = arith.constant 0 : i32
    return %c0_i32, %c0_i32_0 : i32, i32
  }
  func.func @transform_7(%arg0: i32) -> (i32, i32) {
    %c0_i32 = arith.constant 0 : i32
    %c0_i32_0 = arith.constant 0 : i32
    %c0_i32_1 = arith.constant 0 : i32
    return %c0_i32, %c0_i32_0 : i32, i32
  }
  func.func @transform_8(%arg0: i32) -> (i32, i32) {
    %c0_i32 = arith.constant 0 : i32
    %c0_i32_0 = arith.constant 0 : i32
    %c0_i32_1 = arith.constant 0 : i32
    return %c0_i32, %c0_i32_0 : i32, i32
  }
  func.func @transform_9(%arg0: i32) -> (i32, i32) {
    %c0_i32 = arith.constant 0 : i32
    %c0_i32_0 = arith.constant 0 : i32
    %c0_i32_1 = arith.constant 0 : i32
    return %c0_i32, %c0_i32_0 : i32, i32
  }
  func.func @transform_10(%arg0: i32) -> (i32, i32) {
    %c0_i32 = arith.constant 0 : i32
    %c0_i32_0 = arith.constant 0 : i32
    %c0_i32_1 = arith.constant 0 : i32
    return %c0_i32, %c0_i32_0 : i32, i32
  }
  func.func @transform_11(%arg0: i32) -> (i32, i32) {
    %c0_i32 = arith.constant 0 : i32
    %c0_i32_0 = arith.constant 0 : i32
    %c0_i32_1 = arith.constant 0 : i32
    return %c0_i32, %c0_i32_0 : i32, i32
  }
  func.func @transform_12(%arg0: i32) -> (i32, i32) {
    %c0_i32 = arith.constant 0 : i32
    %c0_i32_0 = arith.constant 0 : i32
    %c0_i32_1 = arith.constant 0 : i32
    return %c0_i32, %c0_i32_0 : i32, i32
  }
  func.func @transform_13(%arg0: i32) -> (i32, i32, i32, i32) {
    %c0_i32 = arith.constant 0 : i32
    %c0_i32_0 = arith.constant 0 : i32
    %c0_i32_1 = arith.constant 0 : i32
    %c0_i32_2 = arith.constant 0 : i32
    return %arg0, %c0_i32, %c0_i32_0, %c0_i32_1 : i32, i32, i32, i32
  }
}

</mosaic_0001>

<bundles_post_ra>
// kernel: tpu_custom_call.1
= control target key start
LH: loop header
LB: loop body
LE: loop exit
PB: predicated region body
PF: predicated region fallthrough
CT: control target
= control target key end

     0   :  { %s14092_s0 = inlined_call_operand.hbm [shape: bf16[2,16,16,32], index: 0, kind: input, shape index: {}]   ;;  %s14093_s1 = inlined_call_operand.vmem [shape: bf16[32,16], index: 1, kind: input, shape index: {}]   ;;  %s14094_s2 = inlined_call_operand.vmem [shape: f32[1,16], index: 2, kind: input, shape index: {}]   ;;  %s14095_s3 = inlined_call_operand.vmem [shape: f32[1,16], index: 3, kind: input, shape index: {}]   ;;  %s14096_s4 = inlined_call_operand.vmem [shape: bf16[144,16], index: 4, kind: input, shape index: {}]   ;;  %s14097_s5 = inlined_call_operand.vmem [shape: f32[1,16], index: 5, kind: input, shape index: {}]   ;;  %s14098_s6 = inlined_call_operand.vmem [shape: f32[1,16], index: 6, kind: input, shape index: {}]   ;;  %s14099_s7 = inlined_call_operand.vmem [shape: bf16[16,64], index: 7, kind: input, shape index: {}]   ;;  %s14100_s8 = inlined_call_operand.vmem [shape: f32[1,64], index: 8, kind: input, shape index: {}]   ;;  %s14101_s9 = inlined_call_operand.vmem [shape: f32[1,64], index: 9, kind: input, shape index: {}]   ;;  %s14102_s10 = inlined_call_operand.vmem [shape: bf16[32,64], index: 10, kind: input, shape index: {}]   ;;  %s14103_s11 = inlined_call_operand.vmem [shape: f32[1,64], index: 11, kind: input, shape index: {}]   ;;  %s14104_s12 = inlined_call_operand.vmem [shape: f32[1,64], index: 12, kind: input, shape index: {}]   ;;  %s14105_s13 = inlined_call_operand.hbm [shape: f32[2,8,8,64], index: 13, kind: output, shape index: {}]  }
   0x1   :  { %14211 = sst [smem:[#allocation113_spill]] %s14105_s13 }
   0x2   :  { %18 = vsyncpa [#allocation4], 0 }
   0x3   :  { %20 = vsyncpa [#allocation4 + $0x1], 0 }
   0x4   :  { %21 = vsyncpa [#allocation5], 0 }
   0x5   :  { %23 = vsyncpa [#allocation5 + $0x1], 0  ;;  %s9598_s25 = smov 0   ;;  %s9600_s26 = smov 0  }
   0x6   :  { %s9602_s27 = smov 0   ;;  %s9604_s28 = smov 0  }
   0x7 LB: > { %14212 = sst [smem:[#allocation9_spill]] %s9499_s25  ;;  %s9619_s29 = sadd.s32 4294967295, %s9511_s28   ;;  %s9511_s28 = sphi %s9604_s28, %s14662_s28   ;;  %s9507_s27 = sphi %s9602_s27, %s14664_s27   ;;  %s9503_s26 = sphi %s9600_s26, %s14666_s26   ;;  %s9499_s25 = sphi %s9598_s25, %s14665_s25  }
   0x8   : > { %14213 = sst [smem:[#allocation10_spill]] %s9507_s27  ;;  %s8671_s30 = sadd.s32 4294967294, %s9511_s28  }
   0x9   : > { %s9623_s14 = sadd.s32 1, %s9511_s28   ;;  %s36_s15 = sadd.s32 1, %s9507_s27 }
   0xa   : > { %14214 = sst [smem:[#allocation11_spill]] %s9623_s14  ;;  %s33_s16 = ssub.s32 %s9511_s28, %s9623_s14 }
   0xb   : > { %p43_p0 = scmp.ne.s32.totalorder %s9507_s27, %s9503_s26  ;;  %p34_p1 = scmp.eq.s32.totalorder %s33_s16, 0 }
   0xc   : > { %p44_p2 = scmp.eq.s32.totalorder %s9511_s28, 0  ;;  %p49_p3 = scmp.ne.s32.totalorder %s9503_s26, %s9499_s25 }
   0xd   : > { %p50_p4 = scmp.eq.s32.totalorder %s9619_s29, 0  ;;  %p325_p7 = scmp.eq.s32.totalorder %s9619_s29, 1 }
   0xe   : > { %s9635_s17 = scalar_select %p34_p1, %s9507_s27, %s36_s15  }
   0xf   : > { %p9637_p5 = por %p44_p2, %p43_p0  ;;  %p9641_p6 = por %p50_p4, %p49_p3 }
  0x10   : > { %14215 = sst [smem:[#allocation12_spill]] %s9635_s17  ;;  %p331_p8 = scmp.eq.s32.totalorder %s8671_s30, 1 }
  0x11   : > { %s14217_s19 = scalar_select %p9641_p6, 1, 0 }
  0x12   : > { %p9138_p10 = scmp.lt.s32.totalorder %s9511_s28, 2  ;;  %p9648_p11 = por %p325_p7, %p43_p0 }
  0x13   : > { %p9652_p12 = por %p331_p8, %p49_p3  ;;  %s387_s22 = sand.u32 1, %s9507_s27  }
  0x14   : > { %s14218_s20 = scalar_select %p9648_p11, 1, 0 }
  0x15   : > { %s14219_s21 = scalar_select %p9652_p12, 1, 0 }
  0x16   : > { %s8987_s23 = sshll.u32 %s9511_s28, 11  ;;  %s8674_s24 = sshll.u32 %s387_s22, 7 }
  0x17   : > { %14220 = sst [smem:[#allocation13_spill]] %s14219_s21  ;;  %s9661_s17 = scalar_lea.hbm %s14092_s0, %s8987_s23 }
  0x18   : > { %s391_s30 = scalar_lea.vmem [#allocation3], %s8674_s24  ;;  %p9665_p13 = pnand %p9138_p10, %p9637_p5 }
  0x19   : > { %s398_s14 = sshll.u32 %s391_s30, 4  ;;  %s9671_s27 = scalar_lea.sflag [#allocation4], %s387_s22  ;;  %s9669_s14 = int_to_ptr.vmem [resolvable:$true] %s398_s14 }
  0x1a   : > { %s9419_s21 = scalar_lea.hbm %s9661_s17, 2048  ;;  %p9421_p1 = pneg %p9665_p13 }
  0x1b   : > { %p9420_p0 = scmp.ne.s32.totalorder %s9661_s17, %s9419_s21  ;;  %s9424_s24 = scalar_lea.hbm %s14092_s0, 4096 }
  0x1c   : > { %p9425_p4 = scmp.lt.s32.totalorder %s9661_s17, %s14092_s0  ;;  %p9426_p5 = scmp.lt.s32.totalorder %s9424_s24, %s9419_s21 }
  0x1d   : > { %p9422_p2 = pnand %p9421_p1, %p9420_p0 }
  0x1e   : > { %p9427_p7 = por %p9426_p5, %p9425_p4 }
  0x1f   : > { %p9423_p3 = pneg %p9422_p2 }
  0x21   : > { %p9428_p8 = pnand %p9427_p7, %p9423_p3 }
  0x23   : > { %9431 = shalt.err (!%p9428_p8)
}
  0x24   : > { %s9432_s22 = scalar_lea.vmem %s9669_s14, 2048  ;;  %s9513_s30 = smov [#allocation3]  }
  0x25   : > { %p9433_p10 = scmp.ne.s32.totalorder %s9669_s14, %s9432_s22  ;;  %s9437_s13 = sshll.u32 %s9513_s30, 4  ;;  %s9438_s13 = int_to_ptr.vmem [resolvable:$false] %s9437_s13 }
  0x26   : > { %s9439_s23 = scalar_lea.vmem %s9438_s13, 4096  ;;  %p9440_p2 = scmp.lt.s32.totalorder %s9669_s14, %s9438_s13 }
  0x27   : > { %p9435_p9 = pnand %p9433_p10, %p9421_p1  ;;  %p9441_p12 = scmp.lt.s32.totalorder %s9439_s23, %s9432_s22 }
  0x29   : > { %p9436_p0 = pneg %p9435_p9  ;;  %p9442_p11 = por %p9441_p12, %p9440_p2 }
  0x2b   : > { %p9443_p6 = pnand %p9442_p11, %p9436_p0 }
  0x2d   : > { %9446 = shalt.err (!%p9443_p6)
}
  0x2e   : > { %s9514_s21 = smov 64   ;;  %s9515_s15 = smov 4  }
  0x2f   : > { %9133 = dma.hbm_to_vmem [thread:$0]  (!%p9665_p13), %s9661_s17, 2048, %s9669_s14, %s9671_s27, %s9514_s21, %s9514_s21, %s9515_s15  }
  0x30   : > { %p8677_p9 = scmp.ge.s32.totalorder %s9511_s28, 1  ;;  %p406_p1 = scmp.lt.s32.totalorder %s9511_s28, 3 }
  0x32   : > { %p407_p3 = pnand %p8677_p9, %p406_p1 }
  0x34   : > { %410 = sbr.rel (%p407_p3) target bundleno = 1402 (0x57a), region = 72 }
  0x39   : > { %s9695_s13 = sand.u32 1, %s9503_s26   ;;  %p14222_p6 = scmp.ne.s32.totalorder %s14217_s19, 0 }
  0x3a   : > { %s8678_s24 = sshll.u32 %s9695_s13, 7  ;;  %s413_s18 = scalar_lea.sflag [#allocation4], %s9695_s13 }
  0x3b   : > { %s9699_s16 = scalar_lea.vmem [#allocation3], %s8678_s24 }
  0x3c   : > { %9490 = dma.done.wait (%p14222_p6), %s413_s18, 2048  }
  0x3d   : > { %9492 = vsyncadd (%p14222_p6), %s413_s18, 4294965248  ;;  %v9516_v0 = vmov 1983009808   ;;  %v4229_v2 = vlaneseq  ;;  %v9185_v5 = vld [vmem:[%s14093_s1 + $0x8] sm:$0xff]   ;;  %v9186_v6 = vld [vmem:[%s14093_s1] sm:$0xff]   ;;  %vm588_vm0 = vcmask 261120  }
  0x3e   : > { %v4227_v1 = vunpack.c.l.s4 %v9516_v0  ;;  %9050 = vmatprep.subr.bf16.mxu0 %v9185_v5  ;;  %v460_v7 = vld [vmem:[%s9699_s16] sm:$0xff]   ;;  %v462_v11 = vld [vmem:[%s9699_s16 + $0x8] sm:$0xff]   ;;  %vm7096_vm1 = vcmask 254976   ;;  %v9718_v12 = vld [vmem:[%s9699_s16 + $0x10] sm:$0xff]   ;;  %vm6180_vm2 = vcmask 1041409   ;;  %vm6182_vm3 = vcmask 1042434  }
  0x3f   : > { %v4230_v4 = vshrl.u32 %v4229_v2, 7  ;;  %9051 = vmatpush3.bf16.msra.mxu0 %v9185_v5  ;;  %v6360_v9 = vunpack.c.l.bf16 %v460_v7  ;;  %v9714_v10 = vunpack.c.h.bf16 %v460_v7  ;;  %9054 = vmatprep.mubr.msk.bf16.mxu0 %vm588_vm0, %v460_v7  ;;  %v6362_v23 = vunpack.c.l.bf16 %v462_v11  ;;  %s9518_s21 = smov 32   ;;  %s9519_s15 = smov 16  }
  0x40   : > { %v4228_v3 = vunpack.c.0.s8 %v4227_v1  ;;  %9052 = vmatprep.subr.bf16.mxu0 %v9186_v6  ;;  %v9739_v32 = vunpack.c.h.bf16 %v462_v11  ;;  %vm924_vm4 = vcmask 125952   ;;  %vm1730_vm5 = vcmask 1042432   ;;  %s9520_s24 = smov 96   ;;  %s9521_s18 = smov 48  }
  0x41   : > { %v6424_v13 = vcombine.high %v6360_v9, %v6360_v9  ;;  %v6458_v28 = vcombine.high %v6362_v23, %v6362_v23  ;;  %vm939_vm6 = vcmask 125955   ;;  %vm940_vm7 = vsmask.f32 7950  ;;  %s9523_s14 = smov 112   ;;  %s9524_s27 = smov 64  }
  0x42   : > { %v9712_v8 = vsub.s32 %v4228_v3, %v4230_v4  ;;  %vm10119_vm8 = vmand %vm939_vm6, %vm940_vm7  ;;  %vm990_vm9 = vcmask 122880   ;;  %vm991_vm10 = vsmask.f32 256  ;;  %vm2835_vm12 = vcmask 130048   ;;  %s14656_s19 = sld [smem:[#allocation113_spill]]  ;;  %p14657_p12 = scmp.ne.s32.totalorder %s14218_s20, 0 }
  0x43   : > { %9053 = vmatpush3.bf16.msra.mxu0 %v9186_v6  ;;  %vm10257_vm11 = vmand %vm990_vm9, %vm991_vm10  ;;  %vm3273_vm13 = vsmask.f32 4352  ;;  %vm2980_vm14 = vcmask 392192   ;;  %vm3045_vm15 = vcmask 523264   ;;  %vm3094_vm6 = vcmask 654336  }
  0x44   : > { %v6431_v14 = vrot.slane %v6360_v9, %v9712_v8  ;;  %v9723_v15 = vrot.slane %v6424_v13, %v9712_v8  ;;  %v9727_v17 = vrot.slane %v9714_v10, %v9712_v8  ;;  %v6465_v29 = vrot.slane %v6362_v23, %v9712_v8 }
  0x45   : > { %v9742_v35 = vrot.slane %v6458_v28, %v9712_v8  ;;  %v9746_v39 = vrot.slane %v9739_v32, %v9712_v8  ;;  %vm3159_vm7 = vcmask 785408   ;;  %vm3224_vm9 = vcmask 916480  }
  0x46   : > { %v6439_v16 = vcombine.high %v6431_v14, %v6431_v14  ;;  %v7097_v18 = vsel %vm7096_vm1, %v6431_v14, 0.0  ;;  %v7111_v20 = vsel %vm7096_vm1, %v9723_v15, 0.0  ;;  %9055 = vmatmul.mubr.msk.bf16.vlgmr.msra.gmra.mxu0 %vm588_vm0, %v462_v11  ;;  %v7125_v22 = vsel %vm7096_vm1, %v9727_v17, 0.0 }
  0x47   : > { %v7098_v21 = vrot.slane %v7097_v18, 4  ;;  %9058 = vmatprep.mubr.msk.bf16.mxu0 %vm588_vm0, %v9718_v12  ;;  %v7112_v25 = vrot.slane %v7111_v20, 4  ;;  %v7126_v26 = vrot.slane %v7125_v22, 4  ;;  %v6473_v36 = vcombine.high %v6465_v29, %v6465_v29 }
  0x48   : > { %v7104_v19 = vsel %vm7096_vm1, %v6439_v16, 0.0  ;;  %v7153_v42 = vsel %vm7096_vm1, %v6465_v29, 0.0  ;;  %v7167_v44 = vsel %vm7096_vm1, %v9742_v35, 0.0  ;;  %v7181_v50 = vsel %vm7096_vm1, %v9746_v39, 0.0 }
  0x49   : > { %v7105_v24 = vrot.slane %v7104_v19, 4  ;;  %v7099_v27 = vadd.f32 %v7098_v21, %v7097_v18  ;;  %v7113_v31 = vadd.f32 %v7112_v25, %v7111_v20  ;;  %v7127_v33 = vadd.f32 %v7126_v26, %v7125_v22 }
  0x4a   : > { %v7160_v43 = vsel %vm7096_vm1, %v6473_v36, 0.0  ;;  %v7154_v46 = vrot.slane %v7153_v42, 4  ;;  %v7168_v49 = vrot.slane %v7167_v44, 4  ;;  %v7182_v54 = vrot.slane %v7181_v50, 4 }
  0x4b   : > { %v7106_v30 = vadd.f32 %v7105_v24, %v7104_v19  ;;  %v7100_v34 = vrot.slane %v7099_v27, 2  ;;  %v7114_v38 = vrot.slane %v7113_v31, 2  ;;  %v7128_v40 = vrot.slane %v7127_v33, 2 }
  0x4c   : > { %v7161_v47 = vrot.slane %v7160_v43, 4  ;;  %v7155_v52 = vadd.f32 %v7154_v46, %v7153_v42  ;;  %v7169_v56 = vadd.f32 %v7168_v49, %v7167_v44  ;;  %v7183_v60 = vadd.f32 %v7182_v54, %v7181_v50 }
  0x4d   : > { %v7107_v37 = vrot.slane %v7106_v30, 2  ;;  %v7101_v41 = vadd.f32 %v7100_v34, %v7099_v27  ;;  %v7115_v48 = vadd.f32 %v7114_v38, %v7113_v31  ;;  %v7129_v51 = vadd.f32 %v7128_v40, %v7127_v33 }
  0x4e   : > { %v7162_v53 = vadd.f32 %v7161_v47, %v7160_v43  ;;  %v7156_v58 = vrot.slane %v7155_v52, 2  ;;  %v7170_v62 = vrot.slane %v7169_v56, 2  ;;  %v7184_v2 = vrot.slane %v7183_v60, 2  ;;  %v466_v43 = vld [vmem:[%s9699_s16 + $0x18] sm:$0xff]  }
  0x4f   : > { %v7108_v45 = vadd.f32 %v7107_v37, %v7106_v30  ;;  %v7102_v55 = vrot.slane %v7101_v41, 1  ;;  %v7116_v61 = vrot.slane %v7115_v48, 1  ;;  %v7130_v63 = vrot.slane %v7129_v51, 1  ;;  %9059 = vmatmul.mubr.msk.bf16.gmra.mxu0 %vm588_vm0, %v466_v43 }
  0x50   : > { %v7163_v59 = vrot.slane %v7162_v53, 2  ;;  %v7157_v0 = vadd.f32 %v7156_v58, %v7155_v52  ;;  %v7171_v4 = vadd.f32 %v7170_v62, %v7169_v56  ;;  %v7185_v9 = vadd.f32 %v7184_v2, %v7183_v60  ;;  %v468_v52 = vld [vmem:[%s9699_s16 + $0x20] sm:$0xff]  }
  0x51   : > { %v7109_v57 = vrot.slane %v7108_v45, 1  ;;  %v7103_v3 = vadd.f32 %v7102_v55, %v7101_v41  ;;  %v7117_v11 = vadd.f32 %v7116_v61, %v7115_v48  ;;  %v6364_v14 = vunpack.c.l.bf16 %v9718_v12  ;;  %9062 = vmatprep.mubr.msk.bf16.mxu0 %vm588_vm0, %v468_v52 }
  0x52   : > { %v7164_v1 = vadd.f32 %v7163_v59, %v7162_v53  ;;  %v7158_v6 = vrot.slane %v7157_v0, 1  ;;  %v7172_v13 = vrot.slane %v7171_v4, 1  ;;  %v7131_v16 = vadd.f32 %v7130_v63, %v7129_v51 }
  0x53   : > { %v7110_v5 = vadd.f32 %v7109_v57, %v7108_v45  ;;  %v7186_v20 = vrot.slane %v7185_v9, 1  ;;  %v9760_v25 = vunpack.c.h.bf16 %v9718_v12  ;;  %v6492_v27 = vcombine.high %v6364_v14, %v6364_v14 }
  0x54   : > { %v7165_v7 = vrot.slane %v7164_v1, 1  ;;  %v7159_v18 = vadd.f32 %v7158_v6, %v7157_v0  ;;  %v7173_v21 = vadd.f32 %v7172_v13, %v7171_v4  ;;  %v6499_v28 = vrot.slane %v6364_v14, %v9712_v8 }
  0x55   : > { %v7187_v22 = vadd.f32 %v7186_v20, %v7185_v9  ;;  %v9769_v31 = vrot.slane %v9760_v25, %v9712_v8  ;;  %v9772_v33 = vrot.slane %v6492_v27, %v9712_v8  ;;  %v6366_v48 = vunpack.c.l.bf16 %v466_v43 }
  0x56   : > { %v7166_v19 = vadd.f32 %v7165_v7, %v7164_v1  ;;  %v9755_v23 = vadd.f32 %v7159_v18, %v7103_v3  ;;  %v9762_v26 = vadd.f32 %v7173_v21, %v7117_v11  ;;  %v6507_v30 = vcombine.high %v6499_v28, %v6499_v28 }
  0x57   : > { %v9765_v29 = vadd.f32 %v7187_v22, %v7131_v16  ;;  %v7209_v34 = vsel %vm7096_vm1, %v6499_v28, 0.0  ;;  %v7237_v36 = vsel %vm7096_vm1, %v9769_v31, 0.0  ;;  %v7223_v37 = vsel %vm7096_vm1, %v9772_v33, 0.0 }
  0x58   : > { %v9757_v24 = vadd.f32 %v7166_v19, %v7110_v5  ;;  %v7216_v12 = vsel %vm7096_vm1, %v6507_v30, 0.0  ;;  %v7210_v38 = vrot.slane %v7209_v34, 4  ;;  %v7238_v41 = vrot.slane %v7237_v36, 4 }
  0x59   : > { %14223 = vst [vmem:[#allocation14_spill] sm:$0xff] %v9765_v29  ;;  %v7217_v40 = vrot.slane %v7216_v12, 4  ;;  %v7224_v42 = vrot.slane %v7223_v37, 4  ;;  %v9782_v51 = vunpack.c.h.bf16 %v466_v43  ;;  %v6526_v54 = vcombine.high %v6366_v48, %v6366_v48 }
  0x5a   : > { %v7211_v44 = vadd.f32 %v7210_v38, %v7209_v34  ;;  %v7239_v46 = vadd.f32 %v7238_v41, %v7237_v36  ;;  %v6533_v55 = vrot.slane %v6366_v48, %v9712_v8  ;;  %v6368_v48 = vunpack.c.l.bf16 %v468_v52 }
  0x5b   : > { %v7218_v45 = vadd.f32 %v7217_v40, %v7216_v12  ;;  %v7225_v47 = vadd.f32 %v7224_v42, %v7223_v37  ;;  %v9788_v57 = vrot.slane %v9782_v51, %v9712_v8  ;;  %v9791_v58 = vrot.slane %v6526_v54, %v9712_v8 }
  0x5c   : > { %v7212_v49 = vrot.slane %v7211_v44, 2  ;;  %v7240_v53 = vrot.slane %v7239_v46, 2  ;;  %v6541_v59 = vcombine.high %v6533_v55, %v6533_v55  ;;  %v7265_v60 = vsel %vm7096_vm1, %v6533_v55, 0.0 }
  0x5d   : > { %v7219_v50 = vrot.slane %v7218_v45, 2  ;;  %v7226_v56 = vrot.slane %v7225_v47, 2  ;;  %v7266_v63 = vrot.slane %v7265_v60, 4  ;;  %v7293_v0 = vsel %vm7096_vm1, %v9788_v57, 0.0 }
  0x5e   : > { %v7213_v61 = vadd.f32 %v7212_v49, %v7211_v44  ;;  %v7241_v1 = vadd.f32 %v7240_v53, %v7239_v46  ;;  %v7272_v2 = vsel %vm7096_vm1, %v6541_v59, 0.0  ;;  %v7279_v3 = vsel %vm7096_vm1, %v9791_v58, 0.0 }
  0x5f   : > { %v7220_v62 = vadd.f32 %v7219_v50, %v7218_v45  ;;  %v7294_v4 = vrot.slane %v7293_v0, 4  ;;  %v7227_v5 = vadd.f32 %v7226_v56, %v7225_v47  ;;  %v7267_v6 = vadd.f32 %v7266_v63, %v7265_v60 }
  0x60   : > { %v7273_v7 = vrot.slane %v7272_v2, 4  ;;  %v7280_v9 = vrot.slane %v7279_v3, 4  ;;  %v7214_v13 = vrot.slane %v7213_v61, 1  ;;  %v7242_v20 = vrot.slane %v7241_v1, 1 }
  0x61   : > { %v7295_v11 = vadd.f32 %v7294_v4, %v7293_v0  ;;  %v7268_v14 = vrot.slane %v7267_v6, 2  ;;  %v7221_v19 = vrot.slane %v7220_v62, 1  ;;  %v7228_v22 = vrot.slane %v7227_v5, 1 }
  0x62   : > { %v7274_v16 = vadd.f32 %v7273_v7, %v7272_v2  ;;  %v7281_v18 = vadd.f32 %v7280_v9, %v7279_v3  ;;  %v7215_v12 = vadd.f32 %v7214_v13, %v7213_v61  ;;  %v7243_v41 = vadd.f32 %v7242_v20, %v7241_v1 }
  0x63   : > { %v7296_v21 = vrot.slane %v7295_v11, 2  ;;  %v7269_v27 = vadd.f32 %v7268_v14, %v7267_v6  ;;  %v7222_v40 = vadd.f32 %v7221_v19, %v7220_v62  ;;  %v7229_v43 = vadd.f32 %v7228_v22, %v7227_v5 }
  0x64   : > { %v7275_v28 = vrot.slane %v7274_v16, 2  ;;  %v7282_v30 = vrot.slane %v7281_v18, 2  ;;  %v6369_v55 = vunpack.c.h.bf16 %v468_v52  ;;  %v6560_v60 = vcombine.high %v6368_v48, %v6368_v48 }
  0x65   : > { %v7297_v34 = vadd.f32 %v7296_v21, %v7295_v11  ;;  %v7270_v36 = vrot.slane %v7269_v27, 1  ;;  %v6567_v61 = vrot.slane %v6368_v48, %v9712_v8  ;;  %vm6190_vm10 = vcmask 1046534  }
  0x66   : > { %v7276_v37 = vadd.f32 %v7275_v28, %v7274_v16  ;;  %v7283_v38 = vadd.f32 %v7282_v30, %v7281_v18  ;;  %v6577_v62 = vcombine.high %v6369_v55, %v6369_v55  ;;  %v6584_v63 = vrot.slane %v6369_v55, %v9712_v8 }
  0x67   : > { %v7298_v42 = vrot.slane %v7297_v34, 1  ;;  %v7271_v44 = vadd.f32 %v7270_v36, %v7269_v27  ;;  %v6574_v0 = vrot.slane %v6560_v60, %v9712_v8  ;;  %v6575_v1 = vcombine.high %v6567_v61, %v6567_v61  ;;  %v9824_v60 = vld [vmem:[%s9699_s16 + $0x30] sm:$0xff]  }
  0x68   : > { %v7277_v45 = vrot.slane %v7276_v37, 1  ;;  %v7284_v46 = vrot.slane %v7283_v38, 1  ;;  %v7321_v2 = vsel %vm7096_vm1, %v6567_v61, 0.0  ;;  %v6592_v3 = vcombine.high %v6584_v63, %v6584_v63 }
  0x69   : > { %v7299_v47 = vadd.f32 %v7298_v42, %v7297_v34  ;;  %v9800_v53 = vadd.f32 %v7271_v44, %v7215_v12  ;;  %v6576_v4 = vcombine.high %v6574_v0, %v6574_v0  ;;  %v9813_v5 = vrot.slane %v6577_v62, %v9712_v8 }
  0x6a   : > { %v7278_v49 = vadd.f32 %v7277_v45, %v7276_v37  ;;  %v7285_v50 = vadd.f32 %v7284_v46, %v7283_v38  ;;  %v7322_v52 = vrot.slane %v7321_v2, 4  ;;  %v7328_v6 = vsel %vm7096_vm1, %v6575_v1, 0.0 }
  0x6b   : > { %v9802_v54 = vadd.f32 %v7299_v47, %v7243_v41  ;;  %v7329_v7 = vrot.slane %v7328_v6, 4  ;;  %v7335_v9 = vsel %vm7096_vm1, %v6574_v0, 0.0  ;;  %v7342_v14 = vsel %vm7096_vm1, %v6576_v4, 0.0  ;;  %v470_v47 = vld [vmem:[%s9699_s16 + $0x28] sm:$0xff]  }
  0x6c   : > { %v9804_v56 = vadd.f32 %v7278_v49, %v7222_v40  ;;  %v9806_v59 = vadd.f32 %v7285_v50, %v7229_v43  ;;  %v7323_v11 = vadd.f32 %v7322_v52, %v7321_v2  ;;  %v7336_v13 = vrot.slane %v7335_v9, 4  ;;  %9063 = vmatmul.mubr.msk.bf16.gmra.mxu0 %vm588_vm0, %v470_v47 }
  0x6d   : > { %14224 = vst [vmem:[#allocation15_spill] sm:$0xff] %v9802_v54  ;;  %v7349_v16 = vsel %vm7096_vm1, %v6584_v63, 0.0  ;;  %v7330_v18 = vadd.f32 %v7329_v7, %v7328_v6  ;;  %v7343_v19 = vrot.slane %v7342_v14, 4  ;;  %v7356_v21 = vsel %vm7096_vm1, %v6592_v3, 0.0  ;;  %9066 = vmatprep.mubr.msk.bf16.mxu0 %vm588_vm0, %v9824_v60 }
  0x6e   : > { %14225 = vst [vmem:[#allocation16_spill] sm:$0xff] %v9806_v59  ;;  %v7350_v20 = vrot.slane %v7349_v16, 4  ;;  %v7324_v22 = vrot.slane %v7323_v11, 2  ;;  %v7337_v27 = vadd.f32 %v7336_v13, %v7335_v9  ;;  %v7357_v28 = vrot.slane %v7356_v21, 4 }
  0x6f   : > { %v7363_v30 = vsel %vm7096_vm1, %v9813_v5, 0.0  ;;  %v7331_v34 = vrot.slane %v7330_v18, 2  ;;  %v7344_v12 = vadd.f32 %v7343_v19, %v7342_v14  ;;  %v6370_v0 = vunpack.c.l.bf16 %v470_v47 }
  0x70   : > { %v7351_v36 = vadd.f32 %v7350_v20, %v7349_v16  ;;  %v7364_v37 = vrot.slane %v7363_v30, 4  ;;  %v7325_v38 = vadd.f32 %v7324_v22, %v7323_v11  ;;  %v7338_v40 = vrot.slane %v7337_v27, 2 }
  0x71   : > { %v7358_v41 = vadd.f32 %v7357_v28, %v7356_v21  ;;  %v7332_v42 = vadd.f32 %v7331_v34, %v7330_v18  ;;  %v7345_v43 = vrot.slane %v7344_v12, 2  ;;  %v6371_v3 = vunpack.c.h.bf16 %v470_v47 }
  0x72   : > { %v7352_v44 = vrot.slane %v7351_v36, 2  ;;  %v7365_v45 = vadd.f32 %v7364_v37, %v7363_v30  ;;  %v7339_v46 = vadd.f32 %v7338_v40, %v7337_v27  ;;  %v7326_v48 = vrot.slane %v7325_v38, 1 }
  0x73   : > { %v7359_v49 = vrot.slane %v7358_v41, 2  ;;  %v7333_v50 = vrot.slane %v7332_v42, 1  ;;  %v7346_v55 = vadd.f32 %v7345_v43, %v7344_v12  ;;  %v6594_v6 = vcombine.high %v6370_v0, %v6370_v0 }
  0x74   : > { %v7353_v61 = vadd.f32 %v7352_v44, %v7351_v36  ;;  %v7366_v62 = vrot.slane %v7365_v45, 2  ;;  %v7340_v63 = vrot.slane %v7339_v46, 1  ;;  %v9826_v1 = vadd.f32 %v7326_v48, %v7325_v38 }
  0x75   : > { %v7360_v2 = vadd.f32 %v7359_v49, %v7358_v41  ;;  %v9829_v4 = vadd.f32 %v7333_v50, %v7332_v42  ;;  %v7347_v52 = vrot.slane %v7346_v55, 1  ;;  %v6601_v7 = vrot.slane %v6370_v0, %v9712_v8 }
  0x76   : > { %v7354_v9 = vrot.slane %v7353_v61, 1  ;;  %v7367_v11 = vadd.f32 %v7366_v62, %v7365_v45  ;;  %v6611_v13 = vcombine.high %v6371_v3, %v6371_v3  ;;  %v6618_v14 = vrot.slane %v6371_v3, %v9712_v8 }
  0x77   : > { %v7341_v16 = vadd.f32 %v7340_v63, %v7339_v46  ;;  %v6608_v18 = vrot.slane %v6594_v6, %v9712_v8  ;;  %v6609_v19 = vcombine.high %v6601_v7, %v6601_v7  ;;  %v7377_v20 = vsel %vm7096_vm1, %v6601_v7, 0.0 }
  0x78   : > { %v7361_v21 = vrot.slane %v7360_v2, 1  ;;  %v9838_v22 = vrot.slane %v6611_v13, %v9712_v8  ;;  %v6626_v27 = vcombine.high %v6618_v14, %v6618_v14  ;;  %v7378_v28 = vrot.slane %v7377_v20, 4 }
  0x79   : > { %v6610_v30 = vcombine.high %v6608_v18, %v6608_v18  ;;  %v7384_v34 = vsel %vm7096_vm1, %v6609_v19, 0.0  ;;  %v7391_v12 = vsel %vm7096_vm1, %v6608_v18, 0.0  ;;  %v7405_v36 = vsel %vm7096_vm1, %v6618_v14, 0.0 }
  0x7a   : > { %v7348_v37 = vadd.f32 %v7347_v52, %v7346_v55  ;;  %v7379_v38 = vadd.f32 %v7378_v28, %v7377_v20  ;;  %v7385_v40 = vrot.slane %v7384_v34, 4  ;;  %v7392_v41 = vrot.slane %v7391_v12, 4 }
  0x7b   : > { %v7398_v42 = vsel %vm7096_vm1, %v6610_v30, 0.0  ;;  %v7406_v43 = vrot.slane %v7405_v36, 4  ;;  %v7412_v44 = vsel %vm7096_vm1, %v6626_v27, 0.0  ;;  %v7419_v45 = vsel %vm7096_vm1, %v9838_v22, 0.0 }
  0x7c   : > { %v7380_v46 = vrot.slane %v7379_v38, 2  ;;  %v7386_v47 = vadd.f32 %v7385_v40, %v7384_v34  ;;  %v7393_v48 = vadd.f32 %v7392_v41, %v7391_v12  ;;  %v7399_v49 = vrot.slane %v7398_v42, 4 }
  0x7d   : > { %v7355_v50 = vadd.f32 %v7354_v9, %v7353_v61  ;;  %v7407_v62 = vadd.f32 %v7406_v43, %v7405_v36  ;;  %v7413_v63 = vrot.slane %v7412_v44, 4  ;;  %v7420_v0 = vrot.slane %v7419_v45, 4 }
  0x7e   : > { %v7381_v55 = vadd.f32 %v7380_v46, %v7379_v38  ;;  %v7387_v3 = vrot.slane %v7386_v47, 2  ;;  %v7394_v52 = vrot.slane %v7393_v48, 2  ;;  %v7400_v6 = vadd.f32 %v7399_v49, %v7398_v42 }
  0x7f   : > { %v7368_v7 = vrot.slane %v7367_v11, 1  ;;  %v7408_v13 = vrot.slane %v7407_v62, 2  ;;  %v7414_v14 = vadd.f32 %v7413_v63, %v7412_v44  ;;  %v7421_v18 = vadd.f32 %v7420_v0, %v7419_v45 }
  0x80   : > { %v7382_v19 = vrot.slane %v7381_v55, 1  ;;  %v7388_v20 = vadd.f32 %v7387_v3, %v7386_v47  ;;  %v7395_v27 = vadd.f32 %v7394_v52, %v7393_v48  ;;  %v7401_v28 = vrot.slane %v7400_v6, 2 }
  0x81   : > { %v7362_v30 = vadd.f32 %v7361_v21, %v7360_v2  ;;  %v7409_v34 = vadd.f32 %v7408_v13, %v7407_v62  ;;  %v7415_v12 = vrot.slane %v7414_v14, 2  ;;  %v7422_v40 = vrot.slane %v7421_v18, 2 }
  0x82   : > { %v7383_v61 = vadd.f32 %v7382_v19, %v7381_v55  ;;  %v7389_v9 = vrot.slane %v7388_v20, 1  ;;  %v7396_v36 = vrot.slane %v7395_v27, 1  ;;  %v7402_v41 = vadd.f32 %v7401_v28, %v7400_v6 }
  0x83   : > { %v7410_v38 = vrot.slane %v7409_v34, 1  ;;  %v7416_v43 = vadd.f32 %v7415_v12, %v7414_v14  ;;  %v7423_v46 = vadd.f32 %v7422_v40, %v7421_v18  ;;  %v6372_v42 = vunpack.c.l.bf16 %v9824_v60 }
  0x84   : > { %v7390_v49 = vadd.f32 %v7389_v9, %v7388_v20  ;;  %v7397_v44 = vadd.f32 %v7396_v36, %v7395_v27  ;;  %v7403_v45 = vrot.slane %v7402_v41, 1  ;;  %v8073_v47 = vadd.f32 %v7383_v61, %v9826_v1 }
  0x85   : > { %v7369_v48 = vadd.f32 %v7368_v7, %v7367_v11  ;;  %v7411_v63 = vadd.f32 %v7410_v38, %v7409_v34  ;;  %v7417_v2 = vrot.slane %v7416_v43, 1  ;;  %v7424_v21 = vrot.slane %v7423_v46, 1 }
  0x86   : > { %v7404_v62 = vadd.f32 %v7403_v45, %v7402_v41  ;;  %v8074_v0 = vadd.f32 %v7390_v49, %v9829_v4  ;;  %v8075_v55 = vadd.f32 %v7397_v44, %v7341_v16  ;;  %v8137_v3 = vmul.f32 0.25, %v8073_v47 }
  0x87   : > { %v7418_v52 = vadd.f32 %v7417_v2, %v7416_v43  ;;  %v7425_v6 = vadd.f32 %v7424_v21, %v7423_v46  ;;  %v9850_v13 = vadd.f32 %v7411_v63, %v7355_v50  ;;  %v6628_v14 = vcombine.high %v6372_v42, %v6372_v42 }
  0x88   : > { %v9852_v18 = vadd.f32 %v7404_v62, %v7348_v37  ;;  %v8138_v19 = vmul.f32 0.25, %v8074_v0  ;;  %v8139_v20 = vmul.f32 0.25, %v8075_v55  ;;  %v8201_v27 = vpack.c.bf16 %v8137_v3, %v8137_v3 }
  0x89   : > { %14226 = vst [vmem:[#allocation17_spill] sm:$0xff] %v9850_v13  ;;  %v9854_v1 = vadd.f32 %v7418_v52, %v7362_v30  ;;  %v9856_v11 = vadd.f32 %v7425_v6, %v7369_v48  ;;  %v6373_v4 = vunpack.c.h.bf16 %v9824_v60  ;;  %v6635_v16 = vrot.slane %v6372_v42, %v9712_v8 }
  0x8a   : > { %14227 = vst [vmem:[#allocation18_spill] sm:$0xff] %v9852_v18  ;;  %v8202_v7 = vpack.c.bf16 %v8138_v19, %v8138_v19  ;;  %v8203_v28 = vpack.c.bf16 %v8139_v20, %v8139_v20  ;;  %v8333_v34 = vunpack.c.l.b16 %v8201_v27  ;;  %v6642_v40 = vrot.slane %v6628_v14, %v9712_v8 }
  0x8b   : > { %14228 = vst [vmem:[#allocation19_spill] sm:$0xff] %v9854_v1  ;;  %14229 = vst [vmem:[#allocation20_spill] sm:$0xff] %v9856_v11  ;;  %v6643_v37 = vcombine.high %v6635_v16, %v6635_v16  ;;  %v6645_v9 = vcombine.high %v6373_v4, %v6373_v4  ;;  %v6652_v41 = vrot.slane %v6373_v4, %v9712_v8  ;;  %v7433_v38 = vsel %vm7096_vm1, %v6635_v16, 0.0 }
  0x8c   : > { %v8334_v12 = vunpack.c.l.b16 %v8202_v7  ;;  %v8335_v50 = vunpack.c.l.b16 %v8203_v28  ;;  %v6644_v30 = vcombine.high %v6642_v40, %v6642_v40  ;;  %v7447_v46 = vsel %vm7096_vm1, %v6642_v40, 0.0 }
  0x8d   : > { %v9867_v60 = vrot.slane %v6645_v9, %v9712_v8  ;;  %v7440_v43 = vsel %vm7096_vm1, %v6643_v37, 0.0  ;;  %v6660_v42 = vcombine.high %v6652_v41, %v6652_v41  ;;  %v7434_v49 = vrot.slane %v7433_v38, 4  ;;  %v474_v9 = vld [vmem:[%s9699_s16 + $0x38] sm:$0xff]  }
  0x8e   : > { %v8395_v61 = vsel %vm6180_vm2, %v8334_v12, %v8333_v34  ;;  %v7441_v44 = vrot.slane %v7440_v43, 4  ;;  %v7448_v45 = vrot.slane %v7447_v46, 4  ;;  %v7454_v47 = vsel %vm7096_vm1, %v6644_v30, 0.0  ;;  %9067 = vmatmul.mubr.msk.bf16.gmra.mxu0 %vm588_vm0, %v474_v9 }
  0x8f   : > { %v9863_v36 = vsel %vm6182_vm3, %v8335_v50, %v8395_v61  ;;  %v7461_v48 = vsel %vm7096_vm1, %v6652_v41, 0.0  ;;  %v7475_v63 = vsel %vm7096_vm1, %v9867_v60, 0.0  ;;  %v7435_v2 = vadd.f32 %v7434_v49, %v7433_v38 }
  0x90   : > { %14230 = vst [vmem:[#allocation21_spill] sm:$0xff] %v9863_v36  ;;  %v7442_v21 = vadd.f32 %v7441_v44, %v7440_v43  ;;  %v7449_v62 = vadd.f32 %v7448_v45, %v7447_v46  ;;  %v7455_v0 = vrot.slane %v7454_v47, 4  ;;  %v7462_v55 = vrot.slane %v7461_v48, 4  ;;  %v9879_v44 = vld [vmem:[%s9699_s16 + $0x40] sm:$0xff]  }
  0x91   : > { %v7468_v3 = vsel %vm7096_vm1, %v6660_v42, 0.0  ;;  %v7476_v52 = vrot.slane %v7475_v63, 4  ;;  %v7436_v6 = vrot.slane %v7435_v2, 2  ;;  %v6374_v42 = vunpack.c.l.bf16 %v474_v9  ;;  %9070 = vmatprep.mubr.msk.bf16.mxu0 %vm588_vm0, %v9879_v44 }
  0x92   : > { %v7443_v14 = vrot.slane %v7442_v21, 2  ;;  %v7450_v19 = vrot.slane %v7449_v62, 2  ;;  %v7456_v20 = vadd.f32 %v7455_v0, %v7454_v47  ;;  %v7463_v27 = vadd.f32 %v7462_v55, %v7461_v48 }
  0x93   : > { %v7469_v7 = vrot.slane %v7468_v3, 4  ;;  %v7477_v28 = vadd.f32 %v7476_v52, %v7475_v63  ;;  %v7437_v34 = vadd.f32 %v7436_v6, %v7435_v2  ;;  %v6375_v49 = vunpack.c.h.bf16 %v474_v9 }
  0x94   : > { %v7457_v4 = vrot.slane %v7456_v20, 2  ;;  %v7444_v16 = vadd.f32 %v7443_v14, %v7442_v21  ;;  %v7451_v12 = vadd.f32 %v7450_v19, %v7449_v62  ;;  %v7464_v50 = vrot.slane %v7463_v27, 2 }
  0x95   : > { %v7470_v40 = vadd.f32 %v7469_v7, %v7468_v3  ;;  %v7438_v37 = vrot.slane %v7437_v34, 1  ;;  %v7478_v30 = vrot.slane %v7477_v28, 2  ;;  %v6662_v63 = vcombine.high %v6374_v42, %v6374_v42 }
  0x96   : > { %v7458_v61 = vadd.f32 %v7457_v4, %v7456_v20  ;;  %v7445_v41 = vrot.slane %v7444_v16, 1  ;;  %v7452_v38 = vrot.slane %v7451_v12, 1  ;;  %v7465_v43 = vadd.f32 %v7464_v50, %v7463_v27 }
  0x97   : > { %v7471_v46 = vrot.slane %v7470_v40, 2  ;;  %v9881_v45 = vadd.f32 %v7438_v37, %v7437_v34  ;;  %v7479_v48 = vadd.f32 %v7478_v30, %v7477_v28  ;;  %v6669_v2 = vrot.slane %v6374_v42, %v9712_v8 }
  0x98   : > { %v7459_v47 = vrot.slane %v7458_v61, 1  ;;  %v6679_v21 = vcombine.high %v6375_v49, %v6375_v49  ;;  %v6686_v62 = vrot.slane %v6375_v49, %v9712_v8  ;;  %v9886_v0 = vadd.f32 %v7445_v41, %v7444_v16 }
  0x99   : > { %v9888_v55 = vadd.f32 %v7452_v38, %v7451_v12  ;;  %v7466_v3 = vrot.slane %v7465_v43, 1  ;;  %v7472_v52 = vadd.f32 %v7471_v46, %v7470_v40  ;;  %v6676_v6 = vrot.slane %v6662_v63, %v9712_v8 }
  0x9a   : > { %v6677_v14 = vcombine.high %v6669_v2, %v6669_v2  ;;  %v6694_v19 = vcombine.high %v6686_v62, %v6686_v62  ;;  %v7480_v20 = vrot.slane %v7479_v48, 1  ;;  %v9892_v27 = vrot.slane %v6679_v21, %v9712_v8 }
  0x9b   : > { %v7489_v7 = vsel %vm7096_vm1, %v6669_v2, 0.0  ;;  %v7517_v28 = vsel %vm7096_vm1, %v6686_v62, 0.0  ;;  %v7460_v34 = vadd.f32 %v7459_v47, %v7458_v61  ;;  %v6678_v4 = vcombine.high %v6676_v6, %v6676_v6 }
  0x9c   : > { %14231 = vst [vmem:[#allocation22_spill] sm:$0xff] %v9892_v27  ;;  %v7490_v16 = vrot.slane %v7489_v7, 4  ;;  %v7496_v12 = vsel %vm7096_vm1, %v6677_v14, 0.0  ;;  %v7503_v40 = vsel %vm7096_vm1, %v6676_v6, 0.0  ;;  %v7518_v37 = vrot.slane %v7517_v28, 4 }
  0x9d   : > { %v7497_v50 = vrot.slane %v7496_v12, 4  ;;  %v7524_v30 = vsel %vm7096_vm1, %v6694_v19, 0.0  ;;  %v7504_v41 = vrot.slane %v7503_v40, 4  ;;  %v7510_v38 = vsel %vm7096_vm1, %v6678_v4, 0.0 }
  0x9e   : > { %v7491_v9 = vadd.f32 %v7490_v16, %v7489_v7  ;;  %v7525_v46 = vrot.slane %v7524_v30, 4  ;;  %v7511_v49 = vrot.slane %v7510_v38, 4  ;;  %v7519_v63 = vadd.f32 %v7518_v37, %v7517_v28 }
  0x9f   : > { %v7498_v42 = vadd.f32 %v7497_v50, %v7496_v12  ;;  %v7531_v61 = vsel %vm7096_vm1, %v9892_v27, 0.0  ;;  %v7505_v2 = vadd.f32 %v7504_v41, %v7503_v40  ;;  %v7473_v14 = vrot.slane %v7472_v52, 1 }
  0xa0   : > { %v7492_v47 = vrot.slane %v7491_v9, 2  ;;  %v7526_v21 = vadd.f32 %v7525_v46, %v7524_v30  ;;  %v7532_v62 = vrot.slane %v7531_v61, 4  ;;  %v7512_v36 = vadd.f32 %v7511_v49, %v7510_v38 }
  0xa1   : > { %v7499_v6 = vrot.slane %v7498_v42, 2  ;;  %v7520_v54 = vrot.slane %v7519_v63, 2  ;;  %v7506_v7 = vrot.slane %v7505_v2, 2  ;;  %v7467_v4 = vadd.f32 %v7466_v3, %v7465_v43 }
  0xa2   : > { %v7493_v19 = vadd.f32 %v7492_v47, %v7491_v9  ;;  %v7527_v16 = vrot.slane %v7526_v21, 2  ;;  %v7533_v29 = vadd.f32 %v7532_v62, %v7531_v61  ;;  %v7513_v12 = vrot.slane %v7512_v36, 2 }
  0xa3   : > { %v7500_v11 = vadd.f32 %v7499_v6, %v7498_v42  ;;  %v7521_v50 = vadd.f32 %v7520_v54, %v7519_v63  ;;  %v7507_v37 = vadd.f32 %v7506_v7, %v7505_v2  ;;  %v7474_v18 = vadd.f32 %v7473_v14, %v7472_v52 }
  0xa4   : > { %v7494_v28 = vrot.slane %v7493_v19, 1  ;;  %v7528_v1 = vadd.f32 %v7527_v16, %v7526_v21  ;;  %v7534_v13 = vrot.slane %v7533_v29, 2  ;;  %v7514_v30 = vadd.f32 %v7513_v12, %v7512_v36 }
  0xa5   : > { %v7501_v40 = vrot.slane %v7500_v11, 1  ;;  %v7522_v41 = vrot.slane %v7521_v50, 1  ;;  %v7508_v59 = vrot.slane %v7507_v37, 1  ;;  %v7481_v9 = vadd.f32 %v7480_v20, %v7479_v48 }
  0xa6   : > { %v7495_v46 = vadd.f32 %v7494_v28, %v7493_v19  ;;  %v7529_v38 = vrot.slane %v7528_v1, 1  ;;  %v7535_v49 = vadd.f32 %v7534_v13, %v7533_v29  ;;  %v7515_v27 = vrot.slane %v7514_v30, 1 }
  0xa7   : > { %v7502_v47 = vadd.f32 %v7501_v40, %v7500_v11  ;;  %v7523_v61 = vadd.f32 %v7522_v41, %v7521_v50  ;;  %v7509_v43 = vadd.f32 %v7508_v59, %v7507_v37  ;;  %v6376_v59 = vunpack.c.l.bf16 %v9879_v44 }
  0xa8   : > { %v7530_v3 = vadd.f32 %v7529_v38, %v7528_v1  ;;  %v7536_v42 = vrot.slane %v7535_v49, 1  ;;  %v8081_v54 = vadd.f32 %v7495_v46, %v9881_v45  ;;  %v7516_v63 = vadd.f32 %v7515_v27, %v7514_v30  ;;  %v478_v38 = vld [vmem:[%s9699_s16 + $0x48] sm:$0xff]  }
  0xa9   : > { %v8082_v2 = vadd.f32 %v7502_v47, %v9886_v0  ;;  %v9906_v52 = vadd.f32 %v7523_v61, %v7467_v4  ;;  %v8083_v21 = vadd.f32 %v7509_v43, %v9888_v55  ;;  %v9917_v14 = vunpack.c.h.bf16 %v9879_v44  ;;  %v480_v61 = vld [vmem:[%s9699_s16 + $0x50] sm:$0xff]   ;;  %9071 = vmatmul.mubr.msk.bf16.gmra.mxu0 %vm588_vm0, %v478_v38 }
  0xaa   : > { %v7537_v36 = vadd.f32 %v7536_v42, %v7535_v49  ;;  %v9909_v62 = vadd.f32 %v7530_v3, %v7474_v18  ;;  %v8145_v29 = vmul.f32 0.25, %v8081_v54  ;;  %v9911_v13 = vadd.f32 %v7516_v63, %v7460_v34  ;;  %9074 = vmatprep.mubr.msk.bf16.mxu0 %vm588_vm0, %v480_v61 }
  0xab   : > { %v8146_v11 = vmul.f32 0.25, %v8082_v2  ;;  %v8147_v48 = vmul.f32 0.25, %v8083_v21  ;;  %14235 = vst [vmem:[#allocation26_spill] sm:$0xff] %v9917_v14  ;;  %v6696_v55 = vcombine.high %v6376_v59, %v6376_v59  ;;  %v6703_v18 = vrot.slane %v6376_v59, %v9712_v8 }
  0xac   : > { %14232 = vst [vmem:[#allocation23_spill] sm:$0xff] %v9909_v62  ;;  %14233 = vst [vmem:[#allocation24_spill] sm:$0xff] %v9911_v13  ;;  %v9914_v1 = vadd.f32 %v7537_v36, %v7481_v9  ;;  %v8209_v45 = vpack.c.bf16 %v8145_v29, %v8145_v29  ;;  %v9926_v4 = vrot.slane %v9917_v14, %v9712_v8  ;;  %v6378_v42 = vunpack.c.l.bf16 %v478_v38  ;;  %v996_v14 = vld [vmem:[#allocation2 + $0x40] sm:$0x1] }
  0xad   : > { %v8210_v20 = vpack.c.bf16 %v8146_v11, %v8146_v11  ;;  %v8211_v27 = vpack.c.bf16 %v8147_v48, %v8147_v48  ;;  %v6711_v7 = vcombine.high %v6703_v18, %v6703_v18  ;;  %v9929_v44 = vrot.slane %v6696_v55, %v9712_v8 }
  0xae   : > { %14234 = vst [vmem:[#allocation25_spill] sm:$0xff] %v9914_v1  ;;  %v8341_v0 = vunpack.c.l.b16 %v8209_v45  ;;  %14237 = vst [vmem:[#allocation28_spill] sm:$0xff] %v9926_v4  ;;  %v7545_v12 = vsel %vm7096_vm1, %v6703_v18, 0.0  ;;  %v7573_v28 = vsel %vm7096_vm1, %v9926_v4, 0.0  ;;  %v9940_v63 = vunpack.c.h.bf16 %v478_v38 }
  0xaf   : > { %v8342_v6 = vunpack.c.l.b16 %v8210_v20  ;;  %v8343_v34 = vunpack.c.l.b16 %v8211_v27  ;;  %14238 = vst [vmem:[#allocation29_spill] sm:$0xff] %v9929_v44  ;;  %v7552_v50 = vsel %vm7096_vm1, %v6711_v7, 0.0  ;;  %v7546_v37 = vrot.slane %v7545_v12, 4 }
  0xb0   : > { %v7559_v40 = vsel %vm7096_vm1, %v9929_v44, 0.0  ;;  %v7553_v30 = vrot.slane %v7552_v50, 4  ;;  %v7574_v41 = vrot.slane %v7573_v28, 4  ;;  %14239 = vst [vmem:[#allocation30_spill] sm:$0xff] %v9940_v63  ;;  %v6730_v36 = vcombine.high %v6378_v42, %v6378_v42 }
  0xb1   : > { %v8402_v19 = vsel %vm6180_vm2, %v8342_v6, %v8341_v0  ;;  %v7560_v46 = vrot.slane %v7559_v40, 4  ;;  %v7547_v49 = vadd.f32 %v7546_v37, %v7545_v12  ;;  %v6737_v21 = vrot.slane %v6378_v42, %v9712_v8 }
  0xb2   : > { %v9922_v16 = vsel %vm6182_vm3, %v8343_v34, %v8402_v19  ;;  %v7554_v9 = vadd.f32 %v7553_v30, %v7552_v50  ;;  %v7575_v47 = vadd.f32 %v7574_v41, %v7573_v28  ;;  %v9945_v11 = vrot.slane %v9940_v63, %v9712_v8 }
  0xb3   : > { %14236 = vst [vmem:[#allocation27_spill] sm:$0xff] %v9922_v16  ;;  %v7561_v43 = vadd.f32 %v7560_v46, %v7559_v40  ;;  %v7548_v3 = vrot.slane %v7547_v49, 2  ;;  %v9949_v48 = vrot.slane %v6730_v36, %v9712_v8  ;;  %v6745_v45 = vcombine.high %v6737_v21, %v6737_v21 }
  0xb4   : > { %v7555_v54 = vrot.slane %v7554_v9, 2  ;;  %v7576_v2 = vrot.slane %v7575_v47, 2  ;;  %14240 = vst [vmem:[#allocation31_spill] sm:$0xff] %v9945_v11  ;;  %v7601_v20 = vsel %vm7096_vm1, %v6737_v21, 0.0  ;;  %v7629_v6 = vsel %vm7096_vm1, %v9945_v11, 0.0 }
  0xb5   : > { %v7562_v29 = vrot.slane %v7561_v43, 2  ;;  %v7549_v59 = vadd.f32 %v7548_v3, %v7547_v49  ;;  %14241 = vst [vmem:[#allocation32_spill] sm:$0xff] %v9949_v48  ;;  %v7602_v0 = vrot.slane %v7601_v20, 4  ;;  %v7608_v18 = vsel %vm7096_vm1, %v6745_v45, 0.0 }
  0xb6   : > { %v7556_v27 = vadd.f32 %v7555_v54, %v7554_v9  ;;  %v7577_v55 = vadd.f32 %v7576_v2, %v7575_v47  ;;  %v7615_v34 = vsel %vm7096_vm1, %v9949_v48, 0.0  ;;  %v7630_v19 = vrot.slane %v7629_v6, 4 }
  0xb7   : > { %v7563_v7 = vadd.f32 %v7562_v29, %v7561_v43  ;;  %v7603_v12 = vadd.f32 %v7602_v0, %v7601_v20  ;;  %v7609_v50 = vrot.slane %v7608_v18, 4  ;;  %v7616_v28 = vrot.slane %v7615_v34, 4 }
  0xb8   : > { %v7550_v37 = vrot.slane %v7549_v59, 1  ;;  %v7631_v40 = vadd.f32 %v7630_v19, %v7629_v6  ;;  %v7557_v38 = vrot.slane %v7556_v27, 1  ;;  %v7578_v49 = vrot.slane %v7577_v55, 1 }
  0xb9   : > { %v7604_v30 = vrot.slane %v7603_v12, 2  ;;  %v7610_v41 = vadd.f32 %v7609_v50, %v7608_v18  ;;  %v7617_v46 = vadd.f32 %v7616_v28, %v7615_v34  ;;  %v7564_v3 = vrot.slane %v7563_v7, 1 }
  0xba   : > { %v7632_v9 = vrot.slane %v7631_v40, 2  ;;  %v7551_v2 = vadd.f32 %v7550_v37, %v7549_v59  ;;  %v6380_v29 = vunpack.c.l.bf16 %v480_v61  ;;  %v7558_v20 = vadd.f32 %v7557_v38, %v7556_v27 }
  0xbb   : > { %v7605_v47 = vadd.f32 %v7604_v30, %v7603_v12  ;;  %v7611_v42 = vrot.slane %v7610_v41, 2  ;;  %v7618_v54 = vrot.slane %v7617_v46, 2  ;;  %v7579_v0 = vadd.f32 %v7578_v49, %v7577_v55 }
  0xbc   : > { %v7633_v36 = vadd.f32 %v7632_v9, %v7631_v40  ;;  %v7565_v6 = vadd.f32 %v7564_v3, %v7563_v7  ;;  %v6771_v12 = vrot.slane %v6380_v29, %v9712_v8  ;;  %v6764_v37 = vcombine.high %v6380_v29, %v6380_v29 }
  0xbd   : > { %v7606_v21 = vrot.slane %v7605_v47, 1  ;;  %v7612_v45 = vadd.f32 %v7611_v42, %v7610_v41  ;;  %v7619_v43 = vadd.f32 %v7618_v54, %v7617_v46  ;;  %v9966_v55 = vunpack.c.h.bf16 %v480_v61 }
  0xbe   : > { %v7634_v16 = vrot.slane %v7633_v36, 1  ;;  %v6779_v7 = vcombine.high %v6771_v12, %v6771_v12  ;;  %v9969_v30 = vrot.slane %v6764_v37, %v9712_v8  ;;  %v7657_v41 = vsel %vm7096_vm1, %v6771_v12, 0.0 }
  0xbf   : > { %v7607_v19 = vadd.f32 %v7606_v21, %v7605_v47  ;;  %v7613_v18 = vrot.slane %v7612_v45, 1  ;;  %v7620_v34 = vrot.slane %v7619_v43, 1  ;;  %14246 = vst [vmem:[#allocation37_spill] sm:$0xff] %v9966_v55  ;;  %v7658_v61 = vrot.slane %v7657_v41, 4  ;;  %v482_v47 = vld [vmem:[%s9699_s16 + $0x58] sm:$0xff]  }
  0xc0   : > { %v7635_v50 = vadd.f32 %v7634_v16, %v7633_v36  ;;  %14247 = vst [vmem:[#allocation38_spill] sm:$0xff] %v9969_v30  ;;  %v9973_v16 = vrot.slane %v9966_v55, %v9712_v8  ;;  %v7664_v46 = vsel %vm7096_vm1, %v6779_v7, 0.0  ;;  %v7671_v38 = vsel %vm7096_vm1, %v9969_v30, 0.0  ;;  %9075 = vmatmul.mubr.msk.bf16.gmra.mxu0 %vm588_vm0, %v482_v47 }
  0xc1   : > { %v7614_v28 = vadd.f32 %v7613_v18, %v7612_v45  ;;  %v7621_v11 = vadd.f32 %v7620_v34, %v7619_v43  ;;  %v9957_v63 = vadd.f32 %v7607_v19, %v7551_v2  ;;  %v7665_v49 = vrot.slane %v7664_v46, 4 }
  0xc2   : > { %v9960_v59 = vadd.f32 %v7635_v50, %v7579_v0  ;;  %14248 = vst [vmem:[#allocation39_spill] sm:$0xff] %v9973_v16  ;;  %v7672_v9 = vrot.slane %v7671_v38, 4  ;;  %v7659_v42 = vadd.f32 %v7658_v61, %v7657_v41  ;;  %v6382_v21 = vunpack.c.l.bf16 %v482_v47  ;;  %v9997_v41 = vld [vmem:[%s14094_s2] ss:$0 sm:$0xff] }
  0xc3   : > { %14242 = vst [vmem:[#allocation33_spill] sm:$0xff] %v9957_v63  ;;  %v9962_v40 = vadd.f32 %v7614_v28, %v7558_v20  ;;  %v9964_v27 = vadd.f32 %v7621_v11, %v7565_v6  ;;  %v7685_v11 = vsel %vm7096_vm1, %v9973_v16, 0.0  ;;  %v7666_v54 = vadd.f32 %v7665_v49, %v7664_v46 }
  0xc4   : > { %14243 = vst [vmem:[#allocation34_spill] sm:$0xff] %v9960_v59  ;;  %v7686_v3 = vrot.slane %v7685_v11, 4  ;;  %v7673_v2 = vadd.f32 %v7672_v9, %v7671_v38  ;;  %v7660_v45 = vrot.slane %v7659_v42, 2  ;;  %v9983_v29 = vunpack.c.h.bf16 %v482_v47 }
  0xc5   : > { %14244 = vst [vmem:[#allocation35_spill] sm:$0xff] %v9962_v40  ;;  %14245 = vst [vmem:[#allocation36_spill] sm:$0xff] %v9964_v27  ;;  %v7667_v43 = vrot.slane %v7666_v54, 2  ;;  %v6798_v0 = vcombine.high %v6382_v21, %v6382_v21  ;;  %v6805_v19 = vrot.slane %v6382_v21, %v9712_v8 }
  0xc6   : > { %v7687_v36 = vadd.f32 %v7686_v3, %v7685_v11  ;;  %14249 = vst [vmem:[#allocation40_spill] sm:$0xff] %v9983_v29  ;;  %v7674_v20 = vrot.slane %v7673_v2, 2  ;;  %v9988_v18 = vrot.slane %v9983_v29, %v9712_v8  ;;  %v7661_v50 = vadd.f32 %v7660_v45, %v7659_v42 }
  0xc7   : > { %v9991_v34 = vrot.slane %v6798_v0, %v9712_v8  ;;  %v7668_v28 = vadd.f32 %v7667_v43, %v7666_v54  ;;  %v6813_v12 = vcombine.high %v6805_v19, %v6805_v19  ;;  %v7713_v37 = vsel %vm7096_vm1, %v6805_v19, 0.0 }
  0xc8   : > { %v7688_v6 = vrot.slane %v7687_v36, 2  ;;  %14250 = vst [vmem:[#allocation41_spill] sm:$0xff] %v9988_v18  ;;  %v7675_v46 = vadd.f32 %v7674_v20, %v7673_v2  ;;  %v7714_v38 = vrot.slane %v7713_v37, 4  ;;  %v7741_v61 = vsel %vm7096_vm1, %v9988_v18, 0.0  ;;  %v10008_v2 = vld [vmem:[%s14095_s3] ss:$0 sm:$0xff] }
  0xc9   : > { %14251 = vst [vmem:[#allocation42_spill] sm:$0xff] %v9991_v34  ;;  %v7727_v11 = vsel %vm7096_vm1, %v9991_v34, 0.0  ;;  %v7720_v9 = vsel %vm7096_vm1, %v6813_v12, 0.0  ;;  %v7742_v47 = vrot.slane %v7741_v61, 4  ;;  %v7662_v20 = vrot.slane %v7661_v50, 1 }
  0xca   : > { %v7689_v49 = vadd.f32 %v7688_v6, %v7687_v36  ;;  %v7728_v3 = vrot.slane %v7727_v11, 4  ;;  %v7715_v42 = vadd.f32 %v7714_v38, %v7713_v37  ;;  %v7721_v54 = vrot.slane %v7720_v9, 4 }
  0xcb   : > { %v7743_v43 = vadd.f32 %v7742_v47, %v7741_v61  ;;  %v7669_v0 = vrot.slane %v7668_v28, 1  ;;  %v7676_v6 = vrot.slane %v7675_v46, 1 }
  0xcc   : > { %v7729_v45 = vadd.f32 %v7728_v3, %v7727_v11  ;;  %v7716_v19 = vrot.slane %v7715_v42, 2  ;;  %v7722_v59 = vadd.f32 %v7721_v54, %v7720_v9  ;;  %v7690_v12 = vrot.slane %v7689_v49, 1 }
  0xcd   : > { %v7744_v29 = vrot.slane %v7743_v43, 2  ;;  %v7663_v3 = vadd.f32 %v7662_v20, %v7661_v50  ;;  %v7670_v47 = vadd.f32 %v7669_v0, %v7668_v28  ;;  %v7677_v63 = vadd.f32 %v7676_v6, %v7675_v46 }
  0xce   : > { %v7730_v27 = vrot.slane %v7729_v45, 2  ;;  %v7717_v37 = vadd.f32 %v7716_v19, %v7715_v42  ;;  %v7723_v38 = vrot.slane %v7722_v59, 2  ;;  %v7691_v16 = vadd.f32 %v7690_v12, %v7689_v49  ;;  %v484_v49 = vld [vmem:[%s9699_s16 + $0x60] sm:$0xff]  }
  0xcf   : > { %v7745_v61 = vadd.f32 %v7744_v29, %v7743_v43  ;;  %9078 = vmatprep.mubr.msk.bf16.mxu0 %vm588_vm0, %v484_v49  ;;  %v486_v43 = vld [vmem:[%s9699_s16 + $0x68] sm:$0xff]   ;;  %v10048_v6 = vunpack.c.h.bf16 %v484_v49 }
  0xd0   : > { %v7731_v11 = vadd.f32 %v7730_v27, %v7729_v45  ;;  %v7718_v18 = vrot.slane %v7717_v37, 1  ;;  %v7724_v34 = vadd.f32 %v7723_v38, %v7722_v59  ;;  %9079 = vmatmul.mubr.msk.bf16.gmra.mxu0 %vm588_vm0, %v486_v43 }
  0xd1   : > { %v7746_v9 = vrot.slane %v7745_v61, 1  ;;  %14256 = vst [vmem:[#allocation47_spill] sm:$0xff] %v10048_v6 }
  0xd2   : > { %v7732_v55 = vrot.slane %v7731_v11, 1  ;;  %v7719_v54 = vadd.f32 %v7718_v18, %v7717_v37  ;;  %v7725_v30 = vrot.slane %v7724_v34, 1 }
  0xd3   : > { %v7747_v4 = vadd.f32 %v7746_v9, %v7745_v61 }
  0xd4   : > { %v7733_v19 = vadd.f32 %v7732_v55, %v7731_v11  ;;  %v7726_v29 = vadd.f32 %v7725_v30, %v7724_v34  ;;  %v10013_v50 = vadd.f32 %v7719_v54, %v7663_v3  ;;  %v14125_v34 = vmov 0  }
  0xd5   : > { %v10017_v46 = vadd.f32 %v7747_v4, %v7691_v16  ;;  %927 = vst.msk [vmem:[#allocation2 + $0x8] sm:$0xf] %vm924_vm4, %v14125_v34  ;;  %928 = vst.msk [vmem:[#allocation2 + $0xc] sm:$0xf] %vm924_vm4, %v14125_v34  ;;  %3922 = vmatprep.subr.bf16.mxu0 %v14125_v34  ;;  %9108 = vmatprep.subr.bf16.mxu1 %v14125_v34 }
  0xd6   : > { %14252 = vst [vmem:[#allocation43_spill] sm:$0xff] %v10013_v50  ;;  %v10020_v18 = vadd.f32 %v7726_v29, %v7670_v47  ;;  %926 = vst.msk [vmem:[#allocation2 + $0x4] sm:$0xf] %vm924_vm4, %v14125_v34  ;;  %v10061_v47 = vrot.slane %v10048_v6, %v9712_v8 }
  0xd7   : > { %14254 = vst [vmem:[#allocation45_spill] sm:$0xff] %v10017_v46  ;;  %929 = vst.msk [vmem:[#allocation2 + $0x10] sm:$0xf] %vm924_vm4, %v14125_v34 }
  0xd8   : > { %14255 = vst [vmem:[#allocation46_spill] sm:$0xff] %v10020_v18  ;;  %933 = vst.msk [vmem:[#allocation2 + $0x19c] sm:$0xf] %vm924_vm4, %v14125_v34  ;;  %v7797_v29 = vsel %vm7096_vm1, %v10061_v47, 0.0 }
  0xd9   : > { %934 = vst.msk [vmem:[#allocation2 + $0x1a0] sm:$0xf] %vm924_vm4, %v14125_v34  ;;  %935 = vst.msk [vmem:[#allocation2 + $0x1a4] sm:$0xf] %vm924_vm4, %v14125_v34 }
  0xda   : > { %936 = vst.msk [vmem:[#allocation2 + $0x1a8] sm:$0xf] %vm924_vm4, %v14125_v34  ;;  %14258 = vst [vmem:[#allocation49_spill] sm:$0xff] %v10061_v47 }
  0xdc   : > { %v1187_v11 = vld [vmem:[#allocation2 + $0xc] sm:$0xf] }
 0x106   : > { %v9056_v7 = vpop.f32.mrf.mxu0 }
 0x107   : > { %v807_v21 = vmul.f32 %v9056_v7, %v9997_v41 }
 0x108   : > { %v671_v36 = vpop.f32.mrf.mxu0 }
 0x109   : > { %v846_v7 = vadd.f32 %v10008_v2, %v807_v21  ;;  %v805_v42 = vmul.f32 %v9997_v41, %v671_v36  ;;  %v10015_v21 = vadd.f32 %v7733_v19, %v7677_v63 }
 0x10a   : > { %v9057_v40 = vpop.f32.mrf.mxu0 }
 0x10b   : > { %v878_v48 = vmax.f32 %v846_v7, 0.0  ;;  %v808_v27 = vmul.f32 %v9057_v40, %v9997_v41  ;;  %14253 = vst [vmem:[#allocation44_spill] sm:$0xff] %v10015_v21  ;;  %v844_v55 = vadd.f32 %v10008_v2, %v805_v42  ;;  %v1186_v7 = vld [vmem:[#allocation2 + $0x8] sm:$0xf] }
 0x10c   : > { %v674_v59 = vpop.f32.mrf.mxu0  ;;  %v10057_v3 = vcombine.low %v1186_v7, %v1187_v11 }
 0x10d   : > { %v8990_v28 = vpack.c.bf16 %v878_v48, %v878_v48  ;;  %v847_v45 = vadd.f32 %v10008_v2, %v808_v27  ;;  %v806_v40 = vmul.f32 %v9997_v41, %v674_v59  ;;  %v876_v30 = vmax.f32 %v844_v55, 0.0 }
 0x10e   : > { %v6384_v48 = vunpack.c.l.bf16 %v484_v49  ;;  %v14127_v54 = vrot.slane %v10057_v3, 5  ;;  %v7798_v49 = vrot.slane %v7797_v29, 4 }
 0x10f   : > { %1155 = vst.msk [vmem:[#allocation2 + $0x38] sm:$0xf] %vm924_vm4, %v8990_v28  ;;  %v879_v4 = vmax.f32 %v847_v45, 0.0  ;;  %v845_v63 = vadd.f32 %v10008_v2, %v806_v40  ;;  %v8988_v16 = vpack.c.bf16 %v876_v30, %v876_v30  ;;  %v6386_v45 = vunpack.c.l.bf16 %v486_v43 }
 0x110   : > { %v6832_v36 = vcombine.high %v6384_v48, %v6384_v48  ;;  %v6839_v12 = vrot.slane %v6384_v48, %v9712_v8  ;;  %1779 = vrot.lane.b32.xlu1 %v14127_v54, %s9518_s21  ;;  %v1523_v48 = vshrl.u32 %v10057_v3, 16 }
 0x111   : > { %v8991_v20 = vpack.c.bf16 %v879_v4, %v879_v4  ;;  %v877_v0 = vmax.f32 %v845_v63, 0.0  ;;  %1153 = vst.msk [vmem:[#allocation2 + $0x20] sm:$0xf] %vm924_vm4, %v8988_v16  ;;  %v10073_v4 = vunpack.c.h.bf16 %v486_v43  ;;  %v7799_v63 = vadd.f32 %v7798_v49, %v7797_v29 }
 0x112   : > { %v10053_v38 = vrot.slane %v6832_v36, %v9712_v8  ;;  %v6847_v61 = vcombine.high %v6839_v12, %v6839_v12  ;;  %v7769_v9 = vsel %vm7096_vm1, %v6839_v12, 0.0  ;;  %v1526_v16 = vshll.u32 %v10057_v3, 16 }
 0x113   : > { %1156 = vst.msk [vmem:[#allocation2 + $0x3c] sm:$0xf] %vm924_vm4, %v8991_v20  ;;  %v8989_v37 = vpack.c.bf16 %v877_v0, %v877_v0  ;;  %v7770_v27 = vrot.slane %v7769_v9, 4  ;;  %14259 = vst [vmem:[#allocation50_spill] sm:$0xff] %v10073_v4  ;;  %v6866_v0 = vcombine.high %v6386_v45, %v6386_v45  ;;  %v1525_v12 = vrot.slane %v1523_v48, 4 }
 0x114   : > { %14257 = vst [vmem:[#allocation48_spill] sm:$0xff] %v10053_v38  ;;  %v7783_v42 = vsel %vm7096_vm1, %v10053_v38, 0.0  ;;  %v7776_v19 = vsel %vm7096_vm1, %v6847_v61, 0.0  ;;  %v6873_v7 = vrot.slane %v6386_v45, %v9712_v8  ;;  %v10083_v43 = vrot.slane %v10073_v4, %v9712_v8 }
 0x115   : > { %1154 = vst.msk [vmem:[#allocation2 + $0x24] sm:$0xf] %vm924_vm4, %v8989_v37  ;;  %v7784_v28 = vrot.slane %v7783_v42, 4  ;;  %v7777_v59 = vrot.slane %v7776_v19, 4  ;;  %v7771_v55 = vadd.f32 %v7770_v27, %v7769_v9  ;;  %v1528_v37 = vrot.slane %v1526_v16, 5 }
 0x116   : > { %v10079_v61 = vrot.slane %v6866_v0, %v9712_v8  ;;  %14261 = vst [vmem:[#allocation52_spill] sm:$0xff] %v10083_v43  ;;  %v7800_v9 = vrot.slane %v7799_v63, 2  ;;  %v7825_v27 = vsel %vm7096_vm1, %v6873_v7, 0.0  ;;  %v7853_v16 = vsel %vm7096_vm1, %v10083_v43, 0.0 }
 0x117   : > { %v7785_v40 = vadd.f32 %v7784_v28, %v7783_v42  ;;  %v7778_v30 = vadd.f32 %v7777_v59, %v7776_v19  ;;  %v7772_v20 = vrot.slane %v7771_v55, 2  ;;  %v1529_v42 = vor.u32 %v1528_v37, %v1525_v12  ;;  %v9060_v59 = vpop.f32.mrf.mxu0 }
 0x118   : > { %14260 = vst [vmem:[#allocation51_spill] sm:$0xff] %v10079_v61  ;;  %v6881_v19 = vcombine.high %v6873_v7, %v6873_v7  ;;  %v7826_v28 = vrot.slane %v7825_v27, 4  ;;  %v7839_v48 = vsel %vm7096_vm1, %v10079_v61, 0.0  ;;  %v7801_v7 = vadd.f32 %v7800_v9, %v7799_v63 }
 0x119   : > { %v7786_v36 = vrot.slane %v7785_v40, 2  ;;  %v7779_v11 = vrot.slane %v7778_v30, 2  ;;  %v7773_v29 = vadd.f32 %v7772_v20, %v7771_v55  ;;  %1650 = vrot.lane.b32.xlu1 %v1529_v42, %s9519_s15  ;;  %v7840_v34 = vrot.slane %v7839_v48, 4  ;;  %v687_v18 = vpop.f32.mrf.mxu0 }
 0x11a   : > { %v7832_v45 = vsel %vm7096_vm1, %v6881_v19, 0.0  ;;  %v7827_v12 = vadd.f32 %v7826_v28, %v7825_v27  ;;  %v7854_v55 = vrot.slane %v7853_v16, 4  ;;  %v811_v20 = vmul.f32 %v9060_v59, %v9997_v41 }
 0x11b   : > { %v7787_v49 = vadd.f32 %v7786_v36, %v7785_v40  ;;  %v7780_v0 = vadd.f32 %v7779_v11, %v7778_v30  ;;  %v7833_v37 = vrot.slane %v7832_v45, 4  ;;  %v7774_v40 = vrot.slane %v7773_v29, 1 }
 0x11c   : > { %v7828_v36 = vrot.slane %v7827_v12, 2  ;;  %v7841_v42 = vadd.f32 %v7840_v34, %v7839_v48  ;;  %v7855_v19 = vadd.f32 %v7854_v55, %v7853_v16  ;;  %v7802_v38 = vrot.slane %v7801_v7, 1  ;;  %v9202_v55 = vld [vmem:[#allocation2 + $0x10] ss:$0 sps:$4 sm:$0x11]  }
 0x11d   : > { %v7834_v54 = vadd.f32 %v7833_v37, %v7832_v45  ;;  %v7788_v46 = vrot.slane %v7787_v49, 1  ;;  %v7781_v4 = vrot.slane %v7780_v0, 1  ;;  %v850_v30 = vadd.f32 %v10008_v2, %v811_v20 }
 0x11e   : > { %v7829_v47 = vadd.f32 %v7828_v36, %v7827_v12  ;;  %v7842_v6 = vrot.slane %v7841_v42, 2  ;;  %v7856_v43 = vrot.slane %v7855_v19, 2  ;;  %v7775_v11 = vadd.f32 %v7774_v40, %v7773_v29 }
 0x11f   : > { %v7835_v61 = vrot.slane %v7834_v54, 2  ;;  %v7789_v28 = vadd.f32 %v7788_v46, %v7787_v49  ;;  %v7782_v21 = vadd.f32 %v7781_v4, %v7780_v0  ;;  %v7803_v16 = vadd.f32 %v7802_v38, %v7801_v7  ;;  %v9061_v46 = vpop.f32.mrf.mxu0  ;;  %v10109_v49 = vld [vmem:[#allocation2 + $0x3c] sm:$0xf] }
 0x120   : > { %v7830_v27 = vrot.slane %v7829_v47, 1  ;;  %v7843_v9 = vadd.f32 %v7842_v6, %v7841_v42  ;;  %v7857_v59 = vadd.f32 %v7856_v43, %v7855_v19  ;;  %v882_v12 = vmax.f32 %v850_v30, 0.0  ;;  %v942_v42 = vld [vmem:[#allocation2 + $0x1c] sm:$0x8] }
 0x121   : > { %v7836_v63 = vadd.f32 %v7835_v61, %v7834_v54  ;;  %v6441_v36 = vcombine.high %v9714_v10, %v9714_v10  ;;  %v6456_v4 = vcombine.high %v9727_v17, %v9727_v17  ;;  %v6440_v38 = vcombine.high %v9723_v15, %v9723_v15  ;;  %v945_v17 = vld [vmem:[#allocation2 + $0x34] sm:$0x8]  ;;  %v690_v40 = vpop.f32.mrf.mxu0 }
 0x122   : > { %v7831_v45 = vadd.f32 %v7830_v27, %v7829_v47  ;;  %v7844_v48 = vrot.slane %v7843_v9, 1  ;;  %v7858_v37 = vrot.slane %v7857_v59, 1  ;;  %v8994_v6 = vpack.c.bf16 %v882_v12, %v882_v12 }
 0x123   : > { %v7837_v34 = vrot.slane %v7836_v63, 1  ;;  %v1732_v10 = vrot.slane %v9202_v55, 5  ;;  %v6455_v0 = vrot.slane %v6441_v36, %v9712_v8  ;;  %v809_v15 = vmul.f32 %v9997_v41, %v687_v18 }
 0x124   : > { %v7845_v20 = vadd.f32 %v7844_v48, %v7843_v9  ;;  %v10096_v29 = vadd.f32 %v7831_v45, %v7775_v11  ;;  %v7859_v54 = vadd.f32 %v7858_v37, %v7857_v59  ;;  %1159 = vst.msk [vmem:[#allocation2 + $0x68] sm:$0xf] %vm924_vm4, %v8994_v6  ;;  %v812_v7 = vmul.f32 %v9061_v46, %v9997_v41  ;;  %v488_v9 = vld [vmem:[%s9699_s16 + $0x70] sm:$0xff]   ;;  %v10134_v37 = vld [vmem:[#allocation2 + $0x3c] sm:$0xf] }
 0x125   : > { %v7838_v50 = vadd.f32 %v7837_v34, %v7836_v63  ;;  %v7132_v19 = vsel %vm7096_vm1, %v6456_v4, 0.0  ;;  %v7118_v11 = vsel %vm7096_vm1, %v6440_v38, 0.0  ;;  %v946_v18 = vsel %vm10119_vm8, 0, %v945_v17  ;;  %9082 = vmatprep.mubr.msk.bf16.mxu0 %vm588_vm0, %v488_v9 }
 0x126   : > { %14262 = vst [vmem:[#allocation53_spill] sm:$0xff] %v10096_v29  ;;  %v10102_v61 = vadd.f32 %v7845_v20, %v7789_v28  ;;  %v10106_v43 = vadd.f32 %v7859_v54, %v7803_v16  ;;  %v848_v27 = vadd.f32 %v10008_v2, %v809_v15  ;;  %v851_v63 = vadd.f32 %v10008_v2, %v812_v7  ;;  %v10139_v20 = vld [vmem:[%s9699_s16 + $0x78] sm:$0xff]   ;;  %v10149_v15 = vld [vmem:[#allocation2 + $0x38] sm:$0xf]  ;;  %s9522_s16 = smov 80  }
 0x127   : > { %v10100_v47 = vadd.f32 %v7838_v50, %v7782_v21  ;;  %v14266_v50 = vrot.slane %v10057_v3, 5  ;;  %v8877_v3 = vcombine.low %v10109_v49, %v10109_v49  ;;  %947 = vst [vmem:[#allocation2 + $0x34] sm:$0x8] %v946_v18  ;;  %v810_v28 = vmul.f32 %v9997_v41, %v690_v40  ;;  %9083 = vmatmul.mubr.msk.bf16.gmra.mxu0 %vm588_vm0, %v10139_v20 }
 0x128   : > { %14264 = vst [vmem:[#allocation55_spill] sm:$0xff] %v10102_v61  ;;  %14265 = vst [vmem:[#allocation56_spill] sm:$0xff] %v10106_v43  ;;  %v943_v59 = vsel %vm10119_vm8, 0, %v942_v42  ;;  %v6457_v45 = vcombine.high %v6455_v0, %v6455_v0  ;;  %v7133_v34 = vrot.slane %v7132_v19, 4  ;;  %v880_v48 = vmax.f32 %v848_v27, 0.0 }
 0x129   : > { %14263 = vst [vmem:[#allocation54_spill] sm:$0xff] %v10100_v47  ;;  %v1733_v21 = vsel %vm1730_vm5, %v14266_v50, %v1732_v10  ;;  %v883_v16 = vmax.f32 %v851_v63, 0.0  ;;  %944 = vst [vmem:[#allocation2 + $0x1c] sm:$0x8] %v943_v59  ;;  %v7119_v12 = vrot.slane %v7118_v11, 4  ;;  %v849_v55 = vadd.f32 %v10008_v2, %v810_v28 }
 0x12a   : > { %1781 = vrot.lane.b32.xlu0 %v1733_v21, %s9518_s21  ;;  %v6388_v36 = vunpack.c.l.bf16 %v488_v9  ;;  %v7139_v54 = vsel %vm7096_vm1, %v6455_v0, 0.0  ;;  %v8992_v6 = vpack.c.bf16 %v880_v48, %v880_v48  ;;  %v10142_v4 = vunpack.c.h.bf16 %v488_v9  ;;  %v10153_v0 = vld [vmem:[#allocation2 + $0x24] sm:$0xf]  ;;  %v1253_v48 = vld [vmem:[#allocation2 + $0x38] sm:$0xf] }
 0x12b   : > { %v8995_v46 = vpack.c.bf16 %v883_v16, %v883_v16  ;;  %v881_v38 = vmax.f32 %v849_v55, 0.0  ;;  %v8815_v10 = vcombine.low %v10134_v37, %v10134_v37  ;;  %v7146_v21 = vsel %vm7096_vm1, %v6457_v45, 0.0 }
 0x12c   : > { %14269 = vst [vmem:[#allocation57_spill] sm:$0xff] %v10142_v4  ;;  %v6900_v17 = vcombine.high %v6388_v36, %v6388_v36  ;;  %v6907_v50 = vrot.slane %v6388_v36, %v9712_v8  ;;  %1157 = vst.msk [vmem:[#allocation2 + $0x50] sm:$0xf] %vm924_vm4, %v8992_v6  ;;  %v7134_v7 = vadd.f32 %v7133_v34, %v7132_v19  ;;  %v7140_v18 = vrot.slane %v7139_v54, 4 }
 0x12d   : > { %1160 = vst.msk [vmem:[#allocation2 + $0x6c] sm:$0xf] %vm924_vm4, %v8995_v46  ;;  %v8993_v40 = vpack.c.bf16 %v881_v38, %v881_v38  ;;  %v6474_v27 = vcombine.high %v9742_v35, %v9742_v35  ;;  %v6475_v63 = vcombine.high %v9739_v32, %v9739_v32  ;;  %v10165_v28 = vrot.slane %v10142_v4, %v9712_v8 }
 0x12e   : > { %2501 = vrot.lane.b32.xlu0 %v8877_v3, %s9520_s24  ;;  %v10157_v42 = vrot.slane %v6900_v17, %v9712_v8  ;;  %v6915_v3 = vcombine.high %v6907_v50, %v6907_v50  ;;  %v1314_v9 = vld [vmem:[#allocation2 + $0x34] sm:$0x8]  ;;  %v7147_v19 = vrot.slane %v7146_v21, 4  ;;  %v6490_v59 = vcombine.high %v9746_v39, %v9746_v39 }
 0x12f   : > { %14271 = vst [vmem:[#allocation59_spill] sm:$0xff] %v10165_v28  ;;  %v8876_v45 = vcombine.low %v1314_v9, %v10149_v15  ;;  %1158 = vst.msk [vmem:[#allocation2 + $0x54] sm:$0xf] %vm924_vm4, %v8993_v40  ;;  %v8813_v35 = vcombine.low %v10153_v0, %v10153_v0  ;;  %v7120_v32 = vadd.f32 %v7119_v12, %v7118_v11  ;;  %v1252_v34 = vld [vmem:[#allocation2 + $0x34] sm:$0x8]  ;;  %v7881_v16 = vsel %vm7096_vm1, %v6907_v50, 0.0 }
 0x130   : > { %14270 = vst [vmem:[#allocation58_spill] sm:$0xff] %v10157_v42  ;;  %v7888_v55 = vsel %vm7096_vm1, %v6915_v3, 0.0  ;;  %v7135_v36 = vrot.slane %v7134_v7, 2  ;;  %v7895_v39 = vsel %vm7096_vm1, %v10157_v42, 0.0  ;;  %v7141_v6 = vadd.f32 %v7140_v18, %v7139_v54  ;;  %v1249_v9 = vld [vmem:[#allocation2 + $0x1c] sm:$0x8] }
 0x131   : > { %2499 = vrot.lane.b32.xlu1 %v8876_v45, %s9520_s24  ;;  %v10182_v46 = vrot.slane %v6475_v63, %v9712_v8  ;;  %v7174_v11 = vsel %vm7096_vm1, %v6474_v27, 0.0  ;;  %v7909_v12 = vsel %vm7096_vm1, %v10165_v28, 0.0  ;;  %v7188_v38 = vsel %vm7096_vm1, %v6490_v59, 0.0  ;;  %v10188_v45 = vld [vmem:[#allocation2 + $0x20] sm:$0xf] }
 0x132   : > { %1977 = vrot.lane.b32.xlu0 %v8815_v10, %s9521_s18  ;;  %v8814_v10 = vcombine.low %v1252_v34, %v1253_v48  ;;  %v7882_v17 = vrot.slane %v7881_v16, 4  ;;  %v7889_v50 = vrot.slane %v7888_v55, 4  ;;  %v7121_v40 = vrot.slane %v7120_v32, 2 }
 0x133   : > { %v7148_v3 = vadd.f32 %v7147_v19, %v7146_v21  ;;  %v10190_v54 = vadd.f32 %v7135_v36, %v7134_v7  ;;  %v7175_v18 = vrot.slane %v7174_v11, 4  ;;  %v7910_v27 = vrot.slane %v7909_v12, 4 }
 0x134   : > { %v7142_v63 = vrot.slane %v7141_v6, 2  ;;  %v7189_v43 = vrot.slane %v7188_v38, 4  ;;  %v7195_v59 = vsel %vm7096_vm1, %v10182_v46, 0.0  ;;  %v8812_v34 = vcombine.low %v1249_v9, %v10188_v45 }
 0x135   : > { %1975 = vrot.lane.b32.xlu1 %v8814_v10, %s9521_s18  ;;  %v10197_v61 = vcombine.low %v1253_v48, %v10134_v37  ;;  %v7883_v21 = vadd.f32 %v7882_v17, %v7881_v16  ;;  %v7890_v19 = vadd.f32 %v7889_v50, %v7888_v55  ;;  %v10199_v47 = vadd.f32 %v7121_v40, %v7120_v32 }
 0x136   : > { %1973 = vrot.lane.b32.xlu0 %v8813_v35, %s9521_s18  ;;  %v7896_v35 = vrot.slane %v7895_v39, 4  ;;  %v7149_v7 = vrot.slane %v7148_v3, 2  ;;  %v7176_v10 = vadd.f32 %v7175_v18, %v7174_v11  ;;  %v7911_v42 = vadd.f32 %v7910_v27, %v7909_v12 }
 0x137   : > { %v6390_v28 = vunpack.c.l.bf16 %v10139_v20  ;;  %v10204_v4 = vadd.f32 %v7142_v63, %v7141_v6  ;;  %v7190_v9 = vadd.f32 %v7189_v43, %v7188_v38  ;;  %v7196_v1 = vrot.slane %v7195_v59, 4 }
 0x138   : > { %v7897_v36 = vadd.f32 %v7896_v35, %v7895_v39  ;;  %v10207_v37 = vunpack.c.h.bf16 %v10139_v20  ;;  %v7884_v48 = vrot.slane %v7883_v21, 2  ;;  %v7891_v32 = vrot.slane %v7890_v19, 2 }
 0x139   : > { %1971 = vrot.lane.b32.xlu1 %v8812_v34, %s9521_s18  ;;  %v14141_v16 = vrot.slane %v10197_v61, 5  ;;  %v6934_v55 = vcombine.high %v6390_v28, %v6390_v28  ;;  %v10210_v39 = vadd.f32 %v7149_v7, %v7148_v3  ;;  %v6491_v11 = vcombine.high %v10182_v46, %v10182_v46 }
 0x13a   : > { %14272 = vst [vmem:[#allocation60_spill] sm:$0xff] %v10207_v37  ;;  %v7898_v12 = vrot.slane %v7897_v36, 2  ;;  %v6941_v17 = vrot.slane %v6390_v28, %v9712_v8  ;;  %v7177_v6 = vrot.slane %v7176_v10, 2  ;;  %v7912_v50 = vrot.slane %v7911_v42, 2 }
 0x13b   : > { %14273 = vst [vmem:[#allocation61_spill] sm:$0xff] %v10210_v39  ;;  %v10219_v43 = vrot.slane %v6934_v55, %v9712_v8  ;;  %v10223_v20 = vrot.slane %v10207_v37, %v9712_v8  ;;  %v7191_v38 = vrot.slane %v7190_v9, 2  ;;  %v7197_v40 = vadd.f32 %v7196_v1, %v7195_v59 }
 0x13c   : > { %v6949_v46 = vcombine.high %v6941_v17, %v6941_v17  ;;  %v7937_v3 = vsel %vm7096_vm1, %v6941_v17, 0.0  ;;  %v7885_v28 = vadd.f32 %v7884_v48, %v7883_v21  ;;  %v7892_v35 = vadd.f32 %v7891_v32, %v7890_v19 }
 0x13d   : > { %2311 = vrot.lane.b32.xlu1 %v14141_v16, %s9522_s16  ;;  %14274 = vst [vmem:[#allocation62_spill] sm:$0xff] %v10219_v43  ;;  %14275 = vst [vmem:[#allocation63_spill] sm:$0xff] %v10223_v20  ;;  %v7938_v18 = vrot.slane %v7937_v3, 4  ;;  %v7951_v27 = vsel %vm7096_vm1, %v10219_v43, 0.0  ;;  %v7899_v63 = vadd.f32 %v7898_v12, %v7897_v36  ;;  %v7965_v55 = vsel %vm7096_vm1, %v10223_v20, 0.0 }
 0x13e   : > { %v7944_v34 = vsel %vm7096_vm1, %v6949_v46, 0.0  ;;  %v7952_v7 = vrot.slane %v7951_v27, 4  ;;  %v7913_v29 = vadd.f32 %v7912_v50, %v7911_v42  ;;  %v7966_v1 = vrot.slane %v7965_v55, 4  ;;  %v10238_v42 = vpop.f32.mrf.mxu0 }
 0x13f   : > { %v7939_v16 = vadd.f32 %v7938_v18, %v7937_v3  ;;  %v7945_v37 = vrot.slane %v7944_v34, 4  ;;  %v10231_v59 = vadd.f32 %v7177_v6, %v7176_v10  ;;  %v7198_v17 = vrot.slane %v7197_v40, 2 }
 0x140   : > { %v10234_v21 = vsel %vm7096_vm1, %v6491_v11, 0.0  ;;  %v7953_v19 = vadd.f32 %v7952_v7, %v7951_v27  ;;  %v7886_v48 = vrot.slane %v7885_v28, 1  ;;  %v7967_v12 = vadd.f32 %v7966_v1, %v7965_v55 }
 0x141   : > { %v7940_v32 = vrot.slane %v7939_v16, 2  ;;  %v7946_v36 = vadd.f32 %v7945_v37, %v7944_v34  ;;  %v10236_v46 = vadd.f32 %v7191_v38, %v7190_v9  ;;  %v7893_v43 = vrot.slane %v7892_v35, 1 }
 0x142   : > { %v7900_v44 = vrot.slane %v7899_v63, 1  ;;  %v7954_v20 = vrot.slane %v7953_v19, 2  ;;  %v7914_v50 = vrot.slane %v7913_v29, 1  ;;  %v7968_v6 = vrot.slane %v7967_v12, 2 }
 0x143   : > { %v7941_v3 = vadd.f32 %v7940_v32, %v7939_v16  ;;  %v7947_v10 = vrot.slane %v7946_v36, 2  ;;  %v10240_v18 = vadd.f32 %v7198_v17, %v7197_v40  ;;  %v6509_v11 = vcombine.high %v9760_v25, %v9760_v25  ;;  %v703_v16 = vpop.f32.mrf.mxu0 }
 0x144   : > { %v10246_v37 = vcombine.low %v10149_v15, %v10109_v49  ;;  %v7955_v9 = vadd.f32 %v7954_v20, %v7953_v19  ;;  %v7887_v38 = vadd.f32 %v7886_v48, %v7885_v28  ;;  %v7969_v7 = vadd.f32 %v7968_v6, %v7967_v12  ;;  %v951_v19 = vld [vmem:[#allocation2 + $0x64] sm:$0x8] }
 0x145   : > { %14276 = vst [vmem:[#allocation64_spill] sm:$0xff] %v10240_v18  ;;  %v7942_v27 = vrot.slane %v7941_v3, 1  ;;  %v7948_v34 = vadd.f32 %v7947_v10, %v7946_v36  ;;  %v7894_v55 = vadd.f32 %v7893_v43, %v7892_v35  ;;  %v7901_v1 = vadd.f32 %v7900_v44, %v7899_v63  ;;  %v9065_v48 = vpop.f32.mrf.mxu0 }
 0x146   : > { %v7956_v62 = vrot.slane %v7955_v9, 1  ;;  %v7915_v32 = vadd.f32 %v7914_v50, %v7913_v29  ;;  %v7970_v13 = vrot.slane %v7969_v7, 1  ;;  %v6508_v25 = vcombine.high %v9772_v33, %v9772_v33 }
 0x147   : > { %v7943_v40 = vadd.f32 %v7942_v27, %v7941_v3  ;;  %v7949_v17 = vrot.slane %v7948_v34, 1  ;;  %v6523_v49 = vrot.slane %v6509_v11, %v9712_v8  ;;  %v10252_v20 = vrot.slane %v10246_v37, 5  ;;  %v993_v3 = vld [vmem:[#allocation2 + $0x28] sm:$0x1] }
 0x148   : > { %v7957_v15 = vadd.f32 %v7956_v62, %v7955_v9  ;;  %v7971_v44 = vadd.f32 %v7970_v13, %v7969_v7  ;;  %v7123_v35 = vrot.slane %v10199_v47, 1  ;;  %v7144_v33 = vrot.slane %v10204_v4, 1 }
 0x149   : > { %v7950_v43 = vadd.f32 %v7949_v17, %v7948_v34  ;;  %v10254_v28 = vadd.f32 %v7943_v40, %v7887_v38  ;;  %v997_v62 = vsel %vm10257_vm11, 0, %v996_v14  ;;  %v6524_v36 = vcombine.high %v9769_v31, %v9769_v31  ;;  %v9261_v40 = vld [vmem:[%s14096_s4 + $0x38] sm:$0xff]  }
 0x14a   : > { %v10263_v63 = vadd.f32 %v7957_v15, %v7901_v1  ;;  %v10272_v50 = vadd.f32 %v7971_v44, %v7915_v32  ;;  %998 = vst [vmem:[#allocation2 + $0x40] sm:$0x1] %v997_v62  ;;  %v10278_v14 = vsel %vm7096_vm1, %v6508_v25, 0.0  ;;  %v6525_v38 = vcombine.high %v6523_v49, %v6523_v49  ;;  %v706_v32 = vpop.f32.mrf.mxu0  ;;  %3923 = vmatpush1.bf16.msra.mxu0 %v9261_v40  ;;  %v10319_v62 = vld [vmem:[#allocation2 + $0x68] sm:$0xf] }
 0x14b   : > { %14277 = vst [vmem:[#allocation65_spill] sm:$0xff] %v10254_v28  ;;  %v10270_v12 = vadd.f32 %v7950_v43, %v7894_v55  ;;  %v3290_v31 = vshrl.u32 %v10252_v20, 16  ;;  %v952_v27 = vsel %vm10119_vm8, 0, %v951_v19  ;;  %v10285_v34 = vmul.f32 0.25, %v9755_v23  ;;  %9117 = vmatpush1.bf16.msra.mxu1 %v9261_v40  ;;  %v1190_v19 = vld [vmem:[#allocation2 + $0x24] sm:$0xf] }
 0x14c   : > { %14280 = vst [vmem:[#allocation66_spill] sm:$0xff] %v10263_v63  ;;  %14282 = vst [vmem:[#allocation68_spill] sm:$0xff] %v10272_v50  ;;  %v10288_v7 = vmul.f32 0.25, %v9757_v24  ;;  %v10292_v55 = vcombine.low %v10188_v45, %v10153_v0  ;;  %v994_v1 = vsel %vm10257_vm11, 0, %v993_v3  ;;  %v10300_v17 = vmul.f32 0.25, %v9762_v26 }
 0x14d   : > { %14281 = vst [vmem:[#allocation67_spill] sm:$0xff] %v10270_v12  ;;  %953 = vst [vmem:[#allocation2 + $0x64] sm:$0x8] %v952_v27  ;;  %v10304_v24 = vsel %vm7096_vm1, %v6524_v36, 0.0  ;;  %v815_v0 = vmul.f32 %v10238_v42, %v9997_v41  ;;  %v10309_v45 = vsel %vm7096_vm1, %v6523_v49, 0.0  ;;  %v3293_v25 = vshll.u32 %v10252_v20, 16 }
 0x14e   : > { %995 = vst [vmem:[#allocation2 + $0x28] sm:$0x1] %v994_v1  ;;  %v813_v15 = vmul.f32 %v9997_v41, %v703_v16  ;;  %v816_v43 = vmul.f32 %v9065_v48, %v9997_v41  ;;  %v10315_v26 = vsel %vm7096_vm1, %v6525_v38, 0.0  ;;  %v10317_v44 = vrot.slane %v3290_v31, 3  ;;  %v1189_v38 = vld [vmem:[#allocation2 + $0x20] sm:$0xf] }
 0x14f   : > { %v854_v42 = vadd.f32 %v10008_v2, %v815_v0  ;;  %v814_v49 = vmul.f32 %v9997_v41, %v706_v32  ;;  %v14283_v36 = vmov 0   ;;  %v2259_v48 = vrot.slane %v10292_v55, 5  ;;  %v9263_v32 = vld [vmem:[%s14096_s4 + $0x30] sm:$0xff]  }
 0x150   : > { %3924 = vmatprep.subr.bf16.mxu0 %v14283_v36  ;;  %9109 = vmatprep.subr.bf16.mxu1 %v14283_v36  ;;  %v852_v3 = vadd.f32 %v10008_v2, %v813_v15  ;;  %v855_v31 = vadd.f32 %v10008_v2, %v816_v43  ;;  %v3295_v9 = vrot.slane %v3293_v25, 4  ;;  %v10332_v11 = vcombine.low %v1189_v38, %v1190_v19 }
 0x151   : > { %v9212_v16 = vld [vmem:[#allocation2 + $0x40] ss:$0 sps:$4 sm:$0x11]   ;;  %v886_v1 = vmax.f32 %v854_v42, 0.0  ;;  %v853_v40 = vadd.f32 %v10008_v2, %v814_v49  ;;  %3925 = vmatpush1.bf16.msra.mxu0 %v9263_v32  ;;  %9118 = vmatpush1.bf16.msra.mxu1 %v9263_v32 }
 0x152   : > { %v9213_v27 = vld [vmem:[#allocation2 + $0x40] ss:$0 sps:$4 sm:$0x11]   ;;  %v2788_v0 = vrot.slane %v9212_v16, 5  ;;  %v884_v13 = vmax.f32 %v852_v3, 0.0  ;;  %v887_v41 = vmax.f32 %v855_v31, 0.0  ;;  %3926 = vmatprep.subr.bf16.mxu0 %v14283_v36  ;;  %9110 = vmatprep.subr.bf16.mxu1 %v14283_v36 }
 0x153   : > { %v2263_v6 = vrot.slane %v9213_v27, 5  ;;  %v8998_v23 = vpack.c.bf16 %v886_v1, %v886_v1  ;;  %v885_v15 = vmax.f32 %v853_v40, 0.0  ;;  %v9265_v16 = vld [vmem:[%s14096_s4 + $0x28] sm:$0xff]   ;;  %v14284_v27 = vrot.slane %v10197_v61, 5 }
 0x154   : > { %v1258_v10 = vld [vmem:[#allocation2 + $0x64] sm:$0x8]  ;;  %v2789_v43 = vsel %vm1730_vm5, %v10252_v20, %v2788_v0  ;;  %v8996_v49 = vpack.c.bf16 %v884_v13, %v884_v13  ;;  %v8999_v25 = vpack.c.bf16 %v887_v41, %v887_v41  ;;  %v14285_v20 = vrot.slane %v10190_v54, 1 }
 0x155   : > { %v8818_v42 = vcombine.low %v1258_v10, %v10319_v62  ;;  %v9215_v2 = vld [vmem:[#allocation2 + $0x28] ss:$0 sps:$4 sm:$0x11]   ;;  %v3298_v3 = vshrl.u32 %v2789_v43, 16  ;;  %v3301_v31 = vshll.u32 %v2789_v43, 16  ;;  %v2264_v19 = vsel %vm1730_vm5, %v14284_v27, %v2263_v6  ;;  %3927 = vmatpush1.bf16.msra.mxu0 %v9265_v16  ;;  %9119 = vmatpush1.bf16.msra.mxu1 %v9265_v16 }
 0x156   : > { %1163 = vst.msk [vmem:[#allocation2 + $0x98] sm:$0xf] %vm924_vm4, %v8998_v23  ;;  %v8997_v38 = vpack.c.bf16 %v885_v15, %v885_v15  ;;  %v10348_v13 = vadd.f32 %v14285_v20, %v10190_v54  ;;  %v3296_v10 = vor.u32 %v3295_v9, %v10317_v44  ;;  %2313 = vrot.lane.b32.xlu0 %v2264_v19, %s9522_s16  ;;  %v2260_v1 = vrot.slane %v9215_v2, 5  ;;  %v9217_v6 = vld [vmem:[#allocation2 + $0x28] ss:$0 sps:$4 sm:$0x11]   ;;  %v10358_v9 = vpop.f32.mrf.mxu0 }
 0x157   : > { %1983 = vrot.lane.b32.xlu1 %v8818_v42, %s9521_s18  ;;  %1161 = vst.msk [vmem:[#allocation2 + $0x80] sm:$0xf] %vm924_vm4, %v8996_v49  ;;  %1164 = vst.msk [vmem:[#allocation2 + $0x9c] sm:$0xf] %vm924_vm4, %v8999_v25  ;;  %v948_v23 = vld [vmem:[#allocation2 + $0x4c] sm:$0x8]  ;;  %v6542_v44 = vcombine.high %v9791_v58, %v9791_v58  ;;  %3928 = vmatprep.subr.bf16.mxu0 %v14283_v36  ;;  %v10385_v16 = vadd.f32 %v7123_v35, %v10199_v47 }
 0x158   : > { %14286 = vst [vmem:[#allocation69_spill] sm:$0xff] %v10348_v13  ;;  %v3300_v40 = vrot.slane %v3298_v3, 3  ;;  %v3303_v0 = vrot.slane %v3301_v31, 4  ;;  %1162 = vst.msk [vmem:[#allocation2 + $0x84] sm:$0xf] %vm924_vm4, %v8997_v38  ;;  %v2580_v54 = vshrl.u32 %v10246_v37, 16  ;;  %v6558_v3 = vcombine.high %v9788_v57, %v9788_v57  ;;  %9111 = vmatprep.subr.bf16.mxu1 %v14283_v36 }
 0x159   : > { %v2583_v41 = vshll.u32 %v10246_v37, 16  ;;  %v1734_v32 = vrot.slane %v10332_v11, 5  ;;  %v9266_v15 = vld [vmem:[%s14096_s4 + $0x20] sm:$0xff]   ;;  %v2261_v37 = vsel %vm1730_vm5, %v2259_v48, %v2260_v1  ;;  %v1735_v42 = vrot.slane %v9217_v6, 5  ;;  %v1193_v31 = vld [vmem:[#allocation2 + $0x3c] sm:$0xf]  ;;  %v719_v6 = vpop.f32.mrf.mxu0 }
 0x15a   : > { %v3304_v43 = vor.u32 %v3303_v0, %v3300_v40  ;;  %v949_v2 = vsel %vm10119_vm8, 0, %v948_v23  ;;  %v7245_v58 = vrot.slane %v10304_v24, 4  ;;  %2309 = vrot.lane.b32.xlu0 %v2261_v37, %s9522_s16  ;;  %14287 = vst [vmem:[#allocation70_spill] sm:$0xff] %v10385_v16  ;;  %v2582_v19 = vrot.slane %v2580_v54, 4  ;;  %v954_v20 = vld [vmem:[#allocation2 + $0x7c] sm:$0x8]  ;;  %3929 = vmatpush1.bf16.msra.mxu0 %v9266_v15 }
 0x15b   : > { %2307 = vrot.lane.b32.xlu1 %v2259_v48, %s9522_s16  ;;  %950 = vst [vmem:[#allocation2 + $0x4c] sm:$0x8] %v949_v2  ;;  %v2585_v38 = vrot.slane %v2583_v41, 5  ;;  %v1002_v1 = vld [vmem:[#allocation2 + $0x70] sm:$0x1]  ;;  %v10392_v48 = vadd.f32 %v7144_v33, %v10204_v4  ;;  %v14289_v23 = vrot.slane %v10234_v21, 4  ;;  %3930 = vmatprep.subr.bf16.mxu0 %v14283_v36 }
 0x15c   : > { %v3305_v27 = vsel %vm3273_vm13, %v3296_v10, %v3304_v43  ;;  %v1005_v57 = vld [vmem:[#allocation2 + $0x88] sm:$0x1]  ;;  %v1260_v35 = vld [vmem:[#allocation2 + $0x6c] sm:$0xf]  ;;  %v2060_v10 = vshrl.u32 %v10197_v61, 16  ;;  %v2063_v40 = vshll.u32 %v10197_v61, 16  ;;  %9120 = vmatpush1.bf16.msra.mxu1 %v9266_v15 }
 0x15d   : > { %14288 = vst [vmem:[#allocation71_spill] sm:$0xff] %v10392_v48  ;;  %v10397_v47 = vadd.f32 %v14289_v23, %v10234_v21  ;;  %8949 = vmatprep.mubr.msk.bf16.mxu0 %vm2835_vm12, %v3305_v27  ;;  %v1192_v0 = vld [vmem:[#allocation2 + $0x38] sm:$0xf]  ;;  %v14291_v54 = vrot.slane %v10278_v14, 4  ;;  %v10408_v4 = vsel %vm7096_vm1, %v6542_v44, 0.0  ;;  %v1736_v21 = vsel %vm1730_vm5, %v1734_v32, %v1735_v42  ;;  %9112 = vmatprep.subr.bf16.mxu1 %v14283_v36 }
 0x15e   : > { %v1198_v33 = vld [vmem:[#allocation2 + $0x68] sm:$0xf]  ;;  %v10411_v43 = vcombine.low %v1192_v0, %v1193_v31  ;;  %v10413_v37 = vld [vmem:[#allocation2 + $0x80] sm:$0xf]  ;;  %v9268_v61 = vld [vmem:[%s14096_s4 + $0x18] sm:$0xff]   ;;  %v10425_v44 = vadd.f32 %v7245_v58, %v10304_v24  ;;  %v10428_v42 = vsel %vm7096_vm1, %v6558_v3, 0.0  ;;  %1785 = vrot.lane.b32.xlu0 %v1736_v21, %s9518_s21  ;;  %v2586_v23 = vor.u32 %v2585_v38, %v2582_v19  ;;  %v9069_v58 = vpop.f32.mrf.mxu0 }
 0x15f   : > { %14290 = vst [vmem:[#allocation72_spill] sm:$0xff] %v10397_v47  ;;  %v10405_v41 = vadd.f32 %v14291_v54, %v10278_v14  ;;  %v14293_v14 = vrot.slane %v10231_v59, 1  ;;  %1783 = vrot.lane.b32.xlu1 %v1734_v32, %s9518_s21  ;;  %v1199_v31 = vld [vmem:[#allocation2 + $0x6c] sm:$0xf]  ;;  %v955_v27 = vsel %vm10119_vm8, 0, %v954_v20  ;;  %v8819_v0 = vcombine.low %v1260_v35, %v1260_v35  ;;  %3931 = vmatpush1.bf16.msra.mxu0 %v9268_v61 }
 0x160   : > { %14292 = vst [vmem:[#allocation73_spill] sm:$0xff] %v10411_v43  ;;  %v10434_v15 = vld [vmem:[#allocation2 + $0x84] sm:$0xf]  ;;  %956 = vst [vmem:[#allocation2 + $0x7c] sm:$0x8] %v955_v27  ;;  %v2062_v32 = vrot.slane %v2060_v10, 4  ;;  %3932 = vmatprep.subr.bf16.mxu0 %v14283_v36  ;;  %9121 = vmatpush1.bf16.msra.mxu1 %v9268_v61 }
 0x161   : > { %v10422_v2 = vadd.f32 %v14293_v14, %v10231_v59  ;;  %v10437_v59 = vcombine.low %v10319_v62, %v1260_v35  ;;  %v10441_v24 = vcombine.low %v10413_v37, %v10434_v15  ;;  %v2065_v3 = vrot.slane %v2063_v40, 5  ;;  %v957_v38 = vld [vmem:[#allocation2 + $0x94] sm:$0x8]  ;;  %v10462_v10 = vld [vmem:[%s14094_s2] ss:$0 sm:$0xff]  ;;  %9113 = vmatprep.subr.bf16.mxu1 %v14283_v36 }
 0x162   : > { %v1003_v20 = vsel %vm10257_vm11, 0, %v1002_v1  ;;  %v1006_v19 = vsel %vm10257_vm11, 0, %v1005_v57  ;;  %v10449_v35 = vcombine.low %v1198_v33, %v1199_v31  ;;  %v1539_v54 = vshrl.u32 %v10411_v43, 16  ;;  %1985 = vrot.lane.b32.xlu0 %v8819_v0, %s9521_s18  ;;  %v9271_v61 = vld [vmem:[%s14096_s4 + $0x10] sm:$0xff]   ;;  %v1317_v0 = vld [vmem:[#allocation2 + $0x4c] sm:$0x8] }
 0x163   : > { %14294 = vst [vmem:[#allocation74_spill] sm:$0xff] %v10422_v2  ;;  %v1542_v21 = vshll.u32 %v10411_v43, 16  ;;  %1004 = vst [vmem:[#allocation2 + $0x70] sm:$0x1] %v1003_v20  ;;  %v6543_v57 = vcombine.high %v9782_v51, %v9782_v51  ;;  %2707 = vrot.lane.b32.xlu1 %v2586_v23, %s9523_s14  ;;  %v819_v40 = vmul.f32 %v10462_v10, %v10358_v9  ;;  %v10473_v31 = vrot.slane %v10441_v24, 5  ;;  %v722_v23 = vpop.f32.mrf.mxu0 }
 0x164   : > { %1007 = vst [vmem:[#allocation2 + $0x88] sm:$0x1] %v1006_v19  ;;  %v817_v33 = vmul.f32 %v10462_v10, %v719_v6  ;;  %v958_v27 = vsel %vm10119_vm8, 0, %v957_v38  ;;  %v2066_v9 = vor.u32 %v2065_v3, %v2062_v32  ;;  %v14147_v6 = vrot.slane %v10437_v59, 5  ;;  %v10479_v20 = vld [vmem:[#allocation2 + $0x50] sm:$0xf]  ;;  %3933 = vmatpush1.bf16.msra.mxu0 %v9271_v61  ;;  %9122 = vmatpush1.bf16.msra.mxu1 %v9271_v61 }
 0x165   : > { %v10484_v19 = vld [vmem:[%s14095_s3] ss:$0 sm:$0xff]  ;;  %959 = vst [vmem:[#allocation2 + $0x94] sm:$0x8] %v958_v27  ;;  %v999_v38 = vld [vmem:[#allocation2 + $0x58] sm:$0x1]  ;;  %v820_v51 = vmul.f32 %v10462_v10, %v9069_v58  ;;  %3934 = vmatprep.subr.bf16.mxu0 %v14283_v36  ;;  %v8878_v58 = vcombine.low %v1317_v0, %v10479_v20  ;;  %9114 = vmatprep.subr.bf16.mxu1 %v14283_v36 }
 0x166   : > { %v858_v25 = vadd.f32 %v10484_v19, %v819_v40  ;;  %v856_v1 = vadd.f32 %v10484_v19, %v817_v33  ;;  %v1541_v32 = vrot.slane %v1539_v54, 4  ;;  %v1544_v3 = vrot.slane %v1542_v21, 5  ;;  %v1195_v14 = vld [vmem:[#allocation2 + $0x50] sm:$0xf]  ;;  %2319 = vrot.lane.b32.xlu0 %v14147_v6, %s9522_s16  ;;  %v10495_v40 = vld [vmem:[#allocation2 + $0x54] sm:$0xf] }
 0x167   : > { %2181 = vrot.lane.b32.xlu1 %v2066_v9, %s9524_s27  ;;  %v2052_v33 = vshrl.u32 %v10292_v55, 16  ;;  %v818_v21 = vmul.f32 %v10462_v10, %v722_v23  ;;  %v2055_v49 = vshll.u32 %v10292_v55, 16  ;;  %v1196_v61 = vld [vmem:[#allocation2 + $0x54] sm:$0xf]  ;;  %v3386_v62 = vshrl.u32 %v10473_v31, 16 }
 0x168   : > { %v890_v27 = vmax.f32 %v858_v25, 0.0  ;;  %v888_v54 = vmax.f32 %v856_v1, 0.0  ;;  %v3389_v9 = vshll.u32 %v10473_v31, 16  ;;  %v859_v48 = vadd.f32 %v10484_v19, %v820_v51 }
 0x169   : > { %v857_v25 = vadd.f32 %v10484_v19, %v818_v21  ;;  %v14295_v1 = vrot.slane %v10236_v46, 1  ;;  %v10514_v0 = vrot.slane %v6543_v57, %v9712_v8  ;;  %v14297_v51 = vrot.slane %v10449_v35, 5 }
 0x16a   : > { %v9002_v6 = vpack.c.bf16 %v890_v27, %v890_v27  ;;  %v9000_v50 = vpack.c.bf16 %v888_v54, %v888_v54  ;;  %v1000_v27 = vsel %vm10257_vm11, 0, %v999_v38  ;;  %v10524_v54 = vcombine.low %v1195_v14, %v1196_v61 }
 0x16b   : > { %v10509_v23 = vadd.f32 %v14295_v1, %v10236_v46  ;;  %v9230_v13 = vld [vmem:[#allocation2 + $0x88] ss:$0 sps:$4 sm:$0x11]   ;;  %2503 = vrot.lane.b32.xlu1 %v8878_v58, %s9520_s24  ;;  %1795 = vrot.lane.b32.xlu0 %v14297_v51, %s9518_s21  ;;  %v8879_v46 = vcombine.low %v10495_v40, %v10495_v40  ;;  %v1531_v21 = vshrl.u32 %v10332_v11, 16  ;;  %v1534_v57 = vshll.u32 %v10332_v11, 16 }
 0x16c   : > { %1167 = vst.msk [vmem:[#allocation2 + $0xc8] sm:$0xf] %vm924_vm4, %v9002_v6  ;;  %1165 = vst.msk [vmem:[#allocation2 + $0xb0] sm:$0xf] %vm924_vm4, %v9000_v50  ;;  %v1545_v38 = vor.u32 %v1544_v3, %v1541_v32  ;;  %v2797_v58 = vrot.slane %v9230_v13, 5  ;;  %v891_v1 = vmax.f32 %v859_v48, 0.0 }
 0x16d   : > { %14296 = vst [vmem:[#allocation75_spill] sm:$0xff] %v10509_v23  ;;  %1001 = vst [vmem:[#allocation2 + $0x58] sm:$0x1] %v1000_v27  ;;  %v889_v55 = vmax.f32 %v857_v25, 0.0  ;;  %v2054_v23 = vrot.slane %v2052_v33, 4  ;;  %v2057_v51 = vrot.slane %v2055_v49, 5 }
 0x16e   : > { %v3388_v2 = vrot.slane %v3386_v62, 3  ;;  %v3391_v16 = vrot.slane %v3389_v9, 4  ;;  %v14298_v14 = vrot.slane %v10309_v45, 4  ;;  %v2798_v11 = vsel %vm1730_vm5, %v10473_v31, %v2797_v58  ;;  %v9274_v50 = vld [vmem:[%s14096_s4 + $0x8] sm:$0xff]   ;;  %v9276_v9 = vld [vmem:[%s14096_s4] sm:$0xff]  }
 0x16f   : > { %v9003_v47 = vpack.c.bf16 %v891_v1, %v891_v1  ;;  %v9001_v6 = vpack.c.bf16 %v889_v55, %v889_v55  ;;  %v14299_v13 = vrot.slane %v10408_v4, 4  ;;  %v10545_v49 = vsel %vm7096_vm1, %v10514_v0, 0.0  ;;  %1654 = vrot.lane.b32.xlu1 %v1545_v38, %s9519_s15  ;;  %2505 = vrot.lane.b32.xlu0 %v8879_v46, %s9520_s24  ;;  %v1323_v55 = vld [vmem:[#allocation2 + $0x7c] sm:$0x8] }
 0x170   : > { %v7253_v61 = vadd.f32 %v14298_v14, %v10309_v45  ;;  %v3394_v45 = vshrl.u32 %v2798_v11, 16  ;;  %v3397_v62 = vshll.u32 %v2798_v11, 16  ;;  %v14300_v31 = vrot.slane %v10428_v42, 4  ;;  %3935 = vmatpush1.bf16.msra.mxu0 %v9274_v50  ;;  %9123 = vmatpush1.bf16.msra.mxu1 %v9274_v50  ;;  %v9227_v58 = vld [vmem:[#allocation2 + $0x70] ss:$0 sps:$4 sm:$0x11]  }
 0x171   : > { %v10541_v48 = vadd.f32 %v14299_v13, %v10408_v4  ;;  %v14149_v3 = vrot.slane %v10524_v54, 5  ;;  %v1533_v33 = vrot.slane %v1531_v21, 4  ;;  %v1536_v4 = vrot.slane %v1534_v57, 5  ;;  %1168 = vst.msk [vmem:[#allocation2 + $0xcc] sm:$0xf] %vm924_vm4, %v9003_v47  ;;  %3936 = vmatprep.subr.bf16.mxu0 %v14283_v36  ;;  %9115 = vmatprep.subr.bf16.mxu1 %v14283_v36 }
 0x172   : > { %v10552_v32 = vadd.f32 %v14300_v31, %v10428_v42  ;;  %1166 = vst.msk [vmem:[#allocation2 + $0xb4] sm:$0xf] %vm924_vm4, %v9001_v6  ;;  %v2058_v25 = vor.u32 %v2057_v51, %v2054_v23  ;;  %v3392_v27 = vor.u32 %v3391_v16, %v3388_v2  ;;  %v3396_v46 = vrot.slane %v3394_v45, 3  ;;  %v960_v51 = vld [vmem:[#allocation2 + $0xac] sm:$0x8] }
 0x173   : > { %v3399_v42 = vrot.slane %v3397_v62, 4  ;;  %v8186_v47 = vpack.c.bf16 %v10288_v7, %v10288_v7  ;;  %v14301_v57 = vrot.slane %v10405_v41, 2  ;;  %v7254_v23 = vrot.slane %v7253_v61, 2  ;;  %1791 = vrot.lane.b32.xlu0 %v14149_v3, %s9518_s21  ;;  %v1008_v6 = vld [vmem:[#allocation2 + $0xa0] sm:$0x1] }
 0x174   : > { %v6559_v16 = vcombine.high %v10514_v0, %v10514_v0  ;;  %v7308_v2 = vrot.slane %v10545_v49, 4  ;;  %v6593_v1 = vcombine.high %v9813_v5, %v9813_v5  ;;  %2179 = vrot.lane.b32.xlu1 %v2058_v25, %s9524_s27  ;;  %v7303_v14 = vrot.slane %v10552_v32, 2  ;;  %3937 = vmatpush1.bf16.msra.mxu0 %v9276_v9  ;;  %v9278_v5 = vld [vmem:[%s14096_s4 + $0x40] sm:$0xff]   ;;  %v1261_v45 = vld [vmem:[#allocation2 + $0x7c] sm:$0x8] }
 0x175   : > { %v10569_v38 = vadd.f32 %v14301_v57, %v10405_v41  ;;  %v3400_v7 = vor.u32 %v3399_v42, %v3396_v46  ;;  %v7289_v41 = vrot.slane %v10541_v48, 2  ;;  %v6627_v0 = vcombine.high %v9838_v22, %v9838_v22  ;;  %9124 = vmatpush1.bf16.msra.mxu1 %v9276_v9  ;;  %v10589_v62 = vld [vmem:[#allocation2 + $0x80] sm:$0xf]  ;;  %3952 = vmatprep.subr.bf16.mxu0 %v14283_v36 }
 0x176   : > { %v1547_v11 = vshrl.u32 %v10524_v54, 16  ;;  %v1537_v50 = vor.u32 %v1536_v4, %v1533_v33  ;;  %v8882_v13 = vcombine.low %v1323_v55, %v10413_v37  ;;  %v1550_v25 = vshll.u32 %v10524_v54, 16  ;;  %9116 = vmatprep.subr.bf16.mxu1 %v14283_v36  ;;  %v9231_v37 = vld [vmem:[#allocation2 + $0x70] ss:$0 sps:$4 sm:$0x11]  }
 0x177   : > { %v3401_v31 = vsel %vm3273_vm13, %v3392_v27, %v3400_v7  ;;  %v7235_v22 = vrot.slane %v10569_v38, 1  ;;  %v14302_v46 = vrot.slane %v10425_v44, 2  ;;  %v2269_v33 = vrot.slane %v9227_v58, 5 }
 0x178   : > { %8952 = vmatprep.mubr.msk.bf16.mxu1 %vm2835_vm12, %v3401_v31  ;;  %v961_v4 = vsel %vm10119_vm8, 0, %v960_v51  ;;  %v10602_v55 = vadd.f32 %v7254_v23, %v7253_v61  ;;  %v7314_v27 = vsel %vm7096_vm1, %v6559_v16, 0.0  ;;  %v7370_v42 = vsel %vm7096_vm1, %v6593_v1, 0.0  ;;  %1652 = vrot.lane.b32.xlu1 %v1537_v50, %s9519_s15 }
 0x179   : > { %v7248_v9 = vadd.f32 %v14302_v46, %v10425_v44  ;;  %2511 = vrot.lane.b32.xlu0 %v8882_v13, %s9520_s24  ;;  %962 = vst [vmem:[#allocation2 + $0xac] sm:$0x8] %v961_v4  ;;  %v1009_v36 = vsel %vm10257_vm11, 0, %v1008_v6  ;;  %v963_v44 = vld [vmem:[#allocation2 + $0xc4] sm:$0x8]  ;;  %v10611_v57 = vadd.f32 %v7289_v41, %v10541_v48  ;;  %v7309_v58 = vadd.f32 %v7308_v2, %v10545_v49 }
 0x17a   : > { %14303 = vst [vmem:[#allocation76_spill] sm:$0xff] %v10602_v55  ;;  %v7426_v61 = vsel %vm7096_vm1, %v6627_v0, 0.0  ;;  %v6661_v23 = vcombine.high %v9867_v60, %v9867_v60  ;;  %1010 = vst [vmem:[#allocation2 + $0xa0] sm:$0x1] %v1009_v36  ;;  %3953 = vmatpush2.bf16.msra.mxu0 %v9278_v5  ;;  %9125 = vmatpush2.bf16.msra.mxu1 %v9278_v5  ;;  %v10618_v16 = vadd.f32 %v7303_v14, %v10552_v32 }
 0x17b   : > { %v8820_v1 = vcombine.low %v1261_v45, %v10589_v62  ;;  %v1549_v7 = vrot.slane %v1547_v11, 4  ;;  %v1552_v51 = vrot.slane %v1550_v25, 5  ;;  %v7371_v6 = vrot.slane %v7370_v42, 4 }
 0x17c   : > { %v14304_v48 = vrot.slane %v10437_v59, 5  ;;  %v1744_v2 = vrot.slane %v9231_v37, 5  ;;  %v964_v41 = vsel %vm10119_vm8, 0, %v963_v44  ;;  %v14305_v60 = vpack.c.bf16 %v10285_v34, %v10285_v34 }
 0x17d   : > { %v10631_v32 = vunpack.c.l.b16 %v8186_v47  ;;  %v7249_v14 = vrot.slane %v7248_v9, 1  ;;  %v7427_v5 = vrot.slane %v7426_v61, 4  ;;  %1987 = vrot.lane.b32.xlu0 %v8820_v1, %s9521_s18  ;;  %965 = vst [vmem:[#allocation2 + $0xc4] sm:$0x8] %v964_v41  ;;  %v7310_v50 = vrot.slane %v7309_v58, 2 }
 0x17e   : > { %v2270_v49 = vsel %vm1730_vm5, %v14304_v48, %v2269_v33  ;;  %v10629_v0 = vunpack.c.l.b16 %v14305_v60  ;;  %v7315_v13 = vrot.slane %v7314_v27, 4  ;;  %v7482_v45 = vsel %vm7096_vm1, %v6661_v23, 0.0  ;;  %v1326_v23 = vld [vmem:[#allocation2 + $0x94] sm:$0x8]  ;;  %v10655_v1 = vld [vmem:[#allocation2 + $0x98] sm:$0xf] }
 0x17f   : > { %14307 = vst [vmem:[#allocation78_spill] sm:$0xff] %v10631_v32  ;;  %2321 = vrot.lane.b32.xlu1 %v2270_v49, %s9522_s16  ;;  %v10640_v47 = vmul.f32 0.25, %v9800_v53  ;;  %v1553_v25 = vor.u32 %v1552_v51, %v1549_v7  ;;  %v10643_v46 = vadd.f32 %v7235_v22, %v10569_v38  ;;  %v14309_v33 = vrot.slane %v10315_v26, 4  ;;  %v10657_v53 = vld [vmem:[#allocation2 + $0x9c] sm:$0xf]  ;;  %v14312_v51 = vld [vmem:[#allocation22_spill] sm:$0xff] }
 0x180   : > { %14306 = vst [vmem:[#allocation77_spill] sm:$0xff] %v10629_v0  ;;  %v10650_v4 = vadd.f32 %v7371_v6, %v7370_v42  ;;  %v14311_v36 = vrot.slane %v10449_v35, 5  ;;  %v10660_v7 = vmul.f32 0.25, %v9804_v56  ;;  %v10662_v38 = vadd.f32 %v7427_v5, %v7426_v61  ;;  %v9072_v42 = vpop.f32.mrf.mxu0  ;;  %v1011_v6 = vld [vmem:[#allocation2 + $0xb8] sm:$0x1]  ;;  %v14316_v60 = vld [vmem:[#allocation16_spill] sm:$0xff] }
 0x181   : > { %14308 = vst [vmem:[#allocation79_spill] sm:$0xff] %v10643_v46  ;;  %v10648_v37 = vadd.f32 %v14309_v33, %v10315_v26  ;;  %v7483_v22 = vrot.slane %v7482_v45, 4  ;;  %v6695_v26 = vcombine.high %v14312_v51, %v14312_v51  ;;  %1656 = vrot.lane.b32.xlu0 %v1553_v25, %s9519_s15  ;;  %v10668_v48 = vadd.f32 %v7249_v14, %v7248_v9  ;;  %v1265_v56 = vld [vmem:[#allocation2 + $0x98] sm:$0xf]  ;;  %v1266_v41 = vld [vmem:[#allocation2 + $0x9c] sm:$0xf] }
 0x182   : > { %v1745_v44 = vsel %vm1730_vm5, %v14311_v36, %v1744_v2  ;;  %v10670_v49 = vadd.f32 %v7310_v50, %v7309_v58  ;;  %v10672_v2 = vadd.f32 %v7315_v13, %v7314_v27  ;;  %v823_v61 = vmul.f32 %v10462_v10, %v9072_v42  ;;  %v9238_v14 = vld [vmem:[#allocation2 + $0x58] ss:$0 sps:$4 sm:$0x11]   ;;  %v735_v58 = vpop.f32.mrf.mxu0  ;;  %v1264_v50 = vld [vmem:[#allocation2 + $0x94] sm:$0x8] }
 0x183   : > { %14310 = vst [vmem:[#allocation80_spill] sm:$0xff] %v10648_v37  ;;  %1797 = vrot.lane.b32.xlu1 %v1745_v44, %s9518_s21  ;;  %14313 = vst [vmem:[#allocation22_spill] sm:$0xff] %v10668_v48  ;;  %v10676_v5 = vmul.f32 0.25, %v14316_v60  ;;  %v8884_v25 = vcombine.low %v1326_v23, %v10655_v1  ;;  %v8885_v9 = vcombine.low %v10657_v53, %v10657_v53  ;;  %v7373_v27 = vrot.slane %v10650_v4, 2  ;;  %v1204_v33 = vld [vmem:[#allocation2 + $0x98] sm:$0xf] }
 0x184   : > { %14314 = vst [vmem:[#allocation81_spill] sm:$0xff] %v10670_v49  ;;  %14315 = vst [vmem:[#allocation82_spill] sm:$0xff] %v10672_v2  ;;  %v862_v13 = vadd.f32 %v10484_v19, %v823_v61  ;;  %v821_v36 = vmul.f32 %v10462_v10, %v735_v58  ;;  %v1012_v44 = vsel %vm10257_vm11, 0, %v1011_v6  ;;  %v7429_v51 = vrot.slane %v10662_v38, 2  ;;  %v9073_v11 = vpop.f32.mrf.mxu0  ;;  %v1205_v58 = vld [vmem:[#allocation2 + $0x9c] sm:$0xf] }
 0x185   : > { %v10689_v42 = vadd.f32 %v7483_v22, %v7482_v45  ;;  %v7538_v23 = vsel %vm7096_vm1, %v6695_v26, 0.0  ;;  %2517 = vrot.lane.b32.xlu0 %v8885_v9, %s9520_s24  ;;  %v10694_v60 = vcombine.low %v1265_v56, %v1266_v41  ;;  %1013 = vst [vmem:[#allocation2 + $0xb8] sm:$0x1] %v1012_v44  ;;  %v8823_v61 = vcombine.low %v1266_v41, %v1266_v41  ;;  %v966_v44 = vld [vmem:[#allocation2 + $0xdc] sm:$0x8] }
 0x186   : > { %v894_v34 = vmax.f32 %v862_v13, 0.0  ;;  %v860_v6 = vadd.f32 %v10484_v19, %v821_v36  ;;  %v824_v31 = vmul.f32 %v10462_v10, %v9073_v11  ;;  %v8822_v45 = vcombine.low %v1264_v50, %v1265_v56  ;;  %v738_v21 = vpop.f32.mrf.mxu0  ;;  %v10706_v11 = vld [vmem:[#allocation2 + $0x84] sm:$0xf] }
 0x187   : > { %2515 = vrot.lane.b32.xlu1 %v8884_v25, %s9520_s24  ;;  %v1741_v22 = vrot.slane %v9238_v14, 5  ;;  %v2076_v26 = vshrl.u32 %v10437_v59, 16  ;;  %v2079_v25 = vshll.u32 %v10437_v59, 16  ;;  %v822_v41 = vmul.f32 %v10462_v10, %v738_v21 }
 0x188   : > { %v9006_v9 = vpack.c.bf16 %v894_v34, %v894_v34  ;;  %v892_v3 = vmax.f32 %v860_v6, 0.0  ;;  %v863_v32 = vadd.f32 %v10484_v19, %v824_v31  ;;  %v7539_v0 = vrot.slane %v7538_v23, 4 }
 0x189   : > { %v10704_v13 = vcombine.low %v10479_v20, %v10495_v40  ;;  %1993 = vrot.lane.b32.xlu0 %v8823_v61, %s9521_s18  ;;  %v14151_v59 = vrot.slane %v10694_v60, 5  ;;  %v10711_v34 = vcombine.low %v1204_v33, %v1205_v58  ;;  %v1555_v31 = vshrl.u32 %v10449_v35, 16  ;;  %v1014_v61 = vld [vmem:[#allocation2 + $0xd0] sm:$0x1] }
 0x18a   : > { %1171 = vst.msk [vmem:[#allocation2 + $0xf8] sm:$0xf] %vm924_vm4, %v9006_v9  ;;  %v9004_v21 = vpack.c.bf16 %v892_v3, %v892_v3  ;;  %v895_v56 = vmax.f32 %v863_v32, 0.0  ;;  %v861_v14 = vadd.f32 %v10484_v19, %v822_v41  ;;  %v2078_v20 = vrot.slane %v2076_v26, 4 }
 0x18b   : > { %1991 = vrot.lane.b32.xlu1 %v8822_v45, %s9521_s18  ;;  %v2081_v40 = vrot.slane %v2079_v25, 5  ;;  %v1558_v50 = vshll.u32 %v10449_v35, 16  ;;  %v967_v36 = vsel %vm10119_vm8, 0, %v966_v44  ;;  %v10721_v33 = vcombine.low %v10589_v62, %v10706_v11  ;;  %v9240_v3 = vld [vmem:[#allocation2 + $0x88] ss:$0 sps:$4 sm:$0x11]  }
 0x18c   : > { %v14317_v58 = vrot.slane %v10524_v54, 5  ;;  %1169 = vst.msk [vmem:[#allocation2 + $0xe0] sm:$0xf] %vm924_vm4, %v9004_v21  ;;  %v9007_v32 = vpack.c.bf16 %v895_v56, %v895_v56  ;;  %v893_v45 = vmax.f32 %v861_v14, 0.0  ;;  %968 = vst [vmem:[#allocation2 + $0xdc] sm:$0x8] %v967_v36  ;;  %v14318_v35 = vpack.c.bf16 %v10300_v17, %v10300_v17 }
 0x18d   : > { %v7374_v25 = vadd.f32 %v7373_v27, %v10650_v4  ;;  %v7430_v62 = vadd.f32 %v7429_v51, %v10662_v38  ;;  %v7540_v9 = vadd.f32 %v7539_v0, %v7538_v23  ;;  %2327 = vrot.lane.b32.xlu0 %v14151_v59, %s9522_s16  ;;  %v1201_v54 = vld [vmem:[#allocation2 + $0x80] sm:$0xf]  ;;  %v14150_v41 = vrot.slane %v10711_v34, 5  ;;  %v969_v23 = vld [vmem:[#allocation2 + $0xf4] sm:$0x8] }
 0x18e   : > { %v1742_v6 = vsel %vm1730_vm5, %v14317_v58, %v1741_v22  ;;  %v10730_v26 = vunpack.c.l.b16 %v14318_v35  ;;  %v1202_v22 = vld [vmem:[#allocation2 + $0x84] sm:$0xf]  ;;  %v1557_v44 = vrot.slane %v1555_v31, 4  ;;  %1172 = vst.msk [vmem:[#allocation2 + $0xfc] sm:$0xf] %vm924_vm4, %v9007_v32  ;;  %v9005_v17 = vpack.c.bf16 %v893_v45, %v893_v45  ;;  %v14321_v32 = vld [vmem:[#allocation17_spill] sm:$0xff] }
 0x18f   : > { %1793 = vrot.lane.b32.xlu1 %v1742_v6, %s9518_s21  ;;  %v1015_v4 = vsel %vm10257_vm11, 0, %v1014_v61  ;;  %v2082_v27 = vor.u32 %v2081_v40, %v2078_v20  ;;  %v1560_v38 = vrot.slane %v1558_v50, 5  ;;  %v2588_v0 = vshrl.u32 %v10704_v13, 16  ;;  %v9242_v36 = vld [vmem:[#allocation2 + $0x88] ss:$0 sps:$4 sm:$0x11]  }
 0x190   : > { %14319 = vst [vmem:[#allocation16_spill] sm:$0xff] %v10730_v26  ;;  %v2591_v51 = vshll.u32 %v10704_v13, 16  ;;  %1016 = vst [vmem:[#allocation2 + $0xd0] sm:$0x1] %v1015_v4  ;;  %v7485_v21 = vrot.slane %v10689_v42, 2  ;;  %v14153_v56 = vrot.slane %v10721_v33, 5  ;;  %v10746_v31 = vcombine.low %v1201_v54, %v1202_v22 }
 0x191   : > { %v2272_v14 = vrot.slane %v9240_v3, 5  ;;  %1170 = vst.msk [vmem:[#allocation2 + $0xe4] sm:$0xf] %vm924_vm4, %v9005_v17  ;;  %v8194_v20 = vpack.c.bf16 %v10660_v7, %v10660_v7  ;;  %v8195_v40 = vpack.c.bf16 %v10676_v5, %v10676_v5  ;;  %v7375_v50 = vrot.slane %v7374_v25, 1  ;;  %1803 = vrot.lane.b32.xlu0 %v14150_v41, %s9518_s21  ;;  %v14320_v6 = vld [vmem:[#allocation18_spill] sm:$0xff]  ;;  %v14322_v7 = vld [vmem:[#allocation19_spill] sm:$0xff] }
 0x192   : > { %v7541_v61 = vrot.slane %v7540_v9, 2  ;;  %v7431_v58 = vrot.slane %v7430_v62, 1  ;;  %v8140_v3 = vmul.f32 0.25, %v14320_v6  ;;  %v8141_v45 = vmul.f32 0.25, %v14321_v32  ;;  %v10900_v26 = vld [vmem:[#allocation2 + $0xcc] sm:$0xf] }
 0x193   : > { %2185 = vrot.lane.b32.xlu1 %v2082_v27, %s9524_s27  ;;  %v970_v35 = vsel %vm10119_vm8, 0, %v969_v23  ;;  %v8142_v54 = vmul.f32 0.25, %v14322_v7  ;;  %v1561_v22 = vor.u32 %v1560_v38, %v1557_v44  ;;  %v2590_v5 = vrot.slane %v2588_v0, 4  ;;  %v14325_v44 = vld [vmem:[#allocation20_spill] sm:$0xff]  ;;  %v1273_v49 = vld [vmem:[#allocation2 + $0xdc] sm:$0x8] }
 0x194   : > { %v2593_v17 = vrot.slane %v2591_v51, 5  ;;  %971 = vst [vmem:[#allocation2 + $0xf4] sm:$0x8] %v970_v35  ;;  %v7486_v4 = vadd.f32 %v7485_v21, %v10689_v42  ;;  %v2273_v27 = vsel %vm1730_vm5, %v14153_v56, %v2272_v14  ;;  %v14152_v41 = vrot.slane %v10746_v31, 5 }
 0x195   : > { %v1747_v6 = vrot.slane %v9242_v36, 5  ;;  %v14323_v32 = vrot.slane %v10611_v57, 1  ;;  %v8143_v38 = vmul.f32 0.25, %v14325_v44  ;;  %v7542_v0 = vadd.f32 %v7541_v61, %v7540_v9  ;;  %2325 = vrot.lane.b32.xlu0 %v2273_v27, %s9522_s16  ;;  %v10797_v44 = vld [vmem:[#allocation2 + $0xb0] sm:$0xf] }
 0x196   : > { %v14326_v42 = vrot.slane %v10618_v16, 1  ;;  %v14328_v21 = vpack.c.bf16 %v10640_v47, %v10640_v47  ;;  %v8205_v36 = vpack.c.bf16 %v8141_v45, %v8141_v45  ;;  %v10788_v35 = vunpack.c.l.b16 %v8195_v40  ;;  %v1329_v47 = vld [vmem:[#allocation2 + $0xac] sm:$0x8]  ;;  %v14334_v45 = vld [vmem:[#allocation26_spill] sm:$0xff] }
 0x197   : > { %v10770_v59 = vadd.f32 %v14323_v32, %v10611_v57  ;;  %1658 = vrot.lane.b32.xlu1 %v1561_v22, %s9519_s15  ;;  %v10786_v57 = vunpack.c.l.b16 %v8194_v20  ;;  %v10790_v9 = vadd.f32 %v7375_v50, %v7374_v25  ;;  %v10792_v61 = vadd.f32 %v7431_v58, %v7430_v62  ;;  %v1017_v62 = vld [vmem:[#allocation2 + $0xe8] sm:$0x1]  ;;  %v14336_v58 = vld [vmem:[#allocation24_spill] sm:$0xff]  ;;  %v9262_v18 = vld [vmem:[#allocation2 + $0xd0] ss:$0 sps:$4 sm:$0x11]  }
 0x198   : > { %v10779_v51 = vadd.f32 %v14326_v42, %v10618_v16  ;;  %v10784_v14 = vunpack.c.l.b16 %v14328_v21  ;;  %14331 = vst [vmem:[#allocation83_spill] sm:$0xff] %v10788_v35  ;;  %v2594_v7 = vor.u32 %v2593_v17, %v2590_v5  ;;  %v8204_v22 = vpack.c.bf16 %v8140_v3, %v8140_v3  ;;  %v14338_v17 = vld [vmem:[#allocation29_spill] sm:$0xff]  ;;  %v10817_v21 = vld [vmem:[#allocation2 + $0xb0] sm:$0xf] }
 0x199   : > { %14324 = vst [vmem:[#allocation18_spill] sm:$0xff] %v10770_v59  ;;  %14330 = vst [vmem:[#allocation20_spill] sm:$0xff] %v10786_v57  ;;  %v8206_v27 = vpack.c.bf16 %v8142_v54, %v8142_v54  ;;  %v7487_v32 = vrot.slane %v7486_v4, 1  ;;  %v1748_v16 = vsel %vm1730_vm5, %v14152_v41, %v1747_v6  ;;  %v8207_v20 = vpack.c.bf16 %v8143_v38, %v8143_v38  ;;  %v14337_v54 = vld [vmem:[#allocation23_spill] sm:$0xff] }
 0x19a   : > { %14327 = vst [vmem:[#allocation17_spill] sm:$0xff] %v10779_v51  ;;  %14329 = vst [vmem:[#allocation19_spill] sm:$0xff] %v10784_v14  ;;  %v7543_v42 = vrot.slane %v7542_v0, 1  ;;  %v8149_v40 = vmul.f32 0.25, %v9906_v52  ;;  %v6713_v25 = vcombine.high %v14334_v45, %v14334_v45  ;;  %1801 = vrot.lane.b32.xlu0 %v1748_v16, %s9518_s21  ;;  %v10804_v50 = vunpack.c.l.b16 %v8205_v36 }
 0x19b   : > { %14332 = vst [vmem:[#allocation84_spill] sm:$0xff] %v10790_v9  ;;  %14333 = vst [vmem:[#allocation85_spill] sm:$0xff] %v10792_v61  ;;  %2709 = vrot.lane.b32.xlu1 %v2594_v7, %s9523_s14  ;;  %v10807_v3 = vmul.f32 0.25, %v14336_v58  ;;  %v10810_v5 = vmul.f32 0.25, %v14337_v54  ;;  %v6712_v6 = vcombine.high %v14338_v17, %v14338_v17  ;;  %v8883_v52 = vcombine.low %v10434_v15, %v10434_v15  ;;  %v1267_v54 = vld [vmem:[#allocation2 + $0xac] sm:$0x8]  ;;  %v9076_v61 = vpop.f32.mrf.mxu0 }
 0x19c   : > { %14335 = vst [vmem:[#allocation26_spill] sm:$0xff] %v10804_v50  ;;  %v8886_v38 = vcombine.low %v1329_v47, %v10797_v44  ;;  %v2604_v7 = vshrl.u32 %v10441_v24, 16  ;;  %v2607_v36 = vshll.u32 %v10441_v24, 16  ;;  %v10821_v16 = vunpack.c.l.b16 %v8204_v22  ;;  %v9246_v23 = vld [vmem:[#allocation2 + $0xa0] ss:$0 sps:$4 sm:$0x11]  }
 0x19d   : > { %v10823_v45 = vunpack.c.l.b16 %v8206_v27  ;;  %v10825_v58 = vadd.f32 %v7487_v32, %v7486_v4  ;;  %v1018_v17 = vsel %vm10257_vm11, 0, %v1017_v62  ;;  %v10829_v15 = vunpack.c.l.b16 %v8207_v20  ;;  %v972_v24 = vld [vmem:[#allocation2 + $0x10c] sm:$0x8]  ;;  %v1020_v62 = vld [vmem:[#allocation2 + $0x100] sm:$0x1] }
 0x19e   : > { %14339 = vst [vmem:[#allocation24_spill] sm:$0xff] %v10821_v16  ;;  %v10831_v47 = vadd.f32 %v7543_v42, %v7542_v0  ;;  %v8213_v41 = vpack.c.bf16 %v8149_v40, %v8149_v40  ;;  %v6727_v56 = vrot.slane %v6713_v25, %v9712_v8  ;;  %2519 = vrot.lane.b32.xlu0 %v8886_v38, %s9520_s24  ;;  %1019 = vst [vmem:[#allocation2 + $0xe8] sm:$0x1] %v1018_v17  ;;  %v14344_v4 = vld [vmem:[#allocation25_spill] sm:$0xff] }
 0x19f   : > { %14340 = vst [vmem:[#allocation23_spill] sm:$0xff] %v10823_v45  ;;  %14341 = vst [vmem:[#allocation29_spill] sm:$0xff] %v10825_v58  ;;  %2513 = vrot.lane.b32.xlu1 %v8883_v52, %s9520_s24  ;;  %v10837_v22 = vmul.f32 0.25, %v14344_v4  ;;  %v7566_v27 = vsel %vm7096_vm1, %v6712_v6, 0.0  ;;  %v8821_v32 = vcombine.low %v10706_v11, %v10706_v11  ;;  %v2084_v0 = vshrl.u32 %v10721_v33, 16  ;;  %v14345_v4 = vld [vmem:[#allocation28_spill] sm:$0xff] }
 0x1a0   : > { %14342 = vst [vmem:[#allocation86_spill] sm:$0xff] %v10829_v15  ;;  %14343 = vst [vmem:[#allocation87_spill] sm:$0xff] %v10831_v47  ;;  %v8824_v20 = vcombine.low %v1267_v54, %v10817_v21  ;;  %v2606_v42 = vrot.slane %v2604_v7, 4  ;;  %v2609_v40 = vrot.slane %v2607_v36, 5  ;;  %v2087_v25 = vshll.u32 %v10721_v33, 16  ;;  %v14346_v52 = vld [vmem:[#allocation32_spill] sm:$0xff] }
 0x1a1   : > { %v2275_v17 = vrot.slane %v9246_v23, 5  ;;  %v9247_v6 = vld [vmem:[#allocation2 + $0xa0] ss:$0 sps:$4 sm:$0x11]   ;;  %v973_v11 = vsel %vm10119_vm8, 0, %v972_v24  ;;  %v6728_v15 = vcombine.high %v14345_v4, %v14345_v4  ;;  %v6729_v54 = vcombine.high %v6727_v56, %v6727_v56  ;;  %v14347_v23 = vld [vmem:[#allocation30_spill] sm:$0xff] }
 0x1a2   : > { %v7567_v7 = vrot.slane %v7566_v27, 4  ;;  %v7587_v36 = vsel %vm7096_vm1, %v6727_v56, 0.0  ;;  %1995 = vrot.lane.b32.xlu0 %v8824_v20, %s9521_s18  ;;  %974 = vst [vmem:[#allocation2 + $0x10c] sm:$0x8] %v973_v11  ;;  %v6746_v38 = vcombine.high %v14346_v52, %v14346_v52  ;;  %v6747_v45 = vcombine.high %v14347_v23, %v14347_v23  ;;  %v14349_v20 = vld [vmem:[#allocation31_spill] sm:$0xff] }
 0x1a3   : > { %1989 = vrot.lane.b32.xlu1 %v8821_v32, %s9521_s18  ;;  %v1563_v24 = vshrl.u32 %v10746_v31, 16  ;;  %v1021_v4 = vsel %vm10257_vm11, 0, %v1020_v62  ;;  %v2610_v50 = vor.u32 %v2609_v40, %v2606_v42  ;;  %v2086_v16 = vrot.slane %v2084_v0, 4  ;;  %v9264_v28 = vld [vmem:[#allocation2 + $0xd0] ss:$0 sps:$4 sm:$0x11]  }
 0x1a4   : > { %v2089_v47 = vrot.slane %v2087_v25, 5  ;;  %v1566_v56 = vshll.u32 %v10746_v31, 16  ;;  %1022 = vst [vmem:[#allocation2 + $0x100] sm:$0x1] %v1021_v4  ;;  %v10864_v32 = vunpack.c.l.b16 %v8213_v41  ;;  %v6762_v11 = vcombine.high %v14349_v20, %v14349_v20  ;;  %v10882_v20 = vpop.permute.xlu1 %1779 }
 0x1a5   : > { %v14350_v52 = vrot.slane %v10694_v60, 5  ;;  %v1750_v58 = vrot.slane %v9247_v6, 5  ;;  %v7580_v9 = vsel %vm7096_vm1, %v6728_v15, 0.0  ;;  %v7588_v62 = vrot.slane %v7587_v36, 4  ;;  %v751_v6 = vpop.f32.mrf.mxu0 }
 0x1a6   : > { %14348 = vst [vmem:[#allocation25_spill] sm:$0xff] %v10864_v32  ;;  %v10873_v0 = vsel %vm7096_vm1, %v6729_v54, 0.0  ;;  %2713 = vrot.lane.b32.xlu0 %v2610_v50, %s9523_s14  ;;  %v827_v41 = vmul.f32 %v10462_v10, %v9076_v61  ;;  %v7568_v42 = vadd.f32 %v7567_v7, %v7566_v27  ;;  %v10879_v40 = vrot.slane %v6747_v45, %v9712_v8 }
 0x1a7   : > { %v2276_v23 = vsel %vm1730_vm5, %v14350_v52, %v2275_v17  ;;  %v7622_v25 = vsel %vm7096_vm1, %v6746_v38, 0.0  ;;  %v1565_v17 = vrot.slane %v1563_v24, 4  ;;  %v2090_v4 = vor.u32 %v2089_v47, %v2086_v16  ;;  %v9077_v7 = vpop.f32.mrf.mxu0 }
 0x1a8   : > { %2329 = vrot.lane.b32.xlu1 %v2276_v23, %s9522_s16  ;;  %v1568_v15 = vrot.slane %v1566_v56, 5  ;;  %v866_v54 = vadd.f32 %v10484_v19, %v827_v41  ;;  %v825_v52 = vmul.f32 %v10462_v10, %v751_v6  ;;  %v8215_v50 = vpack.c.bf16 %v10837_v22, %v10837_v22  ;;  %v975_v23 = vld [vmem:[#allocation2 + $0x124] sm:$0x8] }
 0x1a9   : > { %v7581_v61 = vrot.slane %v7580_v9, 4  ;;  %v7636_v27 = vsel %vm7096_vm1, %v6762_v11, 0.0  ;;  %v14351_v45 = vrot.slane %v10711_v34, 5  ;;  %v7623_v24 = vrot.slane %v7622_v25, 4 }
 0x1aa   : > { %2187 = vrot.lane.b32.xlu0 %v2090_v4, %s9524_s27  ;;  %v898_v16 = vmax.f32 %v866_v54, 0.0  ;;  %v864_v47 = vadd.f32 %v10484_v19, %v825_v52  ;;  %v828_v56 = vmul.f32 %v10462_v10, %v9077_v7  ;;  %v7569_v22 = vrot.slane %v7568_v42, 2 }
 0x1ab   : > { %v1751_v38 = vsel %vm1730_vm5, %v14351_v45, %v1750_v58  ;;  %v7589_v41 = vadd.f32 %v7588_v62, %v7587_v36  ;;  %v7595_v11 = vrot.slane %v10873_v0, 4  ;;  %v7643_v6 = vsel %vm7096_vm1, %v10879_v40, 0.0  ;;  %v754_v58 = vpop.f32.mrf.mxu0 }
 0x1ac   : > { %1805 = vrot.lane.b32.xlu1 %v1751_v38, %s9518_s21  ;;  %v1569_v45 = vor.u32 %v1568_v15, %v1565_v17  ;;  %v9010_v32 = vpack.c.bf16 %v898_v16, %v898_v16  ;;  %v896_v35 = vmax.f32 %v864_v47, 0.0  ;;  %v867_v38 = vadd.f32 %v10484_v19, %v828_v56  ;;  %v10909_v17 = vpop.permute.xlu1 %1650  ;;  %v10933_v47 = vld [vmem:[#allocation2 + $0xc8] sm:$0xf] }
 0x1ad   : > { %v7582_v4 = vadd.f32 %v7581_v61, %v7580_v9  ;;  %v7637_v54 = vrot.slane %v7636_v27, 4  ;;  %v826_v52 = vmul.f32 %v10462_v10, %v754_v58  ;;  %v976_v36 = vsel %vm10119_vm8, 0, %v975_v23  ;;  %v1332_v23 = vld [vmem:[#allocation2 + $0xc4] sm:$0x8]  ;;  %v1272_v58 = vld [vmem:[#allocation2 + $0xcc] sm:$0xf] }
 0x1ae   : > { %v7624_v62 = vadd.f32 %v7623_v24, %v7622_v25  ;;  %v7644_v7 = vrot.slane %v7643_v6, 4  ;;  %v14352_v57 = vrot.slane %v10721_v33, 5  ;;  %1660 = vrot.lane.b32.xlu0 %v1569_v45, %s9519_s15  ;;  %1175 = vst.msk [vmem:[#allocation2 + $0x128] sm:$0xf] %vm924_vm4, %v9010_v32  ;;  %v9008_v9 = vpack.c.bf16 %v896_v35, %v896_v35  ;;  %977 = vst [vmem:[#allocation2 + $0x124] sm:$0x8] %v976_v36 }
 0x1af   : > { %v899_v15 = vmax.f32 %v867_v38, 0.0  ;;  %v14353_v10 = vpack.c.bf16 %v10810_v5, %v10810_v5  ;;  %v7590_v25 = vrot.slane %v7589_v41, 2  ;;  %v10919_v24 = vcombine.low %v10655_v1, %v10657_v53  ;;  %v10931_v5 = vld [vmem:[#allocation2 + $0xc8] sm:$0xf]  ;;  %v1026_v53 = vld [vmem:[#allocation2 + $0x130] sm:$0x1] }
 0x1b0   : > { %2323 = vrot.lane.b32.xlu1 %v14352_v57, %s9522_s16  ;;  %v865_v33 = vadd.f32 %v10484_v19, %v826_v52  ;;  %v14355_v57 = vpack.c.bf16 %v10807_v3, %v10807_v3  ;;  %v10927_v35 = vadd.f32 %v7569_v22, %v7568_v42  ;;  %v8889_v32 = vcombine.low %v10900_v26, %v10900_v26 }
 0x1b1   : > { %v10915_v61 = vunpack.c.l.b16 %v14353_v10  ;;  %1173 = vst.msk [vmem:[#allocation2 + $0x110] sm:$0xf] %vm924_vm4, %v9008_v9  ;;  %v9011_v1 = vpack.c.bf16 %v899_v15, %v899_v15  ;;  %v7583_v56 = vrot.slane %v7582_v4, 2  ;;  %v6763_v19 = vcombine.high %v10879_v40, %v10879_v40  ;;  %v1210_v9 = vld [vmem:[#allocation2 + $0xc8] sm:$0xf]  ;;  %v10948_v40 = vpop.permute.xlu0 %1781  ;;  %v10959_v10 = vpop.permute.xlu1 %2499 }
 0x1b2   : > { %v10925_v16 = vunpack.c.l.b16 %v14355_v57  ;;  %v7638_v3 = vadd.f32 %v7637_v54, %v7636_v27  ;;  %v897_v42 = vmax.f32 %v865_v33, 0.0  ;;  %v10938_v22 = vunpack.c.l.b16 %v8215_v50  ;;  %2525 = vrot.lane.b32.xlu0 %v8889_v32, %s9520_s24  ;;  %v1211_v54 = vld [vmem:[#allocation2 + $0xcc] sm:$0xf]  ;;  %v1023_v33 = vld [vmem:[#allocation2 + $0x118] sm:$0x1] }
 0x1b3   : > { %14354 = vst [vmem:[#allocation28_spill] sm:$0xff] %v10915_v61  ;;  %v10941_v45 = vadd.f32 %v7595_v11, %v10873_v0  ;;  %v7625_v38 = vrot.slane %v7624_v62, 2  ;;  %v7645_v52 = vadd.f32 %v7644_v7, %v7643_v6  ;;  %v14359_v36 = vrot.slane %v10746_v31, 5  ;;  %1176 = vst.msk [vmem:[#allocation2 + $0x12c] sm:$0xf] %vm924_vm4, %v9011_v1 }
 0x1b4   : > { %14356 = vst [vmem:[#allocation32_spill] sm:$0xff] %v10925_v16  ;;  %14357 = vst [vmem:[#allocation30_spill] sm:$0xff] %v10938_v22  ;;  %v2612_v27 = vshrl.u32 %v10919_v24, 16  ;;  %v2615_v50 = vshll.u32 %v10919_v24, 16  ;;  %v9009_v0 = vpack.c.bf16 %v897_v42, %v897_v42  ;;  %v1027_v11 = vsel %vm10257_vm11, 0, %v1026_v53  ;;  %v14361_v22 = vld [vmem:[#allocation38_spill] sm:$0xff] }
 0x1b5   : > { %14358 = vst [vmem:[#allocation31_spill] sm:$0xff] %v10941_v45  ;;  %1799 = vrot.lane.b32.xlu1 %v14359_v36, %s9518_s21  ;;  %v7571_v6 = vrot.slane %v10927_v35, 1  ;;  %v8888_v31 = vcombine.low %v1332_v23, %v10931_v5  ;;  %v8827_v7 = vcombine.low %v1272_v58, %v1272_v58  ;;  %v10957_v15 = vcombine.low %v10933_v47, %v1272_v58  ;;  %v10966_v53 = vld [vmem:[#allocation2 + $0xb4] sm:$0xf]  ;;  %v1270_v36 = vld [vmem:[#allocation2 + $0xc4] sm:$0x8] }
 0x1b6   : > { %1028 = vst [vmem:[#allocation2 + $0x130] sm:$0x1] %v1027_v11  ;;  %v7584_v57 = vadd.f32 %v7583_v56, %v7582_v4  ;;  %v10961_v32 = vadd.f32 %v7590_v25, %v7589_v41  ;;  %v7639_v1 = vrot.slane %v7638_v3, 2  ;;  %v10964_v42 = vsel %vm7096_vm1, %v6763_v19, 0.0  ;;  %1174 = vst.msk [vmem:[#allocation2 + $0x114] sm:$0xf] %vm924_vm4, %v9009_v0  ;;  %v10991_v11 = vpop.permute.xlu0 %2501 }
 0x1b7   : > { %v10969_v23 = vadd.f32 %v7625_v38, %v7624_v62  ;;  %v7646_v58 = vrot.slane %v7645_v52, 2  ;;  %v6780_v45 = vcombine.high %v14361_v22, %v14361_v22  ;;  %2001 = vrot.lane.b32.xlu0 %v8827_v7, %s9521_s18  ;;  %v10975_v41 = vcombine.low %v1210_v9, %v1211_v54 }
 0x1b8   : > { %14360 = vst [vmem:[#allocation88_spill] sm:$0xff] %v10961_v32  ;;  %v2614_v4 = vrot.slane %v2612_v27, 4  ;;  %v2617_v25 = vrot.slane %v2615_v50, 5  ;;  %v2092_v56 = vshrl.u32 %v10694_v60, 16  ;;  %v1024_v19 = vsel %vm10257_vm11, 0, %v1023_v33 }
 0x1b9   : > { %2523 = vrot.lane.b32.xlu1 %v8888_v31, %s9520_s24  ;;  %v10982_v62 = vcombine.low %v10817_v21, %v10966_v53  ;;  %v8826_v38 = vcombine.low %v1270_v36, %v10933_v47  ;;  %v14157_v22 = vrot.slane %v10957_v15, 5  ;;  %v2095_v0 = vshll.u32 %v10694_v60, 16  ;;  %1025 = vst [vmem:[#allocation2 + $0x118] sm:$0x1] %v1024_v19  ;;  %v14363_v47 = vld [vmem:[#allocation37_spill] sm:$0xff]  ;;  %v14364_v36 = vld [vmem:[#allocation39_spill] sm:$0xff] }
 0x1ba   : > { %v7585_v9 = vrot.slane %v7584_v57, 1  ;;  %v10988_v50 = vadd.f32 %v7639_v1, %v7638_v3  ;;  %v7651_v54 = vrot.slane %v10964_v42, 4  ;;  %v9254_v31 = vld [vmem:[#allocation2 + $0xb8] ss:$0 sps:$4 sm:$0x11]   ;;  %v10994_v7 = vadd.f32 %v7646_v58, %v7645_v52  ;;  %v11004_v3 = vpop.permute.xlu1 %1975 }
 0x1bb   : > { %v6781_v33 = vcombine.high %v14363_v47, %v14363_v47  ;;  %v6796_v60 = vcombine.high %v14364_v36, %v14364_v36  ;;  %2335 = vrot.lane.b32.xlu0 %v14157_v22, %s9522_s16  ;;  %v1207_v1 = vld [vmem:[#allocation2 + $0xb0] sm:$0xf]  ;;  %v1208_v19 = vld [vmem:[#allocation2 + $0xb4] sm:$0xf]  ;;  %v7678_v27 = vsel %vm7096_vm1, %v6780_v45, 0.0  ;;  %v2618_v52 = vor.u32 %v2617_v25, %v2614_v4 }
 0x1bc   : > { %14362 = vst [vmem:[#allocation38_spill] sm:$0xff] %v10994_v7  ;;  %v14158_v58 = vrot.slane %v10975_v41, 5  ;;  %v2094_v21 = vrot.slane %v2092_v56, 4  ;;  %v2097_v47 = vrot.slane %v2095_v0, 5  ;;  %v1571_v36 = vshrl.u32 %v10711_v34, 16 }
 0x1bd   : > { %1999 = vrot.lane.b32.xlu1 %v8826_v38, %s9521_s18  ;;  %v1574_v38 = vshll.u32 %v10711_v34, 16  ;;  %v11012_v61 = vadd.f32 %v7571_v6, %v10927_v35  ;;  %v11014_v22 = vadd.f32 %v7585_v9, %v7584_v57  ;;  %v2278_v16 = vrot.slane %v9254_v31, 5  ;;  %v9256_v45 = vld [vmem:[#allocation2 + $0xb8] ss:$0 sps:$4 sm:$0x11]   ;;  %v14367_v34 = vld [vmem:[#allocation33_spill] sm:$0xff] }
 0x1be   : > { %v11016_v14 = vcombine.low %v1207_v1, %v1208_v19  ;;  %v11021_v56 = vrot.slane %v6781_v33, %v9712_v8  ;;  %v7679_v0 = vrot.slane %v7678_v27, 4  ;;  %v11028_v35 = vmul.f32 0.25, %v14367_v34  ;;  %v14368_v6 = vld [vmem:[#allocation35_spill] sm:$0xff]  ;;  %v14369_v9 = vld [vmem:[#allocation42_spill] sm:$0xff]  ;;  %v14370_v1 = vld [vmem:[#allocation41_spill] sm:$0xff]  ;;  %v11037_v19 = vpop.permute.xlu0 %1977  ;;  %v11040_v32 = vpop.permute.xlu1 %1971 }
 0x1bf   : > { %14365 = vst [vmem:[#allocation37_spill] sm:$0xff] %v11012_v61  ;;  %14366 = vst [vmem:[#allocation39_spill] sm:$0xff] %v11014_v22  ;;  %1811 = vrot.lane.b32.xlu0 %v14158_v58, %s9518_s21  ;;  %v11031_v57 = vmul.f32 0.25, %v14368_v6  ;;  %v6814_v31 = vcombine.high %v14369_v9, %v14369_v9  ;;  %v6830_v33 = vcombine.high %v14370_v1, %v14370_v1  ;;  %v978_v25 = vld [vmem:[#allocation2 + $0x13c] sm:$0x8]  ;;  %v1573_v58 = vrot.slane %v1571_v36, 4 }
 0x1c0   : > { %v2098_v4 = vor.u32 %v2097_v47, %v2094_v21  ;;  %v1576_v34 = vrot.slane %v1574_v38, 5  ;;  %v11043_v22 = vadd.f32 %v7651_v54, %v10964_v42  ;;  %v14372_v6 = vrot.slane %v10982_v62, 5  ;;  %v1331_v7 = vld [vmem:[#allocation2 + $0xb4] sm:$0xf]  ;;  %v9080_v42 = vpop.f32.mrf.mxu0  ;;  %v11066_v38 = vld [vmem:[%s14094_s2] ss:$0 sm:$0xff] }
 0x1c1   : > { %2715 = vrot.lane.b32.xlu1 %v2618_v52, %s9523_s14  ;;  %v7692_v52 = vsel %vm7096_vm1, %v6796_v60, 0.0  ;;  %v14162_v61 = vrot.slane %v11016_v14, 5  ;;  %v1753_v1 = vrot.slane %v9256_v45, 5  ;;  %v11049_v51 = vadd.f32 %v7679_v0, %v7678_v27  ;;  %v14373_v60 = vld [vmem:[#allocation40_spill] sm:$0xff] }
 0x1c2   : > { %14371 = vst [vmem:[#allocation33_spill] sm:$0xff] %v11043_v22  ;;  %v2279_v9 = vsel %vm1730_vm5, %v14372_v6, %v2278_v16  ;;  %v11053_v21 = vsel %vm7096_vm1, %v11021_v56, 0.0  ;;  %v6815_v47 = vcombine.high %v14373_v60, %v14373_v60  ;;  %v979_v16 = vsel %vm10119_vm8, 0, %v978_v25  ;;  %v11081_v22 = vpop.permute.xlu0 %1973  ;;  %v11098_v48 = vpop.permute.xlu1 %2311 }
 0x1c3   : > { %2333 = vrot.lane.b32.xlu0 %v2279_v9, %s9522_s16  ;;  %v7693_v54 = vrot.slane %v7692_v52, 4  ;;  %v7734_v36 = vsel %vm7096_vm1, %v6814_v31, 0.0  ;;  %v7748_v27 = vsel %vm7096_vm1, %v6830_v33, 0.0  ;;  %v831_v45 = vmul.f32 %v11066_v38, %v9080_v42  ;;  %980 = vst [vmem:[#allocation2 + $0x13c] sm:$0x8] %v979_v16  ;;  %v767_v31 = vpop.f32.mrf.mxu0 }
 0x1c4   : > { %v1577_v25 = vor.u32 %v1576_v34, %v1573_v58  ;;  %v11075_v9 = vcombine.low %v10797_v44, %v1331_v7  ;;  %v7700_v33 = vrot.slane %v11053_v21, 4  ;;  %v1754_v60 = vsel %vm1730_vm5, %v14162_v61, %v1753_v1  ;;  %v1335_v42 = vld [vmem:[#allocation2 + $0xdc] sm:$0x8]  ;;  %v11083_v16 = vld [vmem:[#allocation2 + $0xe0] sm:$0xf] }
 0x1c5   : > { %2189 = vrot.lane.b32.xlu1 %v2098_v4, %s9524_s27  ;;  %v14374_v4 = vld [vmem:[#allocation36_spill] sm:$0xff]  ;;  %v829_v58 = vmul.f32 %v11066_v38, %v767_v31  ;;  %v11094_v6 = vrot.slane %v6815_v47, %v9712_v8  ;;  %v7735_v1 = vrot.slane %v7734_v36, 4  ;;  %v7749_v61 = vrot.slane %v7748_v27, 4  ;;  %v9081_v59 = vpop.f32.mrf.mxu0 }
 0x1c6   : > { %v11070_v0 = vmul.f32 0.25, %v14374_v4  ;;  %14375 = vst [vmem:[#allocation35_spill] sm:$0xff] %v11075_v9  ;;  %v11088_v4 = vld [vmem:[%s14095_s3] ss:$0 sm:$0xff]  ;;  %v11100_v46 = vadd.f32 %v7693_v54, %v7692_v52  ;;  %v832_v31 = vmul.f32 %v11066_v38, %v9081_v59  ;;  %v8887_v34 = vcombine.low %v1331_v7, %v1331_v7 }
 0x1c7   : > { %v870_v44 = vadd.f32 %v11088_v4, %v831_v45  ;;  %1809 = vrot.lane.b32.xlu0 %v1754_v60, %s9518_s21  ;;  %v868_v45 = vadd.f32 %v11088_v4, %v829_v58  ;;  %v8890_v47 = vcombine.low %v1335_v42, %v11083_v16  ;;  %v2620_v37 = vshrl.u32 %v11075_v9, 16  ;;  %v770_v55 = vpop.f32.mrf.mxu0  ;;  %v11107_v60 = vld [vmem:[#allocation2 + $0xe0] sm:$0xf] }
 0x1c8   : > { %v871_v54 = vadd.f32 %v11088_v4, %v832_v31  ;;  %v7736_v58 = vadd.f32 %v7735_v1, %v7734_v36  ;;  %v7750_v59 = vadd.f32 %v7749_v61, %v7748_v27  ;;  %v7755_v7 = vsel %vm7096_vm1, %v11094_v6, 0.0  ;;  %v11120_v36 = vpop.permute.xlu0 %2313 }
 0x1c9   : > { %1662 = vrot.lane.b32.xlu1 %v1577_v25, %s9519_s15  ;;  %v902_v2 = vmax.f32 %v870_v44, 0.0  ;;  %v2623_v25 = vshll.u32 %v11075_v9, 16  ;;  %v900_v52 = vmax.f32 %v868_v45, 0.0  ;;  %v830_v44 = vmul.f32 %v11066_v38, %v770_v55  ;;  %14376 = vst [vmem:[#allocation42_spill] sm:$0xff] %v11120_v36  ;;  %v11122_v61 = vpop.permute.xlu1 %1983 }
 0x1ca   : > { %v8825_v42 = vcombine.low %v10966_v53, %v10966_v53  ;;  %v2100_v63 = vshrl.u32 %v10982_v62, 16  ;;  %v903_v45 = vmax.f32 %v871_v54, 0.0  ;;  %14377 = vst [vmem:[#allocation41_spill] sm:$0xff] %v11122_v61  ;;  %v8828_v27 = vcombine.low %v1273_v49, %v11107_v60 }
 0x1cb   : > { %v9014_v39 = vpack.c.bf16 %v902_v2, %v902_v2  ;;  %2527 = vrot.lane.b32.xlu0 %v8890_v47, %s9520_s24  ;;  %v9012_v2 = vpack.c.bf16 %v900_v52, %v900_v52  ;;  %v869_v55 = vadd.f32 %v11088_v4, %v830_v44  ;;  %v2625_v1 = vrot.slane %v2623_v25, 5  ;;  %v981_v47 = vld [vmem:[#allocation2 + $0x154] sm:$0x8]  ;;  %v1032_v25 = vld [vmem:[#allocation2 + $0x160] sm:$0x1] }
 0x1cc   : > { %v2103_v31 = vshll.u32 %v10982_v62, 16  ;;  %v7701_v53 = vadd.f32 %v7700_v33, %v11053_v21  ;;  %v2281_v12 = vrot.slane %v9262_v18, 5  ;;  %v7695_v54 = vrot.slane %v11100_v46, 2 }
 0x1cd   : > { %2521 = vrot.lane.b32.xlu1 %v8887_v34, %s9520_s24  ;;  %1179 = vst.msk [vmem:[#allocation2 + $0x158] sm:$0xf] %vm924_vm4, %v9014_v39  ;;  %v2622_v34 = vrot.slane %v2620_v37, 4  ;;  %1177 = vst.msk [vmem:[#allocation2 + $0x140] sm:$0xf] %vm924_vm4, %v9012_v2  ;;  %v9015_v39 = vpack.c.bf16 %v903_v45, %v903_v45  ;;  %v901_v52 = vmax.f32 %v869_v55, 0.0  ;;  %v6831_v44 = vcombine.high %v11094_v6, %v11094_v6  ;;  %v11137_v2 = vpop.permute.xlu0 %2309  ;;  %v11139_v45 = vpop.permute.xlu1 %2307 }
 0x1ce   : > { %v7737_v43 = vrot.slane %v7736_v58, 2  ;;  %v7756_v49 = vrot.slane %v7755_v7, 4  ;;  %v7751_v37 = vrot.slane %v7750_v59, 2  ;;  %v1579_v21 = vshrl.u32 %v11016_v14, 16 }
 0x1cf   : > { %2003 = vrot.lane.b32.xlu0 %v8828_v27, %s9521_s18  ;;  %1180 = vst.msk [vmem:[#allocation2 + $0x15c] sm:$0xf] %vm924_vm4, %v9015_v39  ;;  %v9013_v18 = vpack.c.bf16 %v901_v52, %v901_v52  ;;  %v982_v33 = vsel %vm10119_vm8, 0, %v981_v47  ;;  %v2626_v6 = vor.u32 %v2625_v1, %v2622_v34  ;;  %v2102_v55 = vrot.slane %v2100_v63, 4 }
 0x1d0   : > { %v2105_v9 = vrot.slane %v2103_v31, 5  ;;  %983 = vst [vmem:[#allocation2 + $0x154] sm:$0x8] %v982_v33  ;;  %v8217_v27 = vpack.c.bf16 %v11028_v35, %v11028_v35  ;;  %v14378_v39 = vcombine.high %v11021_v56, %v11021_v56  ;;  %v14379_v47 = vrot.slane %v10957_v15, 5  ;;  %v1029_v35 = vld [vmem:[#allocation2 + $0x148] sm:$0x1] }
 0x1d1   : > { %1997 = vrot.lane.b32.xlu1 %v8825_v42, %s9521_s18  ;;  %v1582_v42 = vshll.u32 %v11016_v14, 16  ;;  %v1756_v36 = vrot.slane %v9264_v28, 5  ;;  %1178 = vst.msk [vmem:[#allocation2 + $0x144] sm:$0xf] %vm924_vm4, %v9013_v18  ;;  %v14380_v63 = vrot.slane %v11049_v51, 2  ;;  %v7696_v1 = vadd.f32 %v7695_v54, %v11100_v46  ;;  %v11165_v46 = vpop.permute.xlu1 %1783 }
 0x1d2   : > { %v7706_v52 = vsel %vm7096_vm1, %v14378_v39, 0.0  ;;  %v2282_v61 = vsel %vm1730_vm5, %v14379_v47, %v2281_v12  ;;  %v7702_v31 = vrot.slane %v7701_v53, 2  ;;  %v1033_v56 = vsel %vm10257_vm11, 0, %v1032_v25  ;;  %v11163_v39 = vpop.permute.xlu0 %1785 }
 0x1d3   : > { %v7682_v34 = vadd.f32 %v14380_v63, %v11049_v51  ;;  %2717 = vrot.lane.b32.xlu0 %v2626_v6, %s9523_s14  ;;  %v8218_v28 = vpack.c.bf16 %v11031_v57, %v11031_v57  ;;  %v7738_v12 = vadd.f32 %v7737_v43, %v7736_v58  ;;  %v7757_v18 = vadd.f32 %v7756_v49, %v7755_v7 }
 0x1d4   : > { %v7762_v33 = vsel %vm7096_vm1, %v6831_v44, 0.0  ;;  %1034 = vst [vmem:[#allocation2 + $0x160] sm:$0x1] %v1033_v56  ;;  %v7752_v51 = vadd.f32 %v7751_v37, %v7750_v59  ;;  %v1581_v54 = vrot.slane %v1579_v21, 4  ;;  %v1584_v6 = vrot.slane %v1582_v42, 5 }
 0x1d5   : > { %2337 = vrot.lane.b32.xlu1 %v2282_v61, %s9522_s16  ;;  %v2106_v61 = vor.u32 %v2105_v9, %v2102_v55  ;;  %v14381_v25 = vrot.slane %v10969_v23, 1  ;;  %v7707_v63 = vrot.slane %v7706_v52, 4  ;;  %v14383_v43 = vrot.slane %v10975_v41, 5  ;;  %v1185_v56 = vld [vmem:[#allocation2 + $0x4] sm:$0x8] }
 0x1d6   : > { %v1030_v58 = vsel %vm10257_vm11, 0, %v1029_v35  ;;  %v14384_v59 = vrot.slane %v10988_v50, 1  ;;  %v7683_v9 = vrot.slane %v7682_v34, 1  ;;  %v7697_v44 = vrot.slane %v7696_v1, 1  ;;  %v11192_v35 = vpop.permute.xlu1 %2707 }
 0x1d7   : > { %v11170_v47 = vadd.f32 %v14381_v25, %v10969_v23  ;;  %v1757_v57 = vsel %vm1730_vm5, %v14383_v43, %v1756_v36  ;;  %v11182_v49 = vadd.f32 %v7702_v31, %v7701_v53  ;;  %2191 = vrot.lane.b32.xlu0 %v2106_v61, %s9524_s27  ;;  %1031 = vst [vmem:[#allocation2 + $0x148] sm:$0x1] %v1030_v58  ;;  %v11188_v36 = vunpack.c.l.b16 %v8217_v27  ;;  %v11194_v53 = vpop.permute.xlu0 %1985  ;;  %v14390_v61 = vld [vmem:[#allocation43_spill] sm:$0xff] }
 0x1d8   : > { %v11180_v7 = vadd.f32 %v14384_v59, %v10988_v50  ;;  %v8219_v23 = vpack.c.bf16 %v11070_v0, %v11070_v0  ;;  %v7758_v37 = vrot.slane %v7757_v18, 2  ;;  %v7763_v21 = vrot.slane %v7762_v33, 4  ;;  %v14391_v0 = vld [vmem:[#allocation44_spill] sm:$0xff] }
 0x1d9   : > { %14382 = vst [vmem:[#allocation40_spill] sm:$0xff] %v11170_v47  ;;  %14386 = vst [vmem:[#allocation89_spill] sm:$0xff] %v11182_v49  ;;  %1813 = vrot.lane.b32.xlu1 %v1757_v57, %s9518_s21  ;;  %v11190_v55 = vunpack.c.l.b16 %v8218_v28  ;;  %v7739_v50 = vrot.slane %v7738_v12, 1  ;;  %v7753_v42 = vrot.slane %v7752_v51, 1  ;;  %v1585_v31 = vor.u32 %v1584_v6, %v1581_v54  ;;  %v11208_v57 = vld [vmem:[#allocation2 + $0xfc] sm:$0xf] }
 0x1da   : > { %14385 = vst [vmem:[#allocation36_spill] sm:$0xff] %v11180_v7  ;;  %14387 = vst [vmem:[#allocation90_spill] sm:$0xff] %v11188_v36  ;;  %v11196_v25 = vadd.f32 %v7707_v63, %v7706_v52  ;;  %v11199_v43 = vmul.f32 0.25, %v14390_v61  ;;  %v11202_v27 = vmul.f32 0.25, %v14391_v0  ;;  %v11206_v28 = vcombine.low %v10931_v5, %v10900_v26  ;;  %v14395_v52 = vld [vmem:[#allocation46_spill] sm:$0xff] }
 0x1db   : > { %14388 = vst [vmem:[#allocation91_spill] sm:$0xff] %v11190_v55  ;;  %v11210_v58 = vadd.f32 %v7683_v9, %v7682_v34  ;;  %v11212_v59 = vadd.f32 %v7697_v44, %v7696_v1  ;;  %v11216_v6 = vmul.f32 0.25, %v14395_v52  ;;  %v14396_v63 = vrot.slane %v10982_v62, 5  ;;  %1664 = vrot.lane.b32.xlu0 %v1585_v31, %s9519_s15  ;;  %v9381_v34 = vld [vmem:[#allocation2 + $0x8] sm:$0xf]  ;;  %v11233_v62 = vpop.permute.xlu1 %2181  ;;  %v14403_v55 = vld [vmem:[#allocation47_spill] sm:$0xff] }
 0x1dc   : > { %14389 = vst [vmem:[#allocation92_spill] sm:$0xff] %v11196_v25  ;;  %14392 = vst [vmem:[#allocation43_spill] sm:$0xff] %v11206_v28  ;;  %v11222_v61 = vadd.f32 %v7758_v37, %v7757_v18  ;;  %v11224_v26 = vadd.f32 %v7763_v21, %v7762_v33  ;;  %v11227_v5 = vrot.slane %v10704_v13, 5  ;;  %v8748_v1 = vcombine.low %v1185_v56, %v9381_v34  ;;  %v9281_v9 = vld [vmem:[#allocation2 + $0x58] ss:$0 sps:$4 sm:$0x11]  }
 0x1dd   : > { %14393 = vst [vmem:[#allocation44_spill] sm:$0xff] %v11210_v58  ;;  %14394 = vst [vmem:[#allocation93_spill] sm:$0xff] %v11212_v59  ;;  %2331 = vrot.lane.b32.xlu1 %v14396_v63, %s9522_s16  ;;  %v11229_v44 = vadd.f32 %v7739_v50, %v7738_v12  ;;  %v11231_v0 = vadd.f32 %v7753_v42, %v7752_v51  ;;  %v9382_v52 = vld [vmem:[#allocation2 + $0xc] sm:$0xf]  ;;  %v11235_v63 = vpop.permute.xlu0 %2319  ;;  %v8893_v18 = vcombine.low %v11208_v57, %v11208_v57  ;;  %v11239_v33 = vld [vmem:[#allocation2 + $0xf8] sm:$0xf] }
 0x1de   : > { %14397 = vst [vmem:[#allocation46_spill] sm:$0xff] %v11222_v61  ;;  %14398 = vst [vmem:[#allocation94_spill] sm:$0xff] %v11224_v26  ;;  %v8749_v54 = vcombine.low %v9382_v52, %v9382_v52  ;;  %v1278_v13 = vld [vmem:[#allocation2 + $0xfc] sm:$0xf]  ;;  %v1277_v37 = vld [vmem:[#allocation2 + $0xf8] sm:$0xf]  ;;  %v11247_v56 = vunpack.c.l.b16 %v8219_v23  ;;  %v2838_v23 = vsel %vm2835_vm12, %v8748_v1, %v10909_v17 }
 0x1df   : > { %14399 = vst [vmem:[#allocation95_spill] sm:$0xff] %v11229_v44  ;;  %14400 = vst [vmem:[#allocation96_spill] sm:$0xff] %v11231_v0  ;;  %v1338_v51 = vld [vmem:[#allocation2 + $0xf4] sm:$0x8]  ;;  %v2628_v50 = vshrl.u32 %v11206_v28, 16  ;;  %v2631_v42 = vshll.u32 %v11206_v28, 16  ;;  %2533 = vrot.lane.b32.xlu0 %v8893_v18, %s9520_s24  ;;  %v11269_v44 = vpop.permute.xlu1 %2503 }
 0x1e0   : > { %14401 = vst [vmem:[#allocation97_spill] sm:$0xff] %v11247_v56  ;;  %v14402_v34 = vld [vmem:[#allocation48_spill] sm:$0xff]  ;;  %v14404_v12 = vrot.slane %v11016_v14, 5  ;;  %v1216_v0 = vld [vmem:[#allocation2 + $0xf8] sm:$0xf]  ;;  %v11263_v56 = vcombine.low %v1277_v37, %v1278_v13  ;;  %v2108_v52 = vshrl.u32 %v10957_v15, 16  ;;  %v2840_v36 = vsel %vm2835_vm12, %v8749_v54, %v10909_v17 }
 0x1e1   : > { %v11255_v21 = vld [vmem:[#allocation2 + $0xe4] sm:$0xf]  ;;  %v1217_v31 = vld [vmem:[#allocation2 + $0xfc] sm:$0xf]  ;;  %v2111_v59 = vshll.u32 %v10957_v15, 16  ;;  %v11271_v14 = vpop.permute.xlu0 %1795  ;;  %v8892_v18 = vcombine.low %v1338_v51, %v11239_v33  ;;  %v2791_v58 = vrot.slane %v9281_v9, 5  ;;  %v2919_v9 = vsel %vm588_vm0, %v2840_v36, %v10948_v40 }
 0x1e2   : > { %1807 = vrot.lane.b32.xlu1 %v14404_v12, %s9518_s21  ;;  %v8831_v12 = vcombine.low %v1278_v13, %v1278_v13  ;;  %v1276_v1 = vld [vmem:[#allocation2 + $0xf4] sm:$0x8]  ;;  %v2630_v7 = vrot.slane %v2628_v50, 4  ;;  %v2633_v47 = vrot.slane %v2631_v42, 5  ;;  %v11276_v26 = vcombine.low %v11107_v60, %v11255_v21  ;;  %v1213_v15 = vld [vmem:[#allocation2 + $0xe0] sm:$0xf] }
 0x1e3   : > { %v11280_v17 = vcombine.low %v1216_v0, %v1217_v31  ;;  %v1214_v54 = vld [vmem:[#allocation2 + $0xe4] sm:$0xf]  ;;  %v2110_v13 = vrot.slane %v2108_v52, 4  ;;  %v2113_v51 = vrot.slane %v2111_v59, 5  ;;  %v2917_v50 = vsel %vm588_vm0, %v2838_v23, %v10882_v20  ;;  %v11285_v60 = vpop.permute.xlu1 %1654  ;;  %v984_v31 = vld [vmem:[#allocation2 + $0x16c] sm:$0x8] }
 0x1e4   : > { %2009 = vrot.lane.b32.xlu0 %v8831_v12, %s9521_s18  ;;  %14405 = vst [vmem:[#allocation48_spill] sm:$0xff] %v11285_v60  ;;  %v9277_v12 = vld [vmem:[#allocation2 + $0xe8] ss:$0 sps:$4 sm:$0x11]   ;;  %v1587_v25 = vshrl.u32 %v10975_v41, 16  ;;  %v2792_v0 = vsel %vm1730_vm5, %v11227_v5, %v2791_v58  ;;  %v2634_v52 = vor.u32 %v2633_v47, %v2630_v7  ;;  %v1590_v59 = vshll.u32 %v10975_v41, 16 }
 0x1e5   : > { %v11287_v42 = vpop.permute.xlu0 %2505  ;;  %v11295_v49 = vcombine.low %v1213_v15, %v1214_v54  ;;  %v14406_v20 = vrot.slane %v11263_v56, 5  ;;  %v3322_v58 = vshrl.u32 %v11227_v5, 16  ;;  %v2114_v40 = vor.u32 %v2113_v51, %v2110_v13 }
 0x1e6   : > { %2531 = vrot.lane.b32.xlu1 %v8892_v18, %s9520_s24  ;;  %v8830_v18 = vcombine.low %v1276_v1, %v1277_v37  ;;  %v3325_v1 = vshll.u32 %v11227_v5, 16  ;;  %v3330_v47 = vshrl.u32 %v2792_v0, 16  ;;  %v3333_v7 = vshll.u32 %v2792_v0, 16  ;;  %v9280_v37 = vld [vmem:[#allocation2 + $0xe8] ss:$0 sps:$4 sm:$0x11]  }
 0x1e7   : > { %v985_v41 = vsel %vm10119_vm8, 0, %v984_v31  ;;  %v2982_v36 = vsel %vm2980_vm14, %v2917_v50, %v11040_v32  ;;  %v2984_v15 = vsel %vm2980_vm14, %v2919_v9, %v11081_v22  ;;  %v2180_v54 = vpop.permute.xlu1 %2179  ;;  %v1589_v23 = vrot.slane %v1587_v25, 4 }
 0x1e8   : > { %2343 = vrot.lane.b32.xlu0 %v14406_v20, %s9522_s16  ;;  %v2284_v20 = vrot.slane %v9277_v12, 5  ;;  %986 = vst [vmem:[#allocation2 + $0x16c] sm:$0x8] %v985_v41  ;;  %v3047_v5 = vsel %vm3045_vm15, %v2982_v36, %v2180_v54  ;;  %v3048_v13 = vsel %vm3045_vm15, %v2984_v15, %v2180_v54  ;;  %v1592_v51 = vrot.slane %v1590_v59, 5 }
 0x1e9   : > { %v14180_v0 = vrot.slane %v11295_v49, 5  ;;  %v3096_v32 = vsel %vm3094_vm6, %v3047_v5, %v11139_v45  ;;  %v3098_v22 = vsel %vm3094_vm6, %v3048_v13, %v11137_v2  ;;  %v14407_v25 = vrot.slane %v11280_v17, 5  ;;  %v11328_v45 = vld [vmem:[#allocation2 + $0xe4] sm:$0xf]  ;;  %v11370_v5 = vld [vmem:[#allocation2 + $0x110] sm:$0xf] }
 0x1ea   : > { %2007 = vrot.lane.b32.xlu1 %v8830_v18, %s9521_s18  ;;  %v11311_v18 = vpop.permute.xlu0 %1791  ;;  %v3324_v9 = vrot.slane %v3322_v58, 3  ;;  %v3327_v50 = vrot.slane %v3325_v1, 4  ;;  %v3161_v12 = vsel %vm3159_vm7, %v3096_v32, %v10959_v10  ;;  %v3163_v31 = vsel %vm3159_vm7, %v3098_v22, %v10991_v11  ;;  %v14410_v32 = vld [vmem:[#allocation49_spill] sm:$0xff] }
 0x1eb   : > { %v3332_v59 = vrot.slane %v3330_v47, 3  ;;  %v3335_v41 = vrot.slane %v3333_v7, 4  ;;  %v3226_v2 = vsel %vm3224_vm9, %v3161_v12, %v11192_v35  ;;  %v11334_v36 = vpop.permute.xlu1 %1652  ;;  %v14408_v1 = vrot.slane %v11276_v26, 5 }
 0x1ec   : > { %1819 = vrot.lane.b32.xlu0 %v14407_v25, %s9518_s21  ;;  %v1759_v15 = vrot.slane %v9280_v37, 5  ;;  %v3274_v11 = vshrl.u32 %v3226_v2, 16  ;;  %v3277_v47 = vshll.u32 %v3226_v2, 16  ;;  %v14409_v13 = vcombine.high %v14403_v55, %v14403_v55 }
 0x1ed   : > { %v2285_v10 = vsel %vm1730_vm5, %v14408_v1, %v2284_v20  ;;  %v6864_v22 = vcombine.high %v14410_v32, %v14410_v32  ;;  %v11354_v37 = vcombine.low %v11083_v16, %v11328_v45  ;;  %v9084_v20 = vpop.f32.mrf.mxu0  ;;  %v1593_v1 = vor.u32 %v1592_v51, %v1589_v23 }
 0x1ee   : > { %2719 = vrot.lane.b32.xlu1 %v2634_v52, %s9523_s14  ;;  %v3227_v52 = vsel %vm3224_vm9, %v3163_v31, %v11192_v35  ;;  %v11336_v58 = vpop.permute.xlu0 %2511  ;;  %v11346_v35 = vrot.slane %v14409_v13, %v9712_v8  ;;  %v3276_v25 = vrot.slane %v3274_v11, 3  ;;  %v3279_v12 = vrot.slane %v3277_v47, 4 }
 0x1ef   : > { %v3281_v7 = vshrl.u32 %v3227_v52, 16  ;;  %v3284_v54 = vshll.u32 %v3227_v52, 16  ;;  %14411 = vst [vmem:[#allocation47_spill] sm:$0xff] %v11354_v37  ;;  %v3328_v13 = vor.u32 %v3327_v50, %v3324_v9  ;;  %v3336_v32 = vor.u32 %v3335_v41, %v3332_v59  ;;  %v783_v23 = vpop.f32.mrf.mxu0  ;;  %v1321_v50 = vld [vmem:[#allocation2 + $0x68] sm:$0xf] }
 0x1f0   : > { %2341 = vrot.lane.b32.xlu0 %v2285_v10, %s9522_s16  ;;  %v14413_v10 = vcombine.high %v14402_v34, %v14402_v34  ;;  %v1760_v11 = vsel %vm1730_vm5, %v14180_v0, %v1759_v15  ;;  %v3280_v47 = vor.u32 %v3279_v12, %v3276_v25  ;;  %v11375_v9 = vsel %vm7096_vm1, %v6864_v22, 0.0  ;;  %v1322_v59 = vld [vmem:[#allocation2 + $0x6c] sm:$0xf]  ;;  %v11385_v12 = vld [vmem:[#allocation2 + $0x70] ss:$0 sps:$4 sm:$0x11]  }
 0x1f1   : > { %v3283_v31 = vrot.slane %v3281_v7, 3  ;;  %v3286_v2 = vrot.slane %v3284_v54, 4  ;;  %v11356_v52 = vpop.permute.xlu1 %2321  ;;  %v1341_v54 = vld [vmem:[#allocation2 + $0x10c] sm:$0x8]  ;;  %v2636_v34 = vshrl.u32 %v11354_v37, 16  ;;  %v2639_v25 = vshll.u32 %v11354_v37, 16 }
 0x1f2   : > { %2193 = vrot.lane.b32.xlu1 %v2114_v40, %s9524_s27  ;;  %v11358_v55 = vpop.permute.xlu0 %1987  ;;  %v835_v40 = vmul.f32 %v11066_v38, %v9084_v20  ;;  %v11365_v16 = vsel %vm7096_vm1, %v14413_v10, 0.0  ;;  %v8891_v20 = vcombine.low %v11328_v45, %v11328_v45  ;;  %v833_v22 = vmul.f32 %v11066_v38, %v783_v23  ;;  %v1279_v23 = vld [vmem:[#allocation2 + $0x10c] sm:$0x8] }
 0x1f3   : > { %14412 = vst [vmem:[#allocation49_spill] sm:$0xff] %v11358_v55  ;;  %v3287_v7 = vor.u32 %v3286_v2, %v3283_v31  ;;  %v9085_v31 = vpop.f32.mrf.mxu0  ;;  %v3337_v10 = vsel %vm3273_vm13, %v3328_v13, %v3336_v32  ;;  %v7805_v0 = vrot.slane %v11375_v9, 4  ;;  %v11400_v51 = vcombine.low %v1321_v50, %v1322_v59 }
 0x1f4   : > { %1817 = vrot.lane.b32.xlu0 %v1760_v11, %s9518_s21  ;;  %v874_v41 = vadd.f32 %v11088_v4, %v835_v40  ;;  %v8894_v40 = vcombine.low %v1341_v54, %v11370_v5  ;;  %v9287_v11 = vld [vmem:[#allocation2 + $0x100] ss:$0 sps:$4 sm:$0x11]   ;;  %v836_v45 = vmul.f32 %v11066_v38, %v9085_v31  ;;  %v872_v61 = vadd.f32 %v11088_v4, %v833_v22 }
 0x1f5   : > { %v3288_v15 = vsel %vm3273_vm13, %v3280_v47, %v3287_v7  ;;  %v11388_v2 = vpop.permute.xlu1 %1797  ;;  %v7791_v7 = vrot.slane %v11365_v16, 4  ;;  %14415 = vst [vmem:[#allocation99_spill] sm:$0xff] %v11400_v51  ;;  %v786_v13 = vpop.f32.mrf.mxu0  ;;  %v8829_v32 = vcombine.low %v11255_v21, %v11255_v21  ;;  %v2638_v54 = vrot.slane %v2636_v34, 4  ;;  %v9288_v34 = vld [vmem:[#allocation2 + $0x100] ss:$0 sps:$4 sm:$0x11]  }
 0x1f6   : > { %1666 = vrot.lane.b32.xlu1 %v1593_v1, %s9519_s15  ;;  %3955 = vmatmul.mubr.bf16.vlgmr.msra.gmra.mxu0 %v3288_v15  ;;  %14414 = vst [vmem:[#allocation98_spill] sm:$0xff] %v11388_v2  ;;  %v11390_v1 = vpop.permute.xlu0 %1656  ;;  %v906_v47 = vmax.f32 %v874_v41, 0.0  ;;  %v11398_v15 = vld [vmem:[#allocation2 + $0x110] sm:$0xf]  ;;  %v875_v31 = vadd.f32 %v11088_v4, %v836_v45  ;;  %v2116_v60 = vshrl.u32 %v11276_v26, 16  ;;  %v2119_v50 = vshll.u32 %v11276_v26, 16 }
 0x1f7   : > { %8950 = vmatprep.mubr.msk.bf16.mxu0 %vm2835_vm12, %v3337_v10  ;;  %v1188_v10 = vld [vmem:[#allocation2 + $0x1c] sm:$0x8]  ;;  %v904_v59 = vmax.f32 %v872_v61, 0.0  ;;  %v834_v22 = vmul.f32 %v11066_v38, %v786_v13  ;;  %v2287_v28 = vrot.slane %v9287_v11, 5  ;;  %v2641_v21 = vrot.slane %v2639_v25, 5 }
 0x1f8   : > { %2535 = vrot.lane.b32.xlu0 %v8894_v40, %s9520_s24  ;;  %v9018_v41 = vpack.c.bf16 %v906_v47, %v906_v47  ;;  %v8832_v40 = vcombine.low %v1279_v23, %v11398_v15  ;;  %v907_v47 = vmax.f32 %v875_v31, 0.0  ;;  %v11418_v45 = vrot.slane %v11400_v51, 5  ;;  %v9383_v13 = vld [vmem:[#allocation2 + $0x20] sm:$0xf]  ;;  %v9384_v2 = vld [vmem:[#allocation2 + $0x24] sm:$0xf] }
 0x1f9   : > { %v11411_v37 = vpop.permute.xlu1 %2515  ;;  %v2794_v55 = vrot.slane %v11385_v12, 5  ;;  %v9016_v61 = vpack.c.bf16 %v904_v59, %v904_v59  ;;  %v873_v38 = vadd.f32 %v11088_v4, %v834_v22  ;;  %v1595_v25 = vshrl.u32 %v11295_v49, 16  ;;  %v14430_v51 = vld [vmem:[#allocation41_spill] sm:$0xff] }
 0x1fa   : > { %2529 = vrot.lane.b32.xlu1 %v8891_v20, %s9520_s24  ;;  %14416 = vst [vmem:[#allocation100_spill] sm:$0xff] %v11411_v37  ;;  %v11413_v20 = vpop.permute.xlu0 %2517  ;;  %1183 = vst.msk [vmem:[#allocation2 + $0x188] sm:$0xf] %vm924_vm4, %v9018_v41  ;;  %v8750_v37 = vcombine.low %v1188_v10, %v9383_v13  ;;  %v9019_v11 = vpack.c.bf16 %v907_v47, %v907_v47  ;;  %v2118_v23 = vrot.slane %v2116_v60, 4  ;;  %v2121_v41 = vrot.slane %v2119_v50, 5 }
 0x1fb   : > { %14417 = vst [vmem:[#allocation101_spill] sm:$0xff] %v11413_v20  ;;  %v8751_v20 = vcombine.low %v9384_v2, %v9384_v2  ;;  %v1598_v31 = vshll.u32 %v11295_v49, 16  ;;  %1181 = vst.msk [vmem:[#allocation2 + $0x170] sm:$0xf] %vm924_vm4, %v9016_v61  ;;  %v905_v12 = vmax.f32 %v873_v38, 0.0  ;;  %v7792_v4 = vadd.f32 %v7791_v7, %v11365_v16 }
 0x1fc   : > { %2011 = vrot.lane.b32.xlu0 %v8832_v40, %s9521_s18  ;;  %v14418_v2 = vrot.slane %v11263_v56, 5  ;;  %v2642_v22 = vor.u32 %v2641_v21, %v2638_v54  ;;  %v1762_v40 = vrot.slane %v9288_v34, 5  ;;  %1184 = vst.msk [vmem:[#allocation2 + $0x18c] sm:$0xf] %vm924_vm4, %v9019_v11  ;;  %v2843_v60 = vsel %vm2835_vm12, %v8750_v37, %v11334_v36  ;;  %v987_v38 = vld [vmem:[#allocation2 + $0x184] sm:$0x8] }
 0x1fd   : > { %v11428_v59 = vpop.permute.xlu1 %1991  ;;  %v2845_v50 = vsel %vm2835_vm12, %v8751_v20, %v11334_v36  ;;  %v2795_v16 = vsel %vm1730_vm5, %v11418_v45, %v2794_v55  ;;  %v9017_v7 = vpack.c.bf16 %v905_v12, %v905_v12  ;;  %v11443_v47 = vadd.f32 %v7805_v0, %v11375_v9 }
 0x1fe   : > { %2005 = vrot.lane.b32.xlu1 %v8829_v32, %s9521_s18  ;;  %v11430_v10 = vpop.permute.xlu0 %1993  ;;  %v2288_v32 = vsel %vm1730_vm5, %v14418_v2, %v2287_v28  ;;  %v7811_v28 = vsel %vm7096_vm1, %v11346_v35, 0.0  ;;  %v14419_v54 = vcombine.high %v11346_v35, %v11346_v35  ;;  %v11455_v37 = vcombine.low %v11239_v33, %v11208_v57 }
 0x1ff   : > { %v2122_v36 = vor.u32 %v2121_v41, %v2118_v23  ;;  %v1597_v0 = vrot.slane %v1595_v25, 4  ;;  %v1600_v55 = vrot.slane %v1598_v31, 5  ;;  %v3354_v9 = vshrl.u32 %v11418_v45, 16  ;;  %1182 = vst.msk [vmem:[#allocation2 + $0x174] sm:$0xf] %vm924_vm4, %v9017_v7 }
 0x200   : > { %v11451_v21 = vsel %vm7096_vm1, %v14419_v54, 0.0  ;;  %14420 = vst [vmem:[#allocation102_spill] sm:$0xff] %v11455_v37  ;;  %2721 = vrot.lane.b32.xlu0 %v2642_v22, %s9523_s14  ;;  %v2921_v35 = vsel %vm588_vm0, %v2843_v60, %v11165_v46  ;;  %v2923_v20 = vsel %vm588_vm0, %v2845_v50, %v11163_v39  ;;  %v3357_v33 = vshll.u32 %v11418_v45, 16  ;;  %v1284_v39 = vld [vmem:[#allocation2 + $0x12c] sm:$0xf] }
 0x201   : > { %v11465_v34 = vpop.permute.xlu1 %1793  ;;  %v3362_v61 = vshrl.u32 %v2795_v16, 16  ;;  %v7793_v13 = vrot.slane %v7792_v4, 2  ;;  %v7812_v25 = vrot.slane %v7811_v28, 4  ;;  %v14421_v11 = vrot.slane %v11280_v17, 5 }
 0x202   : > { %2345 = vrot.lane.b32.xlu1 %v2288_v32, %s9522_s16  ;;  %v11467_v57 = vpop.permute.xlu0 %2327  ;;  %v3365_v41 = vshll.u32 %v2795_v16, 16  ;;  %v14422_v46 = vpack.c.bf16 %v11199_v43, %v11199_v43  ;;  %v988_v45 = vsel %vm10119_vm8, 0, %v987_v38  ;;  %v2986_v2 = vsel %vm2980_vm14, %v2921_v35, %v11004_v3 }
 0x203   : > { %v1763_v23 = vsel %vm1730_vm5, %v14421_v11, %v1762_v40  ;;  %v2988_v32 = vsel %vm2980_vm14, %v2923_v20, %v11037_v19  ;;  %v1601_v43 = vor.u32 %v1600_v55, %v1597_v0  ;;  %v2644_v22 = vshrl.u32 %v11455_v37, 16  ;;  %989 = vst [vmem:[#allocation2 + $0x184] sm:$0x8] %v988_v45  ;;  %v1194_v40 = vld [vmem:[#allocation2 + $0x4c] sm:$0x8] }
 0x204   : > { %v11476_v31 = vunpack.c.l.b16 %v14422_v46  ;;  %2195 = vrot.lane.b32.xlu0 %v2122_v36, %s9524_s27  ;;  %v11493_v16 = vrot.slane %v3354_v9, 3  ;;  %v11495_v7 = vrot.slane %v3357_v33, 4  ;;  %v11497_v30 = vrot.slane %v3362_v61, 3  ;;  %v11504_v36 = vld [vmem:[#allocation2 + $0x128] sm:$0xf]  ;;  %v14426_v33 = vld [vmem:[#allocation50_spill] sm:$0xff] }
 0x205   : > { %v11489_v60 = vpop.permute.xlu1 %2185  ;;  %v2647_v3 = vshll.u32 %v11455_v37, 16  ;;  %v11500_v54 = vadd.f32 %v7793_v13, %v7792_v4  ;;  %v11502_v19 = vadd.f32 %v7812_v25, %v7811_v28  ;;  %v11506_v0 = vld [vmem:[#allocation2 + $0x12c] sm:$0xf]  ;;  %v11508_v55 = vrot.slane %v3365_v41, 4  ;;  %v1344_v13 = vld [vmem:[#allocation2 + $0x124] sm:$0x8] }
 0x206   : > { %14423 = vst [vmem:[#allocation103_spill] sm:$0xff] %v11476_v31  ;;  %1821 = vrot.lane.b32.xlu1 %v1763_v23, %s9518_s21  ;;  %v11491_v50 = vpop.permute.xlu0 %1803  ;;  %v2124_v35 = vshrl.u32 %v11263_v56, 16  ;;  %v14424_v9 = vpack.c.bf16 %v11202_v27, %v11202_v27  ;;  %v14427_v4 = vrot.slane %v11276_v26, 5  ;;  %v3050_v28 = vsel %vm3045_vm15, %v2986_v2, %v11233_v62  ;;  %v11526_v25 = vld [vmem:[#allocation2 + $0x124] sm:$0x8] }
 0x207   : > { %v3051_v38 = vsel %vm3045_vm15, %v2988_v32, %v11233_v62  ;;  %v11528_v27 = vld [vmem:[#allocation2 + $0xa0] ss:$0 sps:$4 sm:$0x11]   ;;  %v1035_v11 = vld [vmem:[#allocation2 + $0x178] sm:$0x1]  ;;  %v11531_v23 = vrot.slane %v10919_v24, 5  ;;  %v8897_v32 = vcombine.low %v11506_v0, %v11506_v0 }
 0x208   : > { %v11514_v20 = vunpack.c.l.b16 %v14424_v9  ;;  %1668 = vrot.lane.b32.xlu0 %v1601_v43, %s9519_s15  ;;  %v9385_v41 = vld [vmem:[#allocation2 + $0x50] sm:$0xf]  ;;  %v9386_v46 = vld [vmem:[#allocation2 + $0x54] sm:$0xf]  ;;  %v11533_v43 = vld [vmem:[#allocation2 + $0x128] sm:$0xf] }
 0x209   : > { %v8754_v26 = vcombine.low %v1194_v40, %v9385_v41  ;;  %v8755_v45 = vcombine.low %v9386_v46, %v9386_v46  ;;  %v1222_v9 = vld [vmem:[#allocation2 + $0x128] sm:$0xf]  ;;  %v2127_v2 = vshll.u32 %v11263_v56, 16  ;;  %v11544_v12 = vrot.slane %v2644_v22, 4  ;;  %v1223_v40 = vld [vmem:[#allocation2 + $0x12c] sm:$0xf] }
 0x20a   : > { %14425 = vst [vmem:[#allocation104_spill] sm:$0xff] %v11514_v20  ;;  %2339 = vrot.lane.b32.xlu1 %v14427_v4, %s9522_s16  ;;  %v11536_v4 = vpop.permute.xlu1 %1658  ;;  %v11538_v62 = vpop.permute.xlu0 %2325  ;;  %v1036_v41 = vsel %vm10257_vm11, 0, %v1035_v11  ;;  %v3100_v56 = vsel %vm3094_vm6, %v3050_v28, %v11098_v48  ;;  %v14428_v46 = vld [vmem:[#allocation42_spill] sm:$0xff]  ;;  %v8896_v20 = vcombine.low %v1344_v13, %v11504_v36  ;;  %v14429_v24 = vrot.slane %v11295_v49, 5 }
 0x20b   : > { %v3102_v61 = vsel %vm3094_vm6, %v3051_v38, %v14428_v46  ;;  %1037 = vst [vmem:[#allocation2 + $0x178] sm:$0x1] %v1036_v41  ;;  %v2853_v22 = vsel %vm2835_vm12, %v8754_v26, %v11390_v1  ;;  %v8834_v48 = vcombine.low %v11526_v25, %v11533_v43  ;;  %v11563_v28 = vrot.slane %v2647_v3, 5  ;;  %v11574_v46 = vld [vmem:[#allocation2 + $0x114] sm:$0xf] }
 0x20c   : > { %2541 = vrot.lane.b32.xlu0 %v8897_v32, %s9520_s24  ;;  %v11565_v38 = vrot.slane %v2124_v35, 4  ;;  %v8835_v13 = vcombine.low %v1284_v39, %v1284_v39  ;;  %v11568_v11 = vcombine.low %v11533_v43, %v1284_v39  ;;  %v11570_v41 = vcombine.low %v1222_v9, %v1223_v40 }
 0x20d   : > { %v11572_v26 = vrot.slane %v2127_v2, 5  ;;  %v3165_v49 = vsel %vm3159_vm7, %v3100_v56, %v11269_v44  ;;  %v3167_v25 = vsel %vm3159_vm7, %v3102_v61, %v11287_v42  ;;  %v1603_v35 = vshrl.u32 %v11280_v17, 16 }
 0x20e   : > { %1815 = vrot.lane.b32.xlu1 %v14429_v24, %s9518_s21  ;;  %v2710_v3 = vpop.permute.xlu1 %2709  ;;  %v11580_v32 = vpop.permute.xlu0 %1801  ;;  %v2800_v39 = vrot.slane %v11528_v27, 5  ;;  %v2855_v43 = vsel %vm2835_vm12, %v8755_v45, %v11390_v1  ;;  %v2929_v9 = vsel %vm588_vm0, %v2853_v22, %v11311_v18  ;;  %v9297_v24 = vld [vmem:[#allocation2 + $0x130] ss:$0 sps:$4 sm:$0x11]   ;;  %v11594_v1 = vcombine.low %v11398_v15, %v11574_v46 }
 0x20f   : > { %v3229_v2 = vsel %vm3224_vm9, %v3165_v49, %v2710_v3  ;;  %v3230_v44 = vsel %vm3224_vm9, %v3167_v25, %v2710_v3  ;;  %v1219_v27 = vld [vmem:[#allocation2 + $0x110] sm:$0xf]  ;;  %v2931_v18 = vsel %vm588_vm0, %v2855_v43, %v11465_v34  ;;  %v2292_v45 = vrot.slane %v11568_v11, 5  ;;  %v9298_v49 = vld [vmem:[#allocation2 + $0x118] ss:$0 sps:$4 sm:$0x11]  }
 0x210   : > { %v3306_v40 = vshrl.u32 %v3229_v2, 16  ;;  %v3309_v42 = vshll.u32 %v3229_v2, 16  ;;  %v3313_v61 = vshrl.u32 %v3230_v44, 16  ;;  %v3316_v56 = vshll.u32 %v3230_v44, 16  ;;  %2017 = vrot.lane.b32.xlu0 %v8835_v13, %s9521_s18  ;;  %v1220_v25 = vld [vmem:[#allocation2 + $0x114] sm:$0xf] }
 0x211   : > { %v2650_v22 = vor.u32 %v11563_v28, %v11544_v12  ;;  %v2994_v15 = vsel %vm2980_vm14, %v2929_v9, %v14430_v51  ;;  %v1767_v37 = vrot.slane %v11570_v41, 5  ;;  %v1606_v34 = vshll.u32 %v11280_v17, 16 }
 0x212   : > { %2539 = vrot.lane.b32.xlu1 %v8896_v20, %s9520_s24  ;;  %v3308_v3 = vrot.slane %v3306_v40, 3  ;;  %v3311_v2 = vrot.slane %v3309_v42, 4  ;;  %v3315_v20 = vrot.slane %v3313_v61, 3  ;;  %v3318_v44 = vrot.slane %v3316_v56, 4  ;;  %v2514_v13 = vpop.permute.xlu1 %2513  ;;  %v11601_v31 = vpop.permute.xlu0 %2519 }
 0x213   : > { %v2801_v43 = vsel %vm1730_vm5, %v11531_v23, %v2800_v39  ;;  %v3056_v12 = vsel %vm3045_vm15, %v2994_v15, %v11489_v60  ;;  %v1768_v42 = vrot.slane %v9297_v24, 5  ;;  %v2996_v51 = vsel %vm2980_vm14, %v2931_v18, %v11194_v53  ;;  %v9300_v39 = vld [vmem:[#allocation2 + $0x118] ss:$0 sps:$4 sm:$0x11]  }
 0x214   : > { %2351 = vrot.lane.b32.xlu0 %v2292_v45, %s9522_s16  ;;  %v3312_v28 = vor.u32 %v3311_v2, %v3308_v3  ;;  %v3319_v40 = vor.u32 %v3318_v44, %v3315_v20  ;;  %v14190_v17 = vrot.slane %v11594_v1, 5  ;;  %v2290_v9 = vrot.slane %v9298_v49, 5  ;;  %v1343_v44 = vld [vmem:[#allocation2 + $0x114] sm:$0xf] }
 0x215   : > { %v11618_v61 = vcombine.low %v1219_v27, %v1220_v25  ;;  %v3057_v56 = vsel %vm3045_vm15, %v2996_v51, %v11489_v60  ;;  %v3418_v24 = vshrl.u32 %v11531_v23, 16  ;;  %v3421_v2 = vshll.u32 %v11531_v23, 16 }
 0x216   : > { %2015 = vrot.lane.b32.xlu1 %v8834_v48, %s9521_s18  ;;  %v11622_v48 = vpop.permute.xlu1 %1989  ;;  %v11624_v15 = vpop.permute.xlu0 %1995  ;;  %v3320_v3 = vsel %vm3273_vm13, %v3312_v28, %v3319_v40  ;;  %v3108_v53 = vsel %vm3094_vm6, %v3056_v12, %v11235_v63  ;;  %v14431_v27 = vor.u32 %v11508_v55, %v11497_v30  ;;  %v14432_v60 = vor.u32 %v11495_v7, %v11493_v16 }
 0x217   : > { %3963 = vmatmul.mubr.bf16.gmra.mxu0 %v3320_v3  ;;  %v3426_v49 = vshrl.u32 %v2801_v43, 16  ;;  %v3429_v25 = vshll.u32 %v2801_v43, 16  ;;  %v1769_v23 = vsel %vm1730_vm5, %v1767_v37, %v1768_v42  ;;  %v2130_v63 = vor.u32 %v11572_v26, %v11565_v38 }
 0x218   : > { %v3369_v18 = vsel %vm3273_vm13, %v14432_v60, %v14431_v27  ;;  %v1605_v20 = vrot.slane %v1603_v35, 4  ;;  %v1608_v30 = vrot.slane %v1606_v34, 5  ;;  %v3110_v16 = vsel %vm3094_vm6, %v3057_v56, %v11356_v52  ;;  %1829 = vrot.lane.b32.xlu0 %v1769_v23, %s9518_s21 }
 0x219   : > { %8951 = vmatprep.mubr.msk.bf16.mxu0 %vm2835_vm12, %v3369_v18  ;;  %v2291_v7 = vsel %vm1730_vm5, %v14190_v17, %v2290_v9  ;;  %v14189_v55 = vrot.slane %v11618_v61, 5  ;;  %v3175_v43 = vsel %vm3159_vm7, %v3110_v16, %v2514_v13  ;;  %v3173_v38 = vsel %vm3159_vm7, %v3108_v53, %v11336_v58  ;;  %v14435_v16 = vld [vmem:[#allocation52_spill] sm:$0xff] }
 0x21a   : > { %2723 = vrot.lane.b32.xlu1 %v2650_v22, %s9523_s14  ;;  %v1765_v22 = vrot.slane %v9300_v39, 5  ;;  %v11653_v12 = vpop.permute.xlu1 %2329  ;;  %v2714_v26 = vpop.permute.xlu0 %2713  ;;  %v3420_v35 = vrot.slane %v3418_v24, 3  ;;  %v3423_v52 = vrot.slane %v3421_v2, 4  ;;  %v3428_v40 = vrot.slane %v3426_v49, 3 }
 0x21b   : > { %v3235_v34 = vsel %vm3224_vm9, %v3173_v38, %v2714_v26  ;;  %v3236_v28 = vsel %vm3224_vm9, %v3175_v43, %v2714_v26  ;;  %v3431_v42 = vrot.slane %v3429_v25, 4  ;;  %v11661_v13 = vcombine.low %v11370_v5, %v1343_v44  ;;  %v14433_v25 = vld [vmem:[#allocation51_spill] sm:$0xff] }
 0x21c   : > { %v3370_v51 = vshrl.u32 %v3235_v34, 16  ;;  %v3373_v9 = vshll.u32 %v3235_v34, 16  ;;  %v3377_v39 = vshrl.u32 %v3236_v28, 16  ;;  %v3380_v56 = vshll.u32 %v3236_v28, 16  ;;  %2349 = vrot.lane.b32.xlu0 %v2291_v7, %s9522_s16  ;;  %v1347_v34 = vld [vmem:[#allocation2 + $0x13c] sm:$0x8] }
 0x21d   : > { %v1609_v58 = vor.u32 %v1608_v30, %v1605_v20  ;;  %v1619_v3 = vshrl.u32 %v11570_v41, 16  ;;  %v1622_v24 = vshll.u32 %v11570_v41, 16  ;;  %v6882_v23 = vcombine.high %v14433_v25, %v14433_v25  ;;  %v11684_v28 = vld [vmem:[#allocation2 + $0x140] sm:$0xf] }
 0x21e   : > { %2197 = vrot.lane.b32.xlu1 %v2130_v63, %s9524_s27  ;;  %v3372_v2 = vrot.slane %v3370_v51, 3  ;;  %v3375_v53 = vrot.slane %v3373_v9, 4  ;;  %v3379_v27 = vrot.slane %v3377_v39, 3  ;;  %v3382_v60 = vrot.slane %v3380_v56, 4  ;;  %v11666_v18 = vpop.permute.xlu1 %1805  ;;  %v11668_v49 = vpop.permute.xlu0 %2187 }
 0x21f   : > { %v14434_v5 = vcombine.high %v14426_v33, %v14426_v33  ;;  %v3424_v20 = vor.u32 %v3423_v52, %v3420_v35  ;;  %v3432_v30 = vor.u32 %v3431_v42, %v3428_v40  ;;  %v6898_v7 = vcombine.high %v14435_v16, %v14435_v16  ;;  %v1197_v42 = vld [vmem:[#allocation2 + $0x64] sm:$0x8]  ;;  %v9387_v16 = vld [vmem:[#allocation2 + $0x68] sm:$0xf] }
 0x220   : > { %v1766_v43 = vsel %vm1730_vm5, %v14189_v55, %v1765_v22  ;;  %v3376_v38 = vor.u32 %v3375_v53, %v3372_v2  ;;  %v3383_v26 = vor.u32 %v3382_v60, %v3379_v27  ;;  %v14436_v33 = vpack.c.bf16 %v11216_v6, %v11216_v6 }
 0x221   : > { %v11676_v63 = vrot.slane %v14434_v5, %v9712_v8  ;;  %v7814_v35 = vrot.slane %v11502_v19, 2  ;;  %v14438_v52 = vrot.slane %v11451_v21, 4  ;;  %1825 = vrot.lane.b32.xlu0 %v1766_v43, %s9518_s21  ;;  %v8895_v22 = vcombine.low %v1343_v44, %v1343_v44 }
 0x222   : > { %1670 = vrot.lane.b32.xlu1 %v1609_v58, %s9519_s15  ;;  %v11689_v51 = vunpack.c.l.b16 %v14436_v33  ;;  %v11698_v9 = vpop.permute.xlu1 %2323  ;;  %v11700_v39 = vpop.permute.xlu0 %1660  ;;  %v3384_v56 = vsel %vm3273_vm13, %v3376_v38, %v3383_v26  ;;  %v1621_v6 = vrot.slane %v1619_v3, 4  ;;  %v1624_v58 = vrot.slane %v1622_v24, 5  ;;  %v9303_v26 = vld [vmem:[#allocation2 + $0x130] ss:$0 sps:$4 sm:$0x11]  }
 0x223   : > { %v11695_v40 = vadd.f32 %v14438_v52, %v11451_v21  ;;  %v2652_v2 = vshrl.u32 %v11661_v13, 16  ;;  %v7795_v53 = vrot.slane %v11500_v54, 1  ;;  %3979 = vmatmul.mubr.bf16.vlgmr.msra.gmra.mxu1 %v3384_v56  ;;  %v3433_v21 = vsel %vm3273_vm13, %v3424_v20, %v3432_v30  ;;  %v9305_v20 = vld [vmem:[#allocation2 + $0xb8] ss:$0 sps:$4 sm:$0x11]  }
 0x224   : > { %14437 = vst [vmem:[#allocation50_spill] sm:$0xff] %v11689_v51  ;;  %v8898_v27 = vcombine.low %v1347_v34, %v11684_v28  ;;  %v2655_v44 = vshll.u32 %v11661_v13, 16  ;;  %v14440_v60 = vrot.slane %v11443_v47, 2  ;;  %v6899_v3 = vcombine.high %v11676_v63, %v11676_v63  ;;  %8953 = vmatprep.mubr.msk.bf16.mxu1 %vm2835_vm12, %v3433_v21  ;;  %v1038_v56 = vld [vmem:[#allocation2 + $0x190] sm:$0x1] }
 0x225   : > { %14439 = vst [vmem:[#allocation42_spill] sm:$0xff] %v11695_v40  ;;  %v7846_v24 = vsel %vm7096_vm1, %v6882_v23, 0.0  ;;  %v7860_v5 = vsel %vm7096_vm1, %v6898_v7, 0.0  ;;  %v11721_v30 = vsel %vm7096_vm1, %v11676_v63, 0.0  ;;  %v8756_v43 = vcombine.low %v1197_v42, %v9387_v16 }
 0x226   : > { %v11711_v25 = vadd.f32 %v14440_v60, %v11443_v47  ;;  %2537 = vrot.lane.b32.xlu1 %v8895_v22, %s9520_s24  ;;  %v9388_v47 = vld [vmem:[#allocation2 + $0x6c] sm:$0xf]  ;;  %2543 = vrot.lane.b32.xlu0 %v8898_v27, %s9520_s24  ;;  %v8833_v23 = vcombine.low %v11574_v46, %v11574_v46  ;;  %v11728_v34 = vpop.permute.xlu0 %2525  ;;  %v1625_v33 = vor.u32 %v1624_v58, %v1621_v6  ;;  %v2654_v52 = vrot.slane %v2652_v2, 4 }
 0x227   : > { %v8757_v38 = vcombine.low %v9388_v47, %v9388_v47  ;;  %v11726_v7 = vpop.permute.xlu1 %1799  ;;  %v2132_v22 = vshrl.u32 %v11594_v1, 16  ;;  %v2135_v63 = vshll.u32 %v11594_v1, 16  ;;  %v2858_v42 = vsel %vm2835_vm12, %v8756_v43, %v11536_v4  ;;  %v14441_v47 = vld [vmem:[#allocation35_spill] sm:$0xff] }
 0x228   : > { %v2657_v27 = vrot.slane %v2655_v44, 5  ;;  %v1039_v46 = vsel %vm10257_vm11, 0, %v1038_v56  ;;  %v7847_v60 = vrot.slane %v7846_v24, 4  ;;  %v7861_v16 = vrot.slane %v7860_v5, 4 }
 0x229   : > { %v2860_v21 = vsel %vm2835_vm12, %v8757_v38, %v11536_v4  ;;  %v2802_v6 = vrot.slane %v14441_v47, 5  ;;  %v2803_v58 = vrot.slane %v9305_v20, 5  ;;  %1040 = vst [vmem:[#allocation2 + $0x190] sm:$0x1] %v1039_v46  ;;  %v11741_v2 = vadd.f32 %v7814_v35, %v11502_v19  ;;  %v14443_v38 = vld [vmem:[#allocation98_spill] sm:$0xff] }
 0x22a   : > { %2013 = vrot.lane.b32.xlu1 %v8833_v23, %s9521_s18  ;;  %1674 = vrot.lane.b32.xlu0 %v1625_v33, %s9519_s15  ;;  %v2293_v43 = vrot.slane %v9303_v26, 5  ;;  %v1611_v4 = vshrl.u32 %v11618_v61, 16  ;;  %v1614_v44 = vshll.u32 %v11618_v61, 16  ;;  %v2933_v29 = vsel %vm588_vm0, %v2858_v42, %v11271_v14  ;;  %v11752_v20 = vpop.permute.xlu0 %2001 }
 0x22b   : > { %14442 = vst [vmem:[#allocation41_spill] sm:$0xff] %v11741_v2  ;;  %v2935_v56 = vsel %vm588_vm0, %v2860_v21, %v14443_v38  ;;  %v11750_v47 = vpop.permute.xlu1 %2523  ;;  %v2134_v23 = vrot.slane %v2132_v22, 4  ;;  %v2137_v19 = vrot.slane %v2135_v63, 5  ;;  %v7868_v35 = vrot.slane %v11721_v30, 4  ;;  %v14444_v63 = vld [vmem:[#allocation49_spill] sm:$0xff]  ;;  %v14446_v38 = vld [vmem:[#allocation100_spill] sm:$0xff] }
 0x22c   : > { %v7874_v26 = vsel %vm7096_vm1, %v6899_v3, 0.0  ;;  %v3000_v33 = vsel %vm2980_vm14, %v2935_v56, %v11622_v48  ;;  %v2658_v46 = vor.u32 %v2657_v27, %v2654_v52  ;;  %v7848_v55 = vadd.f32 %v7847_v60, %v7846_v24  ;;  %v14447_v56 = vld [vmem:[#allocation101_spill] sm:$0xff] }
 0x22d   : > { %v11758_v17 = vadd.f32 %v7861_v16, %v7860_v5  ;;  %v3060_v14 = vsel %vm3045_vm15, %v3000_v33, %v11668_v49  ;;  %v2804_v22 = vsel %vm1730_vm5, %v2802_v6, %v2803_v58  ;;  %v2998_v42 = vsel %vm2980_vm14, %v2933_v29, %v14444_v63 }
 0x22e   : > { %1827 = vrot.lane.b32.xlu1 %v1767_v37, %s9518_s21  ;;  %2725 = vrot.lane.b32.xlu0 %v2658_v46, %s9523_s14  ;;  %v2294_v48 = vsel %vm1730_vm5, %v2292_v45, %v2293_v43  ;;  %v1613_v3 = vrot.slane %v1611_v4, 4  ;;  %v1616_v24 = vrot.slane %v1614_v44, 5  ;;  %v3059_v5 = vsel %vm3045_vm15, %v2998_v42, %v11668_v49  ;;  %v11776_v41 = vpop.permute.xlu0 %2335  ;;  %v1285_v4 = vld [vmem:[#allocation2 + $0x13c] sm:$0x8] }
 0x22f   : > { %v11774_v52 = vpop.permute.xlu1 %1999  ;;  %v2138_v37 = vor.u32 %v2137_v19, %v2134_v23  ;;  %v3450_v21 = vshrl.u32 %v2802_v6, 16  ;;  %v3453_v27 = vshll.u32 %v2802_v6, 16  ;;  %v3114_v60 = vsel %vm3094_vm6, %v3060_v14, %v11538_v62 }
 0x230   : > { %v3112_v16 = vsel %vm3094_vm6, %v3059_v5, %v11698_v9  ;;  %v3458_v58 = vshrl.u32 %v2804_v22, 16  ;;  %v3461_v45 = vshll.u32 %v2804_v22, 16  ;;  %v11785_v43 = vadd.f32 %v7795_v53, %v11500_v54  ;;  %v11806_v5 = vld [vmem:[#allocation2 + $0x15c] sm:$0xf] }
 0x231   : > { %v7809_v49 = vrot.slane %v11711_v25, 1  ;;  %v11790_v44 = vadd.f32 %v7868_v35, %v11721_v30  ;;  %v7849_v62 = vrot.slane %v7848_v55, 2  ;;  %v7863_v6 = vrot.slane %v11758_v17, 2 }
 0x232   : > { %14445 = vst [vmem:[#allocation51_spill] sm:$0xff] %v11785_v43  ;;  %2353 = vrot.lane.b32.xlu1 %v2294_v48, %s9522_s16  ;;  %v7875_v9 = vrot.slane %v7874_v26, 4  ;;  %2199 = vrot.lane.b32.xlu0 %v2138_v37, %s9524_s27  ;;  %v1617_v29 = vor.u32 %v1616_v24, %v1613_v3  ;;  %v3177_v54 = vsel %vm3159_vm7, %v3112_v16, %v14446_v38  ;;  %v11799_v19 = vpop.permute.xlu0 %1811  ;;  %v3452_v30 = vrot.slane %v3450_v21, 3  ;;  %v1200_v16 = vld [vmem:[#allocation2 + $0x7c] sm:$0x8] }
 0x233   : > { %v2716_v53 = vpop.permute.xlu1 %2715  ;;  %v3179_v23 = vsel %vm3159_vm7, %v3114_v60, %v14447_v56  ;;  %v3455_v35 = vrot.slane %v3453_v27, 4  ;;  %v3460_v14 = vrot.slane %v3458_v58, 3  ;;  %v3463_v22 = vrot.slane %v3461_v45, 4 }
 0x234   : > { %v3238_v33 = vsel %vm3224_vm9, %v3177_v54, %v2716_v53  ;;  %v3239_v46 = vsel %vm3224_vm9, %v3179_v23, %v2716_v53  ;;  %v14448_v24 = vrot.slane %v11594_v1, 5  ;;  %v11809_v37 = vadd.f32 %v7809_v49, %v11711_v25 }
 0x235   : > { %v3402_v63 = vshrl.u32 %v3238_v33, 16  ;;  %v3405_v42 = vshll.u32 %v3238_v33, 16  ;;  %v3409_v48 = vshrl.u32 %v3239_v46, 16  ;;  %v3412_v3 = vshll.u32 %v3239_v46, 16 }
 0x236   : > { %2347 = vrot.lane.b32.xlu1 %v14448_v24, %s9522_s16  ;;  %14449 = vst [vmem:[#allocation52_spill] sm:$0xff] %v11809_v37  ;;  %v7870_v21 = vrot.slane %v11790_v44, 2  ;;  %v11812_v27 = vadd.f32 %v7875_v9, %v7874_v26  ;;  %v11816_v60 = vcombine.low %v11504_v36, %v11506_v0  ;;  %1672 = vrot.lane.b32.xlu0 %v1617_v29, %s9519_s15  ;;  %v11821_v53 = vpop.permute.xlu0 %2333  ;;  %v1350_v36 = vld [vmem:[#allocation2 + $0x154] sm:$0x8]  ;;  %v1351_v0 = vld [vmem:[#allocation2 + $0x158] sm:$0xf] }
 0x237   : > { %v3404_v58 = vrot.slane %v3402_v63, 3  ;;  %v3407_v45 = vrot.slane %v3405_v42, 4  ;;  %v3411_v1 = vrot.slane %v3409_v48, 3  ;;  %v3414_v38 = vrot.slane %v3412_v3, 4  ;;  %v11819_v54 = vpop.permute.xlu1 %2189  ;;  %v9389_v29 = vld [vmem:[#allocation2 + $0x80] sm:$0xf] }
 0x238   : > { %14450 = vst [vmem:[#allocation35_spill] sm:$0xff] %v11812_v27  ;;  %v11823_v25 = vadd.f32 %v7849_v62, %v7848_v55  ;;  %v8901_v26 = vcombine.low %v11806_v5, %v11806_v5  ;;  %v3456_v49 = vor.u32 %v3455_v35, %v3452_v30  ;;  %v3464_v9 = vor.u32 %v3463_v22, %v3460_v14  ;;  %v1290_v55 = vld [vmem:[#allocation2 + $0x15c] sm:$0xf]  ;;  %v9317_v62 = vld [vmem:[#allocation2 + $0xd0] ss:$0 sps:$4 sm:$0x11]  }
 0x239   : > { %v11828_v56 = vadd.f32 %v7863_v6, %v11758_v17  ;;  %v8758_v23 = vcombine.low %v1200_v16, %v9389_v29  ;;  %v14451_v33 = vrot.slane %v11618_v61, 5  ;;  %v3408_v46 = vor.u32 %v3407_v45, %v3404_v58  ;;  %v9390_v42 = vld [vmem:[#allocation2 + $0x84] sm:$0xf]  ;;  %v1289_v30 = vld [vmem:[#allocation2 + $0x158] sm:$0xf] }
 0x23a   : > { %v3415_v63 = vor.u32 %v3414_v38, %v3411_v1  ;;  %v8759_v48 = vcombine.low %v9390_v42, %v9390_v42  ;;  %2549 = vrot.lane.b32.xlu0 %v8901_v26, %s9520_s24  ;;  %v2660_v35 = vshrl.u32 %v11816_v60, 16  ;;  %v2663_v17 = vshll.u32 %v11816_v60, 16  ;;  %v14452_v14 = vld [vmem:[#allocation43_spill] sm:$0xff]  ;;  %v11842_v3 = vpop.permute.xlu0 %1809  ;;  %v11845_v58 = vld [vmem:[#allocation2 + $0x140] sm:$0xf] }
 0x23b   : > { %1823 = vrot.lane.b32.xlu1 %v14451_v33, %s9518_s21  ;;  %v2140_v6 = vshrl.u32 %v11568_v11, 16  ;;  %v11838_v22 = vrot.slane %v14452_v14, 5  ;;  %v11840_v61 = vpop.permute.xlu1 %1662  ;;  %v8900_v16 = vcombine.low %v1350_v36, %v1351_v0  ;;  %v2143_v45 = vshll.u32 %v11568_v11, 16  ;;  %v1288_v33 = vld [vmem:[#allocation2 + $0x154] sm:$0x8] }
 0x23c   : > { %v3416_v24 = vsel %vm3273_vm13, %v3408_v46, %v3415_v63  ;;  %v2863_v1 = vsel %vm2835_vm12, %v8758_v23, %v11700_v39  ;;  %v2865_v38 = vsel %vm2835_vm12, %v8759_v48, %v11700_v39  ;;  %v3465_v26 = vsel %vm3273_vm13, %v3456_v49, %v3464_v9  ;;  %v1287_v42 = vld [vmem:[#allocation2 + $0x144] sm:$0xf]  ;;  %v1225_v14 = vld [vmem:[#allocation2 + $0x140] sm:$0xf] }
 0x23d   : > { %3987 = vmatmul.mubr.bf16.gmra.mxu1 %v3416_v24  ;;  %v8839_v29 = vcombine.low %v1290_v55, %v1290_v55  ;;  %v11854_v46 = vadd.f32 %v7870_v21, %v11790_v44  ;;  %v2937_v36 = vsel %vm588_vm0, %v2863_v1, %v11726_v7  ;;  %v11860_v11 = vcombine.low %v1289_v30, %v1290_v55  ;;  %v9313_v39 = vld [vmem:[#allocation2 + $0x160] ss:$0 sps:$4 sm:$0x11]   ;;  %v1226_v23 = vld [vmem:[#allocation2 + $0x144] sm:$0xf] }
 0x23e   : > { %8954 = vmatprep.mubr.msk.bf16.mxu1 %vm2835_vm12, %v3465_v26  ;;  %v2806_v63 = vrot.slane %v9317_v62, 5  ;;  %v2662_v9 = vrot.slane %v2660_v35, 4  ;;  %v2665_v48 = vrot.slane %v2663_v17, 5  ;;  %v2142_v44 = vrot.slane %v2140_v6, 4  ;;  %v11866_v24 = vpop.permute.xlu0 %2527 }
 0x23f   : > { %14453 = vst [vmem:[#allocation98_spill] sm:$0xff] %v11854_v46  ;;  %2547 = vrot.lane.b32.xlu1 %v8900_v16, %s9520_s24  ;;  %2025 = vrot.lane.b32.xlu0 %v8839_v29, %s9521_s18  ;;  %v2939_v21 = vsel %vm588_vm0, %v2865_v38, %v11580_v32  ;;  %v2522_v7 = vpop.permute.xlu1 %2521  ;;  %v8838_v1 = vcombine.low %v1288_v33, %v1289_v30  ;;  %v2145_v16 = vrot.slane %v2143_v45, 5  ;;  %v9314_v26 = vld [vmem:[#allocation2 + $0x148] ss:$0 sps:$4 sm:$0x11]   ;;  %v14191_v30 = vrot.slane %v11860_v11, 5 }
 0x240   : > { %v11869_v55 = vcombine.low %v11845_v58, %v1287_v42  ;;  %v3002_v62 = vsel %vm2980_vm14, %v2937_v36, %v11428_v59  ;;  %v11874_v29 = vcombine.low %v1351_v0, %v11806_v5  ;;  %v8837_v35 = vcombine.low %v1287_v42, %v1287_v42  ;;  %v9316_v5 = vld [vmem:[#allocation2 + $0x148] ss:$0 sps:$4 sm:$0x11]  }
 0x241   : > { %v11876_v17 = vcombine.low %v1225_v14, %v1226_v23  ;;  %v3062_v32 = vsel %vm3045_vm15, %v3002_v62, %v11819_v54  ;;  %v2299_v6 = vrot.slane %v9313_v39, 5  ;;  %v2807_v45 = vsel %vm1730_vm5, %v11838_v22, %v2806_v63 }
 0x242   : > { %v3004_v59 = vsel %vm2980_vm14, %v2939_v21, %v11430_v10  ;;  %v3482_v0 = vshrl.u32 %v11838_v22, 16  ;;  %v3485_v33 = vshll.u32 %v11838_v22, 16  ;;  %v11894_v36 = vpop.permute.xlu0 %2003  ;;  %v2666_v39 = vor.u32 %v2665_v48, %v2662_v9  ;;  %v1349_v10 = vld [vmem:[#allocation2 + $0x144] sm:$0xf]  ;;  %v1229_v9 = vld [vmem:[#allocation2 + $0x15c] sm:$0xf] }
 0x243   : > { %2023 = vrot.lane.b32.xlu1 %v8838_v1, %s9521_s18  ;;  %2021 = vrot.lane.b32.xlu0 %v8837_v35, %s9521_s18  ;;  %v3063_v42 = vsel %vm3045_vm15, %v3004_v59, %v11819_v54  ;;  %v11892_v14 = vpop.permute.xlu1 %1997  ;;  %v14192_v23 = vrot.slane %v11869_v55, 5  ;;  %v2296_v63 = vrot.slane %v9314_v26, 5  ;;  %v14454_v1 = vld [vmem:[#allocation57_spill] sm:$0xff]  ;;  %v3116_v21 = vsel %vm3094_vm6, %v3062_v32, %v11467_v57 }
 0x244   : > { %v3490_v62 = vshrl.u32 %v2807_v45, 16  ;;  %v3493_v35 = vshll.u32 %v2807_v45, 16  ;;  %v2300_v54 = vsel %vm1730_vm5, %v14191_v30, %v2299_v6  ;;  %v2146_v22 = vor.u32 %v2145_v16, %v2142_v44 }
 0x245   : > { %v2676_v48 = vshrl.u32 %v11874_v29, 16  ;;  %v3118_v26 = vsel %vm3094_vm6, %v3063_v42, %v11653_v12  ;;  %v1771_v59 = vrot.slane %v9316_v5, 5  ;;  %v3484_v57 = vrot.slane %v3482_v0, 3 }
 0x246   : > { %v3487_v32 = vrot.slane %v3485_v33, 4  ;;  %v3183_v45 = vsel %vm3159_vm7, %v3118_v26, %v2522_v7  ;;  %v3181_v6 = vsel %vm3159_vm7, %v3116_v21, %v11601_v31  ;;  %v2718_v44 = vpop.permute.xlu0 %2717  ;;  %v2297_v16 = vsel %vm1730_vm5, %v14192_v23, %v2296_v63  ;;  %v14455_v31 = vld [vmem:[#allocation59_spill] sm:$0xff] }
 0x247   : > { %2727 = vrot.lane.b32.xlu1 %v2666_v39, %s9523_s14  ;;  %2361 = vrot.lane.b32.xlu0 %v2300_v54, %s9522_s16  ;;  %v11911_v39 = vpop.permute.xlu1 %2337  ;;  %v2679_v12 = vshll.u32 %v11874_v29, 16  ;;  %v3241_v42 = vsel %vm3224_vm9, %v3181_v6, %v2718_v44  ;;  %v3242_v5 = vsel %vm3224_vm9, %v3183_v45, %v2718_v44  ;;  %v3492_v0 = vrot.slane %v3490_v62, 3 }
 0x248   : > { %v3495_v33 = vrot.slane %v3493_v35, 4  ;;  %v3434_v7 = vshrl.u32 %v3241_v42, 16  ;;  %v3437_v54 = vshll.u32 %v3241_v42, 16  ;;  %v3441_v26 = vshrl.u32 %v3242_v5, 16 }
 0x249   : > { %v3444_v30 = vshll.u32 %v3242_v5, 16  ;;  %v6932_v21 = vcombine.high %v14455_v31, %v14455_v31  ;;  %v8836_v63 = vcombine.low %v1285_v4, %v11845_v58  ;;  %v3488_v23 = vor.u32 %v3487_v32, %v3484_v57  ;;  %v1228_v5 = vld [vmem:[#allocation2 + $0x158] sm:$0xf]  ;;  %v14456_v4 = vld [vmem:[#allocation58_spill] sm:$0xff] }
 0x24a   : > { %v2678_v6 = vrot.slane %v2676_v48, 4  ;;  %v3436_v38 = vrot.slane %v3434_v7, 3  ;;  %v3439_v45 = vrot.slane %v3437_v54, 4  ;;  %v3443_v62 = vrot.slane %v3441_v26, 3  ;;  %v11928_v42 = vpop.permute.xlu0 %2191  ;;  %v14462_v26 = vld [vmem:[#allocation53_spill] sm:$0xff]  ;;  %v14463_v54 = vld [vmem:[#allocation54_spill] sm:$0xff] }
 0x24b   : > { %2201 = vrot.lane.b32.xlu1 %v2146_v22, %s9524_s27  ;;  %2357 = vrot.lane.b32.xlu0 %v2297_v16, %s9522_s16  ;;  %v3446_v35 = vrot.slane %v3444_v30, 4  ;;  %v11926_v44 = vpop.permute.xlu1 %1813  ;;  %v3496_v22 = vor.u32 %v3495_v33, %v3492_v0  ;;  %v2681_v49 = vrot.slane %v2679_v12, 5  ;;  %v2156_v31 = vshrl.u32 %v11860_v11, 16 }
 0x24c   : > { %v2159_v16 = vshll.u32 %v11860_v11, 16  ;;  %v6916_v58 = vcombine.high %v14456_v4, %v14456_v4  ;;  %v14457_v48 = vrot.slane %v11876_v17, 5  ;;  %v3440_v57 = vor.u32 %v3439_v45, %v3436_v38  ;;  %v1203_v38 = vld [vmem:[#allocation2 + $0x94] sm:$0x8] }
 0x24d   : > { %v3447_v32 = vor.u32 %v3446_v35, %v3443_v62  ;;  %v14458_v0 = vrot.slane %v11823_v25, 1  ;;  %v14460_v33 = vrot.slane %v11828_v56, 1  ;;  %v8899_v35 = vcombine.low %v1349_v10, %v1349_v10 }
 0x24e   : > { %v1772_v30 = vsel %vm1730_vm5, %v14457_v48, %v1771_v59  ;;  %v9319_v59 = vld [vmem:[#allocation2 + $0x40] ss:$0 sps:$4 sm:$0x11]   ;;  %v11955_v62 = vpop.permute.xlu0 %1664  ;;  %v11959_v4 = vcombine.low %v11684_v28, %v1349_v10  ;;  %v9322_v48 = vld [vmem:[#allocation2 + $0xe8] ss:$0 sps:$4 sm:$0x11]  }
 0x24f   : > { %2019 = vrot.lane.b32.xlu1 %v8836_v63, %s9521_s18  ;;  %v11941_v12 = vadd.f32 %v14458_v0, %v11823_v25  ;;  %v11946_v7 = vadd.f32 %v14460_v33, %v11828_v56  ;;  %v11950_v63 = vmul.f32 0.25, %v14462_v26  ;;  %1833 = vrot.lane.b32.xlu0 %v1772_v30, %s9518_s21  ;;  %v11953_v45 = vpop.permute.xlu1 %2331  ;;  %v3448_v25 = vsel %vm3273_vm13, %v3440_v57, %v3447_v32 }
 0x250   : > { %v11961_v56 = vcombine.low %v1228_v5, %v1229_v9  ;;  %3995 = vmatmul.mubr.bf16.gmra.mxu1 %v3448_v25  ;;  %v3497_v0 = vsel %vm3273_vm13, %v3488_v23, %v3496_v22  ;;  %v2682_v33 = vor.u32 %v2681_v49, %v2678_v6  ;;  %v2158_v30 = vrot.slane %v2156_v31, 4  ;;  %v14465_v23 = vld [vmem:[#allocation47_spill] sm:$0xff]  ;;  %v14466_v31 = vld [vmem:[#allocation73_spill] sm:$0xff] }
 0x251   : > { %14459 = vst [vmem:[#allocation49_spill] sm:$0xff] %v11941_v12  ;;  %14461 = vst [vmem:[#allocation100_spill] sm:$0xff] %v11946_v7  ;;  %v2161_v26 = vrot.slane %v2159_v16, 5  ;;  %v11965_v7 = vmul.f32 0.25, %v14463_v54  ;;  %v14464_v57 = vcombine.high %v14454_v1, %v14454_v1  ;;  %v7902_v28 = vsel %vm7096_vm1, %v6916_v58, 0.0  ;;  %8955 = vmatprep.mubr.msk.bf16.mxu1 %vm2835_vm12, %v3497_v0 }
 0x252   : > { %v7916_v10 = vsel %vm7096_vm1, %v6932_v21, 0.0  ;;  %v11976_v49 = vrot.slane %v14465_v23, 5  ;;  %v9391_v9 = vld [vmem:[#allocation2 + $0x98] sm:$0xf]  ;;  %v9392_v5 = vld [vmem:[#allocation2 + $0x9c] sm:$0xf]  ;;  %v11982_v58 = vpop.permute.xlu0 %2533 }
 0x253   : > { %v6931_v32 = vrot.slane %v14464_v57, %v9712_v8  ;;  %2545 = vrot.lane.b32.xlu1 %v8899_v35, %s9520_s24  ;;  %v8760_v6 = vcombine.low %v1203_v38, %v9391_v9  ;;  %v8761_v22 = vcombine.low %v9392_v5, %v9392_v5  ;;  %2731 = vrot.lane.b32.xlu0 %v2682_v33, %s9523_s14  ;;  %v1738_v21 = vrot.slane %v9319_v59, 5  ;;  %v14467_v23 = vld [vmem:[#allocation55_spill] sm:$0xff] }
 0x254   : > { %v11980_v16 = vpop.permute.xlu1 %1807  ;;  %v1635_v54 = vshrl.u32 %v11961_v56, 16  ;;  %v1638_v25 = vshll.u32 %v11961_v56, 16  ;;  %v2809_v35 = vrot.slane %v9322_v48, 5  ;;  %v2162_v57 = vor.u32 %v2161_v26, %v2158_v30 }
 0x255   : > { %v2868_v0 = vsel %vm2835_vm12, %v8760_v6, %v11840_v61  ;;  %v2870_v38 = vsel %vm2835_vm12, %v8761_v22, %v11840_v61  ;;  %v2668_v33 = vshrl.u32 %v11959_v4, 16  ;;  %v11992_v9 = vmul.f32 0.25, %v14467_v23 }
 0x256   : > { %v14468_v48 = vrot.slane %v11860_v11, 5  ;;  %v2671_v6 = vshll.u32 %v11959_v4, 16  ;;  %v6933_v1 = vcombine.high %v6931_v32, %v6931_v32  ;;  %v7903_v61 = vrot.slane %v7902_v28, 4  ;;  %v12012_v11 = vpop.permute.xlu0 %2009 }
 0x257   : > { %v7917_v30 = vrot.slane %v7916_v10, 4  ;;  %v12003_v26 = vsel %vm7096_vm1, %v6931_v32, 0.0  ;;  %2205 = vrot.lane.b32.xlu0 %v2162_v57, %s9524_s27  ;;  %v2941_v22 = vsel %vm588_vm0, %v2868_v0, %v11491_v50  ;;  %v2943_v23 = vsel %vm588_vm0, %v2870_v38, %v11666_v18 }
 0x258   : > { %2359 = vrot.lane.b32.xlu1 %v14468_v48, %s9522_s16  ;;  %v12010_v5 = vpop.permute.xlu1 %2531  ;;  %v14469_v48 = vrot.slane %v14466_v31, 5  ;;  %v2810_v32 = vsel %vm1730_vm5, %v11976_v49, %v2809_v35  ;;  %v3008_v57 = vsel %vm2980_vm14, %v2943_v23, %v11892_v14  ;;  %v1637_v37 = vrot.slane %v1635_v54, 4  ;;  %v1353_v54 = vld [vmem:[#allocation2 + $0x16c] sm:$0x8] }
 0x259   : > { %v1640_v12 = vrot.slane %v1638_v25, 5  ;;  %v2670_v50 = vrot.slane %v2668_v33, 4  ;;  %v3066_v18 = vsel %vm3045_vm15, %v3008_v57, %v11928_v42  ;;  %v14470_v0 = vrot.slane %v11869_v55, 5  ;;  %v12033_v25 = vld [vmem:[#allocation2 + $0x170] sm:$0xf] }
 0x25a   : > { %v1739_v59 = vsel %vm1730_vm5, %v14469_v48, %v1738_v21  ;;  %v2673_v38 = vrot.slane %v2671_v6, 5  ;;  %v3514_v43 = vshrl.u32 %v11976_v49, 16  ;;  %v3517_v21 = vshll.u32 %v11976_v49, 16  ;;  %v12042_v57 = vpop.permute.xlu0 %2343 }
 0x25b   : > { %v3006_v14 = vsel %vm2980_vm14, %v2941_v22, %v11624_v15  ;;  %1789 = vrot.lane.b32.xlu0 %v1739_v59, %s9518_s21  ;;  %v3522_v33 = vshrl.u32 %v2810_v32, 16  ;;  %v3525_v23 = vshll.u32 %v2810_v32, 16  ;;  %v12036_v48 = vsel %vm7096_vm1, %v6933_v1, 0.0 }
 0x25c   : > { %2355 = vrot.lane.b32.xlu1 %v14470_v0, %s9522_s16  ;;  %v3065_v6 = vsel %vm3045_vm15, %v3006_v14, %v11928_v42  ;;  %v12040_v49 = vpop.permute.xlu1 %2007  ;;  %v2148_v0 = vshrl.u32 %v11869_v55, 16  ;;  %v2151_v15 = vshll.u32 %v11869_v55, 16  ;;  %v12046_v59 = vadd.f32 %v7903_v61, %v7902_v28 }
 0x25d   : > { %v3122_v22 = vsel %vm3094_vm6, %v3066_v18, %v11821_v53  ;;  %v3120_v1 = vsel %vm3094_vm6, %v3065_v6, %v11953_v45  ;;  %v1641_v32 = vor.u32 %v1640_v12, %v1637_v37  ;;  %v12052_v35 = vadd.f32 %v7917_v30, %v7916_v10 }
 0x25e   : > { %v14471_v14 = vrot.slane %v11876_v17, 5  ;;  %v2674_v27 = vor.u32 %v2673_v38, %v2670_v50  ;;  %v8902_v55 = vcombine.low %v1353_v54, %v12033_v25  ;;  %v3516_v28 = vrot.slane %v3514_v43, 3  ;;  %v12064_v45 = vpop.permute.xlu0 %1819 }
 0x25f   : > { %1678 = vrot.lane.b32.xlu0 %v1641_v32, %s9519_s15  ;;  %v3519_v61 = vrot.slane %v3517_v21, 4  ;;  %v3524_v53 = vrot.slane %v3522_v33, 3  ;;  %v3527_v18 = vrot.slane %v3525_v23, 4  ;;  %v3185_v37 = vsel %vm3159_vm7, %v3120_v1, %v11750_v47  ;;  %v12071_v47 = vld [vmem:[#allocation2 + $0x50] sm:$0xf] }
 0x260   : > { %1831 = vrot.lane.b32.xlu1 %v14471_v14, %s9518_s21  ;;  %v2720_v46 = vpop.permute.xlu1 %2719  ;;  %v3187_v12 = vsel %vm3159_vm7, %v3122_v22, %v11728_v34  ;;  %v2150_v10 = vrot.slane %v2148_v0, 4  ;;  %v2153_v30 = vrot.slane %v2151_v15, 5  ;;  %v1627_v43 = vshrl.u32 %v11876_v17, 16  ;;  %v9331_v1 = vld [vmem:[#allocation2 + $0x100] ss:$0 sps:$4 sm:$0x11]  }
 0x261   : > { %v3244_v50 = vsel %vm3224_vm9, %v3185_v37, %v2720_v46  ;;  %v3245_v38 = vsel %vm3224_vm9, %v3187_v12, %v2720_v46  ;;  %v1630_v21 = vshll.u32 %v11876_v17, 16  ;;  %v14472_v34 = vpack.c.bf16 %v11950_v63, %v11950_v63  ;;  %v12080_v17 = vld [vmem:[#allocation2 + $0x54] sm:$0xf]  ;;  %v1206_v32 = vld [vmem:[#allocation2 + $0xac] sm:$0x8] }
 0x262   : > { %v3466_v54 = vshrl.u32 %v3244_v50, 16  ;;  %v3469_v33 = vshll.u32 %v3244_v50, 16  ;;  %v3473_v23 = vshrl.u32 %v3245_v38, 16  ;;  %v3476_v6 = vshll.u32 %v3245_v38, 16  ;;  %v12084_v38 = vpop.permute.xlu0 %2341 }
 0x263   : > { %v12076_v0 = vunpack.c.l.b16 %v14472_v34  ;;  %2729 = vrot.lane.b32.xlu0 %v2674_v27, %s9523_s14  ;;  %v3520_v46 = vor.u32 %v3519_v61, %v3516_v28  ;;  %v3528_v22 = vor.u32 %v3527_v18, %v3524_v53  ;;  %v7905_v63 = vrot.slane %v12046_v59, 2 }
 0x264   : > { %2551 = vrot.lane.b32.xlu1 %v8902_v55, %s9520_s24  ;;  %v3468_v14 = vrot.slane %v3466_v54, 3  ;;  %v3471_v37 = vrot.slane %v3469_v33, 4  ;;  %v3475_v55 = vrot.slane %v3473_v23, 3  ;;  %v3478_v12 = vrot.slane %v3476_v6, 4  ;;  %v12082_v50 = vpop.permute.xlu1 %2193  ;;  %v1355_v54 = vld [vmem:[#allocation2 + $0x174] sm:$0xf] }
 0x265   : > { %14473 = vst [vmem:[#allocation101_spill] sm:$0xff] %v12076_v0  ;;  %v2154_v34 = vor.u32 %v2153_v30, %v2150_v10  ;;  %v1629_v15 = vrot.slane %v1627_v43, 4  ;;  %v1632_v42 = vrot.slane %v1630_v21, 5  ;;  %v7919_v27 = vrot.slane %v12052_v35, 2  ;;  %v14475_v33 = vld [vmem:[#allocation60_spill] sm:$0xff]  ;;  %v14476_v6 = vld [vmem:[#allocation102_spill] sm:$0xff] }
 0x266   : > { %v3472_v28 = vor.u32 %v3471_v37, %v3468_v14  ;;  %v3479_v61 = vor.u32 %v3478_v12, %v3475_v55  ;;  %v14474_v53 = vrot.slane %v14466_v31, 5  ;;  %v12093_v18 = vcombine.low %v12071_v47, %v12080_v17  ;;  %v9393_v30 = vld [vmem:[#allocation2 + $0xb0] sm:$0xf]  ;;  %v9394_v21 = vld [vmem:[#allocation2 + $0xb4] sm:$0xf]  ;;  %v12103_v31 = vpop.permute.xlu0 %1817 }
 0x267   : > { %v6951_v23 = vcombine.high %v14475_v33, %v14475_v33  ;;  %v12098_v10 = vrot.slane %v14476_v6, 5  ;;  %v8762_v43 = vcombine.low %v1206_v32, %v9393_v30  ;;  %v8763_v14 = vcombine.low %v9394_v21, %v9394_v21  ;;  %2203 = vrot.lane.b32.xlu0 %v2154_v34, %s9524_s27  ;;  %v1255_v34 = vld [vmem:[#allocation2 + $0x4c] sm:$0x8] }
 0x268   : > { %1787 = vrot.lane.b32.xlu1 %v14474_v53, %s9518_s21  ;;  %v12101_v37 = vpop.permute.xlu1 %1666  ;;  %v3480_v55 = vsel %vm3273_vm13, %v3472_v28, %v3479_v61  ;;  %v3529_v12 = vsel %vm3273_vm13, %v3520_v46, %v3528_v22  ;;  %v1773_v53 = vrot.slane %v11961_v56, 5  ;;  %v2812_v33 = vrot.slane %v9331_v1, 5  ;;  %v14478_v46 = vld [vmem:[#allocation62_spill] sm:$0xff]  ;;  %v14479_v1 = vld [vmem:[#allocation63_spill] sm:$0xff] }
 0x269   : > { %v2873_v6 = vsel %vm2835_vm12, %v8762_v43, %v11955_v62  ;;  %v2875_v32 = vsel %vm2835_vm12, %v8763_v14, %v11955_v62  ;;  %4003 = vmatmul.mubr.bf16.gmra.mxu1 %v3480_v55  ;;  %v1633_v30 = vor.u32 %v1632_v42, %v1629_v15  ;;  %v12113_v21 = vcombine.low %v12033_v25, %v1355_v54  ;;  %v9329_v62 = vld [vmem:[#allocation2 + $0x160] ss:$0 sps:$4 sm:$0x11]  }
 0x26a   : > { %v14477_v28 = vrot.slane %v12003_v26, 4  ;;  %v6950_v56 = vcombine.high %v14478_v46, %v14478_v46  ;;  %v2945_v22 = vsel %vm588_vm0, %v2873_v6, %v11980_v16  ;;  %8956 = vmatprep.mubr.msk.bf16.mxu1 %vm2835_vm12, %v3529_v12  ;;  %v2068_v42 = vshrl.u32 %v12093_v18, 16  ;;  %v12142_v12 = vpop.permute.xlu0 %2535  ;;  %v1292_v6 = vld [vmem:[#allocation2 + $0x170] sm:$0xf] }
 0x26b   : > { %v12128_v25 = vadd.f32 %v7905_v63, %v12046_v59  ;;  %v12131_v15 = vadd.f32 %v7919_v27, %v12052_v35  ;;  %1676 = vrot.lane.b32.xlu0 %v1633_v30, %s9519_s15  ;;  %v2071_v16 = vshll.u32 %v12093_v18, 16  ;;  %v6966_v43 = vcombine.high %v14479_v1, %v14479_v1 }
 0x26c   : > { %v12118_v61 = vadd.f32 %v14477_v28, %v12003_v26  ;;  %1835 = vrot.lane.b32.xlu1 %v1773_v53, %s9518_s21  ;;  %v12134_v26 = vrot.slane %v6951_v23, %v9712_v8  ;;  %v2947_v14 = vsel %vm588_vm0, %v2875_v32, %v11842_v3  ;;  %v2530_v55 = vpop.permute.xlu1 %2529  ;;  %v8816_v59 = vcombine.low %v1255_v34, %v12071_v47  ;;  %v1291_v23 = vld [vmem:[#allocation2 + $0x16c] sm:$0x8] }
 0x26d   : > { %v2813_v35 = vsel %vm1730_vm5, %v12098_v10, %v2812_v33  ;;  %v3010_v63 = vsel %vm2980_vm14, %v2945_v22, %v11774_v52  ;;  %v8903_v27 = vcombine.low %v1355_v54, %v1355_v54  ;;  %v2684_v30 = vshrl.u32 %v12113_v21, 16 }
 0x26e   : > { %v2687_v28 = vshll.u32 %v12113_v21, 16  ;;  %v7958_v3 = vsel %vm7096_vm1, %v6950_v56, 0.0  ;;  %v3068_v32 = vsel %vm3045_vm15, %v3010_v63, %v12082_v50  ;;  %v1774_v47 = vrot.slane %v9329_v62, 5  ;;  %v12164_v1 = vpop.permute.xlu0 %2011 }
 0x26f   : > { %v2070_v34 = vrot.slane %v2068_v42, 4  ;;  %v3012_v33 = vsel %vm2980_vm14, %v2947_v14, %v11752_v20  ;;  %2553 = vrot.lane.b32.xlu0 %v8903_v27, %s9520_s24  ;;  %v2073_v52 = vrot.slane %v2071_v16, 5  ;;  %v3546_v54 = vshrl.u32 %v12098_v10, 16 }
 0x270   : > { %1979 = vrot.lane.b32.xlu1 %v8816_v59, %s9521_s18  ;;  %v3549_v46 = vshll.u32 %v12098_v10, 16  ;;  %v3069_v56 = vsel %vm3045_vm15, %v3012_v33, %v12082_v50  ;;  %v12162_v22 = vpop.permute.xlu1 %2005  ;;  %v8840_v59 = vcombine.low %v1291_v23, %v1292_v6  ;;  %v3554_v62 = vshrl.u32 %v2813_v35, 16  ;;  %v12173_v33 = vld [vmem:[#allocation2 + $0x174] sm:$0xf] }
 0x271   : > { %v3557_v42 = vshll.u32 %v2813_v35, 16  ;;  %v3124_v20 = vsel %vm3094_vm6, %v3068_v32, %v11776_v41  ;;  %v2686_v16 = vrot.slane %v2684_v30, 4  ;;  %v2689_v14 = vrot.slane %v2687_v28, 5 }
 0x272   : > { %v7959_v27 = vrot.slane %v7958_v3, 4  ;;  %v7972_v50 = vsel %vm7096_vm1, %v6966_v43, 0.0  ;;  %v1775_v23 = vsel %vm1730_vm5, %v1773_v53, %v1774_v47  ;;  %v3126_v35 = vsel %vm3094_vm6, %v3069_v56, %v11911_v39 }
 0x273   : > { %1837 = vrot.lane.b32.xlu0 %v1775_v23, %s9518_s21  ;;  %v2074_v41 = vor.u32 %v2073_v52, %v2070_v34  ;;  %v3548_v30 = vrot.slane %v3546_v54, 3  ;;  %v3551_v28 = vrot.slane %v3549_v46, 4  ;;  %v3191_v32 = vsel %vm3159_vm7, %v3126_v35, %v2530_v55 }
 0x274   : > { %2027 = vrot.lane.b32.xlu1 %v8840_v59, %s9521_s18  ;;  %v12180_v10 = vpop.permute.xlu1 %2345  ;;  %v3189_v43 = vsel %vm3159_vm7, %v3124_v20, %v11866_v24  ;;  %v2722_v59 = vpop.permute.xlu0 %2721  ;;  %v3556_v63 = vrot.slane %v3554_v62, 3  ;;  %v3559_v0 = vrot.slane %v3557_v42, 4  ;;  %v12185_v53 = vcombine.low %v1292_v6, %v12173_v33 }
 0x275   : > { %v3247_v39 = vsel %vm3224_vm9, %v3189_v43, %v2722_v59  ;;  %v3248_v47 = vsel %vm3224_vm9, %v3191_v32, %v2722_v59  ;;  %v2690_v34 = vor.u32 %v2689_v14, %v2686_v16  ;;  %v7973_v56 = vrot.slane %v7972_v50, 4 }
 0x276   : > { %v3498_v52 = vshrl.u32 %v3247_v39, 16  ;;  %v3501_v54 = vshll.u32 %v3247_v39, 16  ;;  %v3505_v46 = vshrl.u32 %v3248_v47, 16  ;;  %v3508_v55 = vshll.u32 %v3248_v47, 16 }
 0x277   : > { %v7979_v24 = vsel %vm7096_vm1, %v12134_v26, 0.0  ;;  %2733 = vrot.lane.b32.xlu0 %v2690_v34, %s9523_s14  ;;  %v8817_v62 = vcombine.low %v12080_v17, %v12080_v17  ;;  %v3560_v32 = vor.u32 %v3559_v0, %v3556_v63  ;;  %v2164_v43 = vshrl.u32 %v12185_v53, 16 }
 0x278   : > { %2183 = vrot.lane.b32.xlu1 %v2074_v41, %s9524_s27  ;;  %v3500_v42 = vrot.slane %v3498_v52, 3  ;;  %v3503_v20 = vrot.slane %v3501_v54, 4  ;;  %v3507_v16 = vrot.slane %v3505_v46, 3  ;;  %v3510_v14 = vrot.slane %v3508_v55, 4  ;;  %v12196_v23 = vpop.permute.xlu1 %1821  ;;  %v12198_v35 = vpop.permute.xlu0 %2195  ;;  %v1320_v46 = vld [vmem:[#allocation2 + $0x64] sm:$0x8] }
 0x279   : > { %v3552_v41 = vor.u32 %v3551_v28, %v3548_v30  ;;  %v2167_v59 = vshll.u32 %v12185_v53, 16  ;;  %v7960_v39 = vadd.f32 %v7959_v27, %v7958_v3  ;;  %v7980_v47 = vrot.slane %v7979_v24, 4  ;;  %v1209_v28 = vld [vmem:[#allocation2 + $0xc4] sm:$0x8] }
 0x27a   : > { %v3504_v34 = vor.u32 %v3503_v20, %v3500_v42  ;;  %v3511_v6 = vor.u32 %v3510_v14, %v3507_v16  ;;  %v14480_v17 = vrot.slane %v12093_v18, 5  ;;  %v14481_v52 = vpack.c.bf16 %v11965_v7, %v11965_v7  ;;  %v12229_v14 = vld [vmem:[#allocation2 + $0x170] sm:$0xf] }
 0x27b   : > { %v14483_v0 = vpack.c.bf16 %v11992_v9, %v11992_v9  ;;  %v7907_v30 = vrot.slane %v12128_v25, 1  ;;  %v14485_v3 = vrot.slane %v12036_v48, 4  ;;  %1981 = vrot.lane.b32.xlu0 %v8817_v62, %s9521_s18  ;;  %v7974_v55 = vadd.f32 %v7973_v56, %v7972_v50  ;;  %v9334_v56 = vld [vmem:[#allocation2 + $0x58] ss:$0 sps:$4 sm:$0x11]  }
 0x27c   : > { %2315 = vrot.lane.b32.xlu1 %v14480_v17, %s9522_s16  ;;  %v12208_v54 = vunpack.c.l.b16 %v14481_v52  ;;  %v12223_v42 = vpop.permute.xlu1 %2339  ;;  %v12225_v20 = vpop.permute.xlu0 %1668  ;;  %v3512_v9 = vsel %vm3273_vm13, %v3504_v34, %v3511_v6  ;;  %v14196_v16 = vrot.slane %v12185_v53, 5  ;;  %v12231_v17 = vld [vmem:[#allocation2 + $0x174] sm:$0xf]  ;;  %v8841_v62 = vcombine.low %v12173_v33, %v12173_v33  ;;  %v9340_v33 = vld [vmem:[#allocation2 + $0x118] ss:$0 sps:$4 sm:$0x11]  }
 0x27d   : > { %v12213_v63 = vunpack.c.l.b16 %v14483_v0  ;;  %v12219_v27 = vadd.f32 %v14485_v3, %v12036_v48  ;;  %4011 = vmatmul.mubr.bf16.gmra.mxu1 %v3512_v9  ;;  %v3561_v48 = vsel %vm3273_vm13, %v3552_v41, %v3560_v32  ;;  %v2166_v52 = vrot.slane %v2164_v43, 4  ;;  %v9395_v41 = vld [vmem:[#allocation2 + $0xc8] sm:$0xf] }
 0x27e   : > { %14482 = vst [vmem:[#allocation43_spill] sm:$0xff] %v12208_v54  ;;  %v2169_v50 = vrot.slane %v2167_v59, 5  ;;  %v14487_v0 = vrot.slane %v12118_v61, 2  ;;  %v7961_v6 = vrot.slane %v7960_v39, 2  ;;  %v12241_v34 = vadd.f32 %v7980_v47, %v7979_v24  ;;  %8957 = vmatprep.mubr.msk.bf16.mxu1 %vm2835_vm12, %v3561_v48  ;;  %v14490_v24 = vld [vmem:[#allocation99_spill] sm:$0xff] }
 0x27f   : > { %14484 = vst [vmem:[#allocation57_spill] sm:$0xff] %v12213_v63  ;;  %14486 = vst [vmem:[#allocation59_spill] sm:$0xff] %v12219_v27  ;;  %v14489_v7 = vcombine.high %v12134_v26, %v12134_v26  ;;  %v8764_v32 = vcombine.low %v1209_v28, %v9395_v41  ;;  %2029 = vrot.lane.b32.xlu0 %v8841_v62, %s9521_s18  ;;  %v2596_v59 = vshrl.u32 %v14490_v24, 16  ;;  %v2599_v41 = vshll.u32 %v14490_v24, 16  ;;  %v1356_v54 = vld [vmem:[#allocation2 + $0x184] sm:$0x8] }
 0x280   : > { %v12239_v3 = vadd.f32 %v14487_v0, %v12118_v61  ;;  %2363 = vrot.lane.b32.xlu1 %v14196_v16, %s9522_s16  ;;  %v9396_v61 = vld [vmem:[#allocation2 + $0xcc] sm:$0xf]  ;;  %v12257_v26 = vcombine.low %v12229_v14, %v12231_v17  ;;  %v12260_v47 = vadd.f32 %v7907_v30, %v12128_v25  ;;  %v12262_v48 = vpop.permute.xlu1 %1815  ;;  %v12264_v0 = vpop.permute.xlu0 %2541  ;;  %v9397_v16 = vld [vmem:[#allocation2 + $0x68] sm:$0xf]  ;;  %v2170_v63 = vor.u32 %v2169_v50, %v2166_v52 }
 0x281   : > { %v12247_v9 = vsel %vm7096_vm1, %v14489_v7, 0.0  ;;  %v8765_v43 = vcombine.low %v9396_v61, %v9396_v61  ;;  %v7975_v7 = vrot.slane %v7974_v55, 2  ;;  %v8880_v28 = vcombine.low %v1320_v46, %v9397_v16  ;;  %v1357_v27 = vld [vmem:[#allocation2 + $0x188] sm:$0xf] }
 0x282   : > { %14488 = vst [vmem:[#allocation58_spill] sm:$0xff] %v12239_v3  ;;  %14491 = vst [vmem:[#allocation53_spill] sm:$0xff] %v12260_v47  ;;  %v2878_v62 = vsel %vm2835_vm12, %v8764_v32, %v12101_v37  ;;  %v2266_v25 = vrot.slane %v9334_v56, 5  ;;  %v12271_v30 = vadd.f32 %v7961_v6, %v7960_v39  ;;  %v2814_v40 = vrot.slane %v11661_v13, 5 }
 0x283   : > { %v2880_v61 = vsel %vm2835_vm12, %v8765_v43, %v12101_v37  ;;  %v9335_v46 = vld [vmem:[#allocation2 + $0x178] ss:$0 sps:$4 sm:$0x11]   ;;  %v2815_v16 = vrot.slane %v9340_v33, 5  ;;  %2207 = vrot.lane.b32.xlu0 %v2170_v63, %s9524_s27  ;;  %v2598_v32 = vrot.slane %v2596_v59, 4  ;;  %v1643_v37 = vshrl.u32 %v12257_v26, 16 }
 0x284   : > { %2507 = vrot.lane.b32.xlu1 %v8880_v28, %s9520_s24  ;;  %v1646_v52 = vshll.u32 %v12257_v26, 16  ;;  %v2949_v39 = vsel %vm588_vm0, %v2878_v62, %v11799_v19  ;;  %v2951_v50 = vsel %vm588_vm0, %v2880_v61, %v11926_v44  ;;  %v12284_v13 = vpop.permute.xlu1 %2539  ;;  %v12286_v56 = vpop.permute.xlu0 %2017  ;;  %v8904_v6 = vcombine.low %v1356_v54, %v1357_v27  ;;  %v12288_v43 = vld [vmem:[#allocation2 + $0x18c] sm:$0xf]  ;;  %v1212_v28 = vld [vmem:[#allocation2 + $0xdc] sm:$0x8] }
 0x285   : > { %v2601_v33 = vrot.slane %v2599_v41, 5  ;;  %v12290_v63 = vadd.f32 %v7975_v7, %v7974_v55  ;;  %v3016_v59 = vsel %vm2980_vm14, %v2951_v50, %v12162_v22  ;;  %v14492_v47 = vrot.slane %v12093_v18, 5  ;;  %v9398_v62 = vld [vmem:[#allocation2 + $0x6c] sm:$0xf] }
 0x286   : > { %v8881_v44 = vcombine.low %v9398_v62, %v9398_v62  ;;  %v3072_v61 = vsel %vm3045_vm15, %v3016_v59, %v12198_v35  ;;  %v2302_v54 = vrot.slane %v9335_v46, 5  ;;  %v9339_v41 = vld [vmem:[#allocation2 + $0x178] ss:$0 sps:$4 sm:$0x11]   ;;  %v2816_v55 = vsel %vm1730_vm5, %v2814_v40, %v2815_v16  ;;  %v9399_v59 = vld [vmem:[#allocation2 + $0xe0] sm:$0xf] }
 0x287   : > { %v2267_v19 = vsel %vm1730_vm5, %v14492_v47, %v2266_v25  ;;  %v3578_v7 = vshrl.u32 %v2814_v40, 16  ;;  %v3014_v22 = vsel %vm2980_vm14, %v2949_v39, %v11894_v36  ;;  %v1645_v18 = vrot.slane %v1643_v37, 4 }
 0x288   : > { %2555 = vrot.lane.b32.xlu1 %v8904_v6, %s9520_s24  ;;  %2317 = vrot.lane.b32.xlu0 %v2267_v19, %s9522_s16  ;;  %v1648_v50 = vrot.slane %v1646_v52, 5  ;;  %v12305_v47 = vcombine.low %v1357_v27, %v12288_v43  ;;  %v3071_v25 = vsel %vm3045_vm15, %v3014_v22, %v12198_v35  ;;  %v8766_v6 = vcombine.low %v1212_v28, %v9399_v59  ;;  %v12309_v46 = vpop.permute.xlu1 %2015  ;;  %v12311_v62 = vpop.permute.xlu0 %2351 }
 0x289   : > { %v2602_v16 = vor.u32 %v2601_v33, %v2598_v32  ;;  %v3581_v24 = vshll.u32 %v2814_v40, 16  ;;  %v3130_v36 = vsel %vm3094_vm6, %v3072_v61, %v12084_v38  ;;  %v3128_v37 = vsel %vm3094_vm6, %v3071_v25, %v12223_v42 }
 0x28a   : > { %v3586_v52 = vshrl.u32 %v2816_v55, 16  ;;  %v3589_v27 = vshll.u32 %v2816_v55, 16  ;;  %v14493_v35 = vrot.slane %v12185_v53, 5  ;;  %v1776_v28 = vrot.slane %v12257_v26, 5 }
 0x28b   : > { %v1777_v19 = vrot.slane %v9339_v41, 5  ;;  %v12322_v22 = vrot.slane %v3578_v7, 3  ;;  %v2883_v40 = vsel %vm2835_vm12, %v8766_v6, %v12225_v20  ;;  %v1649_v38 = vor.u32 %v1648_v50, %v1645_v18 }
 0x28c   : > { %2711 = vrot.lane.b32.xlu1 %v2602_v16, %s9523_s14  ;;  %v2303_v39 = vsel %vm1730_vm5, %v14493_v35, %v2302_v54  ;;  %v2692_v42 = vshrl.u32 %v12305_v47, 16  ;;  %v2695_v32 = vshll.u32 %v12305_v47, 16  ;;  %v2953_v53 = vsel %vm588_vm0, %v2883_v40, %v12262_v48  ;;  %v2724_v33 = vpop.permute.xlu1 %2723  ;;  %v12337_v18 = vpop.permute.xlu0 %1829  ;;  %v9347_v35 = vld [vmem:[#allocation2 + $0x130] ss:$0 sps:$4 sm:$0x11]  }
 0x28d   : > { %2365 = vrot.lane.b32.xlu0 %v2303_v39, %s9522_s16  ;;  %v3193_v61 = vsel %vm3159_vm7, %v3128_v37, %v12010_v5  ;;  %v3195_v54 = vsel %vm3159_vm7, %v3130_v36, %v11982_v58  ;;  %v3583_v41 = vrot.slane %v3581_v24, 4  ;;  %v3588_v50 = vrot.slane %v3586_v52, 3  ;;  %v12348_v37 = vld [vmem:[#allocation2 + $0x1a0] sm:$0xf]  ;;  %v12350_v52 = vld [vmem:[#allocation2 + $0x1a4] sm:$0xf] }
 0x28e   : > { %v3250_v55 = vsel %vm3224_vm9, %v3193_v61, %v2724_v33  ;;  %v3251_v7 = vsel %vm3224_vm9, %v3195_v54, %v2724_v33  ;;  %v3591_v25 = vrot.slane %v3589_v27, 4  ;;  %v3018_v58 = vsel %vm2980_vm14, %v2953_v53, %v12040_v49  ;;  %v1215_v33 = vld [vmem:[#allocation2 + $0xf4] sm:$0x8]  ;;  %v12359_v61 = vld [vmem:[#allocation2 + $0x188] sm:$0xf] }
 0x28f   : > { %v3530_v59 = vshrl.u32 %v3250_v55, 16  ;;  %v3533_v6 = vshll.u32 %v3250_v55, 16  ;;  %v3537_v16 = vshrl.u32 %v3251_v7, 16  ;;  %v3540_v48 = vshll.u32 %v3251_v7, 16  ;;  %v1296_v54 = vld [vmem:[#allocation2 + $0x18c] sm:$0xf] }
 0x290   : > { %1680 = vrot.lane.b32.xlu1 %v1649_v38, %s9519_s15  ;;  %v8905_v5 = vcombine.low %v12288_v43, %v12288_v43  ;;  %v1778_v24 = vsel %vm1730_vm5, %v1776_v28, %v1777_v19  ;;  %v2694_v36 = vrot.slane %v2692_v42, 4  ;;  %v12356_v43 = vpop.permute.xlu0 %2349  ;;  %v3584_v53 = vor.u32 %v3583_v41, %v12322_v22 }
 0x291   : > { %2509 = vrot.lane.b32.xlu0 %v8881_v44, %s9520_s24  ;;  %v3532_v27 = vrot.slane %v3530_v59, 3  ;;  %v3535_v39 = vrot.slane %v3533_v6, 4  ;;  %v3539_v40 = vrot.slane %v3537_v16, 3  ;;  %v3542_v38 = vrot.slane %v3540_v48, 4  ;;  %v12352_v44 = vpop.permute.xlu1 %2197 }
 0x292   : > { %v3074_v49 = vsel %vm3045_vm15, %v3018_v58, %v12352_v44  ;;  %v3592_v19 = vor.u32 %v3591_v25, %v3588_v50  ;;  %v2697_v42 = vrot.slane %v2695_v32, 5  ;;  %v12368_v6 = vcombine.low %v12348_v37, %v12350_v52  ;;  %v9400_v32 = vld [vmem:[#allocation2 + $0xe4] sm:$0xf]  ;;  %v9401_v50 = vld [vmem:[#allocation2 + $0xf8] sm:$0xf] }
 0x293   : > { %v3536_v55 = vor.u32 %v3535_v39, %v3532_v27  ;;  %v3543_v7 = vor.u32 %v3542_v38, %v3539_v40  ;;  %v12363_v59 = vsel %vm3094_vm6, %v3074_v49, %v12042_v57  ;;  %v7963_v16 = vrot.slane %v12271_v30, 1 }
 0x294   : > { %1841 = vrot.lane.b32.xlu1 %v1778_v24, %s9518_s21  ;;  %v12372_v22 = vrot.slane %v11816_v60, 5  ;;  %v8767_v41 = vcombine.low %v9400_v32, %v9400_v32  ;;  %v8768_v25 = vcombine.low %v1215_v33, %v9401_v50  ;;  %v8843_v58 = vcombine.low %v1296_v54, %v1296_v54 }
 0x295   : > { %2557 = vrot.lane.b32.xlu0 %v8905_v5, %s9520_s24  ;;  %v12375_v48 = vpop.permute.xlu1 %1670  ;;  %v3544_v57 = vsel %vm3273_vm13, %v3536_v55, %v3543_v7  ;;  %v12379_v24 = vcombine.low %v12359_v61, %v1296_v54  ;;  %v2818_v27 = vrot.slane %v9347_v35, 5  ;;  %v14494_v39 = vrot.slane %v12131_v15, 1  ;;  %v12388_v5 = vpop.permute.xlu0 %1825  ;;  %v9352_v55 = vld [vmem:[#allocation2 + $0x160] ss:$0 sps:$4 sm:$0x11]  }
 0x296   : > { %v2888_v40 = vsel %vm2835_vm12, %v8768_v25, %v12375_v48  ;;  %4019 = vmatmul.mubr.bf16.gmra.mxu1 %v3544_v57  ;;  %v3593_v38 = vsel %vm3273_vm13, %v3584_v53, %v3592_v19  ;;  %v2698_v33 = vor.u32 %v2697_v42, %v2694_v36  ;;  %v2885_v49 = vsel %vm2835_vm12, %v8767_v41, %v12225_v20 }
 0x297   : > { %v12384_v60 = vadd.f32 %v14494_v39, %v12131_v15  ;;  %v2957_v35 = vsel %vm588_vm0, %v2888_v40, %v12064_v45  ;;  %8958 = vmatprep.mubr.msk.bf16.mxu1 %vm2835_vm12, %v3593_v38  ;;  %v2700_v15 = vshrl.u32 %v12368_v6, 16  ;;  %v2703_v54 = vshll.u32 %v12368_v6, 16  ;;  %v1359_v45 = vld [vmem:[#allocation2 + $0x19c] sm:$0x8] }
 0x298   : > { %2033 = vrot.lane.b32.xlu1 %v8843_v58, %s9521_s18  ;;  %v14496_v53 = vrot.slane %v12241_v34, 2  ;;  %v14498_v20 = vrot.slane %v12247_v9, 4  ;;  %v12413_v42 = vsel %vm2980_vm14, %v2957_v35, %v12164_v1  ;;  %v12416_v7 = vadd.f32 %v7963_v16, %v12271_v30  ;;  %v1294_v1 = vld [vmem:[#allocation2 + $0x184] sm:$0x8]  ;;  %v14502_v39 = vld [vmem:[#allocation67_spill] sm:$0xff] }
 0x299   : > { %14495 = vst [vmem:[#allocation54_spill] sm:$0xff] %v12384_v60  ;;  %2735 = vrot.lane.b32.xlu0 %v2698_v33, %s9523_s14  ;;  %v2538_v41 = vpop.permute.xlu1 %2537  ;;  %v2819_v50 = vsel %vm1730_vm5, %v12372_v22, %v2818_v27  ;;  %v2955_v57 = vsel %vm588_vm0, %v2885_v49, %v12103_v31  ;;  %v12427_v58 = vpop.permute.xlu0 %2543  ;;  %v2172_v30 = vshrl.u32 %v12379_v24, 16  ;;  %v2175_v16 = vshll.u32 %v12379_v24, 16  ;;  %v9349_v35 = vld [vmem:[#allocation2 + $0x148] ss:$0 sps:$4 sm:$0x11]  }
 0x29a   : > { %v12403_v36 = vadd.f32 %v14496_v53, %v12241_v34  ;;  %v12408_v19 = vadd.f32 %v14498_v20, %v12247_v9  ;;  %14500 = vst [vmem:[#allocation55_spill] sm:$0xff] %v12416_v7  ;;  %v14199_v34 = vrot.slane %v12379_v24, 5  ;;  %v14501_v9 = vld [vmem:[#allocation65_spill] sm:$0xff]  ;;  %v12432_v40 = vmul.f32 0.25, %v14502_v39  ;;  %v1221_v49 = vld [vmem:[#allocation2 + $0x124] sm:$0x8] }
 0x29b   : > { %v12423_v25 = vmul.f32 0.25, %v14501_v9  ;;  %v8906_v27 = vcombine.low %v1359_v45, %v12348_v37  ;;  %v2702_v38 = vrot.slane %v2700_v15, 4  ;;  %v2705_v33 = vrot.slane %v2703_v54, 5  ;;  %v9403_v60 = vld [vmem:[#allocation2 + $0x128] sm:$0xf] }
 0x29c   : > { %14497 = vst [vmem:[#allocation47_spill] sm:$0xff] %v12403_v36  ;;  %14499 = vst [vmem:[#allocation73_spill] sm:$0xff] %v12408_v19  ;;  %2367 = vrot.lane.b32.xlu1 %v14199_v34, %s9522_s16  ;;  %v12439_v31 = vrot.slane %v11874_v29, 5  ;;  %v3610_v53 = vshrl.u32 %v12372_v22, 16  ;;  %v3613_v20 = vshll.u32 %v12372_v22, 16  ;;  %v3618_v9 = vshrl.u32 %v2819_v50, 16 }
 0x29d   : > { %1839 = vrot.lane.b32.xlu0 %v1776_v28, %s9518_s21  ;;  %v12447_v39 = vrot.slane %v11959_v4, 5  ;;  %v3020_v37 = vsel %vm2980_vm14, %v2955_v57, %v12012_v11  ;;  %v12451_v15 = vpop.permute.xlu1 %2013  ;;  %v9402_v29 = vld [vmem:[#allocation2 + $0x12c] sm:$0xf]  ;;  %v3621_v45 = vshll.u32 %v2819_v50, 16  ;;  %v1675_v28 = vpop.permute.xlu0 %1674  ;;  %v8842_v32 = vcombine.low %v1294_v1, %v12359_v61  ;;  %s9525_s21 = smov [#allocation6]  }
 0x29e   : > { %v8773_v54 = vcombine.low %v9402_v29, %v9402_v29  ;;  %v3075_v26 = vsel %vm3045_vm15, %v3020_v37, %v12352_v44  ;;  %v2174_v22 = vrot.slane %v2172_v30, 4  ;;  %v2177_v34 = vrot.slane %v2175_v16, 5  ;;  %v9346_v57 = vld [vmem:[#allocation2 + $0x190] ss:$0 sps:$4 sm:$0x11]   ;;  %s9451_s15 = sshll.u32 %s9525_s21, 4  ;;  %s9452_s15 = int_to_ptr.vmem [resolvable:$false] %s9451_s15 }
 0x29f   : > { %v8772_v4 = vcombine.low %v1221_v49, %v9403_v60  ;;  %v2706_v11 = vor.u32 %v2705_v33, %v2702_v38  ;;  %v2821_v19 = vrot.slane %v9349_v35, 5  ;;  %v3612_v50 = vrot.slane %v3610_v53, 3 }
 0x2a0   : > { %v2900_v7 = vsel %vm2835_vm12, %v8773_v54, %v1675_v28  ;;  %2559 = vrot.lane.b32.xlu1 %v8906_v27, %s9520_s24  ;;  %v3615_v29 = vrot.slane %v3613_v20, 4  ;;  %v3620_v3 = vrot.slane %v3618_v9, 3  ;;  %v3134_v61 = vsel %vm3094_vm6, %v3075_v26, %v12180_v10 }
 0x2a1   : > { %2031 = vrot.lane.b32.xlu0 %v8842_v32, %s9521_s18  ;;  %v12461_v44 = vsel %vm588_vm0, %v2900_v7, %v12337_v18  ;;  %v2898_v60 = vsel %vm2835_vm12, %v8772_v4, %v1675_v28  ;;  %v1828_v1 = vpop.permute.xlu1 %1827  ;;  %v3623_v30 = vrot.slane %v3621_v45, 4  ;;  %v2824_v16 = vrot.slane %v9352_v55, 5  ;;  %v2726_v33 = vpop.permute.xlu0 %2725 }
 0x2a2   : > { %v3199_v27 = vsel %vm3159_vm7, %v3134_v61, %v2538_v41  ;;  %v12468_v38 = vsel %vm588_vm0, %v2898_v60, %v1828_v1  ;;  %v3197_v32 = vsel %vm3159_vm7, %v12363_v59, %v12142_v12  ;;  %v2178_v18 = vor.u32 %v2177_v34, %v2174_v22 }
 0x2a3   : > { %v3253_v7 = vsel %vm3224_vm9, %v3197_v32, %v2726_v33  ;;  %v3254_v10 = vsel %vm3224_vm9, %v3199_v27, %v2726_v33  ;;  %v2305_v35 = vrot.slane %v9346_v57, 5  ;;  %v2822_v55 = vsel %vm1730_vm5, %v12447_v39, %v2821_v19  ;;  %v14506_v32 = vld [vmem:[#allocation66_spill] sm:$0xff] }
 0x2a4   : > { %2737 = vrot.lane.b32.xlu1 %v2706_v11, %s9523_s14  ;;  %v3562_v41 = vshrl.u32 %v3253_v7, 16  ;;  %v3565_v49 = vshll.u32 %v3253_v7, 16  ;;  %v3569_v53 = vshrl.u32 %v3254_v10, 16  ;;  %v3572_v20 = vshll.u32 %v3254_v10, 16  ;;  %v1191_v7 = vld [vmem:[#allocation2 + $0x34] sm:$0x8] }
 0x2a5   : > { %2209 = vrot.lane.b32.xlu0 %v2178_v18, %s9524_s27  ;;  %v12479_v9 = vpop.permute.xlu1 %2353  ;;  %v3616_v12 = vor.u32 %v3615_v29, %v3612_v50  ;;  %v3624_v59 = vor.u32 %v3623_v30, %v3620_v3  ;;  %v8907_v34 = vcombine.low %v12350_v52, %v12350_v52  ;;  %v2825_v37 = vsel %vm1730_vm5, %v12439_v31, %v2824_v16  ;;  %v12485_v28 = vpop.permute.xlu0 %2199  ;;  %s9020_s27 = sshll.u32 %s9619_s29, 10  ;;  %s8585_s29 = scalar_lea.sflag [#allocation5], %s9695_s13 }
 0x2a6   : > { %v3564_v54 = vrot.slane %v3562_v41, 3  ;;  %v3567_v45 = vrot.slane %v3565_v49, 4  ;;  %v3571_v26 = vrot.slane %v3569_v53, 3  ;;  %v3574_v19 = vrot.slane %v3572_v20, 4  ;;  %s14043_s22 = scalar_lea.hbm %s14656_s19, %s9020_s27 }
 0x2a7   : > { %v14503_v22 = vrot.slane %v12379_v24, 5  ;;  %v3642_v11 = vshrl.u32 %v12447_v39, 16  ;;  %v3645_v3 = vshll.u32 %v12447_v39, 16  ;;  %v3650_v57 = vshrl.u32 %v2822_v55, 16 }
 0x2a8   : > { %v3568_v50 = vor.u32 %v3567_v45, %v3564_v54  ;;  %v3575_v52 = vor.u32 %v3574_v19, %v3571_v26  ;;  %v3653_v29 = vshll.u32 %v2822_v55, 16  ;;  %v3674_v61 = vshrl.u32 %v12439_v31, 16  ;;  %v9404_v55 = vld [vmem:[#allocation2 + $0xfc] sm:$0xf]  ;;  %v9405_v45 = vld [vmem:[#allocation2 + $0x38] sm:$0xf] }
 0x2a9   : > { %v2306_v4 = vsel %vm1730_vm5, %v14503_v22, %v2305_v35  ;;  %v12495_v1 = vpop.permute.xlu1 %2347  ;;  %v3677_v24 = vshll.u32 %v12439_v31, 16  ;;  %v3682_v30 = vshrl.u32 %v2825_v37, 16  ;;  %v3685_v16 = vshll.u32 %v2825_v37, 16  ;;  %v12508_v10 = vpop.permute.xlu0 %1672  ;;  %v9353_v53 = vld [vmem:[#allocation2 + $0x178] ss:$0 sps:$4 sm:$0x11]  }
 0x2aa   : > { %2369 = vrot.lane.b32.xlu0 %v2306_v4, %s9522_s16  ;;  %v14504_v27 = vrot.slane %v12290_v63, 1  ;;  %v12504_v33 = vmul.f32 0.25, %v14506_v32  ;;  %v8241_v18 = vpack.c.bf16 %v12423_v25, %v12423_v25  ;;  %v3576_v35 = vsel %vm3273_vm13, %v3568_v50, %v3575_v52  ;;  %v9354_v50 = vld [vmem:[#allocation2 + $0x190] ss:$0 sps:$4 sm:$0x11]   ;;  %s8679_s16 = sshll.u32 %s9695_s13, 6 }
 0x2ab   : > { %v8242_v31 = vpack.c.bf16 %v12432_v40, %v12432_v40  ;;  %v8769_v41 = vcombine.low %v9404_v55, %v9404_v55  ;;  %4027 = vmatmul.mubr.bf16.gmra.mxu1 %v3576_v35  ;;  %v3644_v49 = vrot.slane %v3642_v11, 3  ;;  %v3647_v25 = vrot.slane %v3645_v3, 4  ;;  %v9406_v11 = vld [vmem:[#allocation2 + $0x3c] sm:$0xf]  ;;  %s14024_s14 = scalar_lea.vmem [#allocation6], %s8679_s16 }
 0x2ac   : > { %v12501_v39 = vadd.f32 %v14504_v27, %v12290_v63  ;;  %14507 = vst [vmem:[#allocation102_spill] sm:$0xff] %v12504_v33  ;;  %v3625_v63 = vsel %vm3273_vm13, %v3616_v12, %v3624_v59  ;;  %v3652_v20 = vrot.slane %v3650_v57, 3  ;;  %v3655_v37 = vrot.slane %v3653_v29, 4  ;;  %v14510_v29 = vld [vmem:[#allocation48_spill] sm:$0xff]  ;;  %v12546_v55 = vld [vmem:[#allocation2 + $0x13c] sm:$0x8] }
 0x2ad   : > { %8959 = vmatprep.mubr.msk.bf16.mxu1 %vm2835_vm12, %v3625_v63  ;;  %v3676_v54 = vrot.slane %v3674_v61, 3  ;;  %v8752_v26 = vcombine.low %v1191_v7, %v9405_v45  ;;  %v12516_v19 = vpop.permute.xlu1 %1823  ;;  %v3679_v40 = vrot.slane %v3677_v24, 4  ;;  %v3684_v22 = vrot.slane %v3682_v30, 3  ;;  %v12524_v3 = vpop.permute.xlu0 %2549  ;;  %v1218_v30 = vld [vmem:[#allocation2 + $0x10c] sm:$0x8]  ;;  %s8598_s23 = sshll.u32 %s14024_s14, 4  ;;  %s14045_s23 = int_to_ptr.vmem [resolvable:$true] %s8598_s23 }
 0x2ae   : > { %14505 = vst [vmem:[#allocation60_spill] sm:$0xff] %v12501_v39  ;;  %2561 = vrot.lane.b32.xlu0 %v8907_v34, %s9520_s24  ;;  %v3687_v4 = vrot.slane %v3685_v16, 4  ;;  %v12520_v59 = vunpack.c.l.b16 %v8241_v18  ;;  %v8753_v52 = vcombine.low %v9406_v11, %v9406_v11  ;;  %v2890_v34 = vsel %vm2835_vm12, %v8769_v41, %v12375_v48  ;;  %v12540_v7 = vld [vmem:[#allocation2 + $0x154] sm:$0x8]  ;;  %v12573_v11 = vld [vmem:[#allocation2 + $0x144] sm:$0xf]  ;;  %p9454_p5 = scmp.lt.s32.totalorder %s14045_s23, %s9452_s15 }
 0x2af   : > { %v12526_v57 = vunpack.c.l.b16 %v8242_v31  ;;  %v12530_v61 = vsel %vm2835_vm12, %v8752_v26, %v14510_v29  ;;  %v2826_v24 = vrot.slane %v12113_v21, 5  ;;  %v2827_v16 = vrot.slane %v9353_v53, 5  ;;  %v12557_v26 = vld [vmem:[#allocation2 + $0x158] sm:$0xf]  ;;  %s9447_s30 = scalar_lea.vmem %s14045_s23, 1024  ;;  %s9453_s24 = scalar_lea.vmem %s9452_s15, 2048 }
 0x2b0   : > { %14508 = vst [vmem:[#allocation62_spill] sm:$0xff] %v12520_v59  ;;  %v12535_v27 = vsel %vm2835_vm12, %v8753_v52, %v14510_v29  ;;  %v12538_v32 = vrot.slane %v12305_v47, 5  ;;  %v3648_v48 = vor.u32 %v3647_v25, %v3644_v49  ;;  %v3656_v18 = vor.u32 %v3655_v37, %v3652_v20  ;;  %v9407_v49 = vld [vmem:[#allocation2 + $0x110] sm:$0xf]  ;;  %v9408_v20 = vld [vmem:[#allocation2 + $0x114] sm:$0xf]  ;;  %p9448_p11 = scmp.ne.s32.totalorder %s14045_s23, %s9447_s30  ;;  %p9455_p7 = scmp.lt.s32.totalorder %s9453_s24, %s9447_s30 }
 0x2b1   : > { %14509 = vst [vmem:[#allocation63_spill] sm:$0xff] %v12526_v57  ;;  %v2959_v35 = vsel %vm588_vm0, %v2890_v34, %v12196_v23  ;;  %v12544_v31 = vpop.permute.xlu1 %2547  ;;  %v3680_v21 = vor.u32 %v3679_v40, %v3676_v54  ;;  %v3688_v41 = vor.u32 %v3687_v4, %v3684_v22  ;;  %v2830_v63 = vrot.slane %v9354_v50, 5  ;;  %v12553_v45 = vpop.permute.xlu0 %2025  ;;  %v12561_v40 = vld [vmem:[#allocation2 + $0x15c] sm:$0xf]  ;;  %v12569_v4 = vld [vmem:[#allocation2 + $0x140] sm:$0xf] }
 0x2b2   : > { %v3024_v53 = vsel %vm2980_vm14, %v2959_v35, %v12451_v15  ;;  %v12551_v47 = vrot.slane %v12368_v6, 5  ;;  %v8770_v25 = vcombine.low %v1218_v30, %v9407_v49  ;;  %v8771_v37 = vcombine.low %v9408_v20, %v9408_v20  ;;  %v12577_v29 = vld [vmem:[#allocation2 + $0x16c] sm:$0x8]  ;;  %p9449_p13 = pnand %p9448_p11, %p14657_p12  ;;  %p9456_p8 = por %p9455_p7, %p9454_p5 }
 0x2b3   : > { %v3078_v23 = vsel %vm3045_vm15, %v3024_v53, %v12485_v28  ;;  %v2828_v15 = vsel %vm1730_vm5, %v2826_v24, %v2827_v16  ;;  %v12567_v22 = vsel %vm3273_vm13, %v3648_v48, %v3656_v18  ;;  %v3706_v34 = vshrl.u32 %v2826_v24, 16 }
 0x2b4   : > { %v3077_v30 = vsel %vm3045_vm15, %v12413_v42, %v12485_v28  ;;  %v12585_v48 = vsel %vm3273_vm13, %v3680_v21, %v3688_v41  ;;  %v3709_v18 = vshll.u32 %v2826_v24, 16  ;;  %v2831_v35 = vsel %vm1730_vm5, %v12538_v32, %v2830_v63  ;;  %v12600_v28 = vld [vmem:[%s14097_s5] ss:$0 sm:$0xff]  ;;  %p9450_p4 = pneg %p9449_p13 }
 0x2b5   : > { %v12582_v16 = vpop.permute.xlu1 %2023  ;;  %v3138_v53 = vsel %vm3094_vm6, %v3078_v23, %v12356_v43  ;;  %v3136_v49 = vsel %vm3094_vm6, %v3077_v30, %v12495_v1  ;;  %v12593_v20 = vpop.permute.xlu0 %2021  ;;  %v3714_v12 = vshrl.u32 %v2828_v15, 16  ;;  %vm4897_vm1 = vcmask 123904   ;;  %v12619_v1 = vld [vmem:[%s14098_s6] ss:$0 sm:$0xff] }
 0x2b6   : > { %v3717_v24 = vshll.u32 %v2828_v15, 16  ;;  %v3738_v21 = vshrl.u32 %v12538_v32, 16  ;;  %v3741_v43 = vshll.u32 %v12538_v32, 16  ;;  %v2893_v41 = vsel %vm2835_vm12, %v8770_v25, %v12508_v10  ;;  %v3956_v52 = vpop.f32.mrf.mxu0  ;;  %p9457_p10 = pnand %p9456_p8, %p9450_p4 }
 0x2b7   : > { %v12608_v63 = vrot.slane %v3706_v34, 3  ;;  %v3746_v23 = vshrl.u32 %v2831_v35, 16  ;;  %v3749_v30 = vshll.u32 %v2831_v35, 16  ;;  %v2961_v60 = vsel %vm588_vm0, %v2893_v41, %v12516_v19 }
 0x2b8   : > { %v3201_v15 = vsel %vm3159_vm7, %v3136_v49, %v12284_v13  ;;  %v3203_v32 = vsel %vm3159_vm7, %v3138_v53, %v12264_v0  ;;  %v12621_v25 = vrot.slane %v3709_v18, 4  ;;  %v4090_v41 = vmul.f32 %v12600_v28, %v3956_v52  ;;  %v3958_v6 = vpop.f32.mrf.mxu0 }
 0x2b9   : > { %v2728_v42 = vpop.permute.xlu1 %2727  ;;  %v12625_v19 = vpop.permute.xlu0 %2361  ;;  %v12628_v13 = vrot.slane %v3714_v12, 3  ;;  %v2895_v54 = vsel %vm2835_vm12, %v8771_v37, %v12508_v10  ;;  %v12641_v37 = vrot.slane %v3738_v21, 3  ;;  %vm6184_vm4 = vcmask 1043459  }
 0x2ba   : > { %v3256_v34 = vsel %vm3224_vm9, %v3201_v15, %v2728_v42  ;;  %v3257_v35 = vsel %vm3224_vm9, %v3203_v32, %v2728_v42  ;;  %v4129_v18 = vadd.f32 %v12619_v1, %v4090_v41  ;;  %v3026_v15 = vsel %vm2980_vm14, %v2961_v60, %v12309_v46  ;;  %v3959_v33 = vpop.f32.mrf.mxu0 }
 0x2bb   : > { %v3594_v49 = vshrl.u32 %v3256_v34, 16  ;;  %v3597_v0 = vshll.u32 %v3256_v34, 16  ;;  %v3601_v53 = vshrl.u32 %v3257_v35, 16  ;;  %v3604_v50 = vshll.u32 %v3257_v35, 16 }
 0x2bc   : > { %v12635_v42 = vrot.slane %v3717_v24, 4  ;;  %v4161_v34 = vmax.f32 %v4129_v18, 0.0  ;;  %v4091_v10 = vmul.f32 %v12600_v28, %v3959_v33  ;;  %v3961_v60 = vpop.f32.mrf.mxu0  ;;  %v12647_v24 = vrot.slane %v3741_v43, 4 }
 0x2bd   : > { %v3596_v32 = vrot.slane %v3594_v49, 3  ;;  %v3599_v57 = vrot.slane %v3597_v0, 4  ;;  %v3603_v52 = vrot.slane %v3601_v53, 3  ;;  %v3606_v12 = vrot.slane %v3604_v50, 4  ;;  %v2202_v59 = vpop.permute.xlu1 %2201  ;;  %v12638_v6 = vpop.permute.xlu0 %2357 }
 0x2be   : > { %v3080_v35 = vsel %vm3045_vm15, %v3026_v15, %v2202_v59  ;;  %v2963_v50 = vsel %vm588_vm0, %v2895_v54, %v12388_v5  ;;  %v4225_v49 = vcombine.high %v4161_v34, %v4161_v34  ;;  %v4232_v0 = vrot.slane %v4161_v34, %v9712_v8 }
 0x2bf   : > { %v3600_v41 = vor.u32 %v3599_v57, %v3596_v32  ;;  %v3607_v39 = vor.u32 %v3606_v12, %v3603_v52  ;;  %v12645_v46 = vsel %vm3094_vm6, %v3080_v35, %v12311_v62  ;;  %v4130_v53 = vadd.f32 %v12619_v1, %v4091_v10 }
 0x2c0   : > { %v3712_v21 = vor.u32 %v12621_v25, %v12608_v63  ;;  %v3748_v62 = vrot.slane %v3746_v23, 3  ;;  %v3751_v18 = vrot.slane %v3749_v30, 4  ;;  %v4239_v43 = vrot.slane %v4225_v49, %v9712_v8 }
 0x2c1   : > { %v12653_v33 = vpop.permute.xlu1 %2019  ;;  %v3608_v57 = vsel %vm3273_vm13, %v3600_v41, %v3607_v39  ;;  %v4240_v15 = vcombine.high %v4232_v0, %v4232_v0  ;;  %v4898_v32 = vsel %vm4897_vm1, %v4232_v0, 0.0  ;;  %v4162_v5 = vmax.f32 %v4130_v53, 0.0  ;;  %v12660_v54 = vpop.permute.xlu0 %1833 }
 0x2c2   : > { %4035 = vmatmul.mubr.bf16.gmra.mxu1 %v3608_v57  ;;  %v4899_v52 = vrot.slane %v4898_v32, 4  ;;  %v3028_v12 = vsel %vm2980_vm14, %v2963_v50, %v12286_v56  ;;  %v3720_v39 = vor.u32 %v12635_v42, %v12628_v13  ;;  %v3744_v63 = vor.u32 %v12647_v24, %v12641_v37 }
 0x2c3   : > { %8960 = vmatprep.mubr.msk.bf16.mxu1 %vm2835_vm12, %v12567_v22  ;;  %v4241_v23 = vcombine.high %v4239_v43, %v4239_v43  ;;  %v4905_v30 = vsel %vm4897_vm1, %v4240_v15, 0.0  ;;  %v4912_v25 = vsel %vm4897_vm1, %v4239_v43, 0.0  ;;  %v4242_v34 = vcombine.high %v4162_v5, %v4162_v5 }
 0x2c4   : > { %v4900_v35 = vadd.f32 %v4899_v52, %v4898_v32  ;;  %v4906_v10 = vrot.slane %v4905_v30, 4  ;;  %v4913_v41 = vrot.slane %v4912_v25, 4  ;;  %v4249_v56 = vrot.slane %v4162_v5, %v9712_v8 }
 0x2c5   : > { %v2546_v60 = vpop.permute.xlu1 %2545  ;;  %v4919_v22 = vsel %vm4897_vm1, %v4241_v23, 0.0  ;;  %v3081_v50 = vsel %vm3045_vm15, %v3028_v12, %v2202_v59  ;;  %v4256_v13 = vrot.slane %v4242_v34, %v9712_v8  ;;  %v12676_v42 = vpop.permute.xlu0 %2731  ;;  %v3752_v37 = vor.u32 %v3751_v18, %v3748_v62 }
 0x2c6   : > { %v4901_v24 = vrot.slane %v4900_v35, 2  ;;  %v4907_v49 = vadd.f32 %v4906_v10, %v4905_v30  ;;  %v4914_v0 = vadd.f32 %v4913_v41, %v4912_v25  ;;  %v4920_v53 = vrot.slane %v4919_v22, 4 }
 0x2c7   : > { %v4257_v57 = vcombine.high %v4249_v56, %v4249_v56  ;;  %v4258_v43 = vcombine.high %v4256_v13, %v4256_v13  ;;  %v4926_v15 = vsel %vm4897_vm1, %v4249_v56, 0.0  ;;  %v4940_v32 = vsel %vm4897_vm1, %v4256_v13, 0.0 }
 0x2c8   : > { %v4902_v5 = vadd.f32 %v4901_v24, %v4900_v35  ;;  %v4908_v52 = vrot.slane %v4907_v49, 2  ;;  %v4915_v23 = vrot.slane %v4914_v0, 2  ;;  %v4921_v36 = vadd.f32 %v4920_v53, %v4919_v22 }
 0x2c9   : > { %v4927_v12 = vrot.slane %v4926_v15, 4  ;;  %v4933_v34 = vsel %vm4897_vm1, %v4257_v57, 0.0  ;;  %v4941_v62 = vrot.slane %v4940_v32, 4  ;;  %v4947_v18 = vsel %vm4897_vm1, %v4258_v43, 0.0  ;;  %v12684_v30 = vpop.permute.xlu0 %2205 }
 0x2ca   : > { %v12680_v59 = vpop.permute.xlu1 %2359  ;;  %v4909_v25 = vadd.f32 %v4908_v52, %v4907_v49  ;;  %v4916_v10 = vadd.f32 %v4915_v23, %v4914_v0  ;;  %v4922_v41 = vrot.slane %v4921_v36, 2  ;;  %v12687_v56 = vsel %vm3273_vm13, %v3712_v21, %v3720_v39 }
 0x2cb   : > { %v4928_v35 = vadd.f32 %v4927_v12, %v4926_v15  ;;  %v4934_v13 = vrot.slane %v4933_v34, 4  ;;  %v4942_v24 = vadd.f32 %v4941_v62, %v4940_v32  ;;  %v4948_v22 = vrot.slane %v4947_v18, 4 }
 0x2cc   : > { %v4903_v53 = vrot.slane %v4902_v5, 1  ;;  %v4923_v2 = vadd.f32 %v4922_v41, %v4921_v36  ;;  %v3142_v57 = vsel %vm3094_vm6, %v3081_v50, %v12479_v9  ;;  %v12694_v43 = vsel %vm3273_vm13, %v3744_v63, %v3752_v37  ;;  %v9357_v41 = vld [vmem:[#allocation2 + $0x1a8] ss:$0 sps:$4 sm:$0x11]  }
 0x2cd   : > { %v4929_v49 = vrot.slane %v4928_v35, 2  ;;  %v4935_v0 = vadd.f32 %v4934_v13, %v4933_v34  ;;  %v4943_v52 = vrot.slane %v4942_v24, 2  ;;  %v4949_v23 = vadd.f32 %v4948_v22, %v4947_v18  ;;  %v1790_v21 = vpop.permute.xlu0 %1789 }
 0x2ce   : > { %v12691_v51 = vpop.permute.xlu1 %2355  ;;  %v4910_v39 = vrot.slane %v4909_v25, 1  ;;  %v4917_v15 = vrot.slane %v4916_v10, 1  ;;  %v4924_v12 = vrot.slane %v4923_v2, 1  ;;  %v12698_v32 = vsel %vm588_vm0, %v12535_v27, %v1790_v21 }
 0x2cf   : > { %v4930_v36 = vadd.f32 %v4929_v49, %v4928_v35  ;;  %v4936_v62 = vrot.slane %v4935_v0, 2  ;;  %v4944_v9 = vadd.f32 %v4943_v52, %v4942_v24  ;;  %v4950_v50 = vrot.slane %v4949_v23, 2 }
 0x2d0   : > { %v3032_v63 = vsel %vm2980_vm14, %v12461_v44, %v12593_v20  ;;  %v3030_v37 = vsel %vm2980_vm14, %v12468_v38, %v12653_v33  ;;  %v3207_v34 = vsel %vm3159_vm7, %v3142_v57, %v2546_v60  ;;  %v3205_v27 = vsel %vm3159_vm7, %v12645_v46, %v12427_v58 }
 0x2d1   : > { %v4931_v35 = vrot.slane %v4930_v36, 1  ;;  %v4937_v13 = vadd.f32 %v4936_v62, %v4935_v0  ;;  %v4945_v24 = vrot.slane %v4944_v9, 1  ;;  %v4951_v22 = vadd.f32 %v4950_v50, %v4949_v23  ;;  %v1679_v49 = vpop.permute.xlu0 %1678 }
 0x2d2   : > { %v12707_v18 = vpop.permute.xlu1 %1831  ;;  %v12712_v52 = vadd.f32 %v4903_v53, %v4902_v5  ;;  %v12714_v44 = vadd.f32 %v4910_v39, %v4909_v25  ;;  %v2833_v20 = vrot.slane %v9357_v41, 5  ;;  %v3770_v38 = vshrl.u32 %v12551_v47, 16 }
 0x2d3   : > { %v12717_v33 = vadd.f32 %v4917_v15, %v4916_v10  ;;  %v12719_v60 = vadd.f32 %v4924_v12, %v4923_v2  ;;  %v14511_v57 = vcombine.low %v12540_v7, %v12557_v26  ;;  %v14512_v46 = vcombine.low %v12561_v40, %v12561_v40 }
 0x2d4   : > { %v4938_v25 = vrot.slane %v4937_v13, 1  ;;  %v4952_v53 = vrot.slane %v4951_v22, 1  ;;  %v2834_v10 = vsel %vm1730_vm5, %v12551_v47, %v2833_v20  ;;  %v3773_v2 = vshll.u32 %v12551_v47, 16 }
 0x2d5   : > { %v2908_v58 = vsel %vm2835_vm12, %v14511_v57, %v1679_v49  ;;  %v12729_v5 = vsel %vm2835_vm12, %v14512_v46, %v1679_v49  ;;  %v12736_v23 = vadd.f32 %v4931_v35, %v4930_v36  ;;  %v12738_v7 = vadd.f32 %v4945_v24, %v4944_v9  ;;  %v2730_v26 = vpop.permute.xlu0 %2729 }
 0x2d6   : > { %v12731_v0 = vpop.permute.xlu1 %2551  ;;  %v3778_v21 = vshrl.u32 %v2834_v10, 16  ;;  %v3781_v39 = vshll.u32 %v2834_v10, 16  ;;  %v3259_v40 = vsel %vm3224_vm9, %v3205_v27, %v2730_v26  ;;  %v3260_v15 = vsel %vm3224_vm9, %v3207_v34, %v2730_v26 }
 0x2d7   : > { %v12742_v12 = vrot.slane %v3770_v38, 3  ;;  %v12744_v62 = vrot.slane %v3773_v2, 4  ;;  %v3626_v50 = vshrl.u32 %v3259_v40, 16  ;;  %v3629_v41 = vshll.u32 %v3259_v40, 16  ;;  %v3964_v10 = vpop.f32.mrf.mxu0 }
 0x2d8   : > { %v3633_v49 = vshrl.u32 %v3260_v15, 16  ;;  %v3636_v20 = vshll.u32 %v3260_v15, 16  ;;  %v12746_v47 = vadd.f32 %v4938_v25, %v4937_v13  ;;  %v12748_v36 = vadd.f32 %v4952_v53, %v4951_v22 }
 0x2d9   : > { %14513 = vst [vmem:[#allocation99_spill] sm:$0xff] %v12742_v12  ;;  %v12750_v35 = vrot.slane %v3778_v21, 3  ;;  %v12752_v24 = vrot.slane %v3781_v39, 4  ;;  %v3628_v27 = vrot.slane %v3626_v50, 3  ;;  %v3631_v57 = vrot.slane %v3629_v41, 4  ;;  %v2204_v46 = vpop.permute.xlu0 %2203  ;;  %v3966_v40 = vpop.f32.mrf.mxu0 }
 0x2da   : > { %14514 = vst [vmem:[#allocation65_spill] sm:$0xff] %v12748_v36  ;;  %v1788_v9 = vpop.permute.xlu1 %1787  ;;  %v3635_v34 = vrot.slane %v3633_v49, 3  ;;  %v3638_v38 = vrot.slane %v3636_v20, 4  ;;  %v3083_v2 = vsel %vm3045_vm15, %v3030_v37, %v2204_v46  ;;  %v3084_v26 = vsel %vm3045_vm15, %v3032_v63, %v2204_v46 }
 0x2db   : > { %v4092_v13 = vmul.f32 %v12600_v28, %v3964_v10  ;;  %v3632_v25 = vor.u32 %v3631_v57, %v3628_v27  ;;  %v3144_v21 = vsel %vm3094_vm6, %v3083_v2, %v12691_v51  ;;  %v3146_v39 = vsel %vm3094_vm6, %v3084_v26, %v12638_v6  ;;  %v3967_v20 = vpop.f32.mrf.mxu0 }
 0x2dc   : > { %v3639_v53 = vor.u32 %v3638_v38, %v3635_v34  ;;  %v3209_v15 = vsel %vm3159_vm7, %v3144_v21, %v12544_v31  ;;  %v3211_v63 = vsel %vm3159_vm7, %v3146_v39, %v12524_v3  ;;  %v2925_v37 = vsel %vm588_vm0, %v12530_v61, %v1788_v9 }
 0x2dd   : > { %v4131_v50 = vadd.f32 %v12619_v1, %v4092_v13  ;;  %v3262_v49 = vsel %vm3224_vm9, %v3209_v15, %v12676_v42  ;;  %v12774_v51 = vsel %vm3224_vm9, %v3211_v63, %v12676_v42  ;;  %v1677_v6 = vpop.permute.xlu0 %1676  ;;  %v14515_v61 = vcombine.low %v12546_v55, %v12569_v4  ;;  %v3969_v55 = vpop.f32.mrf.mxu0 }
 0x2de   : > { %v1836_v41 = vpop.permute.xlu1 %1835  ;;  %v3640_v31 = vsel %vm3273_vm13, %v3632_v25, %v3639_v53  ;;  %v14516_v57 = vcombine.low %v12573_v11, %v12573_v11  ;;  %v4093_v42 = vmul.f32 %v12600_v28, %v3967_v20  ;;  %v3658_v4 = vshrl.u32 %v3262_v49, 16 }
 0x2df   : > { %v4163_v27 = vmax.f32 %v4131_v50, 0.0  ;;  %v2903_v9 = vsel %vm2835_vm12, %v14515_v61, %v1677_v6  ;;  %4043 = vmatmul.mubr.bf16.gmra.mxu1 %v3640_v31  ;;  %v2973_v10 = vsel %vm588_vm0, %v2908_v58, %v1836_v41  ;;  %v3661_v25 = vshll.u32 %v3262_v49, 16 }
 0x2e0   : > { %v2905_v34 = vsel %vm2835_vm12, %v14516_v57, %v1677_v6  ;;  %v2969_v38 = vsel %vm588_vm0, %v2903_v9, %v12707_v18  ;;  %8961 = vmatprep.mubr.msk.bf16.mxu1 %vm2835_vm12, %v12585_v48  ;;  %v12815_v50 = vrot.slane %v3658_v4, 3  ;;  %vm6186_vm5 = vcmask 1044484  }
 0x2e1   : > { %v2971_v46 = vsel %vm588_vm0, %v2905_v34, %v12660_v54  ;;  %v4259_v2 = vcombine.high %v4163_v27, %v4163_v27  ;;  %v4266_v11 = vrot.slane %v4163_v27, %v9712_v8  ;;  %v12800_v18 = vsel %vm2980_vm14, %v2969_v38, %v12582_v16  ;;  %v2554_v53 = vpop.permute.xlu0 %2553 }
 0x2e2   : > { %v3036_v26 = vsel %vm2980_vm14, %v2971_v46, %v12553_v45  ;;  %v1980_v13 = vpop.permute.xlu1 %1979  ;;  %v4132_v54 = vadd.f32 %v12619_v1, %v4093_v42  ;;  %v12819_v20 = vrot.slane %v3661_v25, 4  ;;  %vm6188_vm8 = vcmask 1045509  }
 0x2e3   : > { %v12804_v58 = vsel %vm2980_vm14, %v2925_v37, %v1980_v13  ;;  %v3087_v48 = vsel %vm3045_vm15, %v3036_v26, %v12684_v30  ;;  %v4273_v21 = vrot.slane %v4259_v2, %v9712_v8  ;;  %v4274_v39 = vcombine.high %v4266_v11, %v4266_v11  ;;  %v3980_v57 = vpop.f32.mrf.mxu1 }
 0x2e4   : > { %v4954_v45 = vsel %vm4897_vm1, %v4266_v11, 0.0  ;;  %v3150_v40 = vsel %vm3094_vm6, %v3087_v48, %v12625_v19  ;;  %v4164_v16 = vmax.f32 %v4132_v54, 0.0  ;;  %v12832_v48 = vmul.f32 %v12600_v28, %v3980_v57 }
 0x2e5   : > { %v4955_v15 = vrot.slane %v4954_v45, 4  ;;  %v12813_v63 = vsel %vm3159_vm7, %v3150_v40, %v2554_v53  ;;  %v4275_v37 = vcombine.high %v4273_v21, %v4273_v21  ;;  %v4961_v41 = vsel %vm4897_vm1, %v4274_v39, 0.0  ;;  %v12821_v19 = vpop.permute.xlu0 %1837  ;;  %v3982_v26 = vpop.f32.mrf.mxu1 }
 0x2e6   : > { %v4968_v49 = vsel %vm4897_vm1, %v4273_v21, 0.0  ;;  %v2028_v6 = vpop.permute.xlu1 %2027  ;;  %v4962_v27 = vrot.slane %v4961_v41, 4  ;;  %v4276_v9 = vcombine.high %v4164_v16, %v4164_v16  ;;  %v4283_v42 = vrot.slane %v4164_v16, %v9712_v8 }
 0x2e7   : > { %v4956_v31 = vadd.f32 %v4955_v15, %v4954_v45  ;;  %v4969_v61 = vrot.slane %v4968_v49, 4  ;;  %v4975_v34 = vsel %vm4897_vm1, %v4275_v37, 0.0  ;;  %v12826_v38 = vsel %vm2980_vm14, %v2973_v10, %v2028_v6  ;;  %v12836_v40 = vpop.f32.mrf.mxu1 }
 0x2e8   : > { %v4963_v4 = vadd.f32 %v4962_v27, %v4961_v41  ;;  %v4976_v11 = vrot.slane %v4975_v34, 4  ;;  %v4290_v13 = vrot.slane %v4276_v9, %v9712_v8  ;;  %v4291_v25 = vcombine.high %v4283_v42, %v4283_v42 }
 0x2e9   : > { %v4957_v55 = vrot.slane %v4956_v31, 2  ;;  %v4970_v2 = vadd.f32 %v4969_v61, %v4968_v49  ;;  %v4982_v54 = vsel %vm4897_vm1, %v4283_v42, 0.0  ;;  %v12834_v45 = vpop.permute.xlu0 %2733  ;;  %v3985_v9 = vpop.f32.mrf.mxu1  ;;  %vm6192_vm11 = vcmask 1047559  }
 0x2ea   : > { %v4964_v21 = vrot.slane %v4963_v4, 2  ;;  %v4977_v10 = vadd.f32 %v4976_v11, %v4975_v34  ;;  %v4292_v15 = vcombine.high %v4290_v13, %v4290_v13  ;;  %v4983_v16 = vrot.slane %v4982_v54, 4  ;;  %v12843_v12 = vpop.permute.xlu1 %2183 }
 0x2eb   : > { %v4958_v53 = vadd.f32 %v4957_v55, %v4956_v31  ;;  %v4971_v39 = vrot.slane %v4970_v2, 2  ;;  %v4989_v37 = vsel %vm4897_vm1, %v4291_v25, 0.0  ;;  %v4996_v41 = vsel %vm4897_vm1, %v4290_v13, 0.0 }
 0x2ec   : > { %v4965_v6 = vadd.f32 %v4964_v21, %v4963_v4  ;;  %v4978_v61 = vrot.slane %v4977_v10, 2  ;;  %v4984_v57 = vadd.f32 %v4983_v16, %v4982_v54  ;;  %v4990_v31 = vrot.slane %v4989_v37, 4 }
 0x2ed   : > { %v4959_v49 = vrot.slane %v4958_v53, 1  ;;  %v4972_v27 = vadd.f32 %v4971_v39, %v4970_v2  ;;  %v4997_v42 = vrot.slane %v4996_v41, 4  ;;  %v5003_v34 = vsel %vm4897_vm1, %v4292_v15, 0.0  ;;  %v12841_v3 = vpop.permute.xlu0 %1981 }
 0x2ee   : > { %v4966_v11 = vrot.slane %v4965_v6, 1  ;;  %v4979_v22 = vadd.f32 %v4978_v61, %v4977_v10  ;;  %v4985_v46 = vrot.slane %v4984_v57, 2  ;;  %v4991_v25 = vadd.f32 %v4990_v31, %v4989_v37 }
 0x2ef   : > { %v4960_v55 = vadd.f32 %v4959_v49, %v4958_v53  ;;  %v4973_v26 = vrot.slane %v4972_v27, 1  ;;  %v4998_v36 = vadd.f32 %v4997_v42, %v4996_v41  ;;  %v5004_v13 = vrot.slane %v5003_v34, 4 }
 0x2f0   : > { %v4967_v4 = vadd.f32 %v4966_v11, %v4965_v6  ;;  %v4980_v21 = vrot.slane %v4979_v22, 1  ;;  %v4986_v39 = vadd.f32 %v4985_v46, %v4984_v57  ;;  %v4992_v16 = vrot.slane %v4991_v25, 2 }
 0x2f1   : > { %v4974_v2 = vadd.f32 %v4973_v26, %v4972_v27  ;;  %v5858_v54 = vadd.f32 %v4960_v55, %v12712_v52  ;;  %v4999_v15 = vrot.slane %v4998_v36, 2  ;;  %v5005_v53 = vadd.f32 %v5004_v13, %v5003_v34  ;;  %v12848_v37 = vpop.permute.xlu0 %2029  ;;  %v12851_v26 = vpop.permute.xlu1 %2315 }
 0x2f2   : > { %v4981_v49 = vadd.f32 %v4980_v21, %v4979_v22  ;;  %v5859_v10 = vadd.f32 %v4967_v4, %v12714_v44  ;;  %v4987_v41 = vrot.slane %v4986_v39, 1  ;;  %v4993_v31 = vadd.f32 %v4992_v16, %v4991_v25 }
 0x2f3   : > { %v5860_v61 = vadd.f32 %v4974_v2, %v12717_v33  ;;  %v5922_v9 = vmul.f32 0.25, %v5858_v54  ;;  %v5000_v42 = vadd.f32 %v4999_v15, %v4998_v36  ;;  %v5006_v6 = vrot.slane %v5005_v53, 2 }
 0x2f4   : > { %v5861_v27 = vadd.f32 %v4981_v49, %v12719_v60  ;;  %v5923_v11 = vmul.f32 0.25, %v5859_v10  ;;  %v4988_v57 = vadd.f32 %v4987_v41, %v4986_v39  ;;  %v4994_v55 = vrot.slane %v4993_v31, 1 }
 0x2f5   : > { %v5924_v52 = vmul.f32 0.25, %v5860_v61  ;;  %v5986_v46 = vpack.c.bf16 %v5922_v9, %v5922_v9  ;;  %v5001_v34 = vrot.slane %v5000_v42, 1  ;;  %v5007_v22 = vadd.f32 %v5006_v6, %v5005_v53  ;;  %v12858_v36 = vpop.permute.xlu0 %2207 }
 0x2f6   : > { %v5925_v44 = vmul.f32 0.25, %v5861_v27  ;;  %v5987_v33 = vpack.c.bf16 %v5923_v11, %v5923_v11  ;;  %v12856_v25 = vsel %vm588_vm0, %v12729_v5, %v12821_v19  ;;  %v4995_v60 = vadd.f32 %v4994_v55, %v4993_v31 }
 0x2f7   : > { %v5988_v13 = vpack.c.bf16 %v5924_v52, %v5924_v52  ;;  %v5002_v4 = vadd.f32 %v5001_v34, %v5000_v42  ;;  %v5008_v2 = vrot.slane %v5007_v22, 1  ;;  %v5862_v21 = vadd.f32 %v4988_v57, %v12736_v23  ;;  %v12883_v42 = vpop.permute.xlu1 %2363 }
 0x2f8   : > { %v5989_v54 = vpack.c.bf16 %v5925_v44, %v5925_v44  ;;  %v6116_v39 = vunpack.c.l.b16 %v5986_v46  ;;  %v6117_v16 = vunpack.c.l.b16 %v5987_v33  ;;  %v4135_v15 = vadd.f32 %v12619_v1, %v12832_v48 }
 0x2f9   : > { %v12863_v53 = vunpack.c.l.b16 %v5988_v13  ;;  %v5863_v49 = vadd.f32 %v4995_v60, %v12746_v47  ;;  %v12867_v5 = vadd.f32 %v5002_v4, %v12738_v7  ;;  %v5926_v19 = vmul.f32 0.25, %v5862_v21 }
 0x2fa   : > { %v12869_v10 = vunpack.c.l.b16 %v5989_v54  ;;  %v12872_v61 = vsel %vm6180_vm2, %v6117_v16, %v6116_v39  ;;  %v12874_v23 = vadd.f32 %v5008_v2, %v5007_v22  ;;  %v4167_v9 = vmax.f32 %v4135_v15, 0.0  ;;  %v12885_v6 = vpop.permute.xlu0 %2317 }
 0x2fb   : > { %v12876_v41 = vmul.f32 0.25, %v5863_v49  ;;  %v3664_v48 = vor.u32 %v12819_v20, %v12815_v50  ;;  %v14517_v31 = vshrl.u32 %v12774_v51, 16  ;;  %v3668_v7 = vshll.u32 %v12774_v51, 16  ;;  %v2508_v15 = vpop.permute.xlu1 %2507 }
 0x2fc   : > { %v5990_v27 = vpack.c.bf16 %v5926_v19, %v5926_v19  ;;  %v4327_v11 = vcombine.high %v4167_v9, %v4167_v9  ;;  %v4334_v52 = vrot.slane %v4167_v9, %v9712_v8  ;;  %v3086_v46 = vsel %vm3045_vm15, %v12800_v18, %v12684_v30 }
 0x2fd   : > { %v3667_v47 = vrot.slane %v14517_v31, 3  ;;  %v3670_v20 = vrot.slane %v3668_v7, 4  ;;  %v3053_v51 = vsel %vm3045_vm15, %v12804_v58, %v12843_v12  ;;  %v3148_v57 = vsel %vm3094_vm6, %v3086_v46, %v12680_v59  ;;  %v12902_v30 = vpop.f32.mrf.mxu1 }
 0x2fe   : > { %v4341_v55 = vrot.slane %v4327_v11, %v9712_v8  ;;  %v4342_v34 = vcombine.high %v4334_v52, %v4334_v52  ;;  %v5066_v22 = vsel %vm4897_vm1, %v4334_v52, 0.0  ;;  %v3213_v44 = vsel %vm3159_vm7, %v3148_v57, %v12731_v0 }
 0x2ff   : > { %v5067_v18 = vrot.slane %v5066_v22, 4  ;;  %v3671_v33 = vor.u32 %v3670_v20, %v3667_v47  ;;  %v3265_v13 = vsel %vm3224_vm9, %v3213_v44, %v12834_v45  ;;  %v3266_v58 = vsel %vm3224_vm9, %v12813_v63, %v12834_v45  ;;  %v3990_v21 = vpop.f32.mrf.mxu1  ;;  %v12912_v49 = vpop.permute.xlu0 %2365 }
 0x300   : > { %v4343_v59 = vcombine.high %v4341_v55, %v4341_v55  ;;  %v5073_v60 = vsel %vm4897_vm1, %v4342_v34, 0.0  ;;  %v5080_v4 = vsel %vm4897_vm1, %v4341_v55, 0.0  ;;  %v3690_v2 = vshrl.u32 %v3265_v13, 16 }
 0x301   : > { %v5068_v54 = vadd.f32 %v5067_v18, %v5066_v22  ;;  %v5074_v0 = vrot.slane %v5073_v60, 4  ;;  %v5081_v39 = vrot.slane %v5080_v4, 4  ;;  %v3672_v16 = vsel %vm3273_vm13, %v3664_v48, %v3671_v33  ;;  %v12915_v31 = vpop.f32.mrf.mxu1 }
 0x302   : > { %v5087_v19 = vsel %vm4897_vm1, %v4343_v59, 0.0  ;;  %4051 = vmatmul.mubr.bf16.gmra.mxu1 %v3672_v16  ;;  %v3692_v9 = vrot.slane %v3690_v2, 3  ;;  %v3693_v63 = vshll.u32 %v3265_v13, 16  ;;  %v3697_v45 = vshrl.u32 %v3266_v58, 16 }
 0x303   : > { %v5069_v47 = vrot.slane %v5068_v54, 2  ;;  %v5075_v7 = vadd.f32 %v5074_v0, %v5073_v60  ;;  %v5082_v11 = vadd.f32 %v5081_v39, %v5080_v4  ;;  %v5088_v52 = vrot.slane %v5087_v19, 4  ;;  %8962 = vmatprep.mubr.msk.bf16.mxu1 %vm2835_vm12, %v12687_v56  ;;  %v3993_v55 = vpop.f32.mrf.mxu1  ;;  %v2556_v0 = vpop.permute.xlu1 %2555 }
 0x304   : > { %v3695_v46 = vrot.slane %v3693_v63, 4  ;;  %v3699_v48 = vrot.slane %v3697_v45, 3  ;;  %v3700_v20 = vshll.u32 %v3266_v58, 16  ;;  %v4097_v57 = vmul.f32 %v12600_v28, %v12836_v40  ;;  %v2510_v58 = vpop.permute.xlu0 %2509 }
 0x305   : > { %v5070_v34 = vadd.f32 %v5069_v47, %v5068_v54  ;;  %v5076_v22 = vrot.slane %v5075_v7, 2  ;;  %v5083_v44 = vrot.slane %v5082_v11, 2  ;;  %v5089_v18 = vadd.f32 %v5088_v52, %v5087_v19 }
 0x306   : > { %v12921_v33 = vunpack.c.l.b16 %v5990_v27  ;;  %v3696_v13 = vor.u32 %v3695_v46, %v3692_v9  ;;  %v3702_v59 = vrot.slane %v3700_v20, 4  ;;  %v4136_v60 = vadd.f32 %v12619_v1, %v4097_v57 }
 0x307   : > { %v5071_v4 = vrot.slane %v5070_v34, 1  ;;  %v5077_v2 = vadd.f32 %v5076_v22, %v5075_v7  ;;  %v5084_v56 = vadd.f32 %v5083_v44, %v5082_v11  ;;  %v5090_v21 = vrot.slane %v5089_v18, 2 }
 0x308   : > { %v3703_v39 = vor.u32 %v3702_v59, %v3699_v48  ;;  %v4168_v16 = vmax.f32 %v4136_v60, 0.0  ;;  %v3104_v40 = vsel %vm3094_vm6, %v3053_v51, %v12851_v26  ;;  %v2992_v27 = vsel %vm2980_vm14, %v12698_v32, %v12841_v3  ;;  %v12954_v55 = vpop.permute.xlu0 %2557 }
 0x309   : > { %v5078_v54 = vrot.slane %v5077_v2, 1  ;;  %v5085_v19 = vrot.slane %v5084_v56, 1  ;;  %v5091_v9 = vadd.f32 %v5090_v21, %v5089_v18  ;;  %v3040_v63 = vsel %vm2980_vm14, %v12856_v25, %v12848_v37 }
 0x30a   : > { %v12932_v45 = vadd.f32 %v5071_v4, %v5070_v34  ;;  %v4344_v47 = vcombine.high %v4168_v16, %v4168_v16  ;;  %v4351_v7 = vrot.slane %v4168_v16, %v9712_v8  ;;  %v3704_v11 = vsel %vm3273_vm13, %v3696_v13, %v3703_v39 }
 0x30b   : > { %v12936_v52 = vadd.f32 %v5078_v54, %v5077_v2  ;;  %v5092_v26 = vrot.slane %v5091_v9, 1  ;;  %4059 = vmatmul.mubr.bf16.gmra.mxu1 %v3704_v11  ;;  %v3169_v32 = vsel %vm3159_vm7, %v3104_v40, %v2508_v15  ;;  %v3089_v3 = vsel %vm3045_vm15, %v12826_v38, %v12858_v36  ;;  %v2712_v38 = vpop.permute.xlu1 %2711 }
 0x30c   : > { %v12942_v51 = vadd.f32 %v5085_v19, %v5084_v56  ;;  %v4358_v37 = vrot.slane %v4344_v47, %v9712_v8  ;;  %v4359_v25 = vcombine.high %v4351_v7, %v4351_v7  ;;  %v5094_v46 = vsel %vm4897_vm1, %v4351_v7, 0.0  ;;  %8963 = vmatprep.mubr.msk.bf16.mxu1 %vm2835_vm12, %v12694_v43  ;;  %v2736_v47 = vpop.permute.xlu0 %2735 }
 0x30d   : > { %v12948_v48 = vadd.f32 %v5092_v26, %v5091_v9  ;;  %v5095_v20 = vrot.slane %v5094_v46, 4  ;;  %v3090_v15 = vsel %vm3045_vm15, %v3040_v63, %v12858_v36  ;;  %v3152_v57 = vsel %vm3094_vm6, %v3089_v3, %v12883_v42 }
 0x30e   : > { %v4360_v34 = vcombine.high %v4358_v37, %v4358_v37  ;;  %v5101_v22 = vsel %vm4897_vm1, %v4359_v25, 0.0  ;;  %v5108_v44 = vsel %vm4897_vm1, %v4358_v37, 0.0  ;;  %v3054_v43 = vsel %vm3045_vm15, %v2992_v27, %v12843_v12 }
 0x30f   : > { %v5096_v18 = vadd.f32 %v5095_v20, %v5094_v46  ;;  %v5102_v13 = vrot.slane %v5101_v22, 4  ;;  %v5109_v59 = vrot.slane %v5108_v44, 4  ;;  %v12961_v60 = vsel %vm3159_vm7, %v3152_v57, %v2556_v0 }
 0x310   : > { %v5115_v36 = vsel %vm4897_vm1, %v4360_v34, 0.0  ;;  %v3106_v42 = vsel %vm3094_vm6, %v3054_v43, %v12885_v6  ;;  %v3232_v4 = vsel %vm3224_vm9, %v3169_v32, %v2712_v38  ;;  %v4098_v2 = vmul.f32 %v12600_v28, %v12902_v30  ;;  %v12971_v54 = vpop.f32.mrf.mxu1 }
 0x311   : > { %v5097_v56 = vrot.slane %v5096_v18, 2  ;;  %v5103_v21 = vadd.f32 %v5102_v13, %v5101_v22  ;;  %v5110_v39 = vadd.f32 %v5109_v59, %v5108_v44  ;;  %v5116_v12 = vrot.slane %v5115_v36, 4 }
 0x312   : > { %v3338_v16 = vshrl.u32 %v3232_v4, 16  ;;  %v3341_v40 = vshll.u32 %v3232_v4, 16  ;;  %v4137_v27 = vadd.f32 %v12619_v1, %v4098_v2  ;;  %v3171_v0 = vsel %vm3159_vm7, %v3106_v42, %v2510_v58  ;;  %v3998_v32 = vpop.f32.mrf.mxu1  ;;  %v1681_v58 = vpop.permute.xlu1 %1680 }
 0x313   : > { %v5098_v19 = vadd.f32 %v5097_v56, %v5096_v18  ;;  %v5104_v9 = vrot.slane %v5103_v21, 2  ;;  %v5111_v6 = vrot.slane %v5110_v39, 2  ;;  %v5117_v63 = vadd.f32 %v5116_v12, %v5115_v36 }
 0x314   : > { %v12973_v7 = vrot.slane %v3338_v16, 3  ;;  %v12975_v30 = vrot.slane %v3341_v40, 4  ;;  %v4169_v11 = vmax.f32 %v4137_v27, 0.0  ;;  %v3233_v26 = vsel %vm3224_vm9, %v3171_v0, %v2712_v38  ;;  %v12981_v44 = vpop.f32.mrf.mxu1 }
 0x315   : > { %v5099_v3 = vrot.slane %v5098_v19, 1  ;;  %v5105_v37 = vadd.f32 %v5104_v9, %v5103_v21  ;;  %v5112_v25 = vadd.f32 %v5111_v6, %v5110_v39  ;;  %v5118_v46 = vrot.slane %v5117_v63, 2  ;;  %v12997_v39 = vpop.permute.xlu0 %1839 }
 0x316   : > { %v3154_v20 = vsel %vm3094_vm6, %v3090_v15, %v12912_v49  ;;  %v4361_v57 = vcombine.high %v4169_v11, %v4169_v11  ;;  %v4368_v34 = vrot.slane %v4169_v11, %v9712_v8  ;;  %v3345_v22 = vshrl.u32 %v3233_v26, 16  ;;  %v4001_v15 = vpop.f32.mrf.mxu1 }
 0x317   : > { %v5106_v43 = vrot.slane %v5105_v37, 1  ;;  %v5113_v18 = vrot.slane %v5112_v25, 1  ;;  %v12983_v13 = vadd.f32 %v5118_v46, %v5117_v63  ;;  %v3344_v38 = vor.u32 %v12975_v30, %v12973_v7  ;;  %v1842_v63 = vpop.permute.xlu1 %1841  ;;  %v13055_v30 = vld [vmem:[%s14098_s6] ss:$0 sm:$0xff] }
 0x318   : > { %v12987_v59 = vadd.f32 %v5099_v3, %v5098_v19  ;;  %v4375_v36 = vrot.slane %v4361_v57, %v9712_v8  ;;  %v4376_v42 = vcombine.high %v4368_v34, %v4368_v34  ;;  %v5122_v49 = vsel %vm4897_vm1, %v4368_v34, 0.0 }
 0x319   : > { %v12991_v4 = vadd.f32 %v5106_v43, %v5105_v37  ;;  %v12993_v2 = vadd.f32 %v5113_v18, %v5112_v25  ;;  %v5123_v56 = vrot.slane %v5122_v49, 4  ;;  %v12995_v21 = vrot.slane %v3345_v22, 3 }
 0x31a   : > { %v4377_v12 = vcombine.high %v4375_v36, %v4375_v36  ;;  %v5129_v16 = vsel %vm4897_vm1, %v4376_v42, 0.0  ;;  %v5136_v40 = vsel %vm4897_vm1, %v4375_v36, 0.0  ;;  %v3348_v27 = vshll.u32 %v3233_v26, 16 }
 0x31b   : > { %14518 = vst [vmem:[#allocation67_spill] sm:$0xff] %v12991_v4  ;;  %14519 = vst [vmem:[#allocation66_spill] sm:$0xff] %v12993_v2  ;;  %v5124_v19 = vadd.f32 %v5123_v56, %v5122_v49  ;;  %v5130_v9 = vrot.slane %v5129_v16, 4  ;;  %v5137_v6 = vrot.slane %v5136_v40, 4  ;;  %v14520_v3 = vcombine.low %v12577_v29, %v12229_v14 }
 0x31c   : > { %v5143_v11 = vsel %vm4897_vm1, %v4377_v12, 0.0  ;;  %v3350_v32 = vrot.slane %v3348_v27, 4  ;;  %v14521_v25 = vcombine.low %v12231_v17, %v12231_v17  ;;  %v4099_v43 = vmul.f32 %v12600_v28, %v12915_v31 }
 0x31d   : > { %v2913_v37 = vsel %vm2835_vm12, %v14520_v3, %v1681_v58  ;;  %v5125_v26 = vrot.slane %v5124_v19, 2  ;;  %v5131_v57 = vadd.f32 %v5130_v9, %v5129_v16  ;;  %v5138_v34 = vadd.f32 %v5137_v6, %v5136_v40  ;;  %v2034_v3 = vpop.permute.xlu1 %2033 }
 0x31e   : > { %v2915_v46 = vsel %vm2835_vm12, %v14521_v25, %v1681_v58  ;;  %v5144_v22 = vrot.slane %v5143_v11, 4  ;;  %v3219_v18 = vsel %vm3159_vm7, %v3154_v20, %v12954_v55  ;;  %v3268_v14 = vsel %vm3224_vm9, %v12961_v60, %v2736_v47  ;;  %v2032_v58 = vpop.permute.xlu0 %2031 }
 0x31f   : > { %v2979_v36 = vsel %vm588_vm0, %v2915_v46, %v1842_v63  ;;  %v5126_v29 = vadd.f32 %v5125_v26, %v5124_v19  ;;  %v5132_v42 = vrot.slane %v5131_v57, 2  ;;  %v5139_v17 = vrot.slane %v5138_v34, 2 }
 0x320   : > { %v5145_v49 = vadd.f32 %v5144_v22, %v5143_v11  ;;  %v4138_v15 = vadd.f32 %v12619_v1, %v4099_v43  ;;  %v3269_v56 = vsel %vm3224_vm9, %v3219_v18, %v2736_v47  ;;  %v3722_v12 = vshrl.u32 %v3268_v14, 16 }
 0x321   : > { %v3725_v16 = vshll.u32 %v3268_v14, 16  ;;  %v5127_v28 = vrot.slane %v5126_v29, 1  ;;  %v5133_v31 = vadd.f32 %v5132_v42, %v5131_v57  ;;  %v5140_v40 = vadd.f32 %v5139_v17, %v5138_v34 }
 0x322   : > { %v5146_v55 = vrot.slane %v5145_v49, 2  ;;  %v4170_v20 = vmax.f32 %v4138_v15, 0.0  ;;  %v3724_v27 = vrot.slane %v3722_v12, 3  ;;  %v3729_v6 = vshrl.u32 %v3269_v56, 16  ;;  %v2210_v43 = vpop.permute.xlu0 %2209 }
 0x323   : > { %v3727_v9 = vrot.slane %v3725_v16, 4  ;;  %v13020_v60 = vadd.f32 %v5127_v28, %v5126_v29  ;;  %v5134_v19 = vrot.slane %v5133_v31, 1  ;;  %v5141_v63 = vrot.slane %v5140_v40, 1 }
 0x324   : > { %v5147_v11 = vadd.f32 %v5146_v55, %v5145_v49  ;;  %v4378_v25 = vcombine.high %v4170_v20, %v4170_v20  ;;  %v4385_v1 = vrot.slane %v4170_v20, %v9712_v8  ;;  %v3731_v46 = vrot.slane %v3729_v6, 3  ;;  %v13046_v6 = vld [vmem:[%s14097_s5] ss:$0 sm:$0xff] }
 0x325   : > { %v3728_v47 = vor.u32 %v3727_v9, %v3724_v27  ;;  %v13023_v26 = vadd.f32 %v5134_v19, %v5133_v31  ;;  %v13025_v57 = vadd.f32 %v5141_v63, %v5140_v40  ;;  %v3732_v22 = vshll.u32 %v3269_v56, 16  ;;  %v2368_v9 = vpop.permute.xlu1 %2367 }
 0x326   : > { %v5148_v34 = vrot.slane %v5147_v11, 1  ;;  %v4392_v18 = vrot.slane %v4378_v25, %v9712_v8  ;;  %v4393_v14 = vcombine.high %v4385_v1, %v4385_v1  ;;  %v5150_v29 = vsel %vm4897_vm1, %v4385_v1, 0.0  ;;  %v2370_v7 = vpop.permute.xlu0 %2369 }
 0x327   : > { %v3044_v42 = vsel %vm2980_vm14, %v2979_v36, %v2034_v3  ;;  %v5151_v49 = vrot.slane %v5150_v29, 4  ;;  %v3734_v15 = vrot.slane %v3732_v22, 4  ;;  %v3351_v12 = vor.u32 %v3350_v32, %v12995_v21 }
 0x328   : > { %v13030_v17 = vadd.f32 %v5148_v34, %v5147_v11  ;;  %v4394_v16 = vcombine.high %v4392_v18, %v4392_v18  ;;  %v5157_v28 = vsel %vm4897_vm1, %v4393_v14, 0.0  ;;  %v5164_v31 = vsel %vm4897_vm1, %v4392_v18, 0.0 }
 0x329   : > { %v2977_v56 = vsel %vm588_vm0, %v2913_v37, %v12997_v39  ;;  %v5152_v40 = vadd.f32 %v5151_v49, %v5150_v29  ;;  %v5158_v55 = vrot.slane %v5157_v28, 4  ;;  %v5165_v20 = vrot.slane %v5164_v31, 4  ;;  %v13050_v37 = vpop.f32.mrf.mxu1  ;;  %v2560_v14 = vpop.permute.xlu1 %2559 }
 0x32a   : > { %v3735_v27 = vor.u32 %v3734_v15, %v3731_v46  ;;  %v5171_v36 = vsel %vm4897_vm1, %v4394_v16, 0.0  ;;  %v3352_v21 = vsel %vm3273_vm13, %v3344_v38, %v3351_v12  ;;  %v3042_v32 = vsel %vm2980_vm14, %v2977_v56, %v2032_v58 }
 0x32b   : > { %v4100_v39 = vmul.f32 %v13046_v6, %v12971_v54  ;;  %v5153_v19 = vrot.slane %v5152_v40, 2  ;;  %v5159_v63 = vadd.f32 %v5158_v55, %v5157_v28  ;;  %v5166_v11 = vadd.f32 %v5165_v20, %v5164_v31  ;;  %3971 = vmatmul.mubr.bf16.gmra.mxu0 %v3352_v21  ;;  %v4006_v1 = vpop.f32.mrf.mxu1 }
 0x32c   : > { %v5172_v3 = vrot.slane %v5171_v36, 4  ;;  %v3736_v58 = vsel %vm3273_vm13, %v3728_v47, %v3735_v27  ;;  %v3092_v25 = vsel %vm3045_vm15, %v3042_v32, %v2210_v43  ;;  %v3093_v54 = vsel %vm3045_vm15, %v3044_v42, %v2210_v43 }
 0x32d   : > { %v4139_v38 = vadd.f32 %v13055_v30, %v4100_v39  ;;  %v5154_v46 = vadd.f32 %v5153_v19, %v5152_v40  ;;  %v5160_v34 = vrot.slane %v5159_v63, 2  ;;  %v5167_v22 = vrot.slane %v5166_v11, 2  ;;  %4067 = vmatmul.mubr.bf16.gmra.mxu1 %v3736_v58  ;;  %v13067_v47 = vpop.f32.mrf.mxu1 }
 0x32e   : > { %v5173_v18 = vadd.f32 %v5172_v3, %v5171_v36  ;;  %v3156_v49 = vsel %vm3094_vm6, %v3092_v25, %v2368_v9  ;;  %v4101_v15 = vmul.f32 %v13046_v6, %v12981_v44  ;;  %v13065_v12 = vsel %vm3094_vm6, %v3093_v54, %v2370_v7 }
 0x32f   : > { %v4171_v29 = vmax.f32 %v4139_v38, 0.0  ;;  %v5155_v16 = vrot.slane %v5154_v46, 1  ;;  %v5161_v43 = vadd.f32 %v5160_v34, %v5159_v63  ;;  %v5168_v42 = vadd.f32 %v5167_v22, %v5166_v11  ;;  %v4009_v20 = vpop.f32.mrf.mxu1  ;;  %v13080_v38 = vpop.permute.xlu1 %2737 }
 0x330   : > { %v5174_v28 = vrot.slane %v5173_v18, 2  ;;  %v4140_v40 = vadd.f32 %v13055_v30, %v4101_v15  ;;  %v3221_v55 = vsel %vm3159_vm7, %v3156_v49, %v2560_v14 }
 0x331   : > { %v4395_v31 = vcombine.high %v4171_v29, %v4171_v29  ;;  %v4402_v56 = vrot.slane %v4171_v29, %v9712_v8  ;;  %v13072_v27 = vadd.f32 %v5155_v16, %v5154_v46  ;;  %v5162_v44 = vrot.slane %v5161_v43, 1 }
 0x332   : > { %v5169_v9 = vrot.slane %v5168_v42, 1  ;;  %v5175_v36 = vadd.f32 %v5174_v28, %v5173_v18  ;;  %v4172_v19 = vmax.f32 %v4140_v40, 0.0  ;;  %v13091_v15 = vsel %vm3224_vm9, %v3221_v55, %v13080_v38 }
 0x333   : > { %v4409_v21 = vrot.slane %v4395_v31, %v9712_v8  ;;  %v4410_v32 = vcombine.high %v4402_v56, %v4402_v56  ;;  %v5178_v39 = vsel %vm4897_vm1, %v4402_v56, 0.0  ;;  %v13076_v63 = vadd.f32 %v5162_v44, %v5161_v43 }
 0x334   : > { %v13078_v11 = vadd.f32 %v5169_v9, %v5168_v42  ;;  %v5176_v3 = vrot.slane %v5175_v36, 1  ;;  %v5179_v7 = vrot.slane %v5178_v39, 4  ;;  %v4412_v1 = vcombine.high %v4172_v19, %v4172_v19 }
 0x335   : > { %v4411_v58 = vcombine.high %v4409_v21, %v4409_v21  ;;  %v5185_v25 = vsel %vm4897_vm1, %v4410_v32, 0.0  ;;  %v5192_v54 = vsel %vm4897_vm1, %v4409_v21, 0.0  ;;  %v4419_v29 = vrot.slane %v4172_v19, %v9712_v8 }
 0x336   : > { %v13084_v46 = vadd.f32 %v5176_v3, %v5175_v36  ;;  %v5180_v34 = vadd.f32 %v5179_v7, %v5178_v39  ;;  %v5186_v22 = vrot.slane %v5185_v25, 4  ;;  %v5193_v18 = vrot.slane %v5192_v54, 4 }
 0x337   : > { %v5199_v14 = vsel %vm4897_vm1, %v4411_v58, 0.0  ;;  %v4426_v49 = vrot.slane %v4412_v1, %v9712_v8  ;;  %v4427_v31 = vcombine.high %v4419_v29, %v4419_v29  ;;  %v5206_v40 = vsel %vm4897_vm1, %v4419_v29, 0.0 }
 0x338   : > { %v5181_v16 = vrot.slane %v5180_v34, 2  ;;  %v5187_v43 = vadd.f32 %v5186_v22, %v5185_v25  ;;  %v5194_v42 = vadd.f32 %v5193_v18, %v5192_v54  ;;  %v5200_v28 = vrot.slane %v5199_v14, 4 }
 0x339   : > { %v4428_v56 = vcombine.high %v4426_v49, %v4426_v49  ;;  %v5220_v20 = vsel %vm4897_vm1, %v4426_v49, 0.0  ;;  %v5207_v32 = vrot.slane %v5206_v40, 4  ;;  %v5213_v39 = vsel %vm4897_vm1, %v4427_v31, 0.0 }
 0x33a   : > { %v5182_v44 = vadd.f32 %v5181_v16, %v5180_v34  ;;  %v5188_v9 = vrot.slane %v5187_v43, 2  ;;  %v5195_v36 = vrot.slane %v5194_v42, 2  ;;  %v5201_v21 = vadd.f32 %v5200_v28, %v5199_v14 }
 0x33b   : > { %v5221_v19 = vrot.slane %v5220_v20, 4  ;;  %v5227_v55 = vsel %vm4897_vm1, %v4428_v56, 0.0  ;;  %v5208_v54 = vadd.f32 %v5207_v32, %v5206_v40  ;;  %v5214_v1 = vrot.slane %v5213_v39, 4 }
 0x33c   : > { %v5183_v3 = vrot.slane %v5182_v44, 1  ;;  %v5189_v7 = vadd.f32 %v5188_v9, %v5187_v43  ;;  %v5196_v58 = vadd.f32 %v5195_v36, %v5194_v42  ;;  %v5202_v25 = vrot.slane %v5201_v21, 2 }
 0x33d   : > { %v5222_v22 = vadd.f32 %v5221_v19, %v5220_v20  ;;  %v5228_v18 = vrot.slane %v5227_v55, 4  ;;  %v5209_v50 = vrot.slane %v5208_v54, 2  ;;  %v5215_v14 = vadd.f32 %v5214_v1, %v5213_v39  ;;  %v13097_v31 = vpop.f32.mrf.mxu1 }
 0x33e   : > { %v5184_v29 = vadd.f32 %v5183_v3, %v5182_v44  ;;  %v5190_v49 = vrot.slane %v5189_v7, 1  ;;  %v5197_v34 = vrot.slane %v5196_v58, 1  ;;  %v5203_v16 = vadd.f32 %v5202_v25, %v5201_v21 }
 0x33f   : > { %v5223_v28 = vrot.slane %v5222_v22, 2  ;;  %v5229_v0 = vadd.f32 %v5228_v18, %v5227_v55  ;;  %v5210_v42 = vadd.f32 %v5209_v50, %v5208_v54  ;;  %v5216_v40 = vrot.slane %v5215_v14, 2  ;;  %v4014_v36 = vpop.f32.mrf.mxu1 }
 0x340   : > { %v5191_v2 = vadd.f32 %v5190_v49, %v5189_v7  ;;  %v5198_v56 = vadd.f32 %v5197_v34, %v5196_v58  ;;  %v5204_v4 = vrot.slane %v5203_v16, 1  ;;  %v5874_v43 = vadd.f32 %v5184_v29, %v13020_v60  ;;  %v2562_v36 = vpop.permute.xlu0 %2561 }
 0x341   : > { %v5224_v9 = vadd.f32 %v5223_v28, %v5222_v22  ;;  %v5230_v20 = vrot.slane %v5229_v0, 2  ;;  %v5211_v19 = vrot.slane %v5210_v42, 1  ;;  %v5217_v55 = vadd.f32 %v5216_v40, %v5215_v14  ;;  %v4015_v7 = vpop.f32.mrf.mxu1 }
 0x342   : > { %v5205_v44 = vadd.f32 %v5204_v4, %v5203_v16  ;;  %v5875_v32 = vadd.f32 %v5191_v2, %v13023_v26  ;;  %v5876_v21 = vadd.f32 %v5198_v56, %v13025_v57  ;;  %v5938_v39 = vmul.f32 0.25, %v5874_v43 }
 0x343   : > { %v5225_v3 = vrot.slane %v5224_v9, 1  ;;  %v5231_v25 = vadd.f32 %v5230_v20, %v5229_v0  ;;  %v5212_v1 = vadd.f32 %v5211_v19, %v5210_v42  ;;  %v5218_v22 = vrot.slane %v5217_v55, 1  ;;  %v4017_v29 = vpop.f32.mrf.mxu1 }
 0x344   : > { %v5877_v58 = vadd.f32 %v5205_v44, %v13030_v17  ;;  %v5939_v60 = vmul.f32 0.25, %v5875_v32  ;;  %v5940_v50 = vmul.f32 0.25, %v5876_v21  ;;  %v6002_v54 = vpack.c.bf16 %v5938_v39, %v5938_v39 }
 0x345   : > { %v5226_v18 = vadd.f32 %v5225_v3, %v5224_v9  ;;  %v5232_v4 = vrot.slane %v5231_v25, 1  ;;  %v5219_v34 = vadd.f32 %v5218_v22, %v5217_v55  ;;  %v5878_v0 = vadd.f32 %v5212_v1, %v13072_v27 }
 0x346   : > { %v5941_v2 = vmul.f32 0.25, %v5877_v58  ;;  %v6003_v26 = vpack.c.bf16 %v5939_v60, %v5939_v60  ;;  %v6004_v57 = vpack.c.bf16 %v5940_v50, %v5940_v50  ;;  %v6132_v49 = vunpack.c.l.b16 %v6002_v54 }
 0x347   : > { %v5233_v16 = vadd.f32 %v5232_v4, %v5231_v25  ;;  %v5880_v14 = vadd.f32 %v5226_v18, %v13078_v11  ;;  %v3754_v43 = vshrl.u32 %v13091_v15, 16  ;;  %v5879_v42 = vadd.f32 %v5219_v34, %v13076_v63 }
 0x348   : > { %v6005_v17 = vpack.c.bf16 %v5941_v2, %v5941_v2  ;;  %v6133_v28 = vunpack.c.l.b16 %v6003_v26  ;;  %v6134_v56 = vunpack.c.l.b16 %v6004_v57  ;;  %v5942_v9 = vmul.f32 0.25, %v5878_v0 }
 0x349   : > { %v5881_v40 = vadd.f32 %v5233_v16, %v13084_v46  ;;  %v5944_v20 = vmul.f32 0.25, %v5880_v14  ;;  %v3756_v21 = vrot.slane %v3754_v43, 3  ;;  %v3757_v27 = vshll.u32 %v13091_v15, 16 }
 0x34a   : > { %v6135_v44 = vunpack.c.l.b16 %v6005_v17  ;;  %v6201_v32 = vsel %vm6180_vm2, %v6133_v28, %v6132_v49  ;;  %v5943_v39 = vmul.f32 0.25, %v5879_v42  ;;  %v6006_v55 = vpack.c.bf16 %v5942_v9, %v5942_v9 }
 0x34b   : > { %v6202_v11 = vsel %vm6182_vm3, %v6134_v56, %v6201_v32  ;;  %v5945_v19 = vmul.f32 0.25, %v5881_v40  ;;  %v6008_v3 = vpack.c.bf16 %v5944_v20, %v5944_v20  ;;  %v3759_v63 = vrot.slane %v3757_v27, 4 }
 0x34c   : > { %v6203_v25 = vsel %vm6184_vm4, %v6135_v44, %v6202_v11  ;;  %v3223_v46 = vsel %vm3159_vm7, %v13065_v12, %v2562_v36  ;;  %v14522_v58 = vrot.slane %v12983_v13, 1  ;;  %v6007_v50 = vpack.c.bf16 %v5943_v39, %v5943_v39 }
 0x34d   : > { %v6136_v54 = vunpack.c.l.b16 %v6006_v55  ;;  %v3272_v15 = vsel %vm3224_vm9, %v3223_v46, %v13080_v38  ;;  %v6009_v1 = vpack.c.bf16 %v5945_v19, %v5945_v19  ;;  %v13121_v22 = vunpack.c.l.b16 %v6008_v3 }
 0x34e   : > { %v13117_v60 = vadd.f32 %v14522_v58, %v12983_v13  ;;  %v3761_v18 = vshrl.u32 %v3272_v15, 16  ;;  %v3764_v4 = vshll.u32 %v3272_v15, 16  ;;  %v6137_v29 = vunpack.c.l.b16 %v6007_v50  ;;  %v14524_v13 = vld [vmem:[#allocation99_spill] sm:$0xff] }
 0x34f   : > { %v6204_v2 = vsel %vm6186_vm5, %v6136_v54, %v6203_v25  ;;  %v3760_v26 = vor.u32 %v3759_v63, %v3756_v21  ;;  %v14523_v12 = vor.u32 %v12752_v24, %v12750_v35  ;;  %v14525_v57 = vor.u32 %v12744_v62, %v14524_v13  ;;  %v14526_v24 = vld [vmem:[#allocation65_spill] sm:$0xff] }
 0x350   : > { %v3763_v34 = vrot.slane %v3761_v18, 3  ;;  %v3766_v16 = vrot.slane %v3764_v4, 4  ;;  %v4102_v38 = vmul.f32 %v13046_v6, %v13050_v37  ;;  %v4103_v0 = vmul.f32 %v13046_v6, %v13067_v47 }
 0x351   : > { %v3785_v49 = vsel %vm3273_vm13, %v14525_v57, %v14523_v12  ;;  %v13137_v14 = vsel %vm6188_vm8, %v6137_v29, %v6204_v2  ;;  %v4104_v35 = vmul.f32 %v13046_v6, %v13097_v31  ;;  %v4105_v62 = vmul.f32 %v13046_v6, %v4015_v7 }
 0x352   : > { %8964 = vmatprep.mubr.msk.bf16.mxu1 %vm2835_vm12, %v3785_v49  ;;  %v5865_v17 = vadd.f32 %v12874_v23, %v14526_v24  ;;  %v3767_v28 = vor.u32 %v3766_v16, %v3763_v34  ;;  %v4141_v56 = vadd.f32 %v13055_v30, %v4102_v38  ;;  %v4142_v43 = vadd.f32 %v13055_v30, %v4103_v0 }
 0x353   : > { %v13147_v37 = vmul.f32 0.25, %v12867_v5  ;;  %v13149_v47 = vunpack.c.l.b16 %v6009_v1  ;;  %v4143_v42 = vadd.f32 %v13055_v30, %v4104_v35  ;;  %v4144_v40 = vadd.f32 %v13055_v30, %v4105_v62 }
 0x354   : > { %v13153_v31 = vmul.f32 0.25, %v5865_v17  ;;  %v3768_v7 = vsel %vm3273_vm13, %v3760_v26, %v3767_v28  ;;  %v4173_v9 = vmax.f32 %v4141_v56, 0.0  ;;  %v4174_v23 = vmax.f32 %v4142_v43, 0.0 }
 0x355   : > { %v14527_v20 = vpack.c.bf16 %v12876_v41, %v12876_v41  ;;  %4075 = vmatmul.mubr.bf16.gmra.mxu1 %v3768_v7  ;;  %v4175_v5 = vmax.f32 %v4143_v42, 0.0  ;;  %v13161_v44 = vmax.f32 %v4144_v40, 0.0  ;;  %v5992_v32 = vpack.c.bf16 %v13147_v37, %v13147_v37 }
 0x356   : > { %v13168_v21 = vsel %vm6182_vm3, %v12863_v53, %v12872_v61  ;;  %v4429_v27 = vcombine.high %v4173_v9, %v4173_v9  ;;  %v4436_v11 = vrot.slane %v4173_v9, %v9712_v8  ;;  %v4446_v39 = vcombine.high %v4174_v23, %v4174_v23  ;;  %v13181_v63 = vpop.f32.mrf.mxu1 }
 0x357   : > { %v13159_v36 = vunpack.c.l.b16 %v14527_v20  ;;  %v4453_v41 = vrot.slane %v4174_v23, %v9712_v8  ;;  %v4463_v19 = vcombine.high %v4175_v5, %v4175_v5  ;;  %v13173_v55 = vrot.slane %v4175_v5, %v9712_v8 }
 0x358   : > { %v4480_v3 = vcombine.high %v13161_v44, %v13161_v44  ;;  %v13179_v25 = vrot.slane %v13161_v44, %v9712_v8  ;;  %v4443_v53 = vrot.slane %v4429_v27, %v9712_v8  ;;  %v4444_v61 = vcombine.high %v4436_v11, %v4436_v11  ;;  %v4022_v18 = vpop.f32.mrf.mxu1 }
 0x359   : > { %v5234_v46 = vsel %vm4897_vm1, %v4436_v11, 0.0  ;;  %v4460_v58 = vrot.slane %v4446_v39, %v9712_v8  ;;  %v4461_v54 = vcombine.high %v4453_v41, %v4453_v41  ;;  %v5262_v15 = vsel %vm4897_vm1, %v4453_v41, 0.0 }
 0x35a   : > { %v5235_v50 = vrot.slane %v5234_v46, 4  ;;  %v13188_v1 = vrot.slane %v4463_v19, %v9712_v8  ;;  %v4445_v4 = vcombine.high %v4443_v53, %v4443_v53  ;;  %v5241_v29 = vsel %vm4897_vm1, %v4444_v61, 0.0  ;;  %v13192_v34 = vpop.f32.mrf.mxu1 }
 0x35b   : > { %v5248_v2 = vsel %vm4897_vm1, %v4443_v53, 0.0  ;;  %v4462_v26 = vcombine.high %v4460_v58, %v4460_v58  ;;  %v5242_v13 = vrot.slane %v5241_v29, 4  ;;  %v5263_v49 = vrot.slane %v5262_v15, 4 }
 0x35c   : > { %v5236_v12 = vadd.f32 %v5235_v50, %v5234_v46  ;;  %v5249_v57 = vrot.slane %v5248_v2, 4  ;;  %v5255_v16 = vsel %vm4897_vm1, %v4445_v4, 0.0  ;;  %v5269_v38 = vsel %vm4897_vm1, %v4461_v54, 0.0  ;;  %v4025_v56 = vpop.f32.mrf.mxu1 }
 0x35d   : > { %v5276_v0 = vsel %vm4897_vm1, %v4460_v58, 0.0  ;;  %v5283_v35 = vsel %vm4897_vm1, %v4462_v26, 0.0  ;;  %v5243_v24 = vadd.f32 %v5242_v13, %v5241_v29  ;;  %v5256_v28 = vrot.slane %v5255_v16, 4 }
 0x35e   : > { %v5237_v62 = vrot.slane %v5236_v12, 2  ;;  %v5250_v17 = vadd.f32 %v5249_v57, %v5248_v2  ;;  %v5264_v43 = vadd.f32 %v5263_v49, %v5262_v15  ;;  %v5270_v42 = vrot.slane %v5269_v38, 4 }
 0x35f   : > { %v5277_v40 = vrot.slane %v5276_v0, 4  ;;  %v5284_v7 = vrot.slane %v5283_v35, 4  ;;  %v5244_v23 = vrot.slane %v5243_v24, 2  ;;  %v5257_v5 = vadd.f32 %v5256_v28, %v5255_v16 }
 0x360   : > { %v5238_v9 = vadd.f32 %v5237_v62, %v5236_v12  ;;  %v5251_v20 = vrot.slane %v5250_v17, 2  ;;  %v5265_v27 = vrot.slane %v5264_v43, 2  ;;  %v5271_v11 = vadd.f32 %v5270_v42, %v5269_v38 }
 0x361   : > { %v5278_v39 = vadd.f32 %v5277_v40, %v5276_v0  ;;  %v5285_v41 = vadd.f32 %v5284_v7, %v5283_v35  ;;  %v5245_v53 = vadd.f32 %v5244_v23, %v5243_v24  ;;  %v5258_v46 = vrot.slane %v5257_v5, 2 }
 0x362   : > { %v5239_v19 = vrot.slane %v5238_v9, 1  ;;  %v5252_v61 = vadd.f32 %v5251_v20, %v5250_v17  ;;  %v5266_v58 = vadd.f32 %v5265_v27, %v5264_v43  ;;  %v5272_v50 = vrot.slane %v5271_v11, 2 }
 0x363   : > { %v5279_v54 = vrot.slane %v5278_v39, 2  ;;  %v5286_v18 = vrot.slane %v5285_v41, 2  ;;  %v5246_v4 = vrot.slane %v5245_v53, 1  ;;  %v5259_v2 = vadd.f32 %v5258_v46, %v5257_v5 }
 0x364   : > { %v13198_v15 = vadd.f32 %v5239_v19, %v5238_v9  ;;  %v5253_v29 = vrot.slane %v5252_v61, 1  ;;  %v5267_v26 = vrot.slane %v5266_v58, 1  ;;  %v5273_v12 = vadd.f32 %v5272_v50, %v5271_v11 }
 0x365   : > { %v5280_v13 = vadd.f32 %v5279_v54, %v5278_v39  ;;  %v5287_v57 = vadd.f32 %v5286_v18, %v5285_v41  ;;  %v13200_v49 = vadd.f32 %v5246_v4, %v5245_v53  ;;  %v5260_v38 = vrot.slane %v5259_v2, 1 }
 0x366   : > { %v13202_v16 = vadd.f32 %v5253_v29, %v5252_v61  ;;  %v4478_v0 = vcombine.high %v13173_v55, %v13173_v55  ;;  %v13206_v35 = vadd.f32 %v5267_v26, %v5266_v58  ;;  %v5274_v62 = vrot.slane %v5273_v12, 1 }
 0x367   : > { %v5281_v24 = vrot.slane %v5280_v13, 1  ;;  %v5288_v17 = vrot.slane %v5287_v57, 1  ;;  %v13208_v28 = vadd.f32 %v5260_v38, %v5259_v2  ;;  %v4479_v56 = vcombine.high %v13188_v1, %v13188_v1 }
 0x368   : > { %v5290_v43 = vsel %vm4897_vm1, %v13173_v55, 0.0  ;;  %v5297_v42 = vsel %vm4897_vm1, %v4478_v0, 0.0  ;;  %v13215_v40 = vadd.f32 %v5274_v62, %v5273_v12  ;;  %v5304_v5 = vsel %vm4897_vm1, %v13188_v1, 0.0 }
 0x369   : > { %v13217_v7 = vadd.f32 %v5281_v24, %v5280_v13  ;;  %v13219_v9 = vadd.f32 %v5288_v17, %v5287_v57  ;;  %v5291_v23 = vrot.slane %v5290_v43, 4  ;;  %v5298_v20 = vrot.slane %v5297_v42, 4 }
 0x36a   : > { %v5311_v27 = vsel %vm4897_vm1, %v4479_v56, 0.0  ;;  %v4494_v55 = vrot.slane %v4480_v3, %v9712_v8  ;;  %v5305_v39 = vrot.slane %v5304_v5, 4  ;;  %v4495_v19 = vcombine.high %v13179_v25, %v13179_v25 }
 0x36b   : > { %v5292_v11 = vadd.f32 %v5291_v23, %v5290_v43  ;;  %v5312_v41 = vrot.slane %v5311_v27, 4  ;;  %v5299_v53 = vadd.f32 %v5298_v20, %v5297_v42  ;;  %v5318_v46 = vsel %vm4897_vm1, %v13179_v25, 0.0  ;;  %v13233_v4 = vpop.f32.mrf.mxu1 }
 0x36c   : > { %v4496_v61 = vcombine.high %v4494_v55, %v4494_v55  ;;  %v5332_v1 = vsel %vm4897_vm1, %v4494_v55, 0.0  ;;  %v5306_v50 = vadd.f32 %v5305_v39, %v5304_v5  ;;  %v5319_v18 = vrot.slane %v5318_v46, 4 }
 0x36d   : > { %v5293_v58 = vrot.slane %v5292_v11, 2  ;;  %v5313_v54 = vadd.f32 %v5312_v41, %v5311_v27  ;;  %v5300_v44 = vrot.slane %v5299_v53, 2  ;;  %v5325_v3 = vsel %vm4897_vm1, %v4495_v19, 0.0  ;;  %v4030_v38 = vpop.f32.mrf.mxu1 }
 0x36e   : > { %v5333_v29 = vrot.slane %v5332_v1, 4  ;;  %v5339_v2 = vsel %vm4897_vm1, %v4496_v61, 0.0  ;;  %v5307_v12 = vrot.slane %v5306_v50, 2  ;;  %v5320_v57 = vadd.f32 %v5319_v18, %v5318_v46 }
 0x36f   : > { %v5294_v26 = vadd.f32 %v5293_v58, %v5292_v11  ;;  %v5314_v13 = vrot.slane %v5313_v54, 2  ;;  %v5301_v25 = vadd.f32 %v5300_v44, %v5299_v53  ;;  %v5326_v0 = vrot.slane %v5325_v3, 4  ;;  %v13237_v23 = vpop.f32.mrf.mxu1 }
 0x370   : > { %v5334_v62 = vadd.f32 %v5333_v29, %v5332_v1  ;;  %v5340_v24 = vrot.slane %v5339_v2, 4  ;;  %v5308_v56 = vadd.f32 %v5307_v12, %v5306_v50  ;;  %v5321_v42 = vrot.slane %v5320_v57, 2 }
 0x371   : > { %v5295_v17 = vrot.slane %v5294_v26, 1  ;;  %v5315_v43 = vadd.f32 %v5314_v13, %v5313_v54  ;;  %v5302_v20 = vrot.slane %v5301_v25, 1  ;;  %v5327_v5 = vadd.f32 %v5326_v0, %v5325_v3  ;;  %v4033_v61 = vpop.f32.mrf.mxu1 }
 0x372   : > { %v5335_v27 = vrot.slane %v5334_v62, 2  ;;  %v5341_v55 = vadd.f32 %v5340_v24, %v5339_v2  ;;  %v5309_v11 = vrot.slane %v5308_v56, 1  ;;  %v5322_v19 = vadd.f32 %v5321_v42, %v5320_v57 }
 0x373   : > { %v5296_v39 = vadd.f32 %v5295_v17, %v5294_v26  ;;  %v5316_v41 = vrot.slane %v5315_v43, 1  ;;  %v5303_v46 = vadd.f32 %v5302_v20, %v5301_v25  ;;  %v5328_v53 = vrot.slane %v5327_v5, 2 }
 0x374   : > { %v5336_v58 = vadd.f32 %v5335_v27, %v5334_v62  ;;  %v5342_v1 = vrot.slane %v5341_v55, 2  ;;  %v5310_v18 = vadd.f32 %v5309_v11, %v5308_v56  ;;  %v5323_v54 = vrot.slane %v5322_v19, 1 }
 0x375   : > { %v5317_v44 = vadd.f32 %v5316_v41, %v5315_v43  ;;  %v5882_v50 = vadd.f32 %v5296_v39, %v13198_v15  ;;  %v5883_v29 = vadd.f32 %v5303_v46, %v13200_v49  ;;  %v5329_v12 = vadd.f32 %v5328_v53, %v5327_v5 }
 0x376   : > { %v5337_v3 = vrot.slane %v5336_v58, 1  ;;  %v5343_v13 = vadd.f32 %v5342_v1, %v5341_v55  ;;  %v5884_v2 = vadd.f32 %v5310_v18, %v13202_v16  ;;  %v5324_v38 = vadd.f32 %v5323_v54, %v5322_v19 }
 0x377   : > { %v5885_v26 = vadd.f32 %v5317_v44, %v13208_v28  ;;  %v5946_v57 = vmul.f32 0.25, %v5882_v50  ;;  %v5947_v25 = vmul.f32 0.25, %v5883_v29  ;;  %v5330_v0 = vrot.slane %v5329_v12, 1 }
 0x378   : > { %v5338_v62 = vadd.f32 %v5337_v3, %v5336_v58  ;;  %v5344_v24 = vrot.slane %v5343_v13, 1  ;;  %v5948_v17 = vmul.f32 0.25, %v5884_v2  ;;  %v5886_v15 = vadd.f32 %v5324_v38, %v13206_v35 }
 0x379   : > { %v5949_v56 = vmul.f32 0.25, %v5885_v26  ;;  %v6010_v43 = vpack.c.bf16 %v5946_v57, %v5946_v57  ;;  %v6011_v42 = vpack.c.bf16 %v5947_v25, %v5947_v25  ;;  %v5331_v49 = vadd.f32 %v5330_v0, %v5329_v12 }
 0x37a   : > { %v5345_v20 = vadd.f32 %v5344_v24, %v5343_v13  ;;  %v5888_v5 = vadd.f32 %v5338_v62, %v13217_v7  ;;  %v6012_v27 = vpack.c.bf16 %v5948_v17, %v5948_v17  ;;  %v5950_v28 = vmul.f32 0.25, %v5886_v15 }
 0x37b   : > { %v6013_v16 = vpack.c.bf16 %v5949_v56, %v5949_v56  ;;  %v6140_v55 = vunpack.c.l.b16 %v6010_v43  ;;  %v6141_v39 = vunpack.c.l.b16 %v6011_v42  ;;  %v5887_v11 = vadd.f32 %v5331_v49, %v13215_v40 }
 0x37c   : > { %v5889_v41 = vadd.f32 %v5345_v20, %v13219_v9  ;;  %v5952_v19 = vmul.f32 0.25, %v5888_v5  ;;  %v6142_v61 = vunpack.c.l.b16 %v6012_v27  ;;  %v6014_v53 = vpack.c.bf16 %v5950_v28, %v5950_v28 }
 0x37d   : > { %v6143_v46 = vunpack.c.l.b16 %v6013_v16  ;;  %v4106_v35 = vmul.f32 %v13046_v6, %v13181_v63  ;;  %v6208_v58 = vsel %vm6180_vm2, %v6141_v39, %v6140_v55  ;;  %v5951_v1 = vmul.f32 0.25, %v5887_v11 }
 0x37e   : > { %v5953_v7 = vmul.f32 0.25, %v5889_v41  ;;  %v6016_v18 = vpack.c.bf16 %v5952_v19, %v5952_v19  ;;  %v6209_v44 = vsel %vm6182_vm3, %v6142_v61, %v6208_v58  ;;  %v6144_v50 = vunpack.c.l.b16 %v6014_v53 }
 0x37f   : > { %v4145_v54 = vadd.f32 %v13055_v30, %v4106_v35  ;;  %v4107_v40 = vmul.f32 %v13046_v6, %v13192_v34  ;;  %v6015_v9 = vpack.c.bf16 %v5951_v1, %v5951_v1  ;;  %v6210_v12 = vsel %vm6184_vm4, %v6143_v46, %v6209_v44 }
 0x380   : > { %v6017_v29 = vpack.c.bf16 %v5953_v7, %v5953_v7  ;;  %v5993_v63 = vpack.c.bf16 %v13153_v31, %v13153_v31  ;;  %v6211_v3 = vsel %vm6186_vm5, %v6144_v50, %v6210_v12  ;;  %v4108_v26 = vmul.f32 %v13046_v6, %v13233_v4 }
 0x381   : > { %v4177_v13 = vmax.f32 %v4145_v54, 0.0  ;;  %v4146_v2 = vadd.f32 %v13055_v30, %v4107_v40  ;;  %v6145_v57 = vunpack.c.l.b16 %v6015_v9  ;;  %v13261_v38 = vunpack.c.l.b16 %v6016_v18 }
 0x382   : > { %v13263_v25 = vunpack.c.l.b16 %v6017_v29  ;;  %v4109_v34 = vmul.f32 %v13046_v6, %v13237_v23  ;;  %v4147_v24 = vadd.f32 %v13055_v30, %v4108_v26  ;;  %v13273_v4 = vpop.f32.mrf.mxu1  ;;  %v13278_v43 = vunpack.c.l.b16 %v5992_v32 }
 0x383   : > { %v4497_v0 = vcombine.high %v4177_v13, %v4177_v13  ;;  %v4504_v62 = vrot.slane %v4177_v13, %v9712_v8  ;;  %v4178_v31 = vmax.f32 %v4146_v2, 0.0  ;;  %v13270_v17 = vsel %vm6188_vm8, %v6145_v57, %v6211_v3 }
 0x384   : > { %v4148_v56 = vadd.f32 %v13055_v30, %v4109_v34  ;;  %v13283_v6 = vsel %vm6184_vm4, %v12869_v10, %v13168_v21  ;;  %v4179_v5 = vmax.f32 %v4147_v24, 0.0  ;;  %v4038_v27 = vpop.f32.mrf.mxu1  ;;  %v13288_v16 = vunpack.c.l.b16 %v5993_v63 }
 0x385   : > { %v4511_v23 = vrot.slane %v4497_v0, %v9712_v8  ;;  %v4512_v15 = vcombine.high %v4504_v62, %v4504_v62  ;;  %v5346_v42 = vsel %vm4897_vm1, %v4504_v62, 0.0  ;;  %v4514_v49 = vcombine.high %v4178_v31, %v4178_v31 }
 0x386   : > { %v5347_v20 = vrot.slane %v5346_v42, 4  ;;  %v4521_v30 = vrot.slane %v4178_v31, %v9712_v8  ;;  %v13293_v41 = vpop.f32.mrf.mxu1 }
 0x387   : > { %v4513_v37 = vcombine.high %v4511_v23, %v4511_v23  ;;  %v5353_v32 = vsel %vm4897_vm1, %v4512_v15, 0.0  ;;  %v5360_v55 = vsel %vm4897_vm1, %v4511_v23, 0.0  ;;  %v4528_v10 = vrot.slane %v4514_v49, %v9712_v8 }
 0x388   : > { %v5348_v21 = vadd.f32 %v5347_v20, %v5346_v42  ;;  %v5354_v28 = vrot.slane %v5353_v32, 4  ;;  %v5361_v39 = vrot.slane %v5360_v55, 4  ;;  %v4529_v11 = vcombine.high %v4521_v30, %v4521_v30  ;;  %v4041_v18 = vpop.f32.mrf.mxu1 }
 0x389   : > { %v5367_v19 = vsel %vm4897_vm1, %v4513_v37, 0.0  ;;  %v4530_v61 = vcombine.high %v4528_v10, %v4528_v10  ;;  %v5374_v46 = vsel %vm4897_vm1, %v4521_v30, 0.0  ;;  %v5388_v53 = vsel %vm4897_vm1, %v4528_v10, 0.0 }
 0x38a   : > { %v5349_v35 = vrot.slane %v5348_v21, 2  ;;  %v5355_v58 = vadd.f32 %v5354_v28, %v5353_v32  ;;  %v5362_v1 = vadd.f32 %v5361_v39, %v5360_v55  ;;  %v5368_v7 = vrot.slane %v5367_v19, 4 }
 0x38b   : > { %v5375_v44 = vrot.slane %v5374_v46, 4  ;;  %v5381_v50 = vsel %vm4897_vm1, %v4529_v11, 0.0  ;;  %v5389_v54 = vrot.slane %v5388_v53, 4  ;;  %v5395_v40 = vsel %vm4897_vm1, %v4530_v61, 0.0 }
 0x38c   : > { %v5350_v9 = vadd.f32 %v5349_v35, %v5348_v21  ;;  %v5356_v29 = vrot.slane %v5355_v58, 2  ;;  %v5363_v12 = vrot.slane %v5362_v1, 2  ;;  %v5369_v63 = vadd.f32 %v5368_v7, %v5367_v19 }
 0x38d   : > { %v5376_v3 = vadd.f32 %v5375_v44, %v5374_v46  ;;  %v5382_v13 = vrot.slane %v5381_v50, 4  ;;  %v5390_v2 = vadd.f32 %v5389_v54, %v5388_v53  ;;  %v5396_v26 = vrot.slane %v5395_v40, 4 }
 0x38e   : > { %v5351_v57 = vrot.slane %v5350_v9, 1  ;;  %v5357_v34 = vadd.f32 %v5356_v29, %v5355_v58  ;;  %v5364_v0 = vadd.f32 %v5363_v12, %v5362_v1  ;;  %v5370_v62 = vrot.slane %v5369_v63, 2 }
 0x38f   : > { %v5377_v31 = vrot.slane %v5376_v3, 2  ;;  %v5383_v24 = vadd.f32 %v5382_v13, %v5381_v50  ;;  %v5391_v23 = vrot.slane %v5390_v2, 2  ;;  %v5397_v15 = vadd.f32 %v5396_v26, %v5395_v40 }
 0x390   : > { %v5358_v42 = vrot.slane %v5357_v34, 1  ;;  %v5365_v49 = vrot.slane %v5364_v0, 1  ;;  %v5371_v20 = vadd.f32 %v5370_v62, %v5369_v63  ;;  %v4180_v30 = vmax.f32 %v4148_v56, 0.0 }
 0x391   : > { %v5378_v27 = vadd.f32 %v5377_v31, %v5376_v3  ;;  %v5384_v37 = vrot.slane %v5383_v24, 2  ;;  %v5392_v32 = vadd.f32 %v5391_v23, %v5390_v2  ;;  %v5398_v55 = vrot.slane %v5397_v15, 2 }
 0x392   : > { %v13300_v10 = vadd.f32 %v5351_v57, %v5350_v9  ;;  %v13302_v21 = vadd.f32 %v5358_v42, %v5357_v34  ;;  %v5372_v28 = vrot.slane %v5371_v20, 1  ;;  %v4531_v39 = vcombine.high %v4179_v5, %v4179_v5 }
 0x393   : > { %v5379_v11 = vrot.slane %v5378_v27, 1  ;;  %v5385_v19 = vadd.f32 %v5384_v37, %v5383_v24  ;;  %v5393_v61 = vrot.slane %v5392_v32, 1  ;;  %v13304_v46 = vadd.f32 %v5398_v55, %v5397_v15 }
 0x394   : > { %v13306_v53 = vadd.f32 %v5365_v49, %v5364_v0  ;;  %v4538_v35 = vrot.slane %v4179_v5, %v9712_v8  ;;  %v4545_v56 = vrot.slane %v4531_v39, %v9712_v8  ;;  %v4548_v58 = vcombine.high %v4180_v30, %v4180_v30 }
 0x395   : > { %v13310_v1 = vadd.f32 %v5372_v28, %v5371_v20  ;;  %v13312_v7 = vadd.f32 %v5379_v11, %v5378_v27  ;;  %v5386_v18 = vrot.slane %v5385_v19, 1  ;;  %v13314_v44 = vadd.f32 %v5393_v61, %v5392_v32 }
 0x396   : > { %v4546_v50 = vcombine.high %v4538_v35, %v4538_v35  ;;  %v4547_v54 = vcombine.high %v4545_v56, %v4545_v56  ;;  %v5402_v40 = vsel %vm4897_vm1, %v4538_v35, 0.0  ;;  %v5416_v9 = vsel %vm4897_vm1, %v4545_v56, 0.0 }
 0x397   : > { %v13318_v29 = vadd.f32 %v5386_v18, %v5385_v19  ;;  %v5400_v5 = vrot.slane %v13304_v46, 1  ;;  %v5403_v12 = vrot.slane %v5402_v40, 4  ;;  %v5417_v63 = vrot.slane %v5416_v9, 4 }
 0x398   : > { %v5409_v3 = vsel %vm4897_vm1, %v4546_v50, 0.0  ;;  %v5423_v13 = vsel %vm4897_vm1, %v4547_v54, 0.0  ;;  %v4555_v2 = vrot.slane %v4180_v30, %v9712_v8  ;;  %v4562_v26 = vrot.slane %v4548_v58, %v9712_v8 }
 0x399   : > { %v5404_v57 = vadd.f32 %v5403_v12, %v5402_v40  ;;  %v5410_v34 = vrot.slane %v5409_v3, 4  ;;  %v5418_v0 = vadd.f32 %v5417_v63, %v5416_v9  ;;  %v5424_v62 = vrot.slane %v5423_v13, 4 }
 0x39a   : > { %v4563_v31 = vcombine.high %v4555_v2, %v4555_v2  ;;  %v4564_v24 = vcombine.high %v4562_v26, %v4562_v26  ;;  %v5430_v23 = vsel %vm4897_vm1, %v4555_v2, 0.0  ;;  %v5444_v15 = vsel %vm4897_vm1, %v4562_v26, 0.0 }
 0x39b   : > { %v5405_v42 = vrot.slane %v5404_v57, 2  ;;  %v5411_v49 = vadd.f32 %v5410_v34, %v5409_v3  ;;  %v5419_v20 = vrot.slane %v5418_v0, 2  ;;  %v5425_v27 = vadd.f32 %v5424_v62, %v5423_v13 }
 0x39c   : > { %v5431_v37 = vrot.slane %v5430_v23, 4  ;;  %v5437_v32 = vsel %vm4897_vm1, %v4563_v31, 0.0  ;;  %v5445_v30 = vrot.slane %v5444_v15, 4  ;;  %v5451_v55 = vsel %vm4897_vm1, %v4564_v24, 0.0 }
 0x39d   : > { %v5406_v28 = vadd.f32 %v5405_v42, %v5404_v57  ;;  %v5412_v39 = vrot.slane %v5411_v49, 2  ;;  %v5420_v11 = vadd.f32 %v5419_v20, %v5418_v0  ;;  %v5426_v19 = vrot.slane %v5425_v27, 2 }
 0x39e   : > { %v5432_v61 = vadd.f32 %v5431_v37, %v5430_v23  ;;  %v5438_v35 = vrot.slane %v5437_v32, 4  ;;  %v5446_v56 = vadd.f32 %v5445_v30, %v5444_v15  ;;  %v5452_v58 = vrot.slane %v5451_v55, 4 }
 0x39f   : > { %v5407_v18 = vrot.slane %v5406_v28, 1  ;;  %v5413_v50 = vadd.f32 %v5412_v39, %v5411_v49  ;;  %v5421_v54 = vrot.slane %v5420_v11, 1  ;;  %v5427_v40 = vadd.f32 %v5426_v19, %v5425_v27  ;;  %v4044_v57 = vpop.f32.mrf.mxu1 }
 0x3a0   : > { %v5433_v9 = vrot.slane %v5432_v61, 2  ;;  %v5439_v12 = vadd.f32 %v5438_v35, %v5437_v32  ;;  %v5447_v63 = vrot.slane %v5446_v56, 2  ;;  %v5453_v3 = vadd.f32 %v5452_v58, %v5451_v55 }
 0x3a1   : > { %v5408_v13 = vadd.f32 %v5407_v18, %v5406_v28  ;;  %v5414_v2 = vrot.slane %v5413_v50, 1  ;;  %v5422_v26 = vadd.f32 %v5421_v54, %v5420_v11  ;;  %v5428_v34 = vrot.slane %v5427_v40, 1  ;;  %v4046_v20 = vpop.f32.mrf.mxu1 }
 0x3a2   : > { %v5434_v62 = vadd.f32 %v5433_v9, %v5432_v61  ;;  %v5440_v0 = vrot.slane %v5439_v12, 2  ;;  %v5448_v31 = vadd.f32 %v5447_v63, %v5446_v56  ;;  %v5454_v24 = vrot.slane %v5453_v3, 2 }
 0x3a3   : > { %v5415_v23 = vadd.f32 %v5414_v2, %v5413_v50  ;;  %v5429_v15 = vadd.f32 %v5428_v34, %v5427_v40  ;;  %v5890_v42 = vadd.f32 %v5408_v13, %v13300_v10  ;;  %v5892_v49 = vadd.f32 %v5422_v26, %v13306_v53  ;;  %v4047_v19 = vpop.f32.mrf.mxu1  ;;  %v13348_v34 = vld [vmem:[%s14097_s5] ss:$0 sm:$0xff] }
 0x3a4   : > { %v5435_v27 = vrot.slane %v5434_v62, 1  ;;  %v5441_v37 = vadd.f32 %v5440_v0, %v5439_v12  ;;  %v5449_v32 = vrot.slane %v5448_v31, 1  ;;  %v5455_v30 = vadd.f32 %v5454_v24, %v5453_v3  ;;  %v13363_v24 = vld [vmem:[%s14098_s6] ss:$0 sm:$0xff] }
 0x3a5   : > { %v5891_v55 = vadd.f32 %v5415_v23, %v13302_v21  ;;  %v5893_v28 = vadd.f32 %v5429_v15, %v13310_v1  ;;  %v5954_v39 = vmul.f32 0.25, %v5890_v42  ;;  %v5956_v11 = vmul.f32 0.25, %v5892_v49  ;;  %v4049_v54 = vpop.f32.mrf.mxu1 }
 0x3a6   : > { %v5436_v61 = vadd.f32 %v5435_v27, %v5434_v62  ;;  %v5442_v35 = vrot.slane %v5441_v37, 1  ;;  %v5450_v56 = vadd.f32 %v5449_v32, %v5448_v31  ;;  %v5456_v58 = vrot.slane %v5455_v30, 1 }
 0x3a7   : > { %v5955_v18 = vmul.f32 0.25, %v5891_v55  ;;  %v5957_v10 = vmul.f32 0.25, %v5893_v28  ;;  %v6018_v50 = vpack.c.bf16 %v5954_v39, %v5954_v39  ;;  %v6020_v53 = vpack.c.bf16 %v5956_v11, %v5956_v11 }
 0x3a8   : > { %v13336_v40 = vadd.f32 %v5400_v5, %v13304_v46  ;;  %v5443_v21 = vadd.f32 %v5442_v35, %v5441_v37  ;;  %v5894_v1 = vadd.f32 %v5436_v61, %v13312_v7  ;;  %v13340_v9 = vadd.f32 %v5450_v56, %v13314_v44 }
 0x3a9   : > { %v6019_v12 = vpack.c.bf16 %v5955_v18, %v5955_v18  ;;  %v6021_v63 = vpack.c.bf16 %v5957_v10, %v5957_v10  ;;  %v6148_v3 = vunpack.c.l.b16 %v6018_v50  ;;  %v13342_v13 = vadd.f32 %v5456_v58, %v5455_v30 }
 0x3aa   : > { %v5895_v2 = vadd.f32 %v5443_v21, %v13318_v29  ;;  %v5958_v26 = vmul.f32 0.25, %v5894_v1  ;;  %v4110_v46 = vmul.f32 %v13348_v34, %v13273_v4  ;;  %v4111_v7 = vmul.f32 %v13348_v34, %v13293_v41 }
 0x3ab   : > { %v6149_v44 = vunpack.c.l.b16 %v6019_v12  ;;  %v13354_v5 = vunpack.c.l.b16 %v6020_v53  ;;  %v4112_v62 = vmul.f32 %v13348_v34, %v4044_v57  ;;  %v4113_v0 = vmul.f32 %v13348_v34, %v4047_v19 }
 0x3ac   : > { %v13358_v29 = vmul.f32 0.25, %v5895_v2  ;;  %v6022_v31 = vpack.c.bf16 %v5958_v26, %v5958_v26  ;;  %v4149_v4 = vadd.f32 %v13363_v24, %v4110_v46  ;;  %v4150_v23 = vadd.f32 %v13363_v24, %v4111_v7 }
 0x3ad   : > { %14528 = vst [vmem:[#allocation48_spill] sm:$0xff] %v13354_v5  ;;  %v13368_v41 = vsel %vm6180_vm2, %v6149_v44, %v6148_v3  ;;  %v4151_v15 = vadd.f32 %v13363_v24, %v4112_v62  ;;  %v4152_v57 = vadd.f32 %v13363_v24, %v4113_v0  ;;  %v6187_v42 = vsel %vm6186_vm5, %v12921_v33, %v13283_v6 }
 0x3ae   : > { %14529 = vst [vmem:[#allocation99_spill] sm:$0xff] %v13368_v41  ;;  %v13375_v49 = vunpack.c.l.b16 %v6021_v63  ;;  %v4181_v27 = vmax.f32 %v4149_v4, 0.0  ;;  %v4182_v37 = vmax.f32 %v4150_v23, 0.0  ;;  %v13379_v32 = vunpack.c.l.b16 %v6022_v31 }
 0x3af   : > { %v4183_v30 = vmax.f32 %v4151_v15, 0.0  ;;  %v13381_v55 = vmax.f32 %v4152_v57, 0.0  ;;  %v13385_v28 = vsel %vm6188_vm8, %v13159_v36, %v6187_v42 }
 0x3b0   : > { %14530 = vst [vmem:[#allocation65_spill] sm:$0xff] %v13375_v49  ;;  %14531 = vst [vmem:[#allocation105_spill] sm:$0xff] %v13379_v32  ;;  %v4565_v39 = vcombine.high %v4181_v27, %v4181_v27  ;;  %v4572_v11 = vrot.slane %v4181_v27, %v9712_v8  ;;  %v4582_v33 = vcombine.high %v4182_v37, %v4182_v37 }
 0x3b1   : > { %v4589_v6 = vrot.slane %v4182_v37, %v9712_v8  ;;  %v4599_v19 = vcombine.high %v4183_v30, %v4183_v30  ;;  %v13390_v61 = vrot.slane %v4183_v30, %v9712_v8  ;;  %v4616_v35 = vcombine.high %v13381_v55, %v13381_v55 }
 0x3b2   : > { %v13396_v56 = vrot.slane %v13381_v55, %v9712_v8  ;;  %v4579_v36 = vrot.slane %v4565_v39, %v9712_v8  ;;  %v4580_v58 = vcombine.high %v4572_v11, %v4572_v11  ;;  %v5458_v18 = vsel %vm4897_vm1, %v4572_v11, 0.0 }
 0x3b3   : > { %v4596_v10 = vrot.slane %v4582_v33, %v9712_v8  ;;  %v5459_v50 = vrot.slane %v5458_v18, 4  ;;  %v4597_v53 = vcombine.high %v4589_v6, %v4589_v6  ;;  %v5486_v54 = vsel %vm4897_vm1, %v4589_v6, 0.0 }
 0x3b4   : > { %v13403_v21 = vrot.slane %v4599_v19, %v9712_v8  ;;  %v4581_v1 = vcombine.high %v4579_v36, %v4579_v36  ;;  %v5465_v12 = vsel %vm4897_vm1, %v4580_v58, 0.0  ;;  %v5472_v63 = vsel %vm4897_vm1, %v4579_v36, 0.0 }
 0x3b5   : > { %v4598_v3 = vcombine.high %v4596_v10, %v4596_v10  ;;  %v5460_v2 = vadd.f32 %v5459_v50, %v5458_v18  ;;  %v5466_v26 = vrot.slane %v5465_v12, 4  ;;  %v5473_v46 = vrot.slane %v5472_v63, 4 }
 0x3b6   : > { %v5487_v7 = vrot.slane %v5486_v54, 4  ;;  %v5479_v44 = vsel %vm4897_vm1, %v4581_v1, 0.0  ;;  %v5493_v62 = vsel %vm4897_vm1, %v4597_v53, 0.0  ;;  %v5500_v0 = vsel %vm4897_vm1, %v4596_v10, 0.0 }
 0x3b7   : > { %v5507_v31 = vsel %vm4897_vm1, %v4598_v3, 0.0  ;;  %v5461_v4 = vrot.slane %v5460_v2, 2  ;;  %v5467_v23 = vadd.f32 %v5466_v26, %v5465_v12  ;;  %v5474_v15 = vadd.f32 %v5473_v46, %v5472_v63 }
 0x3b8   : > { %v5480_v57 = vrot.slane %v5479_v44, 4  ;;  %v5488_v42 = vadd.f32 %v5487_v7, %v5486_v54  ;;  %v5494_v27 = vrot.slane %v5493_v62, 4  ;;  %v5501_v37 = vrot.slane %v5500_v0, 4 }
 0x3b9   : > { %v5508_v30 = vrot.slane %v5507_v31, 4  ;;  %v5462_v39 = vadd.f32 %v5461_v4, %v5460_v2  ;;  %v5468_v11 = vrot.slane %v5467_v23, 2  ;;  %v5475_v33 = vrot.slane %v5474_v15, 2 }
 0x3ba   : > { %v5481_v6 = vadd.f32 %v5480_v57, %v5479_v44  ;;  %v5489_v19 = vrot.slane %v5488_v42, 2  ;;  %v5495_v36 = vadd.f32 %v5494_v27, %v5493_v62  ;;  %v5502_v58 = vadd.f32 %v5501_v37, %v5500_v0 }
 0x3bb   : > { %v5509_v18 = vadd.f32 %v5508_v30, %v5507_v31  ;;  %v5463_v50 = vrot.slane %v5462_v39, 1  ;;  %v5469_v10 = vadd.f32 %v5468_v11, %v5467_v23  ;;  %v5476_v53 = vadd.f32 %v5475_v33, %v5474_v15 }
 0x3bc   : > { %v5482_v1 = vrot.slane %v5481_v6, 2  ;;  %v5490_v3 = vadd.f32 %v5489_v19, %v5488_v42  ;;  %v5496_v12 = vrot.slane %v5495_v36, 2  ;;  %v5503_v63 = vrot.slane %v5502_v58, 2 }
 0x3bd   : > { %v5510_v26 = vrot.slane %v5509_v18, 2  ;;  %v13411_v54 = vadd.f32 %v5463_v50, %v5462_v39  ;;  %v5470_v46 = vrot.slane %v5469_v10, 1  ;;  %v5477_v7 = vrot.slane %v5476_v53, 1 }
 0x3be   : > { %v5483_v2 = vadd.f32 %v5482_v1, %v5481_v6  ;;  %v5491_v4 = vrot.slane %v5490_v3, 1  ;;  %v5497_v20 = vadd.f32 %v5496_v12, %v5495_v36  ;;  %v5504_v44 = vadd.f32 %v5503_v63, %v5502_v58 }
 0x3bf   : > { %v5511_v57 = vadd.f32 %v5510_v26, %v5509_v18  ;;  %v13413_v62 = vadd.f32 %v5470_v46, %v5469_v10  ;;  %v13415_v0 = vadd.f32 %v5477_v7, %v5476_v53  ;;  %v4614_v23 = vcombine.high %v13390_v61, %v13390_v61 }
 0x3c0   : > { %v5484_v31 = vrot.slane %v5483_v2, 1  ;;  %v13419_v15 = vadd.f32 %v5491_v4, %v5490_v3  ;;  %v5498_v42 = vrot.slane %v5497_v20, 1  ;;  %v5505_v27 = vrot.slane %v5504_v44, 1 }
 0x3c1   : > { %v5512_v37 = vrot.slane %v5511_v57, 1  ;;  %v4615_v39 = vcombine.high %v13403_v21, %v13403_v21  ;;  %v5514_v11 = vsel %vm4897_vm1, %v13390_v61, 0.0  ;;  %v5521_v33 = vsel %vm4897_vm1, %v4614_v23, 0.0 }
 0x3c2   : > { %v13421_v30 = vadd.f32 %v5484_v31, %v5483_v2  ;;  %v13428_v6 = vadd.f32 %v5498_v42, %v5497_v20  ;;  %v13430_v19 = vadd.f32 %v5505_v27, %v5504_v44  ;;  %v5515_v58 = vrot.slane %v5514_v11, 4  ;;  %v13443_v12 = vpop.f32.mrf.mxu1 }
 0x3c3   : > { %v13432_v36 = vadd.f32 %v5512_v37, %v5511_v57  ;;  %v5522_v18 = vrot.slane %v5521_v33, 4  ;;  %v5528_v50 = vsel %vm4897_vm1, %v13403_v21, 0.0  ;;  %v5535_v10 = vsel %vm4897_vm1, %v4615_v39, 0.0 }
 0x3c4   : > { %v4630_v61 = vrot.slane %v4616_v35, %v9712_v8  ;;  %v5516_v53 = vadd.f32 %v5515_v58, %v5514_v11  ;;  %v5529_v1 = vrot.slane %v5528_v50, 4  ;;  %v5536_v20 = vrot.slane %v5535_v10, 4  ;;  %v4054_v35 = vpop.f32.mrf.mxu1 }
 0x3c5   : > { %v4631_v3 = vcombine.high %v13396_v56, %v13396_v56  ;;  %v5523_v63 = vadd.f32 %v5522_v18, %v5521_v33  ;;  %v5542_v21 = vsel %vm4897_vm1, %v13396_v56, 0.0 }
 0x3c6   : > { %v4632_v26 = vcombine.high %v4630_v61, %v4630_v61  ;;  %v5556_v46 = vsel %vm4897_vm1, %v4630_v61, 0.0  ;;  %v5517_v7 = vrot.slane %v5516_v53, 2  ;;  %v5530_v2 = vadd.f32 %v5529_v1, %v5528_v50  ;;  %v4055_v11 = vpop.f32.mrf.mxu1  ;;  %v9358_v50 = vld [vmem:[%s14099_s7] sm:$0xff]  }
 0x3c7   : > { %v5537_v4 = vadd.f32 %v5536_v20, %v5535_v10  ;;  %v5543_v55 = vrot.slane %v5542_v21, 4  ;;  %v5524_v44 = vrot.slane %v5523_v63, 2  ;;  %v5549_v57 = vsel %vm4897_vm1, %v4631_v3, 0.0  ;;  %9086 = vmatprep.subr.bf16.mxu0 %v9358_v50 }
 0x3c8   : > { %v5557_v31 = vrot.slane %v5556_v46, 4  ;;  %v5563_v23 = vsel %vm4897_vm1, %v4632_v26, 0.0  ;;  %v5518_v42 = vadd.f32 %v5517_v7, %v5516_v53  ;;  %v5531_v27 = vrot.slane %v5530_v2, 2  ;;  %v4057_v3 = vpop.f32.mrf.mxu1  ;;  %9087 = vmatpush3.bf16.msra.mxu0 %v9358_v50 }
 0x3c9   : > { %v5538_v37 = vrot.slane %v5537_v4, 2  ;;  %v5544_v39 = vadd.f32 %v5543_v55, %v5542_v21  ;;  %v5525_v33 = vadd.f32 %v5524_v44, %v5523_v63  ;;  %v5550_v56 = vrot.slane %v5549_v57, 4 }
 0x3ca   : > { %v5558_v58 = vadd.f32 %v5557_v31, %v5556_v46  ;;  %v5564_v18 = vrot.slane %v5563_v23, 4  ;;  %v5519_v10 = vrot.slane %v5518_v42, 1  ;;  %v5532_v61 = vadd.f32 %v5531_v27, %v5530_v2 }
 0x3cb   : > { %v5539_v1 = vadd.f32 %v5538_v37, %v5537_v4  ;;  %v5545_v20 = vrot.slane %v5544_v39, 2  ;;  %v5526_v35 = vrot.slane %v5525_v33, 1  ;;  %v5551_v26 = vadd.f32 %v5550_v56, %v5549_v57  ;;  %v4060_v5 = vpop.f32.mrf.mxu1 }
 0x3cc   : > { %v5559_v53 = vrot.slane %v5558_v58, 2  ;;  %v5565_v7 = vadd.f32 %v5564_v18, %v5563_v23  ;;  %v5520_v21 = vadd.f32 %v5519_v10, %v5518_v42  ;;  %v5533_v55 = vrot.slane %v5532_v61, 1 }
 0x3cd   : > { %v5540_v63 = vrot.slane %v5539_v1, 1  ;;  %v5546_v44 = vadd.f32 %v5545_v20, %v5544_v39  ;;  %v5527_v46 = vadd.f32 %v5526_v35, %v5525_v33  ;;  %v5552_v31 = vrot.slane %v5551_v26, 2  ;;  %v4062_v18 = vpop.f32.mrf.mxu1 }
 0x3ce   : > { %v5560_v32 = vadd.f32 %v5559_v53, %v5558_v58  ;;  %v5566_v49 = vrot.slane %v5565_v7, 2  ;;  %v5534_v2 = vadd.f32 %v5533_v55, %v5532_v61  ;;  %v5898_v27 = vadd.f32 %v5520_v21, %v13411_v54 }
 0x3cf   : > { %v5541_v4 = vadd.f32 %v5540_v63, %v5539_v1  ;;  %v5547_v37 = vrot.slane %v5546_v44, 1  ;;  %v5899_v57 = vadd.f32 %v5527_v46, %v13413_v62  ;;  %v5553_v23 = vadd.f32 %v5552_v31, %v5551_v26  ;;  %v4063_v1 = vpop.f32.mrf.mxu1 }
 0x3d0   : > { %v5561_v56 = vrot.slane %v5560_v32, 1  ;;  %v5567_v42 = vadd.f32 %v5566_v49, %v5565_v7  ;;  %v5900_v39 = vadd.f32 %v5534_v2, %v13415_v0  ;;  %v5962_v50 = vmul.f32 0.25, %v5898_v27  ;;  %v13470_v2 = vld [vmem:[%s14102_s10 + $0x8] sm:$0xff]  }
 0x3d1   : > { %v5901_v33 = vadd.f32 %v5541_v4, %v13421_v30  ;;  %v5548_v58 = vadd.f32 %v5547_v37, %v5546_v44  ;;  %v5963_v10 = vmul.f32 0.25, %v5899_v57  ;;  %v5554_v20 = vrot.slane %v5553_v23, 1  ;;  %v4065_v30 = vpop.f32.mrf.mxu1  ;;  %14532 = vst [vmem:[#allocation106_spill] sm:$0xff] %v13470_v2  ;;  %9096 = vmatprep.subr.bf16.mxu0 %v13470_v2 }
 0x3d2   : > { %v5562_v3 = vadd.f32 %v5561_v56, %v5560_v32  ;;  %v5568_v61 = vrot.slane %v5567_v42, 1  ;;  %v5964_v35 = vmul.f32 0.25, %v5900_v39  ;;  %v6026_v53 = vpack.c.bf16 %v5962_v50, %v5962_v50 }
 0x3d3   : > { %v5965_v54 = vmul.f32 0.25, %v5901_v33  ;;  %v5902_v62 = vadd.f32 %v5548_v58, %v13419_v15  ;;  %v6027_v26 = vpack.c.bf16 %v5963_v10, %v5963_v10  ;;  %v5555_v21 = vadd.f32 %v5554_v20, %v5553_v23 }
 0x3d4   : > { %v13458_v49 = vadd.f32 %v5568_v61, %v5567_v42  ;;  %v13461_v0 = vadd.f32 %v5562_v3, %v13430_v19  ;;  %v6028_v7 = vpack.c.bf16 %v5964_v35, %v5964_v35  ;;  %v6156_v63 = vunpack.c.l.b16 %v6026_v53 }
 0x3d5   : > { %v6029_v55 = vpack.c.bf16 %v5965_v54, %v5965_v54  ;;  %v5966_v44 = vmul.f32 0.25, %v5902_v62  ;;  %v6157_v32 = vunpack.c.l.b16 %v6027_v26  ;;  %v5903_v46 = vadd.f32 %v5555_v21, %v13428_v6 }
 0x3d6   : > { %v4114_v31 = vmul.f32 %v13348_v34, %v13443_v12  ;;  %v4115_v15 = vmul.f32 %v13348_v34, %v4055_v11  ;;  %v13472_v19 = vunpack.c.l.b16 %v6028_v7  ;;  %v4116_v37 = vmul.f32 %v13348_v34, %v4060_v5 }
 0x3d7   : > { %v13474_v4 = vunpack.c.l.b16 %v6029_v55  ;;  %v6030_v27 = vpack.c.bf16 %v5966_v44, %v5966_v44  ;;  %v13478_v57 = vsel %vm6180_vm2, %v6157_v32, %v6156_v63  ;;  %v13480_v6 = vmul.f32 0.25, %v5903_v46 }
 0x3d8   : > { %14533 = vst [vmem:[#allocation107_spill] sm:$0xff] %v13472_v19  ;;  %14535 = vst [vmem:[#allocation109_spill] sm:$0xff] %v13478_v57  ;;  %v4153_v12 = vadd.f32 %v13363_v24, %v4114_v31  ;;  %v4154_v11 = vadd.f32 %v13363_v24, %v4115_v15  ;;  %v4155_v56 = vadd.f32 %v13363_v24, %v4116_v37 }
 0x3d9   : > { %14534 = vst [vmem:[#allocation108_spill] sm:$0xff] %v13474_v4  ;;  %v13485_v23 = vunpack.c.l.b16 %v6030_v27  ;;  %v4117_v42 = vmul.f32 %v13348_v34, %v4063_v1  ;;  %v6191_v5 = vsel %vm6190_vm10, %v13278_v43, %v13385_v28  ;;  %v6206_v20 = vsel %vm6190_vm10, %v13121_v22, %v13137_v14 }
 0x3da   : > { %v4185_v39 = vmax.f32 %v4153_v12, 0.0  ;;  %v4186_v33 = vmax.f32 %v4154_v11, 0.0  ;;  %v4187_v50 = vmax.f32 %v4155_v56, 0.0  ;;  %v13497_v10 = vsel %vm6192_vm11, %v13288_v16, %v6191_v5 }
 0x3db   : > { %14536 = vst [vmem:[#allocation110_spill] sm:$0xff] %v13485_v23  ;;  %v4156_v58 = vadd.f32 %v13363_v24, %v4117_v42  ;;  %14537 = vst [vmem:[#allocation111_spill] sm:$0xff] %v13497_v10  ;;  %v13511_v16 = vsel %vm6192_vm11, %v13149_v47, %v6206_v20 }
 0x3dc   : > { %v4633_v3 = vcombine.high %v4185_v39, %v4185_v39  ;;  %v4640_v43 = vrot.slane %v4185_v39, %v9712_v8  ;;  %v4650_v28 = vcombine.high %v4186_v33, %v4186_v33  ;;  %v4657_v61 = vrot.slane %v4186_v33, %v9712_v8 }
 0x3dd   : > { %v4667_v1 = vcombine.high %v4187_v50, %v4187_v50  ;;  %v13505_v35 = vrot.slane %v4187_v50, %v9712_v8  ;;  %v13507_v54 = vmax.f32 %v4156_v58, 0.0 }
 0x3de   : > { %v4647_v53 = vrot.slane %v4633_v3, %v9712_v8  ;;  %v4648_v62 = vcombine.high %v4640_v43, %v4640_v43  ;;  %v5570_v22 = vsel %vm4897_vm1, %v4640_v43, 0.0  ;;  %v4664_v14 = vrot.slane %v4650_v28, %v9712_v8 }
 0x3df   : > { %v5571_v26 = vrot.slane %v5570_v22, 4  ;;  %v4665_v21 = vcombine.high %v4657_v61, %v4657_v61  ;;  %v5598_v30 = vsel %vm4897_vm1, %v4657_v61, 0.0  ;;  %v13518_v7 = vrot.slane %v4667_v1, %v9712_v8 }
 0x3e0   : > { %v4649_v55 = vcombine.high %v4647_v53, %v4647_v53  ;;  %v5577_v63 = vsel %vm4897_vm1, %v4648_v62, 0.0  ;;  %v5584_v47 = vsel %vm4897_vm1, %v4647_v53, 0.0  ;;  %v4666_v44 = vcombine.high %v4664_v14, %v4664_v14 }
 0x3e1   : > { %v5572_v32 = vadd.f32 %v5571_v26, %v5570_v22  ;;  %v5578_v46 = vrot.slane %v5577_v63, 4  ;;  %v5585_v31 = vrot.slane %v5584_v47, 4  ;;  %v5599_v15 = vrot.slane %v5598_v30, 4 }
 0x3e2   : > { %v5591_v27 = vsel %vm4897_vm1, %v4649_v55, 0.0  ;;  %v5605_v37 = vsel %vm4897_vm1, %v4665_v21, 0.0  ;;  %v5612_v12 = vsel %vm4897_vm1, %v4664_v14, 0.0  ;;  %v5619_v11 = vsel %vm4897_vm1, %v4666_v44, 0.0 }
 0x3e3   : > { %v5573_v56 = vrot.slane %v5572_v32, 2  ;;  %v5579_v42 = vadd.f32 %v5578_v46, %v5577_v63  ;;  %v5586_v5 = vadd.f32 %v5585_v31, %v5584_v47  ;;  %v5592_v39 = vrot.slane %v5591_v27, 4 }
 0x3e4   : > { %v5600_v33 = vadd.f32 %v5599_v15, %v5598_v30  ;;  %v5606_v50 = vrot.slane %v5605_v37, 4  ;;  %v5613_v58 = vrot.slane %v5612_v12, 4  ;;  %v5620_v20 = vrot.slane %v5619_v11, 4 }
 0x3e5   : > { %v5574_v3 = vadd.f32 %v5573_v56, %v5572_v32  ;;  %v5580_v43 = vrot.slane %v5579_v42, 2  ;;  %v5587_v28 = vrot.slane %v5586_v5, 2  ;;  %v5593_v61 = vadd.f32 %v5592_v39, %v5591_v27 }
 0x3e6   : > { %v5601_v1 = vrot.slane %v5600_v33, 2  ;;  %v5607_v53 = vadd.f32 %v5606_v50, %v5605_v37  ;;  %v5614_v62 = vadd.f32 %v5613_v58, %v5612_v12  ;;  %v5621_v22 = vadd.f32 %v5620_v20, %v5619_v11 }
 0x3e7   : > { %v5575_v26 = vrot.slane %v5574_v3, 1  ;;  %v5581_v14 = vadd.f32 %v5580_v43, %v5579_v42  ;;  %v5588_v21 = vadd.f32 %v5587_v28, %v5586_v5  ;;  %v5594_v55 = vrot.slane %v5593_v61, 2 }
 0x3e8   : > { %v5602_v44 = vadd.f32 %v5601_v1, %v5600_v33  ;;  %v5608_v63 = vrot.slane %v5607_v53, 2  ;;  %v5615_v47 = vrot.slane %v5614_v62, 2  ;;  %v5622_v46 = vrot.slane %v5621_v22, 2 }
 0x3e9   : > { %v13526_v30 = vadd.f32 %v5575_v26, %v5574_v3  ;;  %v5582_v31 = vrot.slane %v5581_v14, 1  ;;  %v5589_v15 = vrot.slane %v5588_v21, 1  ;;  %v5595_v32 = vadd.f32 %v5594_v55, %v5593_v61 }
 0x3ea   : > { %v5603_v56 = vrot.slane %v5602_v44, 1  ;;  %v5609_v18 = vadd.f32 %v5608_v63, %v5607_v53  ;;  %v5616_v27 = vadd.f32 %v5615_v47, %v5614_v62  ;;  %v5623_v39 = vadd.f32 %v5622_v46, %v5621_v22 }
 0x3eb   : > { %v13528_v37 = vadd.f32 %v5582_v31, %v5581_v14  ;;  %v13530_v12 = vadd.f32 %v5589_v15, %v5588_v21  ;;  %v5596_v11 = vrot.slane %v5595_v32, 1  ;;  %v4682_v42 = vcombine.high %v13505_v35, %v13505_v35  ;;  %v3972_v22 = vpop.f32.mrf.mxu0 }
 0x3ec   : > { %v13534_v5 = vadd.f32 %v5603_v56, %v5602_v44  ;;  %v5610_v33 = vrot.slane %v5609_v18, 1  ;;  %v5617_v50 = vrot.slane %v5616_v27, 1  ;;  %v5624_v58 = vrot.slane %v5623_v39, 1 }
 0x3ed   : > { %v13536_v20 = vadd.f32 %v5596_v11, %v5595_v32  ;;  %v4683_v3 = vcombine.high %v13518_v7, %v13518_v7  ;;  %v5626_v43 = vsel %vm4897_vm1, %v13505_v35, 0.0  ;;  %v5633_v28 = vsel %vm4897_vm1, %v4682_v42, 0.0  ;;  %v3974_v47 = vpop.f32.mrf.mxu0  ;;  %v4068_v46 = vpop.f32.mrf.mxu1 }
 0x3ee   : > { %v13543_v61 = vadd.f32 %v5610_v33, %v5609_v18  ;;  %v13545_v1 = vadd.f32 %v5617_v50, %v5616_v27  ;;  %v13547_v53 = vadd.f32 %v5624_v58, %v5623_v39  ;;  %v5627_v62 = vrot.slane %v5626_v43, 4 }
 0x3ef   : > { %v5634_v26 = vrot.slane %v5633_v28, 4  ;;  %v5640_v14 = vsel %vm4897_vm1, %v13518_v7, 0.0  ;;  %v5647_v21 = vsel %vm4897_vm1, %v4683_v3, 0.0  ;;  %v4684_v55 = vcombine.high %v13507_v54, %v13507_v54  ;;  %v13563_v42 = vpop.f32.mrf.mxu0  ;;  %v4070_v33 = vpop.f32.mrf.mxu1 }
 0x3f0   : > { %14538 = vst [vmem:[#allocation112_spill] sm:$0xff] %v13547_v53  ;;  %v5628_v35 = vadd.f32 %v5627_v62, %v5626_v43  ;;  %v5641_v44 = vrot.slane %v5640_v14, 4  ;;  %v5648_v63 = vrot.slane %v5647_v21, 4  ;;  %v4691_v18 = vrot.slane %v13507_v54, %v9712_v8 }
 0x3f1   : > { %v5635_v31 = vadd.f32 %v5634_v26, %v5633_v28  ;;  %v4698_v15 = vrot.slane %v4684_v55, %v9712_v8  ;;  %v13558_v32 = vmul.f32 %v13348_v34, %v3972_v22  ;;  %v13561_v7 = vmul.f32 %v13348_v34, %v4068_v46  ;;  %v3977_v26 = vpop.f32.mrf.mxu0  ;;  %v13567_v55 = vpop.f32.mrf.mxu1 }
 0x3f2   : > { %v5629_v56 = vrot.slane %v5628_v35, 2  ;;  %v5642_v27 = vadd.f32 %v5641_v44, %v5640_v14  ;;  %v5649_v39 = vadd.f32 %v5648_v63, %v5647_v21  ;;  %v4699_v11 = vcombine.high %v4691_v18, %v4691_v18 }
 0x3f3   : > { %v5636_v50 = vrot.slane %v5635_v31, 2  ;;  %v4700_v54 = vcombine.high %v4698_v15, %v4698_v15  ;;  %v5654_v58 = vsel %vm4897_vm1, %v4691_v18, 0.0  ;;  %v5668_v3 = vsel %vm4897_vm1, %v4698_v15, 0.0  ;;  %v4073_v18 = vpop.f32.mrf.mxu1 }
 0x3f4   : > { %v5630_v43 = vadd.f32 %v5629_v56, %v5628_v35  ;;  %v5643_v28 = vrot.slane %v5642_v27, 2  ;;  %v5650_v62 = vrot.slane %v5649_v39, 2  ;;  %v5655_v22 = vrot.slane %v5654_v58, 4 }
 0x3f5   : > { %v5637_v47 = vadd.f32 %v5636_v50, %v5635_v31  ;;  %v5661_v14 = vsel %vm4897_vm1, %v4699_v11, 0.0  ;;  %v5669_v21 = vrot.slane %v5668_v3, 4  ;;  %v5675_v44 = vsel %vm4897_vm1, %v4700_v54, 0.0 }
 0x3f6   : > { %v5631_v63 = vrot.slane %v5630_v43, 1  ;;  %v5644_v46 = vadd.f32 %v5643_v28, %v5642_v27  ;;  %v5651_v33 = vadd.f32 %v5650_v62, %v5649_v39  ;;  %v5656_v2 = vadd.f32 %v5655_v22, %v5654_v58 }
 0x3f7   : > { %v5638_v23 = vrot.slane %v5637_v47, 1  ;;  %v5662_v15 = vrot.slane %v5661_v14, 4  ;;  %v5670_v35 = vadd.f32 %v5669_v21, %v5668_v3  ;;  %v5676_v56 = vrot.slane %v5675_v44, 4 }
 0x3f8   : > { %v5632_v4 = vadd.f32 %v5631_v63, %v5630_v43  ;;  %v5645_v53 = vrot.slane %v5644_v46, 1  ;;  %v5652_v26 = vrot.slane %v5651_v33, 1  ;;  %v5657_v19 = vrot.slane %v5656_v2, 2 }
 0x3f9   : > { %v5639_v57 = vadd.f32 %v5638_v23, %v5637_v47  ;;  %v5663_v31 = vadd.f32 %v5662_v15, %v5661_v14  ;;  %v5671_v50 = vrot.slane %v5670_v35, 2  ;;  %v5677_v11 = vadd.f32 %v5676_v56, %v5675_v44 }
 0x3fa   : > { %v5646_v41 = vadd.f32 %v5645_v53, %v5644_v46  ;;  %v5653_v10 = vadd.f32 %v5652_v26, %v5651_v33  ;;  %v5906_v54 = vadd.f32 %v5632_v4, %v13526_v30  ;;  %v5658_v27 = vadd.f32 %v5657_v19, %v5656_v2 }
 0x3fb   : > { %v5907_v39 = vadd.f32 %v5639_v57, %v13528_v37  ;;  %v5664_v58 = vrot.slane %v5663_v31, 2  ;;  %v5672_v28 = vadd.f32 %v5671_v50, %v5670_v35  ;;  %v5678_v62 = vrot.slane %v5677_v11, 2 }
 0x3fc   : > { %v5908_v3 = vadd.f32 %v5646_v41, %v13530_v12  ;;  %v5909_v43 = vadd.f32 %v5653_v10, %v13536_v20  ;;  %v5970_v22 = vmul.f32 0.25, %v5906_v54  ;;  %v5659_v21 = vrot.slane %v5658_v27, 1 }
 0x3fd   : > { %v5971_v23 = vmul.f32 0.25, %v5907_v39  ;;  %v5665_v47 = vadd.f32 %v5664_v58, %v5663_v31  ;;  %v5673_v14 = vrot.slane %v5672_v28, 1  ;;  %v5679_v44 = vadd.f32 %v5678_v62, %v5677_v11 }
 0x3fe   : > { %v5972_v53 = vmul.f32 0.25, %v5908_v3  ;;  %v5973_v63 = vmul.f32 0.25, %v5909_v43  ;;  %v6034_v46 = vpack.c.bf16 %v5970_v22, %v5970_v22  ;;  %v5660_v4 = vadd.f32 %v5659_v21, %v5658_v27 }
 0x3ff   : > { %v6035_v2 = vpack.c.bf16 %v5971_v23, %v5971_v23  ;;  %v5666_v19 = vrot.slane %v5665_v47, 1  ;;  %v5674_v57 = vadd.f32 %v5673_v14, %v5672_v28  ;;  %v5680_v30 = vrot.slane %v5679_v44, 1 }
 0x400   : > { %v6036_v37 = vpack.c.bf16 %v5972_v53, %v5972_v53  ;;  %v6037_v33 = vpack.c.bf16 %v5973_v63, %v5973_v63  ;;  %v6164_v18 = vunpack.c.l.b16 %v6034_v46  ;;  %v5910_v41 = vadd.f32 %v5660_v4, %v13534_v5 }
 0x401   : > { %v6165_v10 = vunpack.c.l.b16 %v6035_v2  ;;  %v5667_v12 = vadd.f32 %v5666_v19, %v5665_v47  ;;  %v13576_v20 = vadd.f32 %v5680_v30, %v5679_v44  ;;  %v13579_v15 = vadd.f32 %v5674_v57, %v13545_v1 }
 0x402   : > { %v13581_v35 = vunpack.c.l.b16 %v6036_v37  ;;  %v13583_v56 = vunpack.c.l.b16 %v6037_v33  ;;  %v5974_v26 = vmul.f32 0.25, %v5910_v41  ;;  %v4133_v31 = vadd.f32 %v13363_v24, %v13558_v32 }
 0x403   : > { %v13588_v50 = vsel %vm6180_vm2, %v6165_v10, %v6164_v18  ;;  %v5911_v5 = vadd.f32 %v5667_v12, %v13543_v61  ;;  %v4095_v11 = vmul.f32 %v13348_v34, %v13563_v42  ;;  %v4157_v1 = vadd.f32 %v13363_v24, %v13561_v7 }
 0x404   : > { %v6038_v54 = vpack.c.bf16 %v5974_v26, %v5974_v26  ;;  %v4165_v27 = vmax.f32 %v4133_v31, 0.0  ;;  %v4119_v39 = vmul.f32 %v13348_v34, %v13567_v55  ;;  %v6213_v32 = vsel %vm6190_vm10, %v13261_v38, %v13270_v17 }
 0x405   : > { %v13600_v58 = vmul.f32 0.25, %v5911_v5  ;;  %v4134_v28 = vadd.f32 %v13363_v24, %v4095_v11  ;;  %v4189_v61 = vmax.f32 %v4157_v1, 0.0  ;;  %v13605_v42 = vsel %vm6192_vm11, %v13263_v25, %v6213_v32 }
 0x406   : > { %v13607_v62 = vunpack.c.l.b16 %v6038_v54  ;;  %v4293_v7 = vcombine.high %v4165_v27, %v4165_v27  ;;  %v4300_v3 = vrot.slane %v4165_v27, %v9712_v8  ;;  %v4158_v55 = vadd.f32 %v13363_v24, %v4119_v39 }
 0x407   : > { %v4166_v38 = vmax.f32 %v4134_v28, 0.0  ;;  %v4701_v17 = vcombine.high %v4189_v61, %v4189_v61  ;;  %v13614_v22 = vrot.slane %v4189_v61, %v9712_v8 }
 0x408   : > { %v4307_v21 = vrot.slane %v4293_v7, %v9712_v8  ;;  %v4308_v23 = vcombine.high %v4300_v3, %v4300_v3  ;;  %v5010_v25 = vsel %vm4897_vm1, %v4300_v3, 0.0  ;;  %v13618_v47 = vmax.f32 %v4158_v55, 0.0 }
 0x409   : > { %v5011_v14 = vrot.slane %v5010_v25, 4  ;;  %v4310_v44 = vcombine.high %v4166_v38, %v4166_v38  ;;  %v4317_v53 = vrot.slane %v4166_v38, %v9712_v8  ;;  %v13622_v24 = vrot.slane %v4701_v17, %v9712_v8 }
 0x40a   : > { %v4309_v63 = vcombine.high %v4307_v21, %v4307_v21  ;;  %v5017_v46 = vsel %vm4897_vm1, %v4308_v23, 0.0  ;;  %v5024_v4 = vsel %vm4897_vm1, %v4307_v21, 0.0  ;;  %v4716_v2 = vcombine.high %v13614_v22, %v13614_v22 }
 0x40b   : > { %v5012_v19 = vadd.f32 %v5011_v14, %v5010_v25  ;;  %v5018_v57 = vrot.slane %v5017_v46, 4  ;;  %v5025_v30 = vrot.slane %v5024_v4, 4  ;;  %v4324_v37 = vrot.slane %v4310_v44, %v9712_v8 }
 0x40c   : > { %v5031_v33 = vsel %vm4897_vm1, %v4309_v63, 0.0  ;;  %v4325_v18 = vcombine.high %v4317_v53, %v4317_v53  ;;  %v5038_v41 = vsel %vm4897_vm1, %v4317_v53, 0.0  ;;  %v4717_v10 = vcombine.high %v13622_v24, %v13622_v24 }
 0x40d   : > { %v5013_v12 = vrot.slane %v5012_v19, 2  ;;  %v5019_v26 = vadd.f32 %v5018_v57, %v5017_v46  ;;  %v5026_v31 = vadd.f32 %v5025_v30, %v5024_v4  ;;  %v5032_v5 = vrot.slane %v5031_v33, 4 }
 0x40e   : > { %v4326_v11 = vcombine.high %v4324_v37, %v4324_v37  ;;  %v5039_v1 = vrot.slane %v5038_v41, 4  ;;  %v5045_v54 = vsel %vm4897_vm1, %v4325_v18, 0.0  ;;  %v5052_v27 = vsel %vm4897_vm1, %v4324_v37, 0.0 }
 0x40f   : > { %v5014_v39 = vadd.f32 %v5013_v12, %v5012_v19  ;;  %v5020_v32 = vrot.slane %v5019_v26, 2  ;;  %v5027_v28 = vrot.slane %v5026_v31, 2  ;;  %v5033_v61 = vadd.f32 %v5032_v5, %v5031_v33 }
 0x410   : > { %v5040_v7 = vadd.f32 %v5039_v1, %v5038_v41  ;;  %v5046_v3 = vrot.slane %v5045_v54, 4  ;;  %v5053_v55 = vrot.slane %v5052_v27, 4  ;;  %v5059_v38 = vsel %vm4897_vm1, %v4326_v11, 0.0 }
 0x411   : > { %v5015_v17 = vrot.slane %v5014_v39, 1  ;;  %v5021_v21 = vadd.f32 %v5020_v32, %v5019_v26  ;;  %v5028_v23 = vadd.f32 %v5027_v28, %v5026_v31  ;;  %v5034_v25 = vrot.slane %v5033_v61, 2 }
 0x412   : > { %v5041_v14 = vrot.slane %v5040_v7, 2  ;;  %v5047_v44 = vadd.f32 %v5046_v3, %v5045_v54  ;;  %v5054_v53 = vadd.f32 %v5053_v55, %v5052_v27  ;;  %v5060_v63 = vrot.slane %v5059_v38, 4 }
 0x413   : > { %v5016_v46 = vadd.f32 %v5015_v17, %v5014_v39  ;;  %v5022_v4 = vrot.slane %v5021_v21, 1  ;;  %v5029_v57 = vrot.slane %v5028_v23, 1  ;;  %v5035_v19 = vadd.f32 %v5034_v25, %v5033_v61 }
 0x414   : > { %v5042_v30 = vadd.f32 %v5041_v14, %v5040_v7  ;;  %v5048_v37 = vrot.slane %v5047_v44, 2  ;;  %v5055_v33 = vrot.slane %v5054_v53, 2  ;;  %v5061_v18 = vadd.f32 %v5060_v63, %v5059_v38 }
 0x415   : > { %v5023_v41 = vadd.f32 %v5022_v4, %v5021_v21  ;;  %v5030_v12 = vadd.f32 %v5029_v57, %v5028_v23  ;;  %v5036_v5 = vrot.slane %v5035_v19, 1  ;;  %v5866_v11 = vadd.f32 %v12932_v45, %v5016_v46  ;;  %v4076_v61 = vpop.f32.mrf.mxu1 }
 0x416   : > { %v5043_v26 = vrot.slane %v5042_v30, 1  ;;  %v5049_v31 = vadd.f32 %v5048_v37, %v5047_v44  ;;  %v5056_v1 = vadd.f32 %v5055_v33, %v5054_v53  ;;  %v5062_v32 = vrot.slane %v5061_v18, 2 }
 0x417   : > { %v5037_v54 = vadd.f32 %v5036_v5, %v5035_v19  ;;  %v5867_v27 = vadd.f32 %v12936_v52, %v5023_v41  ;;  %v5868_v39 = vadd.f32 %v12942_v51, %v5030_v12  ;;  %v5930_v28 = vmul.f32 0.25, %v5866_v11  ;;  %v4078_v25 = vpop.f32.mrf.mxu1 }
 0x418   : > { %v5044_v7 = vadd.f32 %v5043_v26, %v5042_v30  ;;  %v5050_v3 = vrot.slane %v5049_v31, 1  ;;  %v5057_v55 = vrot.slane %v5056_v1, 1  ;;  %v5063_v38 = vadd.f32 %v5062_v32, %v5061_v18  ;;  %v14539_v30 = vld [vmem:[#allocation67_spill] sm:$0xff] }
 0x419   : > { %v5869_v17 = vadd.f32 %v12948_v48, %v5037_v54  ;;  %v5931_v21 = vmul.f32 0.25, %v5867_v27  ;;  %v5932_v23 = vmul.f32 0.25, %v5868_v39  ;;  %v5994_v45 = vpack.c.bf16 %v5930_v28, %v5930_v28  ;;  %v13641_v57 = vpop.f32.mrf.mxu1  ;;  %v14540_v48 = vld [vmem:[#allocation66_spill] sm:$0xff] }
 0x41a   : > { %v5051_v14 = vadd.f32 %v5050_v3, %v5049_v31  ;;  %v5058_v44 = vadd.f32 %v5057_v55, %v5056_v1  ;;  %v5064_v53 = vrot.slane %v5063_v38, 1  ;;  %v5870_v63 = vadd.f32 %v12987_v59, %v5044_v7 }
 0x41b   : > { %v5933_v52 = vmul.f32 0.25, %v5869_v17  ;;  %v5995_v46 = vpack.c.bf16 %v5931_v21, %v5931_v21  ;;  %v5996_v51 = vpack.c.bf16 %v5932_v23, %v5932_v23  ;;  %v6124_v4 = vunpack.c.l.b16 %v5994_v45  ;;  %v4081_v11 = vpop.f32.mrf.mxu1 }
 0x41c   : > { %v13643_v19 = vadd.f32 %v5064_v53, %v5063_v38  ;;  %v5871_v37 = vadd.f32 %v14539_v30, %v5051_v14  ;;  %v13647_v33 = vadd.f32 %v14540_v48, %v5058_v44  ;;  %v5934_v18 = vmul.f32 0.25, %v5870_v63 }
 0x41d   : > { %v5997_v41 = vpack.c.bf16 %v5933_v52, %v5933_v52  ;;  %v6125_v12 = vunpack.c.l.b16 %v5995_v46  ;;  %v13649_v5 = vunpack.c.l.b16 %v5996_v51  ;;  %v5682_v59 = vsel %vm4897_vm1, %v13614_v22, 0.0 }
 0x41e   : > { %v13653_v26 = vmul.f32 0.25, %v5871_v37  ;;  %v5998_v31 = vpack.c.bf16 %v5934_v18, %v5934_v18  ;;  %v5683_v1 = vrot.slane %v5682_v59, 4  ;;  %v5689_v32 = vsel %vm4897_vm1, %v4716_v2, 0.0 }
 0x41f   : > { %v13659_v54 = vunpack.c.l.b16 %v5997_v41  ;;  %v13662_v27 = vsel %vm6180_vm2, %v6125_v12, %v6124_v4  ;;  %v5690_v39 = vrot.slane %v5689_v32, 4  ;;  %v5696_v28 = vsel %vm4897_vm1, %v13622_v24, 0.0 }
 0x420   : > { %v13668_v3 = vunpack.c.l.b16 %v5998_v31  ;;  %v5684_v55 = vadd.f32 %v5683_v1, %v5682_v59  ;;  %v5697_v38 = vrot.slane %v5696_v28, 4  ;;  %v5703_v22 = vsel %vm4897_vm1, %v4717_v10, 0.0 }
 0x421   : > { %v5691_v17 = vadd.f32 %v5690_v39, %v5689_v32  ;;  %v4718_v2 = vcombine.high %v13618_v47, %v13618_v47  ;;  %v4725_v21 = vrot.slane %v13618_v47, %v9712_v8  ;;  %v5704_v25 = vrot.slane %v5703_v22, 4 }
 0x422   : > { %v5685_v23 = vrot.slane %v5684_v55, 2  ;;  %v5698_v45 = vadd.f32 %v5697_v38, %v5696_v28  ;;  %v4120_v14 = vmul.f32 %v13348_v34, %v4076_v61 }
 0x423   : > { %v5692_v44 = vrot.slane %v5691_v17, 2  ;;  %v4732_v53 = vrot.slane %v4718_v2, %v9712_v8  ;;  %v4733_v63 = vcombine.high %v4725_v21, %v4725_v21  ;;  %v5710_v52 = vsel %vm4897_vm1, %v4725_v21, 0.0 }
 0x424   : > { %v5686_v24 = vadd.f32 %v5685_v23, %v5684_v55  ;;  %v5699_v46 = vrot.slane %v5698_v45, 2  ;;  %v5705_v10 = vadd.f32 %v5704_v25, %v5703_v22  ;;  %v5711_v51 = vrot.slane %v5710_v52, 4  ;;  %v9417_v23 = vld [vmem:[%s14098_s6] ss:$0 sm:$0xff] }
 0x425   : > { %v5693_v4 = vadd.f32 %v5692_v44, %v5691_v17  ;;  %v4734_v30 = vcombine.high %v4732_v53, %v4732_v53  ;;  %v5717_v37 = vsel %vm4897_vm1, %v4733_v63, 0.0  ;;  %v5724_v47 = vsel %vm4897_vm1, %v4732_v53, 0.0  ;;  %v9418_v63 = vld [vmem:[%s14097_s5] ss:$0 sm:$0xff] }
 0x426   : > { %v5687_v48 = vrot.slane %v5686_v24, 1  ;;  %v5700_v18 = vadd.f32 %v5699_v46, %v5698_v45  ;;  %v5706_v41 = vrot.slane %v5705_v10, 2  ;;  %v5712_v34 = vadd.f32 %v5711_v51, %v5710_v52 }
 0x427   : > { %v5694_v61 = vrot.slane %v5693_v4, 1  ;;  %v5718_v12 = vrot.slane %v5717_v37, 4  ;;  %v5725_v59 = vrot.slane %v5724_v47, 4  ;;  %v5731_v11 = vsel %vm4897_vm1, %v4734_v30, 0.0 }
 0x428   : > { %v13684_v31 = vadd.f32 %v5687_v48, %v5686_v24  ;;  %v5701_v1 = vrot.slane %v5700_v18, 1  ;;  %v5707_v32 = vadd.f32 %v5706_v41, %v5705_v10  ;;  %v5713_v39 = vrot.slane %v5712_v34, 2 }
 0x429   : > { %v13686_v28 = vadd.f32 %v5694_v61, %v5693_v4  ;;  %v5719_v55 = vadd.f32 %v5718_v12, %v5717_v37  ;;  %v5726_v38 = vadd.f32 %v5725_v59, %v5724_v47  ;;  %v5732_v17 = vrot.slane %v5731_v11, 4 }
 0x42a   : > { %v13688_v22 = vadd.f32 %v5701_v1, %v5700_v18  ;;  %v5708_v2 = vrot.slane %v5707_v32, 1  ;;  %v5714_v21 = vadd.f32 %v5713_v39, %v5712_v34  ;;  %v4159_v45 = vadd.f32 %v9417_v23, %v4120_v14 }
 0x42b   : > { %v5720_v25 = vrot.slane %v5719_v55, 2  ;;  %v5727_v44 = vrot.slane %v5726_v38, 2  ;;  %v5733_v53 = vadd.f32 %v5732_v17, %v5731_v11  ;;  %v4121_v52 = vmul.f32 %v9418_v63, %v13641_v57 }
 0x42c   : > { %v13697_v24 = vadd.f32 %v5708_v2, %v5707_v32  ;;  %v5715_v46 = vrot.slane %v5714_v21, 1  ;;  %v4191_v10 = vmax.f32 %v4159_v45, 0.0  ;;  %v5873_v51 = vadd.f32 %v13117_v60, %v13643_v19 }
 0x42d   : > { %v5721_v4 = vadd.f32 %v5720_v25, %v5719_v55  ;;  %v5728_v30 = vadd.f32 %v5727_v44, %v5726_v38  ;;  %v5734_v37 = vrot.slane %v5733_v53, 2  ;;  %v4160_v14 = vadd.f32 %v9417_v23, %v4121_v52 }
 0x42e   : > { %v13701_v47 = vadd.f32 %v5715_v46, %v5714_v21  ;;  %v4735_v48 = vcombine.high %v4191_v10, %v4191_v10  ;;  %v4742_v18 = vrot.slane %v4191_v10, %v9712_v8  ;;  %v13705_v41 = vmul.f32 0.25, %v13647_v33 }
 0x42f   : > { %v5722_v57 = vrot.slane %v5721_v4, 1  ;;  %v5729_v34 = vrot.slane %v5728_v30, 1  ;;  %v5735_v61 = vadd.f32 %v5734_v37, %v5733_v53  ;;  %v4192_v12 = vmax.f32 %v4160_v14, 0.0 }
 0x430   : > { %v4749_v59 = vrot.slane %v4735_v48, %v9712_v8  ;;  %v4750_v11 = vcombine.high %v4742_v18, %v4742_v18  ;;  %v5738_v60 = vsel %vm4897_vm1, %v4742_v18, 0.0  ;;  %v13709_v19 = vmul.f32 0.25, %v5873_v51 }
 0x431   : > { %v13711_v1 = vadd.f32 %v5722_v57, %v5721_v4  ;;  %v13713_v32 = vadd.f32 %v5729_v34, %v5728_v30  ;;  %v5736_v39 = vrot.slane %v5735_v61, 1  ;;  %v5739_v55 = vrot.slane %v5738_v60, 4 }
 0x432   : > { %v4751_v38 = vcombine.high %v4749_v59, %v4749_v59  ;;  %v5745_v33 = vsel %vm4897_vm1, %v4750_v11, 0.0  ;;  %v5752_v17 = vsel %vm4897_vm1, %v4749_v59, 0.0  ;;  %v4752_v2 = vcombine.high %v4192_v12, %v4192_v12 }
 0x433   : > { %v13717_v21 = vadd.f32 %v5736_v39, %v5735_v61  ;;  %v5740_v23 = vadd.f32 %v5739_v55, %v5738_v60  ;;  %v5746_v45 = vrot.slane %v5745_v33, 4  ;;  %v5753_v25 = vrot.slane %v5752_v17, 4 }
 0x434   : > { %v5759_v44 = vsel %vm4897_vm1, %v4751_v38, 0.0  ;;  %v4759_v53 = vrot.slane %v4192_v12, %v9712_v8  ;;  %v4766_v63 = vrot.slane %v4752_v2, %v9712_v8 }
 0x435   : > { %v5741_v46 = vrot.slane %v5740_v23, 2  ;;  %v5747_v10 = vadd.f32 %v5746_v45, %v5745_v33  ;;  %v5754_v51 = vadd.f32 %v5753_v25, %v5752_v17  ;;  %v5760_v4 = vrot.slane %v5759_v44, 4 }
 0x436   : > { %v4767_v30 = vcombine.high %v4759_v53, %v4759_v53  ;;  %v4768_v37 = vcombine.high %v4766_v63, %v4766_v63  ;;  %v5766_v14 = vsel %vm4897_vm1, %v4759_v53, 0.0  ;;  %v5780_v48 = vsel %vm4897_vm1, %v4766_v63, 0.0 }
 0x437   : > { %v5742_v18 = vadd.f32 %v5741_v46, %v5740_v23  ;;  %v5748_v57 = vrot.slane %v5747_v10, 2  ;;  %v5755_v34 = vrot.slane %v5754_v51, 2  ;;  %v5761_v61 = vadd.f32 %v5760_v4, %v5759_v44 }
 0x438   : > { %v5767_v12 = vrot.slane %v5766_v14, 4  ;;  %v5773_v8 = vsel %vm4897_vm1, %v4767_v30, 0.0  ;;  %v5781_v59 = vrot.slane %v5780_v48, 4  ;;  %v5787_v11 = vsel %vm4897_vm1, %v4768_v37, 0.0 }
 0x439   : > { %v5743_v60 = vrot.slane %v5742_v18, 1  ;;  %v5749_v39 = vadd.f32 %v5748_v57, %v5747_v10  ;;  %v5756_v55 = vadd.f32 %v5755_v34, %v5754_v51  ;;  %v5762_v38 = vrot.slane %v5761_v61, 2 }
 0x43a   : > { %v5768_v33 = vadd.f32 %v5767_v12, %v5766_v14  ;;  %v5774_v17 = vrot.slane %v5773_v8, 4  ;;  %v5782_v2 = vadd.f32 %v5781_v59, %v5780_v48  ;;  %v5788_v45 = vrot.slane %v5787_v11, 4 }
 0x43b   : > { %v5744_v25 = vadd.f32 %v5743_v60, %v5742_v18  ;;  %v5750_v53 = vrot.slane %v5749_v39, 1  ;;  %v5757_v23 = vrot.slane %v5756_v55, 1  ;;  %v5763_v63 = vadd.f32 %v5762_v38, %v5761_v61 }
 0x43c   : > { %v5769_v46 = vrot.slane %v5768_v33, 2  ;;  %v5775_v44 = vadd.f32 %v5774_v17, %v5773_v8  ;;  %v5783_v4 = vrot.slane %v5782_v2, 2  ;;  %v5789_v43 = vadd.f32 %v5788_v45, %v5787_v11 }
 0x43d   : > { %v5751_v30 = vadd.f32 %v5750_v53, %v5749_v39  ;;  %v5758_v52 = vadd.f32 %v5757_v23, %v5756_v55  ;;  %v5764_v7 = vrot.slane %v5763_v63, 1  ;;  %v5914_v37 = vadd.f32 %v5744_v25, %v13684_v31 }
 0x43e   : > { %v5770_v10 = vadd.f32 %v5769_v46, %v5768_v33  ;;  %v5776_v51 = vrot.slane %v5775_v44, 2  ;;  %v5784_v57 = vadd.f32 %v5783_v4, %v5782_v2  ;;  %v5790_v14 = vrot.slane %v5789_v43, 2 }
 0x43f   : > { %v5765_v34 = vadd.f32 %v5764_v7, %v5763_v63  ;;  %v5915_v48 = vadd.f32 %v5751_v30, %v13686_v28  ;;  %v5916_v18 = vadd.f32 %v5758_v52, %v13688_v22  ;;  %v5978_v12 = vmul.f32 0.25, %v5914_v37 }
 0x440   : > { %v5771_v61 = vrot.slane %v5770_v10, 1  ;;  %v5777_v59 = vadd.f32 %v5776_v51, %v5775_v44  ;;  %v5785_v8 = vrot.slane %v5784_v57, 1  ;;  %v5791_v60 = vadd.f32 %v5790_v14, %v5789_v43 }
 0x441   : > { %v5917_v11 = vadd.f32 %v5765_v34, %v13697_v24  ;;  %v5979_v39 = vmul.f32 0.25, %v5915_v48  ;;  %v5980_v55 = vmul.f32 0.25, %v5916_v18  ;;  %v6042_v38 = vpack.c.bf16 %v5978_v12, %v5978_v12 }
 0x442   : > { %v5772_v31 = vadd.f32 %v5771_v61, %v5770_v10  ;;  %v5778_v33 = vrot.slane %v5777_v59, 1  ;;  %v5786_v17 = vadd.f32 %v5785_v8, %v5784_v57  ;;  %v5792_v2 = vrot.slane %v5791_v60, 1 }
 0x443   : > { %v5981_v45 = vmul.f32 0.25, %v5917_v11  ;;  %v6043_v7 = vpack.c.bf16 %v5979_v39, %v5979_v39  ;;  %v6044_v25 = vpack.c.bf16 %v5980_v55, %v5980_v55  ;;  %v6172_v28 = vunpack.c.l.b16 %v6042_v38 }
 0x444   : > { %v5779_v53 = vadd.f32 %v5778_v33, %v5777_v59  ;;  %v5793_v22 = vadd.f32 %v5792_v2, %v5791_v60  ;;  %v5918_v52 = vadd.f32 %v5772_v31, %v13701_v47  ;;  %v5920_v23 = vadd.f32 %v5786_v17, %v13713_v32  ;;  %v14545_v60 = vld [vmem:[#allocation111_spill] sm:$0xff]  ;;  %v14547_v33 = vld [vmem:[#allocation48_spill] sm:$0xff]  ;;  %v14548_v2 = vld [vmem:[#allocation109_spill] sm:$0xff] }
 0x445   : > { %v6045_v43 = vpack.c.bf16 %v5981_v45, %v5981_v45  ;;  %v6173_v63 = vunpack.c.l.b16 %v6043_v7  ;;  %v13734_v24 = vunpack.c.l.b16 %v6044_v25  ;;  %v6001_v46 = vpack.c.bf16 %v13709_v19, %v13709_v19  ;;  %v14546_v31 = vld [vmem:[#allocation99_spill] sm:$0xff] }
 0x446   : > { %v5919_v44 = vadd.f32 %v5779_v53, %v13711_v1  ;;  %v5982_v4 = vmul.f32 0.25, %v5918_v52  ;;  %v14541_v30 = vpack.c.bf16 %v13653_v26, %v13653_v26  ;;  %v14542_v10 = vpack.c.bf16 %v13705_v41, %v13705_v41  ;;  %v14549_v45 = vld [vmem:[#allocation107_spill] sm:$0xff]  ;;  %v14551_v52 = vld [vmem:[#allocation65_spill] sm:$0xff] }
 0x447   : > { %v13745_v51 = vunpack.c.l.b16 %v6045_v43  ;;  %v13748_v32 = vsel %vm6180_vm2, %v6173_v63, %v6172_v28  ;;  %v6131_v57 = vunpack.c.l.b16 %v6001_v46  ;;  %v6195_v19 = vsel %vm6182_vm3, %v13649_v5, %v13662_v27  ;;  %v14552_v63 = vld [vmem:[#allocation108_spill] sm:$0xff] }
 0x448   : > { %v6129_v37 = vunpack.c.l.b16 %v14541_v30  ;;  %v6130_v47 = vunpack.c.l.b16 %v14542_v10  ;;  %v5983_v1 = vmul.f32 0.25, %v5919_v44  ;;  %v6046_v14 = vpack.c.bf16 %v5982_v4, %v5982_v4  ;;  %v14553_v44 = vld [vmem:[#allocation105_spill] sm:$0xff]  ;;  %v14554_v30 = vld [vmem:[#allocation110_spill] sm:$0xff] }
 0x449   : > { %v6196_v26 = vsel %vm6184_vm4, %v13659_v54, %v6195_v19  ;;  %v6244_v34 = vpack.c.b16 %v13605_v42, %v13511_v16  ;;  %v5897_v48 = vadd.f32 %v13342_v13, %v13336_v40  ;;  %v5905_v18 = vadd.f32 %v13458_v49, %v13432_v36  ;;  %v14555_v19 = vld [vmem:[#allocation106_spill] sm:$0xff] }
 0x44a   : > { %v6197_v41 = vsel %vm6186_vm5, %v13668_v3, %v6196_v26  ;;  %v5960_v12 = vmul.f32 0.25, %v13340_v9  ;;  %v6047_v5 = vpack.c.bf16 %v5983_v1, %v5983_v1  ;;  %v13764_v27 = vunpack.c.l.b16 %v6046_v14 }
 0x44b   : > { %v6198_v61 = vsel %vm6188_vm8, %v6129_v37, %v6197_v41  ;;  %v5968_v54 = vmul.f32 0.25, %v13461_v0  ;;  %v5961_v42 = vmul.f32 0.25, %v5897_v48  ;;  %v5969_v59 = vmul.f32 0.25, %v5905_v18 }
 0x44c   : > { %v6199_v16 = vsel %vm6190_vm10, %v6130_v47, %v6198_v61  ;;  %v6024_v3 = vpack.c.bf16 %v5960_v12, %v5960_v12  ;;  %v14543_v13 = vpack.c.bf16 %v13358_v29, %v13358_v29  ;;  %v14544_v9 = vpack.c.bf16 %v13480_v6, %v13480_v6  ;;  %v9360_v29 = vld [vmem:[%s14102_s10] sm:$0xff]  }
 0x44d   : > { %v6200_v8 = vsel %vm6192_vm11, %v6131_v57, %v6199_v16  ;;  %v6032_v40 = vpack.c.bf16 %v5968_v54, %v5968_v54  ;;  %v6025_v39 = vpack.c.bf16 %v5961_v42, %v5961_v42  ;;  %v6033_v0 = vpack.c.bf16 %v5969_v59, %v5969_v59  ;;  %v14550_v6 = vld [vmem:[#allocation112_spill] sm:$0xff] }
 0x44e   : > { %v6153_v36 = vunpack.c.l.b16 %v14543_v13  ;;  %v6161_v49 = vunpack.c.l.b16 %v14544_v9  ;;  %v6243_v11 = vpack.c.b16 %v6200_v8, %v14545_v60  ;;  %v6154_v55 = vunpack.c.l.b16 %v6024_v3 }
 0x44f   : > { %v6162_v38 = vunpack.c.l.b16 %v6032_v40  ;;  %v6216_v17 = vsel %vm6182_vm3, %v14547_v33, %v14546_v31  ;;  %v6223_v7 = vsel %vm6182_vm3, %v14549_v45, %v14548_v2  ;;  %v5913_v25 = vadd.f32 %v13576_v20, %v14550_v6  ;;  %v14564_v31 = vld [vmem:[#allocation80_spill] sm:$0xff]  ;;  %v14565_v2 = vld [vmem:[#allocation81_spill] sm:$0xff] }
 0x450   : > { %9088 = vmatprep.mubr.msk.bf16.mxu0 %vm2835_vm12, %v6243_v11  ;;  %v6155_v28 = vunpack.c.l.b16 %v6025_v39  ;;  %v6163_v53 = vunpack.c.l.b16 %v6033_v0  ;;  %v6217_v43 = vsel %vm6184_vm4, %v14551_v52, %v6216_v17  ;;  %v6224_v46 = vsel %vm6184_vm4, %v14552_v63, %v6223_v7  ;;  %v14561_v39 = vld [vmem:[#allocation72_spill] sm:$0xff]  ;;  %v14569_v63 = vld [vmem:[#allocation74_spill] sm:$0xff] }
 0x451   : > { %9089 = vmatmul.mubr.msk.bf16.vlgmr.msra.gmra.mxu0 %vm2835_vm12, %v6244_v34  ;;  %v6218_v4 = vsel %vm6186_vm5, %v14553_v44, %v6217_v43  ;;  %v6225_v37 = vsel %vm6186_vm5, %v14554_v30, %v6224_v46  ;;  %v5921_v20 = vadd.f32 %v5793_v22, %v13717_v21  ;;  %v5976_v10 = vmul.f32 0.25, %v13579_v15  ;;  %v14568_v43 = vld [vmem:[#allocation70_spill] sm:$0xff]  ;;  %v14570_v44 = vld [vmem:[#allocation69_spill] sm:$0xff] }
 0x452   : > { %v6219_v47 = vsel %vm6188_vm8, %v6153_v36, %v6218_v4  ;;  %v6226_v57 = vsel %vm6188_vm8, %v6161_v49, %v6225_v37  ;;  %9097 = vmatpush3.bf16.msra.mxu0 %v14555_v19  ;;  %v5977_v1 = vmul.f32 0.25, %v5913_v25  ;;  %v5984_v14 = vmul.f32 0.25, %v5920_v23  ;;  %v14557_v36 = vld [vmem:[#allocation61_spill] sm:$0xff]  ;;  %v14567_v25 = vld [vmem:[#allocation82_spill] sm:$0xff]  ;;  %v14571_v4 = vld [vmem:[#allocation75_spill] sm:$0xff] }
 0x453   : > { %v6220_v26 = vsel %vm6190_vm10, %v6154_v55, %v6219_v47  ;;  %v6227_v34 = vsel %vm6190_vm10, %v6162_v38, %v6226_v57  ;;  %9098 = vmatprep.subr.bf16.mxu0 %v9360_v29  ;;  %v5985_v41 = vmul.f32 0.25, %v5921_v20  ;;  %v6040_v48 = vpack.c.bf16 %v5976_v10, %v5976_v10  ;;  %v14572_v47 = vld [vmem:[#allocation71_spill] sm:$0xff] }
 0x454   : > { %v6221_v18 = vsel %vm6192_vm11, %v6155_v28, %v6220_v26  ;;  %v6228_v21 = vsel %vm6192_vm11, %v6163_v53, %v6227_v34  ;;  %v6041_v15 = vpack.c.bf16 %v5977_v1, %v5977_v1  ;;  %v6048_v22 = vpack.c.bf16 %v5984_v14, %v5984_v14  ;;  %v14573_v1 = vld [vmem:[#allocation79_spill] sm:$0xff]  ;;  %v14574_v14 = vld [vmem:[#allocation18_spill] sm:$0xff] }
 0x455   : > { %v6245_v12 = vpack.c.b16 %v6228_v21, %v6221_v18  ;;  %v6049_v61 = vpack.c.bf16 %v5985_v41, %v5985_v41  ;;  %v14556_v54 = vpack.c.bf16 %v13600_v58, %v13600_v58  ;;  %v6170_v23 = vunpack.c.l.b16 %v6040_v48  ;;  %v14575_v34 = vld [vmem:[#allocation22_spill] sm:$0xff]  ;;  %v14576_v41 = vld [vmem:[#allocation17_spill] sm:$0xff] }
 0x456   : > { %v6171_v42 = vunpack.c.l.b16 %v6041_v15  ;;  %v6177_v59 = vunpack.c.l.b16 %v6047_v5  ;;  %v6178_v3 = vunpack.c.l.b16 %v6048_v22  ;;  %v6230_v8 = vsel %vm6182_vm3, %v13581_v35, %v13588_v50  ;;  %9099 = vmatpush3.bf16.msra.mxu0 %v9360_v29  ;;  %v14559_v50 = vld [vmem:[#allocation64_spill] sm:$0xff] }
 0x457   : > { %v6169_v16 = vunpack.c.l.b16 %v14556_v54  ;;  %9092 = vmatprep.mubr.msk.bf16.mxu0 %vm2835_vm12, %v6245_v12  ;;  %v6179_v40 = vunpack.c.l.b16 %v6049_v61  ;;  %v6231_v13 = vsel %vm6184_vm4, %v13583_v56, %v6230_v8  ;;  %v6237_v58 = vsel %vm6182_vm3, %v13734_v24, %v13748_v32  ;;  %v14562_v32 = vld [vmem:[#allocation76_spill] sm:$0xff]  ;;  %v14577_v12 = vld [vmem:[#allocation14_spill] sm:$0xff] }
 0x458   : > { %v14558_v9 = vrot.slane %v14557_v36, 1  ;;  %v6232_v49 = vsel %vm6186_vm5, %v13607_v62, %v6231_v13  ;;  %v6238_v35 = vsel %vm6184_vm4, %v13745_v51, %v6237_v58  ;;  %v14560_v60 = vrot.slane %v14559_v50, 1 }
 0x459   : > { %v7205_v56 = vrot.slane %v14561_v39, 2  ;;  %v6233_v0 = vsel %vm6188_vm8, %v6169_v16, %v6232_v49  ;;  %v6239_v24 = vsel %vm6186_vm5, %v13764_v27, %v6238_v35  ;;  %v14563_v55 = vrot.slane %v14562_v32, 1 }
 0x45a   : > { %v7152_v5 = vadd.f32 %v14558_v9, %v14557_v36  ;;  %v7201_v11 = vadd.f32 %v14560_v60, %v14559_v50  ;;  %v7261_v62 = vrot.slane %v14564_v31, 2  ;;  %v6234_v33 = vsel %vm6190_vm10, %v6170_v23, %v6233_v0 }
 0x45b   : > { %v7257_v38 = vadd.f32 %v14563_v55, %v14562_v32  ;;  %v6240_v51 = vsel %vm6188_vm8, %v6177_v59, %v6239_v24  ;;  %v7206_v17 = vadd.f32 %v7205_v56, %v14561_v39  ;;  %v14566_v45 = vrot.slane %v14565_v2, 1 }
 0x45c   : > { %v6235_v29 = vsel %vm6192_vm11, %v6171_v42, %v6234_v33  ;;  %v6241_v27 = vsel %vm6190_vm10, %v6178_v3, %v6240_v51  ;;  %v7262_v6 = vadd.f32 %v7261_v62, %v14564_v31  ;;  %v7317_v28 = vrot.slane %v14567_v25, 2  ;;  %v14578_v3 = vld [vmem:[#allocation15_spill] sm:$0xff] }
 0x45d   : > { %v7313_v7 = vadd.f32 %v14566_v45, %v14565_v2  ;;  %v6242_v53 = vsel %vm6192_vm11, %v6179_v40, %v6241_v27  ;;  %v7207_v52 = vrot.slane %v7206_v17, 1  ;;  %v8060_v46 = vadd.f32 %v14569_v63, %v14568_v43  ;;  %v14579_v45 = vld [vmem:[#allocation77_spill] sm:$0xff]  ;;  %v14581_v27 = vld [vmem:[#allocation19_spill] sm:$0xff]  ;;  %v14585_v63 = vld [vmem:[#allocation84_spill] sm:$0xff] }
 0x45e   : > { %v8062_v30 = vadd.f32 %v14571_v4, %v14570_v44  ;;  %v6246_v37 = vpack.c.b16 %v6242_v53, %v6235_v29  ;;  %v7263_v20 = vrot.slane %v7262_v6, 1  ;;  %v7318_v10 = vadd.f32 %v7317_v28, %v14567_v25  ;;  %v14583_v28 = vld [vmem:[#allocation16_spill] sm:$0xff]  ;;  %v14587_v4 = vld [vmem:[#allocation29_spill] sm:$0xff] }
 0x45f   : > { %v8063_v57 = vadd.f32 %v7201_v11, %v14572_v47  ;;  %v7208_v19 = vadd.f32 %v7207_v52, %v7206_v17  ;;  %v8068_v26 = vadd.f32 %v14574_v14, %v14573_v1  ;;  %v8070_v48 = vadd.f32 %v14576_v41, %v14575_v34  ;;  %v14584_v52 = vld [vmem:[#allocation83_spill] sm:$0xff] }
 0x460   : > { %v8071_v18 = vadd.f32 %v7313_v7, %v7257_v38  ;;  %9093 = vmatmul.mubr.msk.bf16.gmra.mxu0 %vm2835_vm12, %v6246_v37  ;;  %v7264_v21 = vadd.f32 %v7263_v20, %v7262_v6  ;;  %v7319_v15 = vrot.slane %v7318_v10, 1  ;;  %v8124_v22 = vmul.f32 0.25, %v8060_v46  ;;  %v14580_v7 = vld [vmem:[#allocation78_spill] sm:$0xff]  ;;  %v14582_v6 = vld [vmem:[#allocation20_spill] sm:$0xff]  ;;  %v14586_v46 = vld [vmem:[#allocation85_spill] sm:$0xff] }
 0x461   : > { %v8125_v61 = vmul.f32 0.25, %v14577_v12  ;;  %v8064_v54 = vadd.f32 %v7208_v19, %v7152_v5  ;;  %v8126_v16 = vmul.f32 0.25, %v8062_v30  ;;  %v8127_v23 = vmul.f32 0.25, %v8063_v57  ;;  %v14588_v30 = vld [vmem:[#allocation87_spill] sm:$0xff]  ;;  %v14589_v57 = vld [vmem:[#allocation21_spill] sm:$0xff]  ;;  %v14590_v19 = vld [vmem:[#allocation24_spill] sm:$0xff] }
 0x462   : > { %v8132_v42 = vmul.f32 0.25, %v8068_v26  ;;  %v7320_v59 = vadd.f32 %v7319_v15, %v7318_v10  ;;  %v8133_v8 = vmul.f32 0.25, %v14578_v3  ;;  %v8134_v40 = vmul.f32 0.25, %v8070_v48  ;;  %v14593_v12 = vld [vmem:[#allocation32_spill] sm:$0xff] }
 0x463   : > { %v8135_v13 = vmul.f32 0.25, %v8071_v18  ;;  %v8128_v58 = vmul.f32 0.25, %v8064_v54  ;;  %v8188_v36 = vpack.c.bf16 %v8124_v22, %v8124_v22  ;;  %v8189_v9 = vpack.c.bf16 %v8125_v61, %v8125_v61  ;;  %v14592_v22 = vld [vmem:[#allocation27_spill] sm:$0xff] }
 0x464   : > { %v8190_v49 = vpack.c.bf16 %v8126_v16, %v8126_v16  ;;  %v8072_v35 = vadd.f32 %v7320_v59, %v7264_v21  ;;  %v8191_v50 = vpack.c.bf16 %v8127_v23, %v8127_v23  ;;  %v8196_v60 = vpack.c.bf16 %v8132_v42, %v8132_v42  ;;  %v14591_v21 = vld [vmem:[#allocation26_spill] sm:$0xff] }
 0x465   : > { %v8197_v11 = vpack.c.bf16 %v8133_v8, %v8133_v8  ;;  %v8192_v39 = vpack.c.bf16 %v8128_v58, %v8128_v58  ;;  %v8198_v56 = vpack.c.bf16 %v8134_v40, %v8134_v40  ;;  %v8199_v0 = vpack.c.bf16 %v8135_v13, %v8135_v13  ;;  %v14594_v8 = vld [vmem:[#allocation23_spill] sm:$0xff]  ;;  %v14595_v13 = vld [vmem:[#allocation25_spill] sm:$0xff] }
 0x466   : > { %v8320_v5 = vunpack.c.l.b16 %v8188_v36  ;;  %v8136_v24 = vmul.f32 0.25, %v8072_v35  ;;  %v8321_v32 = vunpack.c.l.b16 %v8189_v9  ;;  %v8322_v55 = vunpack.c.l.b16 %v8190_v49  ;;  %v14596_v35 = vld [vmem:[#allocation86_spill] sm:$0xff] }
 0x467   : > { %v8323_v38 = vunpack.c.l.b16 %v8191_v50  ;;  %v8324_v31 = vunpack.c.l.b16 %v8192_v39  ;;  %v8328_v62 = vunpack.c.l.b16 %v8196_v60  ;;  %v8329_v33 = vunpack.c.l.b16 %v8197_v11  ;;  %v14597_v60 = vld [vmem:[#allocation28_spill] sm:$0xff] }
 0x468   : > { %v8330_v51 = vunpack.c.l.b16 %v8198_v56  ;;  %v8200_v17 = vpack.c.bf16 %v8136_v24, %v8136_v24  ;;  %v8331_v2 = vunpack.c.l.b16 %v8199_v0  ;;  %v8381_v29 = vsel %vm6180_vm2, %v14580_v7, %v14579_v45  ;;  %v14598_v39 = vld [vmem:[#allocation88_spill] sm:$0xff] }
 0x469   : > { %v8388_v25 = vsel %vm6180_vm2, %v14582_v6, %v14581_v27  ;;  %v8382_v53 = vsel %vm6182_vm3, %v14583_v28, %v8381_v29  ;;  %v8080_v44 = vadd.f32 %v14586_v46, %v14585_v63  ;;  %v8088_v37 = vadd.f32 %v14588_v30, %v14587_v4  ;;  %v14607_v6 = vld [vmem:[#allocation92_spill] sm:$0xff]  ;;  %v14608_v28 = vld [vmem:[#allocation46_spill] sm:$0xff]  ;;  %v14611_v4 = vld [vmem:[#allocation37_spill] sm:$0xff] }
 0x46a   : > { %v8389_v43 = vsel %vm6182_vm3, %v14584_v52, %v8388_v25  ;;  %v8332_v20 = vunpack.c.l.b16 %v8200_v17  ;;  %v8383_v10 = vsel %vm6184_vm4, %v8320_v5, %v8382_v53  ;;  %v8397_v1 = vsel %vm6184_vm4, %v14590_v19, %v14589_v57  ;;  %v14600_v5 = vld [vmem:[#allocation31_spill] sm:$0xff]  ;;  %v14610_v46 = vld [vmem:[#allocation94_spill] sm:$0xff]  ;;  %v14612_v30 = vld [vmem:[#allocation40_spill] sm:$0xff] }
 0x46b   : > { %v8390_v47 = vsel %vm6184_vm4, %v8328_v62, %v8389_v43  ;;  %v8384_v14 = vsel %vm6186_vm5, %v8321_v32, %v8383_v10  ;;  %v8144_v34 = vmul.f32 0.25, %v8080_v44  ;;  %v8152_v41 = vmul.f32 0.25, %v8088_v37  ;;  %v14601_v32 = vld [vmem:[#allocation38_spill] sm:$0xff]  ;;  %v14614_v57 = vld [vmem:[#allocation36_spill] sm:$0xff] }
 0x46c   : > { %v8391_v26 = vsel %vm6186_vm5, %v8329_v33, %v8390_v47  ;;  %v8385_v48 = vsel %vm6188_vm8, %v8322_v55, %v8384_v14  ;;  %v8398_v15 = vsel %vm6186_vm5, %v14591_v21, %v8397_v1  ;;  %v8404_v61 = vsel %vm6184_vm4, %v14593_v12, %v14592_v22  ;;  %v14603_v62 = vld [vmem:[#allocation30_spill] sm:$0xff]  ;;  %v14613_v47 = vld [vmem:[#allocation39_spill] sm:$0xff]  ;;  %v14618_v21 = vld [vmem:[#allocation96_spill] sm:$0xff] }
 0x46d   : > { %v8392_v18 = vsel %vm6188_vm8, %v8330_v51, %v8391_v26  ;;  %v8386_v54 = vsel %vm6190_vm10, %v8323_v38, %v8385_v48  ;;  %v8208_v23 = vpack.c.bf16 %v8144_v34, %v8144_v34  ;;  %v8216_v42 = vpack.c.bf16 %v8152_v41, %v8152_v41  ;;  %v14604_v51 = vld [vmem:[#allocation33_spill] sm:$0xff]  ;;  %v14615_v34 = vld [vmem:[#allocation44_spill] sm:$0xff]  ;;  %v14616_v41 = vld [vmem:[#allocation95_spill] sm:$0xff] }
 0x46e   : > { %v8393_v16 = vsel %vm6190_vm10, %v8331_v2, %v8392_v18  ;;  %v8387_v59 = vsel %vm6192_vm11, %v8324_v31, %v8386_v54  ;;  %v8399_v40 = vsel %vm6188_vm8, %v14594_v8, %v8398_v15  ;;  %v8405_v58 = vsel %vm6186_vm5, %v14595_v13, %v8404_v61  ;;  %v14605_v2 = vld [vmem:[#allocation89_spill] sm:$0xff] }
 0x46f   : > { %v8394_v3 = vsel %vm6192_vm11, %v8332_v20, %v8393_v16  ;;  %v8340_v9 = vunpack.c.l.b16 %v8208_v23  ;;  %v8348_v49 = vunpack.c.l.b16 %v8216_v42  ;;  %v8400_v50 = vsel %vm6190_vm10, %v14596_v35, %v8399_v40  ;;  %v14617_v18 = vld [vmem:[#allocation93_spill] sm:$0xff]  ;;  %v14619_v42 = vld [vmem:[#allocation34_spill] sm:$0xff] }
 0x470   : > { %v8437_v36 = vpack.c.b16 %v8394_v3, %v8387_v59  ;;  %v8406_v11 = vsel %vm6188_vm8, %v14597_v60, %v8405_v58  ;;  %v14599_v56 = vrot.slane %v14598_v39, 1  ;;  %v7597_v24 = vrot.slane %v14600_v5, 2  ;;  %v14620_v58 = vld [vmem:[#allocation45_spill] sm:$0xff] }
 0x471   : > { %v14602_v55 = vrot.slane %v14601_v32, 1  ;;  %v8401_v31 = vsel %vm6192_vm11, %v8340_v9, %v8400_v50  ;;  %v8407_v33 = vsel %vm6190_vm10, %v14603_v62, %v8406_v11  ;;  %v7653_v17 = vrot.slane %v14604_v51, 2 }
 0x472   : > { %v7593_v0 = vadd.f32 %v14599_v56, %v14598_v39  ;;  %9100 = vmatprep.mubr.msk.bf16.mxu0 %vm588_vm0, %v8437_v36  ;;  %v14606_v45 = vrot.slane %v14605_v2, 1  ;;  %v8408_v29 = vsel %vm6192_vm11, %v8348_v49, %v8407_v33  ;;  %v7598_v27 = vadd.f32 %v7597_v24, %v14600_v5 }
 0x473   : > { %v7649_v38 = vadd.f32 %v14602_v55, %v14601_v32  ;;  %v7709_v25 = vrot.slane %v14607_v6, 2  ;;  %v14609_v53 = vrot.slane %v14608_v28, 1  ;;  %v8438_v43 = vpack.c.b16 %v8408_v29, %v8401_v31 }
 0x474   : > { %v7705_v7 = vadd.f32 %v14606_v45, %v14605_v2  ;;  %v7654_v63 = vadd.f32 %v7653_v17, %v14604_v51  ;;  %v7765_v44 = vrot.slane %v14610_v46, 2  ;;  %v8092_v37 = vadd.f32 %v14612_v30, %v14611_v4  ;;  %v14626_v30 = vld [vmem:[#allocation104_spill] sm:$0xff] }
 0x475   : > { %v7761_v52 = vadd.f32 %v14609_v53, %v14608_v28  ;;  %v7599_v20 = vrot.slane %v7598_v27, 1  ;;  %v7710_v10 = vadd.f32 %v7709_v25, %v14607_v6  ;;  %v8094_v19 = vadd.f32 %v14614_v57, %v14613_v47  ;;  %9101 = vmatmul.mubr.msk.bf16.vlgmr.msra.gmra.mxu0 %vm588_vm0, %v8438_v43  ;;  %v14621_v28 = vld [vmem:[#allocation90_spill] sm:$0xff]  ;;  %v14622_v53 = vld [vmem:[#allocation91_spill] sm:$0xff] }
 0x476   : > { %v8095_v1 = vadd.f32 %v7649_v38, %v7593_v0  ;;  %v7655_v14 = vrot.slane %v7654_v63, 1  ;;  %v7766_v26 = vadd.f32 %v7765_v44, %v14610_v46  ;;  %v8100_v48 = vadd.f32 %v14616_v41, %v14615_v34  ;;  %v14623_v43 = vld [vmem:[#allocation103_spill] sm:$0xff]  ;;  %v14625_v44 = vld [vmem:[#allocation97_spill] sm:$0xff]  ;;  %v14629_v57 = vld [vmem:[#allocation42_spill] sm:$0xff] }
 0x477   : > { %v8102_v15 = vadd.f32 %v14618_v21, %v14617_v18  ;;  %v7600_v22 = vadd.f32 %v7599_v20, %v7598_v27  ;;  %v7711_v12 = vrot.slane %v7710_v10, 1  ;;  %v8103_v61 = vadd.f32 %v7761_v52, %v7705_v7  ;;  %v14627_v20 = vld [vmem:[#allocation41_spill] sm:$0xff]  ;;  %v14630_v34 = vld [vmem:[#allocation98_spill] sm:$0xff] }
 0x478   : > { %v8156_v54 = vmul.f32 0.25, %v8092_v37  ;;  %v7656_v16 = vadd.f32 %v7655_v14, %v7654_v63  ;;  %v7767_v23 = vrot.slane %v7766_v26, 1  ;;  %v8157_v59 = vmul.f32 0.25, %v14619_v42  ;;  %v14624_v63 = vld [vmem:[#allocation50_spill] sm:$0xff] }
 0x479   : > { %v8158_v3 = vmul.f32 0.25, %v8094_v19  ;;  %v7712_v8 = vadd.f32 %v7711_v12, %v7710_v10  ;;  %v8159_v40 = vmul.f32 0.25, %v8095_v1  ;;  %v8164_v13 = vmul.f32 0.25, %v8100_v48 }
 0x47a   : > { %v8165_v36 = vmul.f32 0.25, %v14620_v58  ;;  %v7768_v9 = vadd.f32 %v7767_v23, %v7766_v26  ;;  %v8096_v49 = vadd.f32 %v7656_v16, %v7600_v22  ;;  %v8166_v35 = vmul.f32 0.25, %v8102_v15  ;;  %v14632_v22 = vld [vmem:[#allocation35_spill] sm:$0xff]  ;;  %v14633_v16 = vld [vmem:[#allocation58_spill] sm:$0xff] }
 0x47b   : > { %v8167_v50 = vmul.f32 0.25, %v8103_v61  ;;  %v8220_v60 = vpack.c.bf16 %v8156_v54, %v8156_v54  ;;  %v8221_v11 = vpack.c.bf16 %v8157_v59, %v8157_v59  ;;  %v8222_v39 = vpack.c.bf16 %v8158_v3, %v8158_v3  ;;  %v14635_v59 = vld [vmem:[#allocation59_spill] sm:$0xff] }
 0x47c   : > { %v8223_v56 = vpack.c.bf16 %v8159_v40, %v8159_v40  ;;  %v8104_v0 = vadd.f32 %v7768_v9, %v7712_v8  ;;  %v8160_v5 = vmul.f32 0.25, %v8096_v49  ;;  %v8228_v24 = vpack.c.bf16 %v8164_v13, %v8164_v13 }
 0x47d   : > { %v8229_v32 = vpack.c.bf16 %v8165_v36, %v8165_v36  ;;  %v8230_v55 = vpack.c.bf16 %v8166_v35, %v8166_v35  ;;  %v8231_v38 = vpack.c.bf16 %v8167_v50, %v8167_v50  ;;  %v8352_v31 = vunpack.c.l.b16 %v8220_v60  ;;  %v14636_v35 = vld [vmem:[#allocation47_spill] sm:$0xff] }
 0x47e   : > { %v8353_v62 = vunpack.c.l.b16 %v8221_v11  ;;  %v8168_v33 = vmul.f32 0.25, %v8104_v0  ;;  %v8224_v51 = vpack.c.bf16 %v8160_v5, %v8160_v5  ;;  %v8354_v17 = vunpack.c.l.b16 %v8222_v39  ;;  %v14638_v0 = vld [vmem:[#allocation73_spill] sm:$0xff] }
 0x47f   : > { %v8355_v2 = vunpack.c.l.b16 %v8223_v56  ;;  %v8360_v45 = vunpack.c.l.b16 %v8228_v24  ;;  %v8361_v7 = vunpack.c.l.b16 %v8229_v32  ;;  %v8362_v29 = vunpack.c.l.b16 %v8230_v55  ;;  %v14639_v32 = vld [vmem:[#allocation51_spill] sm:$0xff]  ;;  %v14640_v55 = vld [vmem:[#allocation49_spill] sm:$0xff] }
 0x480   : > { %v8363_v27 = vunpack.c.l.b16 %v8231_v38  ;;  %v8232_v6 = vpack.c.bf16 %v8168_v33, %v8168_v33  ;;  %v8356_v25 = vunpack.c.l.b16 %v8224_v51  ;;  %v8409_v52 = vsel %vm6180_vm2, %v14622_v53, %v14621_v28 }
 0x481   : > { %v8416_v46 = vsel %vm6180_vm2, %v14624_v63, %v14623_v43  ;;  %v8410_v4 = vsel %vm6182_vm3, %v14625_v44, %v8409_v52  ;;  %v14628_v10 = vrot.slane %v14627_v20, 1  ;;  %v7821_v19 = vrot.slane %v14629_v57, 2  ;;  %v14647_v43 = vld [vmem:[#allocation56_spill] sm:$0xff] }
 0x482   : > { %v8417_v37 = vsel %vm6182_vm3, %v14626_v30, %v8416_v46  ;;  %v8364_v1 = vunpack.c.l.b16 %v8232_v6  ;;  %v8411_v14 = vsel %vm6184_vm4, %v8352_v31, %v8410_v4  ;;  %v14631_v41 = vrot.slane %v14630_v34, 1  ;;  %v14641_v31 = vld [vmem:[#allocation52_spill] sm:$0xff] }
 0x483   : > { %v7817_v47 = vadd.f32 %v14628_v10, %v14627_v20  ;;  %v8418_v26 = vsel %vm6184_vm4, %v8360_v45, %v8417_v37  ;;  %v8412_v18 = vsel %vm6186_vm5, %v8353_v62, %v8411_v14  ;;  %v7822_v15 = vadd.f32 %v7821_v19, %v14629_v57  ;;  %v14642_v62 = vld [vmem:[#allocation100_spill] sm:$0xff]  ;;  %v14643_v45 = vld [vmem:[#allocation53_spill] sm:$0xff] }
 0x484   : > { %v7873_v48 = vadd.f32 %v14631_v41, %v14630_v34  ;;  %v8419_v21 = vsel %vm6186_vm5, %v8361_v7, %v8418_v26  ;;  %v7877_v12 = vrot.slane %v14632_v22, 2  ;;  %v8413_v61 = vsel %vm6188_vm8, %v8354_v17, %v8412_v18  ;;  %v14644_v7 = vld [vmem:[#allocation55_spill] sm:$0xff]  ;;  %v14646_v6 = vld [vmem:[#allocation60_spill] sm:$0xff] }
 0x485   : > { %v8420_v54 = vsel %vm6188_vm8, %v8362_v29, %v8419_v21  ;;  %v14634_v23 = vrot.slane %v14633_v16, 1  ;;  %v7933_v3 = vrot.slane %v14635_v59, 2  ;;  %v8414_v8 = vsel %vm6190_vm10, %v8355_v2, %v8413_v61  ;;  %v14648_v20 = vld [vmem:[#allocation68_spill] sm:$0xff]  ;;  %v14649_v21 = vld [vmem:[#allocation102_spill] sm:$0xff] }
 0x486   : > { %v8421_v40 = vsel %vm6190_vm10, %v8363_v27, %v8420_v54  ;;  %v7823_v13 = vrot.slane %v7822_v15, 1  ;;  %v7878_v58 = vadd.f32 %v7877_v12, %v14632_v22  ;;  %v8415_v36 = vsel %vm6192_vm11, %v8356_v25, %v8414_v8  ;;  %v14645_v27 = vld [vmem:[#allocation54_spill] sm:$0xff] }
 0x487   : > { %v7929_v42 = vadd.f32 %v14634_v23, %v14633_v16  ;;  %v8422_v9 = vsel %vm6192_vm11, %v8364_v1, %v8421_v40  ;;  %v7934_v49 = vadd.f32 %v7933_v3, %v14635_v59  ;;  %v14637_v50 = vrot.slane %v14636_v35, 1 }
 0x488   : > { %v8439_v11 = vpack.c.b16 %v8422_v9, %v8415_v36  ;;  %v7824_v39 = vadd.f32 %v7823_v13, %v7822_v15  ;;  %v7879_v56 = vrot.slane %v7878_v58, 1  ;;  %v7989_v5 = vrot.slane %v14638_v0, 2  ;;  %v14651_v36 = vld [vmem:[#allocation101_spill] sm:$0xff]  ;;  %v14652_v9 = vld [vmem:[#allocation43_spill] sm:$0xff] }
 0x489   : > { %v7985_v60 = vadd.f32 %v14637_v50, %v14636_v35  ;;  %v7935_v24 = vrot.slane %v7934_v49, 1  ;;  %v8108_v38 = vadd.f32 %v14640_v55, %v14639_v32  ;;  %v8110_v33 = vadd.f32 %v14642_v62, %v14641_v31  ;;  %v14653_v35 = vld [vmem:[#allocation62_spill] sm:$0xff]  ;;  %v14654_v50 = vld [vmem:[#allocation63_spill] sm:$0xff] }
 0x48a   : > { %v8111_v51 = vadd.f32 %v7873_v48, %v7817_v47  ;;  %9104 = vmatprep.mubr.msk.bf16.mxu0 %vm588_vm0, %v8439_v11  ;;  %v7880_v17 = vadd.f32 %v7879_v56, %v7878_v58  ;;  %v7990_v2 = vadd.f32 %v7989_v5, %v14638_v0  ;;  %v8116_v29 = vadd.f32 %v14644_v7, %v14643_v45  ;;  %v14655_v56 = vld [vmem:[#allocation57_spill] sm:$0xff] }
 0x48b   : > { %v8118_v25 = vadd.f32 %v14646_v6, %v14645_v27  ;;  %v7936_v28 = vadd.f32 %v7935_v24, %v7934_v49  ;;  %v8119_v53 = vadd.f32 %v7985_v60, %v7929_v42  ;;  %v8172_v52 = vmul.f32 0.25, %v8108_v38 }
 0x48c   : > { %v8173_v63 = vmul.f32 0.25, %v14647_v43  ;;  %v7991_v46 = vrot.slane %v7990_v2, 1  ;;  %v8112_v44 = vadd.f32 %v7880_v17, %v7824_v39  ;;  %v8174_v4 = vmul.f32 0.25, %v8110_v33 }
 0x48d   : > { %v8175_v30 = vmul.f32 0.25, %v8111_v51  ;;  %v8180_v37 = vmul.f32 0.25, %v8116_v29  ;;  %v8181_v10 = vmul.f32 0.25, %v14648_v20  ;;  %v8182_v47 = vmul.f32 0.25, %v8118_v25 }
 0x48e   : > { %v8183_v57 = vmul.f32 0.25, %v8119_v53  ;;  %v7992_v19 = vadd.f32 %v7991_v46, %v7990_v2  ;;  %v8176_v1 = vmul.f32 0.25, %v8112_v44  ;;  %v8236_v14 = vpack.c.bf16 %v8172_v52, %v8172_v52  ;;  %v8980_v44 = vld [vmem:[%s14103_s11] ss:$0 sm:$0xff] }
 0x48f   : > { %v8237_v26 = vpack.c.bf16 %v8173_v63, %v8173_v63  ;;  %v8238_v34 = vpack.c.bf16 %v8174_v4, %v8174_v4  ;;  %v8239_v41 = vpack.c.bf16 %v8175_v30, %v8175_v30  ;;  %v8244_v48 = vpack.c.bf16 %v8180_v37, %v8180_v37  ;;  %v8972_v63 = vld [vmem:[%s14100_s8] ss:$0 sm:$0xff] }
 0x490   : > { %v8245_v18 = vpack.c.bf16 %v8181_v10, %v8181_v10  ;;  %v14650_v15 = vpack.c.bf16 %v14649_v21, %v14649_v21  ;;  %v8120_v12 = vadd.f32 %v7992_v19, %v7936_v28  ;;  %v8246_v61 = vpack.c.bf16 %v8182_v47, %v8182_v47  ;;  %v8973_v30 = vld [vmem:[%s14101_s9] ss:$0 sm:$0xff] }
 0x491   : > { %v8247_v54 = vpack.c.bf16 %v8183_v57, %v8183_v57  ;;  %v8240_v16 = vpack.c.bf16 %v8176_v1, %v8176_v1  ;;  %v8368_v23 = vunpack.c.l.b16 %v8236_v14  ;;  %v8369_v42 = vunpack.c.l.b16 %v8237_v26  ;;  %v8981_v10 = vld [vmem:[%s14104_s12] ss:$0 sm:$0xff] }
 0x492   : > { %v8375_v22 = vunpack.c.l.b16 %v14650_v15  ;;  %v8184_v59 = vmul.f32 0.25, %v8120_v12  ;;  %v8370_v3 = vunpack.c.l.b16 %v8238_v34  ;;  %v8376_v8 = vunpack.c.l.b16 %v8244_v48 }
 0x493   : > { %v8377_v40 = vunpack.c.l.b16 %v8245_v18  ;;  %v8371_v13 = vunpack.c.l.b16 %v8239_v41  ;;  %v8378_v58 = vunpack.c.l.b16 %v8246_v61  ;;  %v8423_v49 = vsel %vm6180_vm2, %v14652_v9, %v14651_v36 }
 0x494   : > { %v8430_v60 = vsel %vm6180_vm2, %v14654_v50, %v14653_v35  ;;  %v8248_v11 = vpack.c.bf16 %v8184_v59, %v8184_v59  ;;  %v8379_v39 = vunpack.c.l.b16 %v8247_v54  ;;  %v8424_v0 = vsel %vm6182_vm3, %v14655_v56, %v8423_v49 }
 0x495   : > { %v8431_v5 = vsel %vm6182_vm3, %v8375_v22, %v8430_v60  ;;  %v8372_v24 = vunpack.c.l.b16 %v8240_v16  ;;  %v8425_v32 = vsel %vm6184_vm4, %v8368_v23, %v8424_v0 }
 0x496   : > { %v8432_v55 = vsel %vm6184_vm4, %v8376_v8, %v8431_v5  ;;  %v8380_v38 = vunpack.c.l.b16 %v8248_v11  ;;  %v8426_v31 = vsel %vm6186_vm5, %v8369_v42, %v8425_v32 }
 0x497   : > { %v8433_v62 = vsel %vm6186_vm5, %v8377_v40, %v8432_v55  ;;  %v8427_v33 = vsel %vm6188_vm8, %v8370_v3, %v8426_v31 }
 0x498   : > { %v8434_v51 = vsel %vm6188_vm8, %v8378_v58, %v8433_v62  ;;  %v8428_v17 = vsel %vm6190_vm10, %v8371_v13, %v8427_v33 }
 0x499   : > { %v8435_v2 = vsel %vm6190_vm10, %v8379_v39, %v8434_v51  ;;  %v8429_v45 = vsel %vm6192_vm11, %v8372_v24, %v8428_v17 }
 0x49a   : > { %v8436_v7 = vsel %vm6192_vm11, %v8380_v38, %v8435_v2 }
 0x49b   : > { %v8440_v29 = vpack.c.b16 %v8436_v7, %v8429_v45 }
 0x49d   : > { %9105 = vmatmul.mubr.msk.bf16.gmra.mxu0 %vm588_vm0, %v8440_v29 }
 0x511   : > { %v9090_v27 = vpop.f32.mrf.mxu0 }
 0x512   : > { %v6339_v4 = vmul.f32 %v9090_v27, %v8972_v63 }
 0x513   : > { %v6299_v6 = vpop.f32.mrf.mxu0 }
 0x514   : > { %v6337_v37 = vmul.f32 %v8972_v63, %v6299_v6  ;;  %v6354_v1 = vadd.f32 %v8973_v30, %v6339_v4 }
 0x515   : > { %v9091_v25 = vpop.f32.mrf.mxu0 }
 0x516   : > { %v6340_v57 = vmul.f32 %v9091_v25, %v8972_v63  ;;  %v6352_v34 = vadd.f32 %v8973_v30, %v6337_v37 }
 0x517   : > { %v6302_v28 = vpop.f32.mrf.mxu0 }
 0x518   : > { %v6338_v48 = vmul.f32 %v8972_v63, %v6302_v28  ;;  %v6355_v22 = vadd.f32 %v8973_v30, %v6340_v57 }
 0x51a   : > { %v6353_v42 = vadd.f32 %v8973_v30, %v6338_v48 }
 0x520   : > { %v9094_v53 = vpop.f32.mrf.mxu0 }
 0x521   : > { %v6343_v36 = vmul.f32 %v9094_v53, %v8972_v63 }
 0x522   : > { %v6315_v52 = vpop.f32.mrf.mxu0 }
 0x523   : > { %v6341_v9 = vmul.f32 %v8972_v63, %v6315_v52  ;;  %v6358_v11 = vadd.f32 %v8973_v30, %v6343_v36 }
 0x524   : > { %v9095_v43 = vpop.f32.mrf.mxu0 }
 0x525   : > { %v6344_v50 = vmul.f32 %v9095_v43, %v8972_v63  ;;  %v6356_v0 = vadd.f32 %v8973_v30, %v6341_v9 }
 0x526   : > { %v6318_v46 = vpop.f32.mrf.mxu0 }
 0x527   : > { %v6342_v24 = vmul.f32 %v8972_v63, %v6318_v46  ;;  %v6359_v31 = vadd.f32 %v8973_v30, %v6344_v50 }
 0x529   : > { %v6357_v45 = vadd.f32 %v8973_v30, %v6342_v24 }
 0x535   : > { %v9102_v20 = vpop.f32.mrf.mxu0 }
 0x536   : > { %v8539_v47 = vmul.f32 %v9102_v20, %v8980_v44 }
 0x537   : > { %v8499_v19 = vpop.f32.mrf.mxu0 }
 0x538   : > { %v8554_v14 = vadd.f32 %v8981_v10, %v8539_v47  ;;  %v8537_v26 = vmul.f32 %v8980_v44, %v8499_v19 }
 0x539   : > { %v9103_v41 = vpop.f32.mrf.mxu0 }
 0x53a   : > { %v8562_v18 = vadd.f32 %v8554_v14, %v6354_v1  ;;  %v8552_v21 = vadd.f32 %v8981_v10, %v8537_v26  ;;  %v8540_v15 = vmul.f32 %v9103_v41, %v8980_v44 }
 0x53b   : > { %v8502_v12 = vpop.f32.mrf.mxu0 }
 0x53c   : > { %v8570_v61 = vmax.f32 %v8562_v18, 0.0  ;;  %v8560_v54 = vadd.f32 %v8552_v21, %v6352_v34  ;;  %v8555_v16 = vadd.f32 %v8981_v10, %v8540_v15  ;;  %v8538_v23 = vmul.f32 %v8980_v44, %v8502_v12 }
 0x53e   : > { %8578 = vst.msk [vmem:[%s14024_s14 + $0x10] sm:$0xff] %vm3045_vm15, %v8570_v61  ;;  %v8568_v59 = vmax.f32 %v8560_v54, 0.0  ;;  %v8563_v3 = vadd.f32 %v8555_v16, %v6355_v22  ;;  %v8553_v8 = vadd.f32 %v8981_v10, %v8538_v23 }
 0x540   : > { %8576 = vst.msk [vmem:[%s14024_s14] sm:$0xff] %vm3045_vm15, %v8568_v59  ;;  %v8571_v40 = vmax.f32 %v8563_v3, 0.0  ;;  %v8561_v13 = vadd.f32 %v8553_v8, %v6353_v42 }
 0x542   : > { %8579 = vst.msk [vmem:[%s14024_s14 + $0x18] sm:$0xff] %vm3045_vm15, %v8571_v40  ;;  %v8569_v58 = vmax.f32 %v8561_v13, 0.0 }
 0x544   : > { %8577 = vst.msk [vmem:[%s14024_s14 + $0x8] sm:$0xff] %vm3045_vm15, %v8569_v58 }
 0x55d   : > { %v9106_v49 = vpop.f32.mrf.mxu0 }
 0x55e   : > { %v8543_v35 = vmul.f32 %v9106_v49, %v8980_v44 }
 0x55f   : > { %v8515_v60 = vpop.f32.mrf.mxu0 }
 0x560   : > { %v8558_v39 = vadd.f32 %v8981_v10, %v8543_v35  ;;  %v8541_v56 = vmul.f32 %v8980_v44, %v8515_v60 }
 0x561   : > { %v9107_v5 = vpop.f32.mrf.mxu0 }
 0x562   : > { %v8566_v32 = vadd.f32 %v8558_v39, %v6358_v11  ;;  %v8556_v55 = vadd.f32 %v8981_v10, %v8541_v56  ;;  %v8544_v38 = vmul.f32 %v9107_v5, %v8980_v44 }
 0x563   : > { %v8518_v62 = vpop.f32.mrf.mxu0 }
 0x564   : > { %v8574_v33 = vmax.f32 %v8566_v32, 0.0  ;;  %v8564_v51 = vadd.f32 %v8556_v55, %v6356_v0  ;;  %v8559_v17 = vadd.f32 %v8981_v10, %v8544_v38  ;;  %v8542_v2 = vmul.f32 %v8980_v44, %v8518_v62 }
 0x566   : > { %8582 = vst.msk [vmem:[%s14024_s14 + $0x30] sm:$0xff] %vm3045_vm15, %v8574_v33  ;;  %v8572_v7 = vmax.f32 %v8564_v51, 0.0  ;;  %v8567_v29 = vadd.f32 %v8559_v17, %v6359_v31  ;;  %v8557_v27 = vadd.f32 %v8981_v10, %v8542_v2 }
 0x568   : > { %8580 = vst.msk [vmem:[%s14024_s14 + $0x20] sm:$0xff] %vm3045_vm15, %v8572_v7  ;;  %v8575_v6 = vmax.f32 %v8567_v29, 0.0  ;;  %v8565_v25 = vadd.f32 %v8557_v27, %v6357_v45 }
 0x56a   : > { %8583 = vst.msk [vmem:[%s14024_s14 + $0x38] sm:$0xff] %vm3045_vm15, %v8575_v6  ;;  %v8573_v28 = vmax.f32 %v8565_v25, 0.0 }
 0x56c   : > { %8581 = vst.msk [vmem:[%s14024_s14 + $0x28] sm:$0xff] %vm3045_vm15, %v8573_v28 }
 0x56d   : > { %9460 = shalt.err (!%p9457_p10)
}
 0x56e   : > { %s9461_s18 = scalar_lea.hbm %s14043_s22, 1024  ;;  %s9465_s27 = scalar_lea.hbm %s14656_s19, 2048 }
 0x56f   : > { %p9462_p0 = scmp.ne.s32.totalorder %s14043_s22, %s9461_s18  ;;  %p9466_p1 = scmp.lt.s32.totalorder %s14043_s22, %s14656_s19 }
 0x570   : > { %p9467_p3 = scmp.lt.s32.totalorder %s9465_s27, %s9461_s18 }
 0x571   : > { %p9463_p2 = pnand %p9462_p0, %p14657_p12 }
 0x572   : > { %p9468_p6 = por %p9467_p3, %p9466_p1 }
 0x573   : > { %p9464_p9 = pneg %p9463_p2 }
 0x575   : > { %p9469_p11 = pnand %p9468_p6, %p9464_p9 }
 0x577   : > { %9472 = shalt.err (!%p9469_p11)
}
 0x578   : > { %s9526_s30 = smov 128   ;;  %s9527_s21 = smov 8  }
 0x579   : > { %9128 = dma.vmem_to_hbm [thread:$0]  (%p14657_p12), %s14045_s23, 1024, %s14043_s22, %s8585_s29, %s9526_s30, %s9526_s30, %s9527_s21  }
 0x57a PF: > { %s14658_s15 = sld [smem:[#allocation9_spill]]  ;;  %p14661_p4 = scmp.ge.s32.totalorder %s9511_s28, 2 }
 0x57b   : > { %s14659_s24 = sld [smem:[#allocation13_spill]] }
 0x580   : > { %s8613_s16 = sand.u32 1, %s14658_s15  }
 0x581   : > { %p14660_p13 = scmp.ne.s32.totalorder %s14659_s24, 0  ;;  %s8614_s18 = scalar_lea.sflag [#allocation5], %s8613_s16 }
 0x583   : > { %p9135_p5 = pnand %p14661_p4, %p14660_p13 }
 0x585   : > { %p9136_p7 = pneg %p9135_p5 }
 0x587   : > { %9494 = dma.done.wait (%p9136_p7), %s8614_s18, 1024  }
 0x588   : > { %9496 = vsyncadd (%p9136_p7), %s8614_s18, 4294966272  ;;  %s14662_s28 = sld [smem:[#allocation11_spill]]  ;;  %s14665_s25 = smov %s9503_s26 }
 0x589   : > { %s14663_s14 = sld [smem:[#allocation10_spill]] }
 0x58a   : > { %s14664_s27 = sld [smem:[#allocation12_spill]] }
 0x58e   : > { %p26_p8 = scmp.ge.s32.totalorder %s14662_s28, 4  }
 0x58f   : > { %s14666_s26 = smov %s14663_s14 }
 0x590   :  { %28 = sbr.rel (!%p26_p8) target bundleno = 7 (0x7), region = 120 }
 0x595   :  { %8619 = vsyncpa [#allocation4], 1 }
 0x596   :  { %8621 = vsyncpa [#allocation4 + $0x1], 1 }
 0x597   :  { %8622 = vsyncpa [#allocation5], 1 }
 0x598   :  { %8624 = vsyncpa [#allocation5 + $0x1], 1 }

</bundles_post_ra>
